<compile_context>
chip_gen: v7x
topology: tpu7x:2x2x1
jax: 0.10.0
libtpu: 0.0.40
codegen_flags: <defaults>
</compile_context>

<pallas_src>
import functools

import jax
import jax.numpy as jnp
from jax.experimental import pallas as pl
from jax.experimental.pallas import tpu as pltpu


# ----------------------------------------------------------------------------
# Pallas kernel: fused Conv + (folded, eval-mode) BN + ReLU + MaxPool + pad
# ----------------------------------------------------------------------------
def _conv_bn_relu_pool_kernel(x_ref, w_ref, b_ref, o_ref, acc_ref, *,
                              kh, kw, sh, Ho, Wo, plh, plw, poh, pow_):
    """One batch-block per grid step.

    x_ref:   (bn, Hp, Wp, Cin)             spatially pre-padded NHWC acts, bf16
    w_ref:   (kh, kw*Cin, Cout)            conv weight, BN scale folded, bf16
    b_ref:   (1, Cout)                     conv bias + BN shift, f32
    o_ref:   (bn, Hq+2*poh, Wq+2*pow_, Cout) pooled output, zero-padded for the
                                           next layer
    acc_ref: (bn*Ho*Wo, Cout) f32          MXU accumulator scratch
    """
    bn, Hp, Wp, Cin = x_ref.shape
    Cout = o_ref.shape[-1]
    K = kw * Cin

    x = x_ref[...]
    # Fused im2col along W -- built ONCE per block (not once per tap).
    parts = [x[:, :, dw:dw + Wo, :] for dw in range(kw)]
    xc = parts[0] if kw == 1 else jnp.concatenate(parts, axis=-1)  # (bn,Hp,Wo,K)

    # kh MXU matmuls with K = kw*Cin, accumulated in the f32 scratch ref.
    for dh in range(kh):
        if sh == 1:
            rows = xc[:, dh:dh + Ho]                               # (bn,Ho,Wo,K)
        else:
            # Only conv6 (kh == sh == 2): every sh-th row at offset dh.
            rows = xc[:, :sh * Ho].reshape(bn, Ho, sh, Wo, K)[:, :, dh]
        part = jnp.dot(rows.reshape(bn * Ho * Wo, K), w_ref[dh],
                       preferred_element_type=jnp.float32)
        if dh == 0:
            acc_ref[...] = part
        else:
            acc_ref[...] += part

    # Bias + ReLU in f32, then cast to the output dtype (exact: max is
    # monotone and the cast is AFTER the ReLU).  Pooling runs at half width.
    y = jnp.maximum(acc_ref[...] + b_ref[...], 0.0).astype(o_ref.dtype)

    Hq, Wq = Ho // plh, Wo // plw
    y = y.reshape(bn, Ho, Wo, Cout)
    if plh > 1 or plw > 1:
        if Hq * plh != Ho:                 # floor-mode pool: drop ragged rows
            y = y[:, :Hq * plh]
        if Wq * plw != Wo:                 # floor-mode pool: drop ragged cols
            y = y[:, :, :Wq * plw]
        if plh > 1:                        # pool along H via dim-2 slices
            yh = y.reshape(bn, Hq, plh, Wq * plw, Cout)
            m = yh[:, :, 0]
            for r in range(1, plh):
                m = jnp.maximum(m, yh[:, :, r])
            y = m                          # (bn, Hq, Wq*plw, Cout)
        else:
            y = y.reshape(bn, Hq, Wq * plw, Cout)
        if plw > 1:                        # pool along W via dim-3 slices
            yw = y.reshape(bn, Hq, Wq, plw, Cout)
            m = yw[:, :, :, 0]
            for r in range(1, plw):
                m = jnp.maximum(m, yw[:, :, :, r])
            y = m                          # (bn, Hq, Wq, Cout)
        else:
            y = y.reshape(bn, Hq, Wq, Cout)

    if poh == 0 and pow_ == 0:
        o_ref[...] = y
    else:
        # Fused next-layer zero padding: zero the block, store the interior.
        o_ref[...] = jnp.zeros_like(o_ref)
        o_ref[:, poh:poh + Hq, pow_:pow_ + Wq, :] = y


# ----------------------------------------------------------------------------
# Wrapper: one pallas_call per LCNet stage
# ----------------------------------------------------------------------------
def _vmem_budget(bn, Hp, Wp, Cin, Ho, Wo, Hop, Wop, Cout, kh, kw, out_itemsize):
    act_in = bn * Hp * Wp * Cin * 2
    im2col = bn * Hp * Wo * kw * Cin * 2
    act_out = bn * Hop * Wop * Cout * out_itemsize
    weights = kh * kw * Cin * Cout * 2 + Cout * 4
    acc = bn * Ho * Wo * Cout * 4
    # double-buffered activation I/O + resident weights + scratch + temp slack
    est = 2 * (act_in + act_out + weights) + acc + 3 * (im2col + acc)
    return int(min(96 << 20, max(32 << 20, 2 * est)))


def conv_block(x, layer, images_per_step=1):
    """x: (N, Hp, Wp, Cin) bf16, already padded for THIS layer.  Returns the
    pooled NHWC output already zero-padded for the NEXT layer."""
    kh, kw = layer["k"]
    sh, sw = layer["s"]
    plh, plw = layer["pool"]
    poh, pow_ = layer["pad_out"]
    w, b = layer["w"], layer["b"]
    bn = images_per_step

    N, Hp, Wp, Cin = x.shape
    assert sw == 1, "LCNet only uses stride 1 along W"
    assert sh == 1 or kh == sh, "strided-H path assumes kh == sh (conv6)"
    assert N % bn == 0
    assert w.shape[0] == kh and w.shape[1] == kw * Cin, (
        "weight / activation channel mismatch", w.shape, (kh, kw, Cin))
    Cout = w.shape[-1]

    Ho = (Hp - kh) // sh + 1
    Wo = (Wp - kw) // sw + 1
    Hq, Wq = Ho // plh, Wo // plw
    Hop, Wop = Hq + 2 * poh, Wq + 2 * pow_

    kernel = functools.partial(_conv_bn_relu_pool_kernel,
                               kh=kh, kw=kw, sh=sh, Ho=Ho, Wo=Wo,
                               plh=plh, plw=plw, poh=poh, pow_=pow_)
    return pl.pallas_call(
        kernel,
        out_shape=jax.ShapeDtypeStruct((N, Hop, Wop, Cout), layer["out_dtype"]),
        grid=(N // bn,),
        in_specs=[
            # One padded batch-block per step; trailing dims are full, so the
            # (8,128) block-shape constraint is satisfied.
            pl.BlockSpec((bn, Hp, Wp, Cin), lambda n: (n, 0, 0, 0)),
            # Weight / bias: constant index maps -> fetched once, stay resident.
            pl.BlockSpec(w.shape, lambda n: (0, 0, 0)),
            pl.BlockSpec(b.shape, lambda n: (0, 0)),
        ],
        out_specs=pl.BlockSpec((bn, Hop, Wop, Cout), lambda n: (n, 0, 0, 0)),
        scratch_shapes=[pltpu.VMEM((bn * Ho * Wo, Cout), jnp.float32)],
        compiler_params=pltpu.CompilerParams(
            dimension_semantics=("parallel",),   # batch shards across TCs
            vmem_limit_bytes=_vmem_budget(
                bn, Hp, Wp, Cin, Ho, Wo, Hop, Wop, Cout, kh, kw,
                jnp.dtype(layer["out_dtype"]).itemsize),
        ),
    )(x, w, b)


def lcnet_forward(x_nchw, layers, images_per_step=1):
    # Cast BEFORE the layout transpose (half the relayout traffic).
    x = jnp.transpose(x_nchw.astype(jnp.bfloat16), (0, 2, 3, 1))   # NCHW -> NHWC
    pdh, pdw = layers[0]["pad_in"]
    if pdh or pdw:
        # Only the raw (tiny, Cin=4) network input is padded in JAX; all other
        # padding is fused into the producing kernel's output store.
        x = jnp.pad(x, ((0, 0), (pdh, pdh), (pdw, pdw), (0, 0)))
    for layer in layers:
        x = conv_block(x, layer, images_per_step=images_per_step)
    # Final transpose back to NCHW to match the PyTorch module's output layout
    # (tiny tensor; an NHWC-consuming pipeline could skip it).
    return jnp.transpose(x, (0, 3, 1, 2))


# ----------------------------------------------------------------------------
# Parameter preparation: fold eval-mode BN, reformat & channel-pad weights
# ----------------------------------------------------------------------------
# (kh, kw, sh, sw, pad_h, pad_w, pool_h, pool_w) for conv1..conv6 of LCNet
_LAYER_CFG = (
    (3, 3, 1, 1, 1, 1, 2, 2),
    (3, 3, 1, 1, 1, 1, 2, 2),
    (3, 3, 1, 1, 1, 1, 1, 1),
    (3, 3, 1, 1, 1, 1, 2, 1),
    (3, 3, 1, 1, 1, 1, 1, 1),
    (2, 2, 2, 1, 0, 0, 1, 1),
)


def prepare_layers(params, eps=1e-5):
    layers = []
    prev_cout_padded = None
    n_layers = len(_LAYER_CFG)
    for idx, (kh, kw, sh, sw, pdh, pdw, plh, plw) in enumerate(_LAYER_CFG, 1):
        w, b, gamma, beta, mean, var = params[f"layer{idx}"]
        cout, cin = int(w.shape[0]), int(w.shape[1])
        assert (kh, kw) == (int(w.shape[2]), int(w.shape[3]))
        inv = gamma * jax.lax.rsqrt(var + eps)
        # torch (Cout, Cin, kh, kw) -> (kh, kw, Cin, Cout); fold BN scale.
        w2 = jnp.transpose(w, (2, 3, 1, 0)) * inv[None, None, None, :]
        bias = beta + (b - mean) * inv                 # conv bias + BN shift
        # Pad Cin to match the channel-padded previous layer output (padding
        # must happen BEFORE collapsing (kw, Cin) so each dw group gets the
        # zero rows in the right place).
        cin_p = cin if prev_cout_padded is None else prev_cout_padded
        assert cin_p >= cin
        if cin_p > cin:
            w2 = jnp.pad(w2, ((0, 0), (0, 0), (0, cin_p - cin), (0, 0)))
        # Pad Cout to a multiple of 128 for lane-dense stores (exact: padded
        # channels are ReLU(0)=0 and hit zero weight rows downstream).
        cout_p = -(-cout // 128) * 128 if idx < n_layers else cout
        if cout_p > cout:
            w2 = jnp.pad(w2, ((0, 0), (0, 0), (0, 0), (0, cout_p - cout)))
            bias = jnp.pad(bias, (0, cout_p - cout))
        w2 = w2.reshape(kh, kw * cin_p, cout_p)        # (kh, kw*Cin, Cout)
        # Next layer's spatial padding gets fused into this layer's store.
        pad_out = ((_LAYER_CFG[idx][4], _LAYER_CFG[idx][5])
                   if idx < n_layers else (0, 0))
        layers.append(dict(
            w=w2.astype(jnp.bfloat16),
            b=bias.reshape(1, -1).astype(jnp.float32),
            k=(kh, kw), s=(sh, sw), pool=(plh, plw),
            pad_in=(pdh, pdw), pad_out=pad_out,
            out_dtype=jnp.float32 if idx == n_layers else jnp.bfloat16,
        ))
        prev_cout_padded = cout_p
    return layers


# ----------------------------------------------------------------------------
# Deterministic synthetic parameters (eval-mode BN running stats)
# ----------------------------------------------------------------------------
def make_params(img_channel, key):
    conv_shapes = [
        (64, img_channel, 3, 3),
        (128, 64, 3, 3),
        (256, 128, 3, 3),
        (256, 256, 3, 3),
        (512, 256, 3, 3),
        (512, 512, 2, 2),
    ]
    params = {}
    for idx, shape in enumerate(conv_shapes, start=1):
        cout = shape[0]
        key, kw_, kb_, kg_, kbe_, km_, kv_ = jax.random.split(key, 7)
        w = jax.random.normal(kw_, shape, jnp.float32) * 0.05
        b = jax.random.normal(kb_, (cout,), jnp.float32) * 0.05
        gamma = 1.0 + 0.1 * jax.random.normal(kg_, (cout,), jnp.float32)
        beta = 0.1 * jax.random.normal(kbe_, (cout,), jnp.float32)
        mean = 0.1 * jax.random.normal(km_, (cout,), jnp.float32)
        var = 1.0 + 0.1 * jnp.abs(jax.random.normal(kv_, (cout,), jnp.float32))
        params[f"layer{idx}"] = (w, b, gamma, beta, mean, var)
    return params


if __name__ == "__main__":
    key = jax.random.PRNGKey(0)
    k_x, k_p = jax.random.split(key)

    # small NCHW input consistent with the module: (batch=2, channels=4, 16x16)
    x = jax.random.normal(k_x, (2, 4, 16, 16), jnp.float32)
    params = make_params(img_channel=4, key=k_p)
    layers = prepare_layers(params)

    fwd = jax.jit(functools.partial(lcnet_forward, layers=layers))
    out = jax.block_until_ready(fwd(x))

    assert out.shape == (2, 512, 1, 3), out.shape
    assert jnp.all(jnp.isfinite(out))
    print("KERNEL_OK")
</pallas_src>

<mosaic_0001>
module attributes {stable_mosaic.version = 11 : i64} {
  func.func @_conv_bn_relu_pool_kernel(%arg0: i32, %arg1: memref<1x18x18x4xbf16, #tpu.memory_space<vmem>>, %arg2: memref<3x12x128xbf16, #tpu.memory_space<vmem>>, %arg3: memref<1x128xf32, #tpu.memory_space<vmem>>, %arg4: memref<1x10x10x128xbf16, #tpu.memory_space<vmem>>, %arg5: memref<256x128xf32, #tpu.memory_space<vmem>>) attributes {dimension_semantics = [#tpu.dimension_semantics<parallel>], iteration_bounds = array<i64: 2>, scalar_prefetch = 0 : i64, scratch_operands = 1 : i64, tpu.core_type = #tpu.core_type<tc>, window_params = [{transform_indices = @transform_0, window_bounds = array<i64: 1, 18, 18, 4>}, {pipeline_mode = #tpu.pipeline_mode<synchronous>, transform_indices = @transform_1, window_bounds = array<i64: 3, 12, 128>}, {pipeline_mode = #tpu.pipeline_mode<synchronous>, transform_indices = @transform_2, window_bounds = array<i64: 1, 128>}, {transform_indices = @transform_3, window_bounds = array<i64: 1, 10, 10, 128>}]} {
    %c0 = arith.constant 0 : index
    %c0_0 = arith.constant 0 : index
    %c0_1 = arith.constant 0 : index
    %c0_2 = arith.constant 0 : index
    %0 = vector.load %arg1[%c0, %c0_0, %c0_1, %c0_2] : memref<1x18x18x4xbf16, #tpu.memory_space<vmem>>, vector<1x18x18x4xbf16>
    %1 = vector.extract_strided_slice %0 {offsets = [0, 0, 0, 0], sizes = [1, 18, 16, 4], strides = [1, 1, 1, 1]} : vector<1x18x18x4xbf16> to vector<1x18x16x4xbf16>
    %2 = vector.extract_strided_slice %0 {offsets = [0, 0, 1, 0], sizes = [1, 18, 16, 4], strides = [1, 1, 1, 1]} : vector<1x18x18x4xbf16> to vector<1x18x16x4xbf16>
    %3 = vector.extract_strided_slice %0 {offsets = [0, 0, 2, 0], sizes = [1, 18, 16, 4], strides = [1, 1, 1, 1]} : vector<1x18x18x4xbf16> to vector<1x18x16x4xbf16>
    %4 = tpu.concatenate %1, %2, %3 in 3 : vector<1x18x16x4xbf16>, vector<1x18x16x4xbf16>, vector<1x18x16x4xbf16> -> vector<1x18x16x12xbf16>
    %5 = vector.extract_strided_slice %4 {offsets = [0, 0, 0, 0], sizes = [1, 16, 16, 12], strides = [1, 1, 1, 1]} : vector<1x18x16x12xbf16> to vector<1x16x16x12xbf16>
    %6 = vector.shape_cast %5 : vector<1x16x16x12xbf16> to vector<256x12xbf16>
    %c0_3 = arith.constant 0 : index
    %c0_4 = arith.constant 0 : index
    %c0_5 = arith.constant 0 : index
    %7 = vector.load %arg2[%c0_3, %c0_4, %c0_5] : memref<3x12x128xbf16, #tpu.memory_space<vmem>>, vector<1x12x128xbf16>
    %8 = vector.shape_cast %7 : vector<1x12x128xbf16> to vector<12x128xbf16>
    %cst = arith.constant dense<0.000000e+00> : vector<256x128xf32>
    %9 = tpu.matmul %6, %8, %cst {dimension_numbers = #tpu.dot_dimension_numbers<[1], [0], [0], [1], [0, 0, 1, 1], [], []>} : vector<256x12xbf16>, vector<12x128xbf16>, vector<256x128xf32> -> vector<256x128xf32>
    %c0_6 = arith.constant 0 : index
    %c0_7 = arith.constant 0 : index
    %10 = vector.load %arg5[%c0_6, %c0_7] : memref<256x128xf32, #tpu.memory_space<vmem>>, vector<256x128xf32>
    tpu.vector_store %arg5[%c0_6, %c0_7], %9 {strides = array<i32>} : memref<256x128xf32, #tpu.memory_space<vmem>>, vector<256x128xf32>,
    %11 = vector.extract_strided_slice %4 {offsets = [0, 1, 0, 0], sizes = [1, 16, 16, 12], strides = [1, 1, 1, 1]} : vector<1x18x16x12xbf16> to vector<1x16x16x12xbf16>
    %12 = vector.shape_cast %11 : vector<1x16x16x12xbf16> to vector<256x12xbf16>
    %c1 = arith.constant 1 : index
    %c0_8 = arith.constant 0 : index
    %c0_9 = arith.constant 0 : index
    %13 = vector.load %arg2[%c1, %c0_8, %c0_9] : memref<3x12x128xbf16, #tpu.memory_space<vmem>>, vector<1x12x128xbf16>
    %14 = vector.shape_cast %13 : vector<1x12x128xbf16> to vector<12x128xbf16>
    %cst_10 = arith.constant dense<0.000000e+00> : vector<256x128xf32>
    %15 = tpu.matmul %12, %14, %cst_10 {dimension_numbers = #tpu.dot_dimension_numbers<[1], [0], [0], [1], [0, 0, 1, 1], [], []>} : vector<256x12xbf16>, vector<12x128xbf16>, vector<256x128xf32> -> vector<256x128xf32>
    %c0_11 = arith.constant 0 : index
    %c0_12 = arith.constant 0 : index
    %16 = vector.load %arg5[%c0_11, %c0_12] : memref<256x128xf32, #tpu.memory_space<vmem>>, vector<256x128xf32>
    %17 = arith.addf %16, %15 : vector<256x128xf32>
    %c0_13 = arith.constant 0 : index
    %c0_14 = arith.constant 0 : index
    %18 = vector.load %arg5[%c0_13, %c0_14] : memref<256x128xf32, #tpu.memory_space<vmem>>, vector<256x128xf32>
    tpu.vector_store %arg5[%c0_13, %c0_14], %17 {strides = array<i32>} : memref<256x128xf32, #tpu.memory_space<vmem>>, vector<256x128xf32>,
    %19 = vector.extract_strided_slice %4 {offsets = [0, 2, 0, 0], sizes = [1, 16, 16, 12], strides = [1, 1, 1, 1]} : vector<1x18x16x12xbf16> to vector<1x16x16x12xbf16>
    %20 = vector.shape_cast %19 : vector<1x16x16x12xbf16> to vector<256x12xbf16>
    %c2 = arith.constant 2 : index
    %c0_15 = arith.constant 0 : index
    %c0_16 = arith.constant 0 : index
    %21 = vector.load %arg2[%c2, %c0_15, %c0_16] : memref<3x12x128xbf16, #tpu.memory_space<vmem>>, vector<1x12x128xbf16>
    %22 = vector.shape_cast %21 : vector<1x12x128xbf16> to vector<12x128xbf16>
    %cst_17 = arith.constant dense<0.000000e+00> : vector<256x128xf32>
    %23 = tpu.matmul %20, %22, %cst_17 {dimension_numbers = #tpu.dot_dimension_numbers<[1], [0], [0], [1], [0, 0, 1, 1], [], []>} : vector<256x12xbf16>, vector<12x128xbf16>, vector<256x128xf32> -> vector<256x128xf32>
    %c0_18 = arith.constant 0 : index
    %c0_19 = arith.constant 0 : index
    %24 = vector.load %arg5[%c0_18, %c0_19] : memref<256x128xf32, #tpu.memory_space<vmem>>, vector<256x128xf32>
    %25 = arith.addf %24, %23 : vector<256x128xf32>
    %c0_20 = arith.constant 0 : index
    %c0_21 = arith.constant 0 : index
    %26 = vector.load %arg5[%c0_20, %c0_21] : memref<256x128xf32, #tpu.memory_space<vmem>>, vector<256x128xf32>
    tpu.vector_store %arg5[%c0_20, %c0_21], %25 {strides = array<i32>} : memref<256x128xf32, #tpu.memory_space<vmem>>, vector<256x128xf32>,
    %c0_22 = arith.constant 0 : index
    %c0_23 = arith.constant 0 : index
    %27 = vector.load %arg5[%c0_22, %c0_23] : memref<256x128xf32, #tpu.memory_space<vmem>>, vector<256x128xf32>
    %c0_24 = arith.constant 0 : index
    %c0_25 = arith.constant 0 : index
    %28 = vector.load %arg3[%c0_24, %c0_25] : memref<1x128xf32, #tpu.memory_space<vmem>>, vector<1x128xf32>
    %29 = vector.broadcast %28 : vector<1x128xf32> to vector<256x128xf32>
    %30 = arith.addf %27, %29 : vector<256x128xf32>
    %cst_26 = arith.constant 0.000000e+00 : f32
    %31 = vector.broadcast %cst_26 : f32 to vector<256x128xf32>
    %32 = arith.maximumf %30, %31 : vector<256x128xf32>
    %33 = arith.truncf %32 : vector<256x128xf32> to vector<256x128xbf16>
    %34 = vector.shape_cast %33 : vector<256x128xbf16> to vector<1x16x16x128xbf16>
    %35 = vector.shape_cast %34 : vector<1x16x16x128xbf16> to vector<1x8x2x16x128xbf16>
    %36 = vector.extract_strided_slice %35 {offsets = [0, 0, 0, 0, 0], sizes = [1, 8, 1, 16, 128], strides = [1, 1, 1, 1, 1]} : vector<1x8x2x16x128xbf16> to vector<1x8x1x16x128xbf16>
    %37 = vector.shape_cast %36 : vector<1x8x1x16x128xbf16> to vector<1x8x16x128xbf16>
    %38 = vector.extract_strided_slice %35 {offsets = [0, 0, 1, 0, 0], sizes = [1, 8, 1, 16, 128], strides = [1, 1, 1, 1, 1]} : vector<1x8x2x16x128xbf16> to vector<1x8x1x16x128xbf16>
    %39 = vector.shape_cast %38 : vector<1x8x1x16x128xbf16> to vector<1x8x16x128xbf16>
    %40 = arith.maximumf %37, %39 : vector<1x8x16x128xbf16>
    %41 = vector.shape_cast %40 : vector<1x8x16x128xbf16> to vector<1x8x8x2x128xbf16>
    %42 = vector.extract_strided_slice %41 {offsets = [0, 0, 0, 0, 0], sizes = [1, 8, 8, 1, 128], strides = [1, 1, 1, 1, 1]} : vector<1x8x8x2x128xbf16> to vector<1x8x8x1x128xbf16>
    %43 = vector.shape_cast %42 : vector<1x8x8x1x128xbf16> to vector<1x8x8x128xbf16>
    %44 = vector.extract_strided_slice %41 {offsets = [0, 0, 0, 1, 0], sizes = [1, 8, 8, 1, 128], strides = [1, 1, 1, 1, 1]} : vector<1x8x8x2x128xbf16> to vector<1x8x8x1x128xbf16>
    %45 = vector.shape_cast %44 : vector<1x8x8x1x128xbf16> to vector<1x8x8x128xbf16>
    %46 = arith.maximumf %43, %45 : vector<1x8x8x128xbf16>
    %cst_27 = arith.constant 0.000000e+00 : bf16
    %47 = vector.broadcast %cst_27 : bf16 to vector<1x10x10x128xbf16>
    %c0_28 = arith.constant 0 : index
    %c0_29 = arith.constant 0 : index
    %c0_30 = arith.constant 0 : index
    %c0_31 = arith.constant 0 : index
    %48 = vector.load %arg4[%c0_28, %c0_29, %c0_30, %c0_31] : memref<1x10x10x128xbf16, #tpu.memory_space<vmem>>, vector<1x10x10x128xbf16>
    tpu.vector_store %arg4[%c0_28, %c0_29, %c0_30, %c0_31], %47 {strides = array<i32>} : memref<1x10x10x128xbf16, #tpu.memory_space<vmem>>, vector<1x10x10x128xbf16>,
    %c0_32 = arith.constant 0 : index
    %c1_33 = arith.constant 1 : index
    %c1_34 = arith.constant 1 : index
    %c0_35 = arith.constant 0 : index
    %49 = vector.load %arg4[%c0_32, %c1_33, %c1_34, %c0_35] : memref<1x10x10x128xbf16, #tpu.memory_space<vmem>>, vector<1x8x8x128xbf16>
    tpu.vector_store %arg4[%c0_32, %c1_33, %c1_34, %c0_35], %46 {strides = array<i32>} : memref<1x10x10x128xbf16, #tpu.memory_space<vmem>>, vector<1x8x8x128xbf16>,
    return
  }
  func.func @transform_0(%arg0: i32) -> (i32, i32, i32, i32) {
    %c0_i32 = arith.constant 0 : i32
    %c0_i32_0 = arith.constant 0 : i32
    %c0_i32_1 = arith.constant 0 : i32
    %c0_i32_2 = arith.constant 0 : i32
    return %arg0, %c0_i32, %c0_i32_0, %c0_i32_1 : i32, i32, i32, i32
  }
  func.func @transform_1(%arg0: i32) -> (i32, i32, i32) {
    %c0_i32 = arith.constant 0 : i32
    %c0_i32_0 = arith.constant 0 : i32
    %c0_i32_1 = arith.constant 0 : i32
    %c0_i32_2 = arith.constant 0 : i32
    return %c0_i32, %c0_i32_0, %c0_i32_1 : i32, i32, i32
  }
  func.func @transform_2(%arg0: i32) -> (i32, i32) {
    %c0_i32 = arith.constant 0 : i32
    %c0_i32_0 = arith.constant 0 : i32
    %c0_i32_1 = arith.constant 0 : i32
    return %c0_i32, %c0_i32_0 : i32, i32
  }
  func.func @transform_3(%arg0: i32) -> (i32, i32, i32, i32) {
    %c0_i32 = arith.constant 0 : i32
    %c0_i32_0 = arith.constant 0 : i32
    %c0_i32_1 = arith.constant 0 : i32
    %c0_i32_2 = arith.constant 0 : i32
    return %arg0, %c0_i32, %c0_i32_0, %c0_i32_1 : i32, i32, i32, i32
  }
}

module attributes {stable_mosaic.version = 11 : i64} {
  func.func @_conv_bn_relu_pool_kernel(%arg0: i32, %arg1: memref<1x10x10x128xbf16, #tpu.memory_space<vmem>>, %arg2: memref<3x384x128xbf16, #tpu.memory_space<vmem>>, %arg3: memref<1x128xf32, #tpu.memory_space<vmem>>, %arg4: memref<1x6x6x128xbf16, #tpu.memory_space<vmem>>, %arg5: memref<64x128xf32, #tpu.memory_space<vmem>>) attributes {dimension_semantics = [#tpu.dimension_semantics<parallel>], iteration_bounds = array<i64: 2>, scalar_prefetch = 0 : i64, scratch_operands = 1 : i64, tpu.core_type = #tpu.core_type<tc>, window_params = [{transform_indices = @transform_0, window_bounds = array<i64: 1, 10, 10, 128>}, {pipeline_mode = #tpu.pipeline_mode<synchronous>, transform_indices = @transform_1, window_bounds = array<i64: 3, 384, 128>}, {pipeline_mode = #tpu.pipeline_mode<synchronous>, transform_indices = @transform_2, window_bounds = array<i64: 1, 128>}, {transform_indices = @transform_3, window_bounds = array<i64: 1, 6, 6, 128>}]} {
    %c0 = arith.constant 0 : index
    %c0_0 = arith.constant 0 : index
    %c0_1 = arith.constant 0 : index
    %c0_2 = arith.constant 0 : index
    %0 = vector.load %arg1[%c0, %c0_0, %c0_1, %c0_2] : memref<1x10x10x128xbf16, #tpu.memory_space<vmem>>, vector<1x10x10x128xbf16>
    %1 = vector.extract_strided_slice %0 {offsets = [0, 0, 0, 0], sizes = [1, 10, 8, 128], strides = [1, 1, 1, 1]} : vector<1x10x10x128xbf16> to vector<1x10x8x128xbf16>
    %2 = vector.extract_strided_slice %0 {offsets = [0, 0, 1, 0], sizes = [1, 10, 8, 128], strides = [1, 1, 1, 1]} : vector<1x10x10x128xbf16> to vector<1x10x8x128xbf16>
    %3 = vector.extract_strided_slice %0 {offsets = [0, 0, 2, 0], sizes = [1, 10, 8, 128], strides = [1, 1, 1, 1]} : vector<1x10x10x128xbf16> to vector<1x10x8x128xbf16>
    %4 = tpu.concatenate %1, %2, %3 in 3 : vector<1x10x8x128xbf16>, vector<1x10x8x128xbf16>, vector<1x10x8x128xbf16> -> vector<1x10x8x384xbf16>
    %5 = vector.extract_strided_slice %4 {offsets = [0, 0, 0, 0], sizes = [1, 8, 8, 384], strides = [1, 1, 1, 1]} : vector<1x10x8x384xbf16> to vector<1x8x8x384xbf16>
    %6 = vector.shape_cast %5 : vector<1x8x8x384xbf16> to vector<64x384xbf16>
    %c0_3 = arith.constant 0 : index
    %c0_4 = arith.constant 0 : index
    %c0_5 = arith.constant 0 : index
    %7 = vector.load %arg2[%c0_3, %c0_4, %c0_5] : memref<3x384x128xbf16, #tpu.memory_space<vmem>>, vector<1x384x128xbf16>
    %8 = vector.shape_cast %7 : vector<1x384x128xbf16> to vector<384x128xbf16>
    %cst = arith.constant dense<0.000000e+00> : vector<64x128xf32>
    %9 = tpu.matmul %6, %8, %cst {dimension_numbers = #tpu.dot_dimension_numbers<[1], [0], [0], [1], [0, 0, 1, 1], [], []>} : vector<64x384xbf16>, vector<384x128xbf16>, vector<64x128xf32> -> vector<64x128xf32>
    %c0_6 = arith.constant 0 : index
    %c0_7 = arith.constant 0 : index
    %10 = vector.load %arg5[%c0_6, %c0_7] : memref<64x128xf32, #tpu.memory_space<vmem>>, vector<64x128xf32>
    tpu.vector_store %arg5[%c0_6, %c0_7], %9 {strides = array<i32>} : memref<64x128xf32, #tpu.memory_space<vmem>>, vector<64x128xf32>,
    %11 = vector.extract_strided_slice %4 {offsets = [0, 1, 0, 0], sizes = [1, 8, 8, 384], strides = [1, 1, 1, 1]} : vector<1x10x8x384xbf16> to vector<1x8x8x384xbf16>
    %12 = vector.shape_cast %11 : vector<1x8x8x384xbf16> to vector<64x384xbf16>
    %c1 = arith.constant 1 : index
    %c0_8 = arith.constant 0 : index
    %c0_9 = arith.constant 0 : index
    %13 = vector.load %arg2[%c1, %c0_8, %c0_9] : memref<3x384x128xbf16, #tpu.memory_space<vmem>>, vector<1x384x128xbf16>
    %14 = vector.shape_cast %13 : vector<1x384x128xbf16> to vector<384x128xbf16>
    %cst_10 = arith.constant dense<0.000000e+00> : vector<64x128xf32>
    %15 = tpu.matmul %12, %14, %cst_10 {dimension_numbers = #tpu.dot_dimension_numbers<[1], [0], [0], [1], [0, 0, 1, 1], [], []>} : vector<64x384xbf16>, vector<384x128xbf16>, vector<64x128xf32> -> vector<64x128xf32>
    %c0_11 = arith.constant 0 : index
    %c0_12 = arith.constant 0 : index
    %16 = vector.load %arg5[%c0_11, %c0_12] : memref<64x128xf32, #tpu.memory_space<vmem>>, vector<64x128xf32>
    %17 = arith.addf %16, %15 : vector<64x128xf32>
    %c0_13 = arith.constant 0 : index
    %c0_14 = arith.constant 0 : index
    %18 = vector.load %arg5[%c0_13, %c0_14] : memref<64x128xf32, #tpu.memory_space<vmem>>, vector<64x128xf32>
    tpu.vector_store %arg5[%c0_13, %c0_14], %17 {strides = array<i32>} : memref<64x128xf32, #tpu.memory_space<vmem>>, vector<64x128xf32>,
    %19 = vector.extract_strided_slice %4 {offsets = [0, 2, 0, 0], sizes = [1, 8, 8, 384], strides = [1, 1, 1, 1]} : vector<1x10x8x384xbf16> to vector<1x8x8x384xbf16>
    %20 = vector.shape_cast %19 : vector<1x8x8x384xbf16> to vector<64x384xbf16>
    %c2 = arith.constant 2 : index
    %c0_15 = arith.constant 0 : index
    %c0_16 = arith.constant 0 : index
    %21 = vector.load %arg2[%c2, %c0_15, %c0_16] : memref<3x384x128xbf16, #tpu.memory_space<vmem>>, vector<1x384x128xbf16>
    %22 = vector.shape_cast %21 : vector<1x384x128xbf16> to vector<384x128xbf16>
    %cst_17 = arith.constant dense<0.000000e+00> : vector<64x128xf32>
    %23 = tpu.matmul %20, %22, %cst_17 {dimension_numbers = #tpu.dot_dimension_numbers<[1], [0], [0], [1], [0, 0, 1, 1], [], []>} : vector<64x384xbf16>, vector<384x128xbf16>, vector<64x128xf32> -> vector<64x128xf32>
    %c0_18 = arith.constant 0 : index
    %c0_19 = arith.constant 0 : index
    %24 = vector.load %arg5[%c0_18, %c0_19] : memref<64x128xf32, #tpu.memory_space<vmem>>, vector<64x128xf32>
    %25 = arith.addf %24, %23 : vector<64x128xf32>
    %c0_20 = arith.constant 0 : index
    %c0_21 = arith.constant 0 : index
    %26 = vector.load %arg5[%c0_20, %c0_21] : memref<64x128xf32, #tpu.memory_space<vmem>>, vector<64x128xf32>
    tpu.vector_store %arg5[%c0_20, %c0_21], %25 {strides = array<i32>} : memref<64x128xf32, #tpu.memory_space<vmem>>, vector<64x128xf32>,
    %c0_22 = arith.constant 0 : index
    %c0_23 = arith.constant 0 : index
    %27 = vector.load %arg5[%c0_22, %c0_23] : memref<64x128xf32, #tpu.memory_space<vmem>>, vector<64x128xf32>
    %c0_24 = arith.constant 0 : index
    %c0_25 = arith.constant 0 : index
    %28 = vector.load %arg3[%c0_24, %c0_25] : memref<1x128xf32, #tpu.memory_space<vmem>>, vector<1x128xf32>
    %29 = vector.broadcast %28 : vector<1x128xf32> to vector<64x128xf32>
    %30 = arith.addf %27, %29 : vector<64x128xf32>
    %cst_26 = arith.constant 0.000000e+00 : f32
    %31 = vector.broadcast %cst_26 : f32 to vector<64x128xf32>
    %32 = arith.maximumf %30, %31 : vector<64x128xf32>
    %33 = arith.truncf %32 : vector<64x128xf32> to vector<64x128xbf16>
    %34 = vector.shape_cast %33 : vector<64x128xbf16> to vector<1x8x8x128xbf16>
    %35 = vector.shape_cast %34 : vector<1x8x8x128xbf16> to vector<1x4x2x8x128xbf16>
    %36 = vector.extract_strided_slice %35 {offsets = [0, 0, 0, 0, 0], sizes = [1, 4, 1, 8, 128], strides = [1, 1, 1, 1, 1]} : vector<1x4x2x8x128xbf16> to vector<1x4x1x8x128xbf16>
    %37 = vector.shape_cast %36 : vector<1x4x1x8x128xbf16> to vector<1x4x8x128xbf16>
    %38 = vector.extract_strided_slice %35 {offsets = [0, 0, 1, 0, 0], sizes = [1, 4, 1, 8, 128], strides = [1, 1, 1, 1, 1]} : vector<1x4x2x8x128xbf16> to vector<1x4x1x8x128xbf16>
    %39 = vector.shape_cast %38 : vector<1x4x1x8x128xbf16> to vector<1x4x8x128xbf16>
    %40 = arith.maximumf %37, %39 : vector<1x4x8x128xbf16>
    %41 = vector.shape_cast %40 : vector<1x4x8x128xbf16> to vector<1x4x4x2x128xbf16>
    %42 = vector.extract_strided_slice %41 {offsets = [0, 0, 0, 0, 0], sizes = [1, 4, 4, 1, 128], strides = [1, 1, 1, 1, 1]} : vector<1x4x4x2x128xbf16> to vector<1x4x4x1x128xbf16>
    %43 = vector.shape_cast %42 : vector<1x4x4x1x128xbf16> to vector<1x4x4x128xbf16>
    %44 = vector.extract_strided_slice %41 {offsets = [0, 0, 0, 1, 0], sizes = [1, 4, 4, 1, 128], strides = [1, 1, 1, 1, 1]} : vector<1x4x4x2x128xbf16> to vector<1x4x4x1x128xbf16>
    %45 = vector.shape_cast %44 : vector<1x4x4x1x128xbf16> to vector<1x4x4x128xbf16>
    %46 = arith.maximumf %43, %45 : vector<1x4x4x128xbf16>
    %cst_27 = arith.constant 0.000000e+00 : bf16
    %47 = vector.broadcast %cst_27 : bf16 to vector<1x6x6x128xbf16>
    %c0_28 = arith.constant 0 : index
    %c0_29 = arith.constant 0 : index
    %c0_30 = arith.constant 0 : index
    %c0_31 = arith.constant 0 : index
    %48 = vector.load %arg4[%c0_28, %c0_29, %c0_30, %c0_31] : memref<1x6x6x128xbf16, #tpu.memory_space<vmem>>, vector<1x6x6x128xbf16>
    tpu.vector_store %arg4[%c0_28, %c0_29, %c0_30, %c0_31], %47 {strides = array<i32>} : memref<1x6x6x128xbf16, #tpu.memory_space<vmem>>, vector<1x6x6x128xbf16>,
    %c0_32 = arith.constant 0 : index
    %c1_33 = arith.constant 1 : index
    %c1_34 = arith.constant 1 : index
    %c0_35 = arith.constant 0 : index
    %49 = vector.load %arg4[%c0_32, %c1_33, %c1_34, %c0_35] : memref<1x6x6x128xbf16, #tpu.memory_space<vmem>>, vector<1x4x4x128xbf16>
    tpu.vector_store %arg4[%c0_32, %c1_33, %c1_34, %c0_35], %46 {strides = array<i32>} : memref<1x6x6x128xbf16, #tpu.memory_space<vmem>>, vector<1x4x4x128xbf16>,
    return
  }
  func.func @transform_0(%arg0: i32) -> (i32, i32, i32, i32) {
    %c0_i32 = arith.constant 0 : i32
    %c0_i32_0 = arith.constant 0 : i32
    %c0_i32_1 = arith.constant 0 : i32
    %c0_i32_2 = arith.constant 0 : i32
    return %arg0, %c0_i32, %c0_i32_0, %c0_i32_1 : i32, i32, i32, i32
  }
  func.func @transform_1(%arg0: i32) -> (i32, i32, i32) {
    %c0_i32 = arith.constant 0 : i32
    %c0_i32_0 = arith.constant 0 : i32
    %c0_i32_1 = arith.constant 0 : i32
    %c0_i32_2 = arith.constant 0 : i32
    return %c0_i32, %c0_i32_0, %c0_i32_1 : i32, i32, i32
  }
  func.func @transform_2(%arg0: i32) -> (i32, i32) {
    %c0_i32 = arith.constant 0 : i32
    %c0_i32_0 = arith.constant 0 : i32
    %c0_i32_1 = arith.constant 0 : i32
    return %c0_i32, %c0_i32_0 : i32, i32
  }
  func.func @transform_3(%arg0: i32) -> (i32, i32, i32, i32) {
    %c0_i32 = arith.constant 0 : i32
    %c0_i32_0 = arith.constant 0 : i32
    %c0_i32_1 = arith.constant 0 : i32
    %c0_i32_2 = arith.constant 0 : i32
    return %arg0, %c0_i32, %c0_i32_0, %c0_i32_1 : i32, i32, i32, i32
  }
}

module attributes {stable_mosaic.version = 11 : i64} {
  func.func @_conv_bn_relu_pool_kernel(%arg0: i32, %arg1: memref<1x6x6x128xbf16, #tpu.memory_space<vmem>>, %arg2: memref<3x384x256xbf16, #tpu.memory_space<vmem>>, %arg3: memref<1x256xf32, #tpu.memory_space<vmem>>, %arg4: memref<1x6x6x256xbf16, #tpu.memory_space<vmem>>, %arg5: memref<16x256xf32, #tpu.memory_space<vmem>>) attributes {dimension_semantics = [#tpu.dimension_semantics<parallel>], iteration_bounds = array<i64: 2>, scalar_prefetch = 0 : i64, scratch_operands = 1 : i64, tpu.core_type = #tpu.core_type<tc>, window_params = [{transform_indices = @transform_0, window_bounds = array<i64: 1, 6, 6, 128>}, {pipeline_mode = #tpu.pipeline_mode<synchronous>, transform_indices = @transform_1, window_bounds = array<i64: 3, 384, 256>}, {pipeline_mode = #tpu.pipeline_mode<synchronous>, transform_indices = @transform_2, window_bounds = array<i64: 1, 256>}, {transform_indices = @transform_3, window_bounds = array<i64: 1, 6, 6, 256>}]} {
    %c0 = arith.constant 0 : index
    %c0_0 = arith.constant 0 : index
    %c0_1 = arith.constant 0 : index
    %c0_2 = arith.constant 0 : index
    %0 = vector.load %arg1[%c0, %c0_0, %c0_1, %c0_2] : memref<1x6x6x128xbf16, #tpu.memory_space<vmem>>, vector<1x6x6x128xbf16>
    %1 = vector.extract_strided_slice %0 {offsets = [0, 0, 0, 0], sizes = [1, 6, 4, 128], strides = [1, 1, 1, 1]} : vector<1x6x6x128xbf16> to vector<1x6x4x128xbf16>
    %2 = vector.extract_strided_slice %0 {offsets = [0, 0, 1, 0], sizes = [1, 6, 4, 128], strides = [1, 1, 1, 1]} : vector<1x6x6x128xbf16> to vector<1x6x4x128xbf16>
    %3 = vector.extract_strided_slice %0 {offsets = [0, 0, 2, 0], sizes = [1, 6, 4, 128], strides = [1, 1, 1, 1]} : vector<1x6x6x128xbf16> to vector<1x6x4x128xbf16>
    %4 = tpu.concatenate %1, %2, %3 in 3 : vector<1x6x4x128xbf16>, vector<1x6x4x128xbf16>, vector<1x6x4x128xbf16> -> vector<1x6x4x384xbf16>
    %5 = vector.extract_strided_slice %4 {offsets = [0, 0, 0, 0], sizes = [1, 4, 4, 384], strides = [1, 1, 1, 1]} : vector<1x6x4x384xbf16> to vector<1x4x4x384xbf16>
    %6 = vector.shape_cast %5 : vector<1x4x4x384xbf16> to vector<16x384xbf16>
    %c0_3 = arith.constant 0 : index
    %c0_4 = arith.constant 0 : index
    %c0_5 = arith.constant 0 : index
    %7 = vector.load %arg2[%c0_3, %c0_4, %c0_5] : memref<3x384x256xbf16, #tpu.memory_space<vmem>>, vector<1x384x256xbf16>
    %8 = vector.shape_cast %7 : vector<1x384x256xbf16> to vector<384x256xbf16>
    %cst = arith.constant dense<0.000000e+00> : vector<16x256xf32>
    %9 = tpu.matmul %6, %8, %cst {dimension_numbers = #tpu.dot_dimension_numbers<[1], [0], [0], [1], [0, 0, 1, 1], [], []>} : vector<16x384xbf16>, vector<384x256xbf16>, vector<16x256xf32> -> vector<16x256xf32>
    %c0_6 = arith.constant 0 : index
    %c0_7 = arith.constant 0 : index
    %10 = vector.load %arg5[%c0_6, %c0_7] : memref<16x256xf32, #tpu.memory_space<vmem>>, vector<16x256xf32>
    tpu.vector_store %arg5[%c0_6, %c0_7], %9 {strides = array<i32>} : memref<16x256xf32, #tpu.memory_space<vmem>>, vector<16x256xf32>,
    %11 = vector.extract_strided_slice %4 {offsets = [0, 1, 0, 0], sizes = [1, 4, 4, 384], strides = [1, 1, 1, 1]} : vector<1x6x4x384xbf16> to vector<1x4x4x384xbf16>
    %12 = vector.shape_cast %11 : vector<1x4x4x384xbf16> to vector<16x384xbf16>
    %c1 = arith.constant 1 : index
    %c0_8 = arith.constant 0 : index
    %c0_9 = arith.constant 0 : index
    %13 = vector.load %arg2[%c1, %c0_8, %c0_9] : memref<3x384x256xbf16, #tpu.memory_space<vmem>>, vector<1x384x256xbf16>
    %14 = vector.shape_cast %13 : vector<1x384x256xbf16> to vector<384x256xbf16>
    %cst_10 = arith.constant dense<0.000000e+00> : vector<16x256xf32>
    %15 = tpu.matmul %12, %14, %cst_10 {dimension_numbers = #tpu.dot_dimension_numbers<[1], [0], [0], [1], [0, 0, 1, 1], [], []>} : vector<16x384xbf16>, vector<384x256xbf16>, vector<16x256xf32> -> vector<16x256xf32>
    %c0_11 = arith.constant 0 : index
    %c0_12 = arith.constant 0 : index
    %16 = vector.load %arg5[%c0_11, %c0_12] : memref<16x256xf32, #tpu.memory_space<vmem>>, vector<16x256xf32>
    %17 = arith.addf %16, %15 : vector<16x256xf32>
    %c0_13 = arith.constant 0 : index
    %c0_14 = arith.constant 0 : index
    %18 = vector.load %arg5[%c0_13, %c0_14] : memref<16x256xf32, #tpu.memory_space<vmem>>, vector<16x256xf32>
    tpu.vector_store %arg5[%c0_13, %c0_14], %17 {strides = array<i32>} : memref<16x256xf32, #tpu.memory_space<vmem>>, vector<16x256xf32>,
    %19 = vector.extract_strided_slice %4 {offsets = [0, 2, 0, 0], sizes = [1, 4, 4, 384], strides = [1, 1, 1, 1]} : vector<1x6x4x384xbf16> to vector<1x4x4x384xbf16>
    %20 = vector.shape_cast %19 : vector<1x4x4x384xbf16> to vector<16x384xbf16>
    %c2 = arith.constant 2 : index
    %c0_15 = arith.constant 0 : index
    %c0_16 = arith.constant 0 : index
    %21 = vector.load %arg2[%c2, %c0_15, %c0_16] : memref<3x384x256xbf16, #tpu.memory_space<vmem>>, vector<1x384x256xbf16>
    %22 = vector.shape_cast %21 : vector<1x384x256xbf16> to vector<384x256xbf16>
    %cst_17 = arith.constant dense<0.000000e+00> : vector<16x256xf32>
    %23 = tpu.matmul %20, %22, %cst_17 {dimension_numbers = #tpu.dot_dimension_numbers<[1], [0], [0], [1], [0, 0, 1, 1], [], []>} : vector<16x384xbf16>, vector<384x256xbf16>, vector<16x256xf32> -> vector<16x256xf32>
    %c0_18 = arith.constant 0 : index
    %c0_19 = arith.constant 0 : index
    %24 = vector.load %arg5[%c0_18, %c0_19] : memref<16x256xf32, #tpu.memory_space<vmem>>, vector<16x256xf32>
    %25 = arith.addf %24, %23 : vector<16x256xf32>
    %c0_20 = arith.constant 0 : index
    %c0_21 = arith.constant 0 : index
    %26 = vector.load %arg5[%c0_20, %c0_21] : memref<16x256xf32, #tpu.memory_space<vmem>>, vector<16x256xf32>
    tpu.vector_store %arg5[%c0_20, %c0_21], %25 {strides = array<i32>} : memref<16x256xf32, #tpu.memory_space<vmem>>, vector<16x256xf32>,
    %c0_22 = arith.constant 0 : index
    %c0_23 = arith.constant 0 : index
    %27 = vector.load %arg5[%c0_22, %c0_23] : memref<16x256xf32, #tpu.memory_space<vmem>>, vector<16x256xf32>
    %c0_24 = arith.constant 0 : index
    %c0_25 = arith.constant 0 : index
    %28 = vector.load %arg3[%c0_24, %c0_25] : memref<1x256xf32, #tpu.memory_space<vmem>>, vector<1x256xf32>
    %29 = vector.broadcast %28 : vector<1x256xf32> to vector<16x256xf32>
    %30 = arith.addf %27, %29 : vector<16x256xf32>
    %cst_26 = arith.constant 0.000000e+00 : f32
    %31 = vector.broadcast %cst_26 : f32 to vector<16x256xf32>
    %32 = arith.maximumf %30, %31 : vector<16x256xf32>
    %33 = arith.truncf %32 : vector<16x256xf32> to vector<16x256xbf16>
    %34 = vector.shape_cast %33 : vector<16x256xbf16> to vector<1x4x4x256xbf16>
    %cst_27 = arith.constant 0.000000e+00 : bf16
    %35 = vector.broadcast %cst_27 : bf16 to vector<1x6x6x256xbf16>
    %c0_28 = arith.constant 0 : index
    %c0_29 = arith.constant 0 : index
    %c0_30 = arith.constant 0 : index
    %c0_31 = arith.constant 0 : index
    %36 = vector.load %arg4[%c0_28, %c0_29, %c0_30, %c0_31] : memref<1x6x6x256xbf16, #tpu.memory_space<vmem>>, vector<1x6x6x256xbf16>
    tpu.vector_store %arg4[%c0_28, %c0_29, %c0_30, %c0_31], %35 {strides = array<i32>} : memref<1x6x6x256xbf16, #tpu.memory_space<vmem>>, vector<1x6x6x256xbf16>,
    %c0_32 = arith.constant 0 : index
    %c1_33 = arith.constant 1 : index
    %c1_34 = arith.constant 1 : index
    %c0_35 = arith.constant 0 : index
    %37 = vector.load %arg4[%c0_32, %c1_33, %c1_34, %c0_35] : memref<1x6x6x256xbf16, #tpu.memory_space<vmem>>, vector<1x4x4x256xbf16>
    tpu.vector_store %arg4[%c0_32, %c1_33, %c1_34, %c0_35], %34 {strides = array<i32>} : memref<1x6x6x256xbf16, #tpu.memory_space<vmem>>, vector<1x4x4x256xbf16>,
    return
  }
  func.func @transform_0(%arg0: i32) -> (i32, i32, i32, i32) {
    %c0_i32 = arith.constant 0 : i32
    %c0_i32_0 = arith.constant 0 : i32
    %c0_i32_1 = arith.constant 0 : i32
    %c0_i32_2 = arith.constant 0 : i32
    return %arg0, %c0_i32, %c0_i32_0, %c0_i32_1 : i32, i32, i32, i32
  }
  func.func @transform_1(%arg0: i32) -> (i32, i32, i32) {
    %c0_i32 = arith.constant 0 : i32
    %c0_i32_0 = arith.constant 0 : i32
    %c0_i32_1 = arith.constant 0 : i32
    %c0_i32_2 = arith.constant 0 : i32
    return %c0_i32, %c0_i32_0, %c0_i32_1 : i32, i32, i32
  }
  func.func @transform_2(%arg0: i32) -> (i32, i32) {
    %c0_i32 = arith.constant 0 : i32
    %c0_i32_0 = arith.constant 0 : i32
    %c0_i32_1 = arith.constant 0 : i32
    return %c0_i32, %c0_i32_0 : i32, i32
  }
  func.func @transform_3(%arg0: i32) -> (i32, i32, i32, i32) {
    %c0_i32 = arith.constant 0 : i32
    %c0_i32_0 = arith.constant 0 : i32
    %c0_i32_1 = arith.constant 0 : i32
    %c0_i32_2 = arith.constant 0 : i32
    return %arg0, %c0_i32, %c0_i32_0, %c0_i32_1 : i32, i32, i32, i32
  }
}

module attributes {stable_mosaic.version = 11 : i64} {
  func.func @_conv_bn_relu_pool_kernel(%arg0: i32, %arg1: memref<1x6x6x256xbf16, #tpu.memory_space<vmem>>, %arg2: memref<3x768x256xbf16, #tpu.memory_space<vmem>>, %arg3: memref<1x256xf32, #tpu.memory_space<vmem>>, %arg4: memref<1x4x6x256xbf16, #tpu.memory_space<vmem>>, %arg5: memref<16x256xf32, #tpu.memory_space<vmem>>) attributes {dimension_semantics = [#tpu.dimension_semantics<parallel>], iteration_bounds = array<i64: 2>, scalar_prefetch = 0 : i64, scratch_operands = 1 : i64, tpu.core_type = #tpu.core_type<tc>, window_params = [{transform_indices = @transform_0, window_bounds = array<i64: 1, 6, 6, 256>}, {pipeline_mode = #tpu.pipeline_mode<synchronous>, transform_indices = @transform_1, window_bounds = array<i64: 3, 768, 256>}, {pipeline_mode = #tpu.pipeline_mode<synchronous>, transform_indices = @transform_2, window_bounds = array<i64: 1, 256>}, {transform_indices = @transform_3, window_bounds = array<i64: 1, 4, 6, 256>}]} {
    %c0 = arith.constant 0 : index
    %c0_0 = arith.constant 0 : index
    %c0_1 = arith.constant 0 : index
    %c0_2 = arith.constant 0 : index
    %0 = vector.load %arg1[%c0, %c0_0, %c0_1, %c0_2] : memref<1x6x6x256xbf16, #tpu.memory_space<vmem>>, vector<1x6x6x256xbf16>
    %1 = vector.extract_strided_slice %0 {offsets = [0, 0, 0, 0], sizes = [1, 6, 4, 256], strides = [1, 1, 1, 1]} : vector<1x6x6x256xbf16> to vector<1x6x4x256xbf16>
    %2 = vector.extract_strided_slice %0 {offsets = [0, 0, 1, 0], sizes = [1, 6, 4, 256], strides = [1, 1, 1, 1]} : vector<1x6x6x256xbf16> to vector<1x6x4x256xbf16>
    %3 = vector.extract_strided_slice %0 {offsets = [0, 0, 2, 0], sizes = [1, 6, 4, 256], strides = [1, 1, 1, 1]} : vector<1x6x6x256xbf16> to vector<1x6x4x256xbf16>
    %4 = tpu.concatenate %1, %2, %3 in 3 : vector<1x6x4x256xbf16>, vector<1x6x4x256xbf16>, vector<1x6x4x256xbf16> -> vector<1x6x4x768xbf16>
    %5 = vector.extract_strided_slice %4 {offsets = [0, 0, 0, 0], sizes = [1, 4, 4, 768], strides = [1, 1, 1, 1]} : vector<1x6x4x768xbf16> to vector<1x4x4x768xbf16>
    %6 = vector.shape_cast %5 : vector<1x4x4x768xbf16> to vector<16x768xbf16>
    %c0_3 = arith.constant 0 : index
    %c0_4 = arith.constant 0 : index
    %c0_5 = arith.constant 0 : index
    %7 = vector.load %arg2[%c0_3, %c0_4, %c0_5] : memref<3x768x256xbf16, #tpu.memory_space<vmem>>, vector<1x768x256xbf16>
    %8 = vector.shape_cast %7 : vector<1x768x256xbf16> to vector<768x256xbf16>
    %cst = arith.constant dense<0.000000e+00> : vector<16x256xf32>
    %9 = tpu.matmul %6, %8, %cst {dimension_numbers = #tpu.dot_dimension_numbers<[1], [0], [0], [1], [0, 0, 1, 1], [], []>} : vector<16x768xbf16>, vector<768x256xbf16>, vector<16x256xf32> -> vector<16x256xf32>
    %c0_6 = arith.constant 0 : index
    %c0_7 = arith.constant 0 : index
    %10 = vector.load %arg5[%c0_6, %c0_7] : memref<16x256xf32, #tpu.memory_space<vmem>>, vector<16x256xf32>
    tpu.vector_store %arg5[%c0_6, %c0_7], %9 {strides = array<i32>} : memref<16x256xf32, #tpu.memory_space<vmem>>, vector<16x256xf32>,
    %11 = vector.extract_strided_slice %4 {offsets = [0, 1, 0, 0], sizes = [1, 4, 4, 768], strides = [1, 1, 1, 1]} : vector<1x6x4x768xbf16> to vector<1x4x4x768xbf16>
    %12 = vector.shape_cast %11 : vector<1x4x4x768xbf16> to vector<16x768xbf16>
    %c1 = arith.constant 1 : index
    %c0_8 = arith.constant 0 : index
    %c0_9 = arith.constant 0 : index
    %13 = vector.load %arg2[%c1, %c0_8, %c0_9] : memref<3x768x256xbf16, #tpu.memory_space<vmem>>, vector<1x768x256xbf16>
    %14 = vector.shape_cast %13 : vector<1x768x256xbf16> to vector<768x256xbf16>
    %cst_10 = arith.constant dense<0.000000e+00> : vector<16x256xf32>
    %15 = tpu.matmul %12, %14, %cst_10 {dimension_numbers = #tpu.dot_dimension_numbers<[1], [0], [0], [1], [0, 0, 1, 1], [], []>} : vector<16x768xbf16>, vector<768x256xbf16>, vector<16x256xf32> -> vector<16x256xf32>
    %c0_11 = arith.constant 0 : index
    %c0_12 = arith.constant 0 : index
    %16 = vector.load %arg5[%c0_11, %c0_12] : memref<16x256xf32, #tpu.memory_space<vmem>>, vector<16x256xf32>
    %17 = arith.addf %16, %15 : vector<16x256xf32>
    %c0_13 = arith.constant 0 : index
    %c0_14 = arith.constant 0 : index
    %18 = vector.load %arg5[%c0_13, %c0_14] : memref<16x256xf32, #tpu.memory_space<vmem>>, vector<16x256xf32>
    tpu.vector_store %arg5[%c0_13, %c0_14], %17 {strides = array<i32>} : memref<16x256xf32, #tpu.memory_space<vmem>>, vector<16x256xf32>,
    %19 = vector.extract_strided_slice %4 {offsets = [0, 2, 0, 0], sizes = [1, 4, 4, 768], strides = [1, 1, 1, 1]} : vector<1x6x4x768xbf16> to vector<1x4x4x768xbf16>
    %20 = vector.shape_cast %19 : vector<1x4x4x768xbf16> to vector<16x768xbf16>
    %c2 = arith.constant 2 : index
    %c0_15 = arith.constant 0 : index
    %c0_16 = arith.constant 0 : index
    %21 = vector.load %arg2[%c2, %c0_15, %c0_16] : memref<3x768x256xbf16, #tpu.memory_space<vmem>>, vector<1x768x256xbf16>
    %22 = vector.shape_cast %21 : vector<1x768x256xbf16> to vector<768x256xbf16>
    %cst_17 = arith.constant dense<0.000000e+00> : vector<16x256xf32>
    %23 = tpu.matmul %20, %22, %cst_17 {dimension_numbers = #tpu.dot_dimension_numbers<[1], [0], [0], [1], [0, 0, 1, 1], [], []>} : vector<16x768xbf16>, vector<768x256xbf16>, vector<16x256xf32> -> vector<16x256xf32>
    %c0_18 = arith.constant 0 : index
    %c0_19 = arith.constant 0 : index
    %24 = vector.load %arg5[%c0_18, %c0_19] : memref<16x256xf32, #tpu.memory_space<vmem>>, vector<16x256xf32>
    %25 = arith.addf %24, %23 : vector<16x256xf32>
    %c0_20 = arith.constant 0 : index
    %c0_21 = arith.constant 0 : index
    %26 = vector.load %arg5[%c0_20, %c0_21] : memref<16x256xf32, #tpu.memory_space<vmem>>, vector<16x256xf32>
    tpu.vector_store %arg5[%c0_20, %c0_21], %25 {strides = array<i32>} : memref<16x256xf32, #tpu.memory_space<vmem>>, vector<16x256xf32>,
    %c0_22 = arith.constant 0 : index
    %c0_23 = arith.constant 0 : index
    %27 = vector.load %arg5[%c0_22, %c0_23] : memref<16x256xf32, #tpu.memory_space<vmem>>, vector<16x256xf32>
    %c0_24 = arith.constant 0 : index
    %c0_25 = arith.constant 0 : index
    %28 = vector.load %arg3[%c0_24, %c0_25] : memref<1x256xf32, #tpu.memory_space<vmem>>, vector<1x256xf32>
    %29 = vector.broadcast %28 : vector<1x256xf32> to vector<16x256xf32>
    %30 = arith.addf %27, %29 : vector<16x256xf32>
    %cst_26 = arith.constant 0.000000e+00 : f32
    %31 = vector.broadcast %cst_26 : f32 to vector<16x256xf32>
    %32 = arith.maximumf %30, %31 : vector<16x256xf32>
    %33 = arith.truncf %32 : vector<16x256xf32> to vector<16x256xbf16>
    %34 = vector.shape_cast %33 : vector<16x256xbf16> to vector<1x4x4x256xbf16>
    %35 = vector.shape_cast %34 : vector<1x4x4x256xbf16> to vector<1x2x2x4x256xbf16>
    %36 = vector.extract_strided_slice %35 {offsets = [0, 0, 0, 0, 0], sizes = [1, 2, 1, 4, 256], strides = [1, 1, 1, 1, 1]} : vector<1x2x2x4x256xbf16> to vector<1x2x1x4x256xbf16>
    %37 = vector.shape_cast %36 : vector<1x2x1x4x256xbf16> to vector<1x2x4x256xbf16>
    %38 = vector.extract_strided_slice %35 {offsets = [0, 0, 1, 0, 0], sizes = [1, 2, 1, 4, 256], strides = [1, 1, 1, 1, 1]} : vector<1x2x2x4x256xbf16> to vector<1x2x1x4x256xbf16>
    %39 = vector.shape_cast %38 : vector<1x2x1x4x256xbf16> to vector<1x2x4x256xbf16>
    %40 = arith.maximumf %37, %39 : vector<1x2x4x256xbf16>
    %cst_27 = arith.constant 0.000000e+00 : bf16
    %41 = vector.broadcast %cst_27 : bf16 to vector<1x4x6x256xbf16>
    %c0_28 = arith.constant 0 : index
    %c0_29 = arith.constant 0 : index
    %c0_30 = arith.constant 0 : index
    %c0_31 = arith.constant 0 : index
    %42 = vector.load %arg4[%c0_28, %c0_29, %c0_30, %c0_31] : memref<1x4x6x256xbf16, #tpu.memory_space<vmem>>, vector<1x4x6x256xbf16>
    tpu.vector_store %arg4[%c0_28, %c0_29, %c0_30, %c0_31], %41 {strides = array<i32>} : memref<1x4x6x256xbf16, #tpu.memory_space<vmem>>, vector<1x4x6x256xbf16>,
    %c0_32 = arith.constant 0 : index
    %c1_33 = arith.constant 1 : index
    %c1_34 = arith.constant 1 : index
    %c0_35 = arith.constant 0 : index
    %43 = vector.load %arg4[%c0_32, %c1_33, %c1_34, %c0_35] : memref<1x4x6x256xbf16, #tpu.memory_space<vmem>>, vector<1x2x4x256xbf16>
    tpu.vector_store %arg4[%c0_32, %c1_33, %c1_34, %c0_35], %40 {strides = array<i32>} : memref<1x4x6x256xbf16, #tpu.memory_space<vmem>>, vector<1x2x4x256xbf16>,
    return
  }
  func.func @transform_0(%arg0: i32) -> (i32, i32, i32, i32) {
    %c0_i32 = arith.constant 0 : i32
    %c0_i32_0 = arith.constant 0 : i32
    %c0_i32_1 = arith.constant 0 : i32
    %c0_i32_2 = arith.constant 0 : i32
    return %arg0, %c0_i32, %c0_i32_0, %c0_i32_1 : i32, i32, i32, i32
  }
  func.func @transform_1(%arg0: i32) -> (i32, i32, i32) {
    %c0_i32 = arith.constant 0 : i32
    %c0_i32_0 = arith.constant 0 : i32
    %c0_i32_1 = arith.constant 0 : i32
    %c0_i32_2 = arith.constant 0 : i32
    return %c0_i32, %c0_i32_0, %c0_i32_1 : i32, i32, i32
  }
  func.func @transform_2(%arg0: i32) -> (i32, i32) {
    %c0_i32 = arith.constant 0 : i32
    %c0_i32_0 = arith.constant 0 : i32
    %c0_i32_1 = arith.constant 0 : i32
    return %c0_i32, %c0_i32_0 : i32, i32
  }
  func.func @transform_3(%arg0: i32) -> (i32, i32, i32, i32) {
    %c0_i32 = arith.constant 0 : i32
    %c0_i32_0 = arith.constant 0 : i32
    %c0_i32_1 = arith.constant 0 : i32
    %c0_i32_2 = arith.constant 0 : i32
    return %arg0, %c0_i32, %c0_i32_0, %c0_i32_1 : i32, i32, i32, i32
  }
}

module attributes {stable_mosaic.version = 11 : i64} {
  func.func @_conv_bn_relu_pool_kernel(%arg0: i32, %arg1: memref<1x4x6x256xbf16, #tpu.memory_space<vmem>>, %arg2: memref<3x768x512xbf16, #tpu.memory_space<vmem>>, %arg3: memref<1x512xf32, #tpu.memory_space<vmem>>, %arg4: memref<1x2x4x512xbf16, #tpu.memory_space<vmem>>, %arg5: memref<8x512xf32, #tpu.memory_space<vmem>>) attributes {dimension_semantics = [#tpu.dimension_semantics<parallel>], iteration_bounds = array<i64: 2>, scalar_prefetch = 0 : i64, scratch_operands = 1 : i64, tpu.core_type = #tpu.core_type<tc>, window_params = [{transform_indices = @transform_0, window_bounds = array<i64: 1, 4, 6, 256>}, {pipeline_mode = #tpu.pipeline_mode<synchronous>, transform_indices = @transform_1, window_bounds = array<i64: 3, 768, 512>}, {pipeline_mode = #tpu.pipeline_mode<synchronous>, transform_indices = @transform_2, window_bounds = array<i64: 1, 512>}, {transform_indices = @transform_3, window_bounds = array<i64: 1, 2, 4, 512>}]} {
    %c0 = arith.constant 0 : index
    %c0_0 = arith.constant 0 : index
    %c0_1 = arith.constant 0 : index
    %c0_2 = arith.constant 0 : index
    %0 = vector.load %arg1[%c0, %c0_0, %c0_1, %c0_2] : memref<1x4x6x256xbf16, #tpu.memory_space<vmem>>, vector<1x4x6x256xbf16>
    %1 = vector.extract_strided_slice %0 {offsets = [0, 0, 0, 0], sizes = [1, 4, 4, 256], strides = [1, 1, 1, 1]} : vector<1x4x6x256xbf16> to vector<1x4x4x256xbf16>
    %2 = vector.extract_strided_slice %0 {offsets = [0, 0, 1, 0], sizes = [1, 4, 4, 256], strides = [1, 1, 1, 1]} : vector<1x4x6x256xbf16> to vector<1x4x4x256xbf16>
    %3 = vector.extract_strided_slice %0 {offsets = [0, 0, 2, 0], sizes = [1, 4, 4, 256], strides = [1, 1, 1, 1]} : vector<1x4x6x256xbf16> to vector<1x4x4x256xbf16>
    %4 = tpu.concatenate %1, %2, %3 in 3 : vector<1x4x4x256xbf16>, vector<1x4x4x256xbf16>, vector<1x4x4x256xbf16> -> vector<1x4x4x768xbf16>
    %5 = vector.extract_strided_slice %4 {offsets = [0, 0, 0, 0], sizes = [1, 2, 4, 768], strides = [1, 1, 1, 1]} : vector<1x4x4x768xbf16> to vector<1x2x4x768xbf16>
    %6 = vector.shape_cast %5 : vector<1x2x4x768xbf16> to vector<8x768xbf16>
    %c0_3 = arith.constant 0 : index
    %c0_4 = arith.constant 0 : index
    %c0_5 = arith.constant 0 : index
    %7 = vector.load %arg2[%c0_3, %c0_4, %c0_5] : memref<3x768x512xbf16, #tpu.memory_space<vmem>>, vector<1x768x512xbf16>
    %8 = vector.shape_cast %7 : vector<1x768x512xbf16> to vector<768x512xbf16>
    %cst = arith.constant dense<0.000000e+00> : vector<8x512xf32>
    %9 = tpu.matmul %6, %8, %cst {dimension_numbers = #tpu.dot_dimension_numbers<[1], [0], [0], [1], [0, 0, 1, 1], [], []>} : vector<8x768xbf16>, vector<768x512xbf16>, vector<8x512xf32> -> vector<8x512xf32>
    %c0_6 = arith.constant 0 : index
    %c0_7 = arith.constant 0 : index
    %10 = vector.load %arg5[%c0_6, %c0_7] : memref<8x512xf32, #tpu.memory_space<vmem>>, vector<8x512xf32>
    tpu.vector_store %arg5[%c0_6, %c0_7], %9 {strides = array<i32>} : memref<8x512xf32, #tpu.memory_space<vmem>>, vector<8x512xf32>,
    %11 = vector.extract_strided_slice %4 {offsets = [0, 1, 0, 0], sizes = [1, 2, 4, 768], strides = [1, 1, 1, 1]} : vector<1x4x4x768xbf16> to vector<1x2x4x768xbf16>
    %12 = vector.shape_cast %11 : vector<1x2x4x768xbf16> to vector<8x768xbf16>
    %c1 = arith.constant 1 : index
    %c0_8 = arith.constant 0 : index
    %c0_9 = arith.constant 0 : index
    %13 = vector.load %arg2[%c1, %c0_8, %c0_9] : memref<3x768x512xbf16, #tpu.memory_space<vmem>>, vector<1x768x512xbf16>
    %14 = vector.shape_cast %13 : vector<1x768x512xbf16> to vector<768x512xbf16>
    %cst_10 = arith.constant dense<0.000000e+00> : vector<8x512xf32>
    %15 = tpu.matmul %12, %14, %cst_10 {dimension_numbers = #tpu.dot_dimension_numbers<[1], [0], [0], [1], [0, 0, 1, 1], [], []>} : vector<8x768xbf16>, vector<768x512xbf16>, vector<8x512xf32> -> vector<8x512xf32>
    %c0_11 = arith.constant 0 : index
    %c0_12 = arith.constant 0 : index
    %16 = vector.load %arg5[%c0_11, %c0_12] : memref<8x512xf32, #tpu.memory_space<vmem>>, vector<8x512xf32>
    %17 = arith.addf %16, %15 : vector<8x512xf32>
    %c0_13 = arith.constant 0 : index
    %c0_14 = arith.constant 0 : index
    %18 = vector.load %arg5[%c0_13, %c0_14] : memref<8x512xf32, #tpu.memory_space<vmem>>, vector<8x512xf32>
    tpu.vector_store %arg5[%c0_13, %c0_14], %17 {strides = array<i32>} : memref<8x512xf32, #tpu.memory_space<vmem>>, vector<8x512xf32>,
    %19 = vector.extract_strided_slice %4 {offsets = [0, 2, 0, 0], sizes = [1, 2, 4, 768], strides = [1, 1, 1, 1]} : vector<1x4x4x768xbf16> to vector<1x2x4x768xbf16>
    %20 = vector.shape_cast %19 : vector<1x2x4x768xbf16> to vector<8x768xbf16>
    %c2 = arith.constant 2 : index
    %c0_15 = arith.constant 0 : index
    %c0_16 = arith.constant 0 : index
    %21 = vector.load %arg2[%c2, %c0_15, %c0_16] : memref<3x768x512xbf16, #tpu.memory_space<vmem>>, vector<1x768x512xbf16>
    %22 = vector.shape_cast %21 : vector<1x768x512xbf16> to vector<768x512xbf16>
    %cst_17 = arith.constant dense<0.000000e+00> : vector<8x512xf32>
    %23 = tpu.matmul %20, %22, %cst_17 {dimension_numbers = #tpu.dot_dimension_numbers<[1], [0], [0], [1], [0, 0, 1, 1], [], []>} : vector<8x768xbf16>, vector<768x512xbf16>, vector<8x512xf32> -> vector<8x512xf32>
    %c0_18 = arith.constant 0 : index
    %c0_19 = arith.constant 0 : index
    %24 = vector.load %arg5[%c0_18, %c0_19] : memref<8x512xf32, #tpu.memory_space<vmem>>, vector<8x512xf32>
    %25 = arith.addf %24, %23 : vector<8x512xf32>
    %c0_20 = arith.constant 0 : index
    %c0_21 = arith.constant 0 : index
    %26 = vector.load %arg5[%c0_20, %c0_21] : memref<8x512xf32, #tpu.memory_space<vmem>>, vector<8x512xf32>
    tpu.vector_store %arg5[%c0_20, %c0_21], %25 {strides = array<i32>} : memref<8x512xf32, #tpu.memory_space<vmem>>, vector<8x512xf32>,
    %c0_22 = arith.constant 0 : index
    %c0_23 = arith.constant 0 : index
    %27 = vector.load %arg5[%c0_22, %c0_23] : memref<8x512xf32, #tpu.memory_space<vmem>>, vector<8x512xf32>
    %c0_24 = arith.constant 0 : index
    %c0_25 = arith.constant 0 : index
    %28 = vector.load %arg3[%c0_24, %c0_25] : memref<1x512xf32, #tpu.memory_space<vmem>>, vector<1x512xf32>
    %29 = vector.broadcast %28 : vector<1x512xf32> to vector<8x512xf32>
    %30 = arith.addf %27, %29 : vector<8x512xf32>
    %cst_26 = arith.constant 0.000000e+00 : f32
    %31 = vector.broadcast %cst_26 : f32 to vector<8x512xf32>
    %32 = arith.maximumf %30, %31 : vector<8x512xf32>
    %33 = arith.truncf %32 : vector<8x512xf32> to vector<8x512xbf16>
    %34 = vector.shape_cast %33 : vector<8x512xbf16> to vector<1x2x4x512xbf16>
    %c0_27 = arith.constant 0 : index
    %c0_28 = arith.constant 0 : index
    %c0_29 = arith.constant 0 : index
    %c0_30 = arith.constant 0 : index
    %35 = vector.load %arg4[%c0_27, %c0_28, %c0_29, %c0_30] : memref<1x2x4x512xbf16, #tpu.memory_space<vmem>>, vector<1x2x4x512xbf16>
    tpu.vector_store %arg4[%c0_27, %c0_28, %c0_29, %c0_30], %34 {strides = array<i32>} : memref<1x2x4x512xbf16, #tpu.memory_space<vmem>>, vector<1x2x4x512xbf16>,
    return
  }
  func.func @transform_0(%arg0: i32) -> (i32, i32, i32, i32) {
    %c0_i32 = arith.constant 0 : i32
    %c0_i32_0 = arith.constant 0 : i32
    %c0_i32_1 = arith.constant 0 : i32
    %c0_i32_2 = arith.constant 0 : i32
    return %arg0, %c0_i32, %c0_i32_0, %c0_i32_1 : i32, i32, i32, i32
  }
  func.func @transform_1(%arg0: i32) -> (i32, i32, i32) {
    %c0_i32 = arith.constant 0 : i32
    %c0_i32_0 = arith.constant 0 : i32
    %c0_i32_1 = arith.constant 0 : i32
    %c0_i32_2 = arith.constant 0 : i32
    return %c0_i32, %c0_i32_0, %c0_i32_1 : i32, i32, i32
  }
  func.func @transform_2(%arg0: i32) -> (i32, i32) {
    %c0_i32 = arith.constant 0 : i32
    %c0_i32_0 = arith.constant 0 : i32
    %c0_i32_1 = arith.constant 0 : i32
    return %c0_i32, %c0_i32_0 : i32, i32
  }
  func.func @transform_3(%arg0: i32) -> (i32, i32, i32, i32) {
    %c0_i32 = arith.constant 0 : i32
    %c0_i32_0 = arith.constant 0 : i32
    %c0_i32_1 = arith.constant 0 : i32
    %c0_i32_2 = arith.constant 0 : i32
    return %arg0, %c0_i32, %c0_i32_0, %c0_i32_1 : i32, i32, i32, i32
  }
}

module attributes {stable_mosaic.version = 11 : i64} {
  func.func @_conv_bn_relu_pool_kernel(%arg0: i32, %arg1: memref<1x2x4x512xbf16, #tpu.memory_space<vmem>>, %arg2: memref<2x1024x512xbf16, #tpu.memory_space<vmem>>, %arg3: memref<1x512xf32, #tpu.memory_space<vmem>>, %arg4: memref<1x1x3x512xf32, #tpu.memory_space<vmem>>, %arg5: memref<3x512xf32, #tpu.memory_space<vmem>>) attributes {dimension_semantics = [#tpu.dimension_semantics<parallel>], iteration_bounds = array<i64: 2>, scalar_prefetch = 0 : i64, scratch_operands = 1 : i64, tpu.core_type = #tpu.core_type<tc>, window_params = [{transform_indices = @transform_0, window_bounds = array<i64: 1, 2, 4, 512>}, {pipeline_mode = #tpu.pipeline_mode<synchronous>, transform_indices = @transform_1, window_bounds = array<i64: 2, 1024, 512>}, {pipeline_mode = #tpu.pipeline_mode<synchronous>, transform_indices = @transform_2, window_bounds = array<i64: 1, 512>}, {transform_indices = @transform_3, window_bounds = array<i64: 1, 1, 3, 512>}]} {
    %c0 = arith.constant 0 : index
    %c0_0 = arith.constant 0 : index
    %c0_1 = arith.constant 0 : index
    %c0_2 = arith.constant 0 : index
    %0 = vector.load %arg1[%c0, %c0_0, %c0_1, %c0_2] : memref<1x2x4x512xbf16, #tpu.memory_space<vmem>>, vector<1x2x4x512xbf16>
    %1 = vector.extract_strided_slice %0 {offsets = [0, 0, 0, 0], sizes = [1, 2, 3, 512], strides = [1, 1, 1, 1]} : vector<1x2x4x512xbf16> to vector<1x2x3x512xbf16>
    %2 = vector.extract_strided_slice %0 {offsets = [0, 0, 1, 0], sizes = [1, 2, 3, 512], strides = [1, 1, 1, 1]} : vector<1x2x4x512xbf16> to vector<1x2x3x512xbf16>
    %3 = tpu.concatenate %1, %2 in 3 : vector<1x2x3x512xbf16>, vector<1x2x3x512xbf16> -> vector<1x2x3x1024xbf16>
    %4 = vector.shape_cast %3 : vector<1x2x3x1024xbf16> to vector<1x1x2x3x1024xbf16>
    %5 = vector.extract_strided_slice %4 {offsets = [0, 0, 0, 0, 0], sizes = [1, 1, 1, 3, 1024], strides = [1, 1, 1, 1, 1]} : vector<1x1x2x3x1024xbf16> to vector<1x1x1x3x1024xbf16>
    %6 = vector.shape_cast %5 : vector<1x1x1x3x1024xbf16> to vector<1x1x3x1024xbf16>
    %7 = vector.shape_cast %6 : vector<1x1x3x1024xbf16> to vector<3x1024xbf16>
    %c0_3 = arith.constant 0 : index
    %c0_4 = arith.constant 0 : index
    %c0_5 = arith.constant 0 : index
    %8 = vector.load %arg2[%c0_3, %c0_4, %c0_5] : memref<2x1024x512xbf16, #tpu.memory_space<vmem>>, vector<1x1024x512xbf16>
    %9 = vector.shape_cast %8 : vector<1x1024x512xbf16> to vector<1024x512xbf16>
    %cst = arith.constant dense<0.000000e+00> : vector<3x512xf32>
    %10 = tpu.matmul %7, %9, %cst {dimension_numbers = #tpu.dot_dimension_numbers<[1], [0], [0], [1], [0, 0, 1, 1], [], []>} : vector<3x1024xbf16>, vector<1024x512xbf16>, vector<3x512xf32> -> vector<3x512xf32>
    %c0_6 = arith.constant 0 : index
    %c0_7 = arith.constant 0 : index
    %11 = vector.load %arg5[%c0_6, %c0_7] : memref<3x512xf32, #tpu.memory_space<vmem>>, vector<3x512xf32>
    tpu.vector_store %arg5[%c0_6, %c0_7], %10 {strides = array<i32>} : memref<3x512xf32, #tpu.memory_space<vmem>>, vector<3x512xf32>,
    %12 = vector.shape_cast %3 : vector<1x2x3x1024xbf16> to vector<1x1x2x3x1024xbf16>
    %13 = vector.extract_strided_slice %12 {offsets = [0, 0, 1, 0, 0], sizes = [1, 1, 1, 3, 1024], strides = [1, 1, 1, 1, 1]} : vector<1x1x2x3x1024xbf16> to vector<1x1x1x3x1024xbf16>
    %14 = vector.shape_cast %13 : vector<1x1x1x3x1024xbf16> to vector<1x1x3x1024xbf16>
    %15 = vector.shape_cast %14 : vector<1x1x3x1024xbf16> to vector<3x1024xbf16>
    %c1 = arith.constant 1 : index
    %c0_8 = arith.constant 0 : index
    %c0_9 = arith.constant 0 : index
    %16 = vector.load %arg2[%c1, %c0_8, %c0_9] : memref<2x1024x512xbf16, #tpu.memory_space<vmem>>, vector<1x1024x512xbf16>
    %17 = vector.shape_cast %16 : vector<1x1024x512xbf16> to vector<1024x512xbf16>
    %cst_10 = arith.constant dense<0.000000e+00> : vector<3x512xf32>
    %18 = tpu.matmul %15, %17, %cst_10 {dimension_numbers = #tpu.dot_dimension_numbers<[1], [0], [0], [1], [0, 0, 1, 1], [], []>} : vector<3x1024xbf16>, vector<1024x512xbf16>, vector<3x512xf32> -> vector<3x512xf32>
    %c0_11 = arith.constant 0 : index
    %c0_12 = arith.constant 0 : index
    %19 = vector.load %arg5[%c0_11, %c0_12] : memref<3x512xf32, #tpu.memory_space<vmem>>, vector<3x512xf32>
    %20 = arith.addf %19, %18 : vector<3x512xf32>
    %c0_13 = arith.constant 0 : index
    %c0_14 = arith.constant 0 : index
    %21 = vector.load %arg5[%c0_13, %c0_14] : memref<3x512xf32, #tpu.memory_space<vmem>>, vector<3x512xf32>
    tpu.vector_store %arg5[%c0_13, %c0_14], %20 {strides = array<i32>} : memref<3x512xf32, #tpu.memory_space<vmem>>, vector<3x512xf32>,
    %c0_15 = arith.constant 0 : index
    %c0_16 = arith.constant 0 : index
    %22 = vector.load %arg5[%c0_15, %c0_16] : memref<3x512xf32, #tpu.memory_space<vmem>>, vector<3x512xf32>
    %c0_17 = arith.constant 0 : index
    %c0_18 = arith.constant 0 : index
    %23 = vector.load %arg3[%c0_17, %c0_18] : memref<1x512xf32, #tpu.memory_space<vmem>>, vector<1x512xf32>
    %24 = vector.broadcast %23 : vector<1x512xf32> to vector<3x512xf32>
    %25 = arith.addf %22, %24 : vector<3x512xf32>
    %cst_19 = arith.constant 0.000000e+00 : f32
    %26 = vector.broadcast %cst_19 : f32 to vector<3x512xf32>
    %27 = arith.maximumf %25, %26 : vector<3x512xf32>
    %28 = vector.shape_cast %27 : vector<3x512xf32> to vector<1x1x3x512xf32>
    %c0_20 = arith.constant 0 : index
    %c0_21 = arith.constant 0 : index
    %c0_22 = arith.constant 0 : index
    %c0_23 = arith.constant 0 : index
    %29 = vector.load %arg4[%c0_20, %c0_21, %c0_22, %c0_23] : memref<1x1x3x512xf32, #tpu.memory_space<vmem>>, vector<1x1x3x512xf32>
    tpu.vector_store %arg4[%c0_20, %c0_21, %c0_22, %c0_23], %28 {strides = array<i32>} : memref<1x1x3x512xf32, #tpu.memory_space<vmem>>, vector<1x1x3x512xf32>,
    return
  }
  func.func @transform_0(%arg0: i32) -> (i32, i32, i32, i32) {
    %c0_i32 = arith.constant 0 : i32
    %c0_i32_0 = arith.constant 0 : i32
    %c0_i32_1 = arith.constant 0 : i32
    %c0_i32_2 = arith.constant 0 : i32
    return %arg0, %c0_i32, %c0_i32_0, %c0_i32_1 : i32, i32, i32, i32
  }
  func.func @transform_1(%arg0: i32) -> (i32, i32, i32) {
    %c0_i32 = arith.constant 0 : i32
    %c0_i32_0 = arith.constant 0 : i32
    %c0_i32_1 = arith.constant 0 : i32
    %c0_i32_2 = arith.constant 0 : i32
    return %c0_i32, %c0_i32_0, %c0_i32_1 : i32, i32, i32
  }
  func.func @transform_2(%arg0: i32) -> (i32, i32) {
    %c0_i32 = arith.constant 0 : i32
    %c0_i32_0 = arith.constant 0 : i32
    %c0_i32_1 = arith.constant 0 : i32
    return %c0_i32, %c0_i32_0 : i32, i32
  }
  func.func @transform_3(%arg0: i32) -> (i32, i32, i32, i32) {
    %c0_i32 = arith.constant 0 : i32
    %c0_i32_0 = arith.constant 0 : i32
    %c0_i32_1 = arith.constant 0 : i32
    %c0_i32_2 = arith.constant 0 : i32
    return %arg0, %c0_i32, %c0_i32_0, %c0_i32_1 : i32, i32, i32, i32
  }
}

</mosaic_0001>

<bundles_post_ra>
// kernel: lcnet_forward.7
= control target key start
LH: loop header
LB: loop body
LE: loop exit
PB: predicated region body
PF: predicated region fallthrough
CT: control target
= control target key end

     0   :  { %8 = vsyncpa [#allocation4], 0  ;;  %s3198_s0 = inlined_call_operand.vmem [shape: bf16[2,10,10,128], index: 0, kind: input, shape index: {}]   ;;  %s3199_s1 = inlined_call_operand.hbm [shape: bf16[3,384,128], index: 1, kind: input, shape index: {}]   ;;  %s3200_s2 = inlined_call_operand.hbm [shape: f32[1,128], index: 2, kind: input, shape index: {}]   ;;  %s3201_s3 = inlined_call_operand.vmem [shape: bf16[2,6,6,128], index: 3, kind: output, shape index: {}]  }
   0x1   :  { %9 = vsyncpa [#allocation6], 0  ;;  %s2794_s12 = smov 0  }
   0x2 LB: > { %s2800_s13 = sadd.s32 4294967295, %s2765_s12   ;;  %p2139_p0 = scmp.ge.s32.totalorder %s2765_s12, 1  ;;  %s2765_s12 = sphi %s2794_s12, %s15_s12  }
   0x3   : > { %p114_p1 = scmp.lt.s32.totalorder %s2765_s12, 3  ;;  %s2767_s14 = smov [#allocation3]  }
   0x4   : > { %s126_s15 = sshll.u32 %s2767_s14, 4  ;;  %p3202_p3 = scmp.eq.s32.totalorder %s2800_s13, 0  ;;  %s127_s15 = int_to_ptr.vmem [resolvable:$true] %s126_s15 }
   0x5   : > { %p2804_p2 = pnand %p2139_p0, %p114_p1  ;;  %s2768_s17 = smov [#allocation5]  }
   0x6   : > { %s140_s18 = sshll.u32 %s2768_s17, 4  ;;  %s2695_s22 = scalar_lea.hbm %s3199_s1, 9216  ;;  %s2817_s18 = int_to_ptr.vmem [resolvable:$true] %s140_s18 }
   0x7   : > { %s3204_s16 = scalar_select %p2804_p2, 1, 0 }
   0x8   : > { %p2578_p4 = pneg %p2804_p2  ;;  %p2696_p6 = scmp.ne.s32.totalorder %s3199_s1, %s2695_s22 }
   0x9   : > { %p2702_p10 = scmp.lt.u32.totalorder %s2695_s22, %s3199_s1 }
   0xa   : > { %p2813_p5 = pnand %p3202_p3, %p2578_p4 }
   0xc   : > { %p2697_p7 = pneg %p2813_p5 }
   0xe   : > { %p2698_p8 = pnand %p2697_p7, %p2696_p6 }
  0x10   : > { %p2699_p9 = pneg %p2698_p8 }
  0x12   : > { %p2704_p11 = pnand %p2702_p10, %p2699_p9 }
  0x14   : > { %2707 = shalt.err (!%p2704_p11)
}
  0x15   : > { %s2708_s27 = scalar_lea.vmem %s127_s15, 9216  ;;  %p2716_p1 = scmp.lt.s32.totalorder %s127_s15, %s127_s15 }
  0x16   : > { %p2709_p12 = scmp.ne.s32.totalorder %s127_s15, %s2708_s27  ;;  %p2717_p4 = scmp.lt.s32.totalorder %s2708_s27, %s2708_s27 }
  0x18   : > { %p2711_p13 = pnand %p2709_p12, %p2697_p7  ;;  %p2718_p3 = por %p2717_p4, %p2716_p1 }
  0x1a   : > { %p2712_p0 = pneg %p2711_p13 }
  0x1c   : > { %p2719_p2 = pnand %p2718_p3, %p2712_p0 }
  0x1e   : > { %2722 = shalt.err (!%p2719_p2)
}
  0x1f   : > { %s2769_s28 = smov 64   ;;  %s2770_s29 = smov 4  }
  0x20   : > { %2581 = dma.hbm_to_vmem [thread:$0]  (!%p2813_p5), %s3199_s1, 9216, %s127_s15, [#allocation4], %s2769_s28, %s2769_s28, %s2770_s29  }
  0x21   : > { %s2723_s7 = scalar_lea.hbm %s3200_s2, 16 }
  0x22   : > { %p2724_p6 = scmp.ne.s32.totalorder %s3200_s2, %s2723_s7  ;;  %p2730_p8 = scmp.lt.u32.totalorder %s2723_s7, %s3200_s2 }
  0x24   : > { %p2726_p2 = pnand %p2724_p6, %p2697_p7 }
  0x26   : > { %p2727_p3 = pneg %p2726_p2 }
  0x28   : > { %p2732_p9 = pnand %p2730_p8, %p2727_p3 }
  0x2a   : > { %2735 = shalt.err (!%p2732_p9)
}
  0x2b   : > { %s2736_s14 = scalar_lea.vmem %s2817_s18, 16  ;;  %s2743_s15 = scalar_lea.vmem %s2817_s18, 32 }
  0x2c   : > { %p2737_p10 = scmp.ne.s32.totalorder %s2817_s18, %s2736_s14  ;;  %p2744_p13 = scmp.lt.s32.totalorder %s2817_s18, %s2817_s18 }
  0x2d   : > { %p2745_p0 = scmp.lt.s32.totalorder %s2743_s15, %s2736_s14 }
  0x2e   : > { %p2739_p11 = pnand %p2737_p10, %p2697_p7 }
  0x2f   : > { %p2746_p1 = por %p2745_p0, %p2744_p13 }
  0x30   : > { %p2740_p12 = pneg %p2739_p11 }
  0x32   : > { %p2747_p4 = pnand %p2746_p1, %p2740_p12 }
  0x34   : > { %2750 = shalt.err (!%p2747_p4)
}
  0x35   : > { %2584 = dma.hbm_to_vmem [thread:$0]  (!%p2813_p5), %s3200_s2, 16, %s2817_s18, [#allocation6]  }
  0x36   : > { %p3206_p6 = scmp.ne.s32.totalorder %s3204_s16, 0 }
  0x37   : > { %p3207_p7 = scmp.eq.s32.totalorder (!%p3206_p6), %s2800_s13, 0 }
  0x38   : > { %161 = sbr.rel (%p3206_p6) target bundleno = 461 (0x1cd), region = 32 }
  0x3f   : > { %2756 = dma.done.wait (%p3207_p7), [#allocation4], 9216   ;;  %p3208_p2 = pmov %p3207_p7 }
  0x41   : > { %2758 = vsyncadd (%p3208_p2), [#allocation4], 4294958080  ;;  %p3209_p3 = pmov %p3208_p2 }
  0x42   : > { %p3210_p8 = pmov %p3208_p2 }
  0x43   : > { %2760 = dma.done.wait (%p3209_p3), [#allocation6], 16  }
  0x44   : > { %2762 = vsyncadd (%p3210_p8), [#allocation6], 4294967280  ;;  %v2604_v0 = vld [vmem:[#allocation3 + $0x40] sm:$0xff]   ;;  %v2607_v3 = vld [vmem:[#allocation3 + $0x48] sm:$0xff]   ;;  %p189_p5 = scmp.lt.s32.totalorder %s2800_s13, 1  ;;  %vm2007_vm0 = vcmask 1042434  }
  0x45   : > { %v2605_v1 = vld [vmem:[#allocation3 + $0x80] sm:$0xff]   ;;  %2300 = vmatprep.subr.bf16.mxu0 %v2604_v0  ;;  %v2608_v4 = vld [vmem:[#allocation3 + $0x88] sm:$0xff]   ;;  %v2610_v6 = vld [vmem:[#allocation3 + $0x50] sm:$0xff]   ;;  %vm2010_vm1 = vcmask 1043459   ;;  %vm2013_vm2 = vcmask 1044484   ;;  %vm2045_vm3 = vcmask 1042432  }
  0x46   : > { %v2606_v2 = vld [vmem:[#allocation3] sm:$0xff]   ;;  %2456 = vmatprep.subr.bf16.mxu1 %v2605_v1  ;;  %v2609_v5 = vld [vmem:[#allocation3 + $0x8] sm:$0xff]   ;;  %v2611_v7 = vld [vmem:[#allocation3 + $0x90] sm:$0xff]   ;;  %s3214_s13 = smov (!%p189_p5, %s2800_s13), 1  ;;  %vm2046_vm4 = vsmask.f32 2306 }
  0x47   : > { %2301 = vmatpush3.bf16.msra.mxu0 %v2606_v2  ;;  %2457 = vmatpush3.bf16.msra.mxu1 %v2605_v1  ;;  %v2612_v8 = vld [vmem:[#allocation3 + $0x10] sm:$0xff]   ;;  %v2613_v9 = vld [vmem:[#allocation3 + $0x58] sm:$0xff]   ;;  %v2616_v12 = vld [vmem:[#allocation3 + $0x60] sm:$0xff]   ;;  %s2568_s16 = smul.u32 80, %s3214_s13 }
  0x48   : > { %2302 = vmatprep.subr.bf16.mxu0 %v2607_v3  ;;  %2458 = vmatprep.subr.bf16.mxu1 %v2608_v4  ;;  %v2614_v10 = vld [vmem:[#allocation3 + $0x98] sm:$0xff]   ;;  %v2617_v13 = vld [vmem:[#allocation3 + $0xa0] sm:$0xff]   ;;  %v2619_v15 = vld [vmem:[#allocation3 + $0x68] sm:$0xff]   ;;  %s2569_s22 = smul.u32 24, %s3214_s13 }
  0x49   : > { %v2615_v11 = vld [vmem:[#allocation3 + $0x18] sm:$0xff]   ;;  %v2618_v14 = vld [vmem:[#allocation3 + $0x20] sm:$0xff]   ;;  %v2620_v16 = vld [vmem:[#allocation3 + $0xa8] sm:$0xff]   ;;  %s2885_s21 = scalar_lea.vmem %s3198_s0, %s2568_s16 }
  0x4a   : > { %v2621_v17 = vld [vmem:[#allocation3 + $0x28] sm:$0xff]   ;;  %v2622_v18 = vld [vmem:[#allocation3 + $0x70] sm:$0xff]   ;;  %v2625_v21 = vld [vmem:[#allocation3 + $0x78] sm:$0xff]   ;;  %s3071_s25 = scalar_lea.vmem %s3201_s3, %s2569_s22 }
  0x4b   : > { %2303 = vmatpush3.bf16.msra.mxu0 %v2609_v5  ;;  %2459 = vmatpush3.bf16.msra.mxu1 %v2608_v4  ;;  %v2623_v19 = vld [vmem:[#allocation3 + $0xb0] sm:$0xff]   ;;  %v2626_v22 = vld [vmem:[#allocation3 + $0xb8] sm:$0xff]   ;;  %v200_v23 = vld [vmem:[%s2885_s21] sm:$0xf] }
  0x4c   : > { %2304 = vmatprep.subr.bf16.mxu0 %v2610_v6  ;;  %2460 = vmatprep.subr.bf16.mxu1 %v2611_v7  ;;  %v2624_v20 = vld [vmem:[#allocation3 + $0x30] sm:$0xff]   ;;  %v201_v24 = vld [vmem:[%s2885_s21 + $0x4] sm:$0x1]  ;;  %v2890_v25 = vld [vmem:[%s2885_s21 + $0x8] sm:$0xf] }
  0x4d   : > { %v203_v26 = vld [vmem:[%s2885_s21 + $0xc] sm:$0x1]  ;;  %v2148_v27 = vcombine.low %v200_v23, %v201_v24  ;;  %v2897_v32 = vld [vmem:[%s2885_s21 + $0x10] sm:$0xf]  ;;  %v2627_v33 = vld [vmem:[#allocation3 + $0x38] sm:$0xff]   ;;  %v2158_v53 = vcombine.low %v200_v23, %v2890_v25 }
  0x4e   : > { %v2894_v28 = vcombine.low %v2890_v25, %v203_v26  ;;  %v205_v37 = vld [vmem:[%s2885_s21 + $0x14] sm:$0x1]  ;;  %v2631_v39 = vld [vmem:[#allocation3 + $0x100] sm:$0xff]   ;;  %v2904_v40 = vld [vmem:[%s2885_s21 + $0x18] sm:$0xf] }
  0x4f   : > { %2305 = vmatpush3.bf16.msra.mxu0 %v2612_v8  ;;  %2461 = vmatpush3.bf16.msra.mxu1 %v2611_v7  ;;  %v271_v29 = vshrl.u32 %v2148_v27, 16  ;;  %v273_v30 = vshll.u32 %v2148_v27, 16  ;;  %v340_v31 = vrot.slane %v2148_v27, 1  ;;  %v207_v41 = vld [vmem:[%s2885_s21 + $0x1c] sm:$0x1]  ;;  %v2908_v42 = vcombine.low %v2897_v32, %v205_v37  ;;  %v2632_v45 = vld [vmem:[#allocation3 + $0x140] sm:$0xff]   ;;  %vm3133_vm5 = vmand %vm2045_vm3, %vm2046_vm4 }
  0x50   : > { %2306 = vmatprep.subr.bf16.mxu0 %v2613_v9  ;;  %2462 = vmatprep.subr.bf16.mxu1 %v2614_v10  ;;  %v278_v34 = vshrl.u32 %v2894_v28, 16  ;;  %v280_v35 = vshll.u32 %v2894_v28, 16  ;;  %v341_v36 = vrot.slane %v2894_v28, 1  ;;  %v2913_v46 = vcombine.low %v2904_v40, %v207_v41  ;;  %v2635_v51 = vld [vmem:[#allocation3 + $0xc0] sm:$0xff]   ;;  %v2637_v52 = vld [vmem:[#allocation3 + $0x148] sm:$0xff]   ;;  %v2640_v2 = vld [vmem:[#allocation3 + $0x110] sm:$0xff]  }
  0x51   : > { %v275_v38 = vrot.slane %v273_v30, 1  ;;  %v342_v48 = vrot.slane %v2908_v42, 1  ;;  %v285_v54 = vshrl.u32 %v2908_v42, 16  ;;  %v287_v55 = vshll.u32 %v2908_v42, 16  ;;  %v2636_v60 = vld [vmem:[#allocation3 + $0x108] sm:$0xff]   ;;  %v2641_v3 = vld [vmem:[#allocation3 + $0x150] sm:$0xff]  }
  0x52   : > { %v282_v43 = vrot.slane %v280_v35, 1  ;;  %v2160_v44 = vcombine.low %v340_v31, %v341_v36  ;;  %v343_v50 = vrot.slane %v2913_v46, 1  ;;  %v292_v58 = vshrl.u32 %v2913_v46, 16  ;;  %v2638_v63 = vld [vmem:[#allocation3 + $0xc8] sm:$0xff]   ;;  %v2642_v5 = vld [vmem:[#allocation3 + $0xd0] sm:$0xff]   ;;  %v2649_v24 = vld [vmem:[#allocation3 + $0x120] sm:$0xff]  }
  0x53   : > { %2307 = vmatpush3.bf16.msra.mxu0 %v2615_v11  ;;  %2463 = vmatpush3.bf16.msra.mxu1 %v2614_v10  ;;  %v276_v47 = vor.u32 %v275_v38, %v271_v29  ;;  %v294_v59 = vshll.u32 %v2913_v46, 16  ;;  %v289_v61 = vrot.slane %v287_v55, 1  ;;  %v2941_v6 = vld [vmem:[%s2885_s21 + $0x20] sm:$0xf]  ;;  %v209_v7 = vld [vmem:[%s2885_s21 + $0x24] sm:$0x1]  ;;  %v2949_v9 = vcombine.low %v2897_v32, %v2904_v40 }
  0x54   : > { %2308 = vmatprep.subr.bf16.mxu0 %v2616_v12  ;;  %2464 = vmatprep.subr.bf16.mxu1 %v2617_v13  ;;  %v2916_v49 = vor.u32 %v282_v43, %v278_v34  ;;  %v2927_v57 = vcombine.low %v342_v48, %v343_v50  ;;  %v2945_v8 = vld [vmem:[%s2885_s21 + $0x28] sm:$0xf]  ;;  %v211_v10 = vld [vmem:[%s2885_s21 + $0x2c] sm:$0x1]  ;;  %v2953_v11 = vcombine.low %v2941_v6, %v209_v7  ;;  %v2644_v12 = vld [vmem:[#allocation3 + $0x158] sm:$0xff]  }
  0x55   : > { %2472 = vmatprep.mubr.bf16.mxu1 %v2160_v44  ;;  %v296_v62 = vrot.slane %v294_v59, 1  ;;  %v2932_v0 = vor.u32 %v289_v61, %v285_v54  ;;  %v2967_v26 = vld [vmem:[%s2885_s21 + $0x30] sm:$0xf]  ;;  %v2651_v30 = vld [vmem:[#allocation3 + $0xe0] sm:$0xff]   ;;  %v213_v31 = vld [vmem:[%s2885_s21 + $0x34] sm:$0x1]  ;;  %v2979_v35 = vcombine.low %v2941_v6, %v2945_v8 }
  0x56   : > { %v2159_v56 = vcombine.low %v276_v47, %v2916_v49  ;;  %v344_v27 = vrot.slane %v2953_v11, 1  ;;  %v215_v34 = vld [vmem:[%s2885_s21 + $0x3c] sm:$0x1]  ;;  %v2652_v37 = vld [vmem:[#allocation3 + $0x128] sm:$0xff]   ;;  %v2982_v38 = vcombine.low %v2967_v26, %v213_v31  ;;  %v2659_v61 = vld [vmem:[#allocation3 + $0x170] sm:$0xff]  }
  0x57   : > { %2309 = vmatpush3.bf16.msra.mxu0 %v2618_v14  ;;  %2465 = vmatpush3.bf16.msra.mxu1 %v2617_v13  ;;  %v2934_v1 = vor.u32 %v296_v62, %v292_v58  ;;  %v2957_v13 = vcombine.low %v2945_v8, %v211_v10  ;;  %v2643_v14 = vld [vmem:[#allocation3 + $0x118] sm:$0xff]   ;;  %v2653_v44 = vld [vmem:[#allocation3 + $0x168] sm:$0xff]   ;;  %v2660_v42 = vld [vmem:[#allocation3 + $0xf0] sm:$0xff]   ;;  %v2195_v7 = vcombine.low %v2916_v49, %v2932_v0 }
  0x58   : > { %2310 = vmatprep.subr.bf16.mxu0 %v2619_v15  ;;  %2466 = vmatprep.subr.bf16.mxu1 %v2620_v16  ;;  %v299_v15 = vshrl.u32 %v2953_v11, 16  ;;  %v315_v47 = vshll.u32 %v2982_v38, 16  ;;  %v346_v55 = vrot.slane %v2982_v38, 1  ;;  %v2663_v10 = vld [vmem:[#allocation3 + $0xf8] sm:$0xff]   ;;  %v2669_v49 = vld [vmem:[#allocation3 + $0x208] sm:$0xff]   ;;  %v2679_v31 = vld [vmem:[#allocation3 + $0x1e0] sm:$0xff]  }
  0x59   : > { %614 = vmatprep.mubr.bf16.mxu0 %v2159_v56  ;;  %v2938_v4 = vcombine.low %v2932_v0, %v2934_v1  ;;  %v345_v41 = vrot.slane %v2957_v13, 1  ;;  %v2668_v0 = vld [vmem:[#allocation3 + $0x1c8] sm:$0xff]  }
  0x5a   : > { %v317_v58 = vrot.slane %v315_v47, 1  ;;  %v2670_v46 = vld [vmem:[#allocation3 + $0x188] sm:$0xff]  }
  0x5b   : > { %2311 = vmatpush3.bf16.msra.mxu0 %v2621_v17  ;;  %2467 = vmatpush3.bf16.msra.mxu1 %v2620_v16  ;;  %v301_v16 = vshll.u32 %v2953_v11, 16  ;;  %v306_v17 = vshrl.u32 %v2957_v13, 16  ;;  %v2997_v54 = vcombine.low %v344_v27, %v345_v41  ;;  %v2666_v11 = vld [vmem:[#allocation3 + $0x200] sm:$0xff]  }
  0x5c   : > { %2312 = vmatprep.subr.bf16.mxu0 %v2622_v18  ;;  %2468 = vmatprep.subr.bf16.mxu1 %v2623_v19  ;;  %v308_v18 = vshll.u32 %v2957_v13, 16  ;;  %v2199_v13 = vcombine.low %v343_v50, %v344_v27  ;;  %v2673_v50 = vld [vmem:[#allocation3 + $0x210] sm:$0xff]  }
  0x5f   : > { %2313 = vmatpush3.bf16.msra.mxu0 %v2624_v20  ;;  %2469 = vmatpush3.bf16.msra.mxu1 %v2623_v19  ;;  %v2645_v19 = vld [vmem:[#allocation3 + $0xd8] sm:$0xff]   ;;  %v303_v20 = vrot.slane %v301_v16, 1 }
  0x60   : > { %2314 = vmatprep.subr.bf16.mxu0 %v2625_v21  ;;  %2470 = vmatprep.subr.bf16.mxu1 %v2626_v22  ;;  %v310_v21 = vrot.slane %v308_v18, 1  ;;  %v2197_v18 = vcombine.low %v2904_v40, %v2941_v6 }
  0x61   : > { %v2964_v23 = vor.u32 %v303_v20, %v299_v15  ;;  %v2667_v15 = vld [vmem:[#allocation3 + $0x180] sm:$0xff]  }
  0x62   : > { %v2970_v29 = vor.u32 %v310_v21, %v306_v17  ;;  %v2202_v17 = vcombine.low %v345_v41, %v346_v55  ;;  %v217_v20 = vld [vmem:[%s2885_s21 + $0x44] sm:$0x1]  ;;  %v2675_v21 = vld [vmem:[#allocation3 + $0x1d8] sm:$0xff]  }
  0x63   : > { %2315 = vmatpush3.bf16.msra.mxu0 %v2627_v33  ;;  %2471 = vmatpush3.bf16.msra.mxu1 %v2626_v22  ;;  %v2650_v22 = vld [vmem:[#allocation3 + $0x160] sm:$0xff]   ;;  %v2974_v33 = vld [vmem:[%s2885_s21 + $0x38] sm:$0xf]  ;;  %v2198_v16 = vcombine.low %v2934_v1, %v2964_v23 }
  0x64   : > { %2352 = vmatprep.subr.bf16.mxu0 %v2631_v39  ;;  %2480 = vmatprep.subr.bf16.mxu1 %v2632_v45  ;;  %v2985_v39 = vcombine.low %v2974_v33, %v215_v34  ;;  %v2990_v43 = vcombine.low %v2964_v23, %v2970_v29  ;;  %v2676_v1 = vld [vmem:[#allocation3 + $0x218] sm:$0xff]   ;;  %v2681_v41 = vld [vmem:[#allocation3 + $0x1a0] sm:$0xff]  }
  0x66   : > { %2473 = vmatmul.mubr.bf16.vlgmr.msra.gmra.mrb[0].mxu1 %v2927_v57  ;;  %615 = vmatmul.mubr.bf16.vlgmr.msra.gmra.mrb[0].mxu0 %v2158_v53  ;;  %v2654_v53 = vld [vmem:[#allocation3 + $0xe8] sm:$0xff]   ;;  %v347_v56 = vrot.slane %v2985_v39, 1 }
  0x67   : > { %2481 = vmatpush3.bf16.msra.mxu1 %v2632_v45  ;;  %2353 = vmatpush3.bf16.msra.mxu0 %v2635_v51  ;;  %v313_v45 = vshrl.u32 %v2982_v38, 16  ;;  %v320_v51 = vshrl.u32 %v2985_v39, 16 }
  0x68   : > { %2482 = vmatprep.subr.bf16.mxu1 %v2637_v52  ;;  %2354 = vmatprep.subr.bf16.mxu0 %v2636_v60  ;;  %v2196_v60 = vcombine.low %v341_v36, %v342_v48  ;;  %v3008_v62 = vcombine.low %v346_v55, %v347_v56  ;;  %v3022_v36 = vcombine.low %v2967_v26, %v2974_v33  ;;  %v2662_v48 = vld [vmem:[#allocation3 + $0x178] sm:$0xff]   ;;  %v218_v55 = vld [vmem:[%s2885_s21 + $0x48] sm:$0xf] }
  0x69   : > { %622 = vmatprep.mubr.bf16.mxu0 %v2938_v4  ;;  %2476 = vmatprep.mubr.bf16.mxu1 %v2997_v54 }
  0x6b   : > { %2483 = vmatpush3.bf16.msra.mxu1 %v2637_v52  ;;  %2355 = vmatpush3.bf16.msra.mxu0 %v2638_v63  ;;  %v322_v52 = vshll.u32 %v2985_v39, 16  ;;  %v3010_v63 = vor.u32 %v317_v58, %v313_v45  ;;  %v2682_v45 = vld [vmem:[#allocation3 + $0x1e8] sm:$0xff]   ;;  %v2692_v58 = vld [vmem:[#allocation3 + $0x1b8] sm:$0xff]  }
  0x6c   : > { %2356 = vmatprep.subr.bf16.mxu0 %v2640_v2  ;;  %2484 = vmatprep.subr.bf16.mxu1 %v2641_v3  ;;  %v2684_v39 = vld [vmem:[#allocation3 + $0x1a8] sm:$0xff]  }
  0x6d   : > { %v324_v59 = vrot.slane %v322_v52, 1  ;;  %v2689_v52 = vld [vmem:[#allocation3 + $0x1b0] sm:$0xff]  }
  0x6e   : > { %623 = vmatmul.mubr.bf16.gmra.mrb[4].mxu0 %v2949_v9  ;;  %2477 = vmatmul.mubr.bf16.gmra.mrb[4].mxu1 %v3008_v62 }
  0x6f   : > { %2485 = vmatpush3.bf16.msra.mxu1 %v2641_v3  ;;  %2357 = vmatpush3.bf16.msra.mxu0 %v2642_v5  ;;  %v3012_v2 = vor.u32 %v324_v59, %v320_v51  ;;  %v2658_v3 = vld [vmem:[#allocation3 + $0x130] sm:$0xff]   ;;  %v2661_v5 = vld [vmem:[#allocation3 + $0x138] sm:$0xff]  }
  0x70   : > { %2486 = vmatprep.subr.bf16.mxu1 %v2644_v12  ;;  %2358 = vmatprep.subr.bf16.mxu0 %v2643_v14  ;;  %v2194_v14 = vcombine.low %v2890_v25, %v2897_v32  ;;  %v2672_v25 = vld [vmem:[#allocation3 + $0x1d0] sm:$0xff]  }
  0x71   : > { %630 = vmatprep.mubr.bf16.mxu0 %v2990_v43  ;;  %v3018_v28 = vcombine.low %v3010_v63, %v3012_v2  ;;  %2496 = vmatprep.mubr.bf16.mxu1 %v2196_v60  ;;  %v2674_v32 = vld [vmem:[#allocation3 + $0x190] sm:$0xff]  }
  0x73   : > { %2487 = vmatpush3.bf16.msra.mxu1 %v2644_v12  ;;  %2359 = vmatpush3.bf16.msra.mxu0 %v2645_v19  ;;  %v2665_v12 = vld [vmem:[#allocation3 + $0x1c0] sm:$0xff]  }
  0x74   : > { %2488 = vmatprep.subr.bf16.mxu1 %v2650_v22  ;;  %2360 = vmatprep.subr.bf16.mxu0 %v2649_v24  ;;  %v3037_v19 = vld [vmem:[%s2885_s21 + $0x40] sm:$0xf]  ;;  %v2677_v24 = vld [vmem:[#allocation3 + $0x198] sm:$0xff]  }
  0x75   : > { %v3043_v23 = vcombine.low %v3037_v19, %v217_v20  ;;  %v2203_v51 = vcombine.low %v2974_v33, %v3037_v19 }
  0x76   : > { %631 = vmatmul.mubr.bf16.gmra.mrb[8].mxu0 %v2979_v35 }
  0x77   : > { %2489 = vmatpush3.bf16.msra.mxu1 %v2650_v22  ;;  %2361 = vmatpush3.bf16.msra.mxu0 %v2651_v30  ;;  %v2201_v22 = vcombine.low %v2970_v29, %v3010_v63  ;;  %v327_v27 = vshrl.u32 %v3043_v23, 16  ;;  %v329_v40 = vshll.u32 %v3043_v23, 16  ;;  %v348_v6 = vrot.slane %v3043_v23, 1  ;;  %v2680_v30 = vld [vmem:[#allocation3 + $0x220] sm:$0xff]  }
  0x78   : > { %2490 = vmatprep.subr.bf16.mxu1 %v2653_v44  ;;  %2362 = vmatprep.subr.bf16.mxu0 %v2652_v37  ;;  %v2200_v37 = vcombine.low %v2945_v8, %v2967_v26  ;;  %v2688_v8 = vld [vmem:[#allocation3 + $0x230] sm:$0xff]  }
  0x79   : > { %638 = vmatprep.mubr.bf16.mxu0 %v3018_v28  ;;  %v331_v34 = vrot.slane %v329_v40, 1  ;;  %v2205_v29 = vcombine.low %v347_v56, %v348_v6  ;;  %v2687_v26 = vld [vmem:[#allocation3 + $0x1f0] sm:$0xff]   ;;  %v219_v56 = vld [vmem:[%s2885_s21 + $0x4c] sm:$0x1] }
  0x7a   : > { %v2157_v59 = vcombine.low %v218_v55, %v219_v56 }
  0x7b   : > { %2491 = vmatpush3.bf16.msra.mxu1 %v2653_v44  ;;  %2363 = vmatpush3.bf16.msra.mxu0 %v2654_v53  ;;  %v332_v38 = vor.u32 %v331_v34, %v327_v27  ;;  %v2683_v44 = vld [vmem:[#allocation3 + $0x228] sm:$0xff]   ;;  %v2691_v53 = vld [vmem:[#allocation3 + $0x238] sm:$0xff]  }
  0x7c   : > { %2492 = vmatprep.subr.bf16.mxu1 %v2659_v61  ;;  %2364 = vmatprep.subr.bf16.mxu0 %v2658_v3  ;;  %v349_v33 = vrot.slane %v2157_v59, 1  ;;  %v336_v60 = vshll.u32 %v2157_v59, 16  ;;  %v334_v63 = vshrl.u32 %v2157_v59, 16 }
  0x7d   : > { %v2204_v47 = vcombine.low %v3012_v2, %v332_v38 }
  0x7e   : > { %639 = vmatmul.mubr.bf16.gmra.mrb[12].mxu0 %v3022_v36  ;;  %v338_v2 = vrot.slane %v336_v60, 1 }
  0x7f   : > { %2493 = vmatpush3.bf16.msra.mxu1 %v2659_v61  ;;  %2365 = vmatpush3.bf16.msra.mxu0 %v2660_v42  ;;  %v2232_v61 = vcombine.low %v348_v6, %v349_v33 }
  0x80   : > { %2494 = vmatprep.subr.bf16.mxu1 %v2662_v48  ;;  %2366 = vmatprep.subr.bf16.mxu0 %v2661_v5 }
  0x81   : > { %971 = vmatprep.mubr.bf16.mxu0 %v2195_v7 }
  0x83   : > { %2495 = vmatpush3.bf16.msra.mxu1 %v2662_v48  ;;  %2367 = vmatpush3.bf16.msra.mxu0 %v2663_v10 }
  0x84   : > { %2504 = vmatprep.subr.bf16.mxu1 %v2666_v11  ;;  %2404 = vmatprep.subr.bf16.mxu0 %v2665_v12 }
  0x86   : > { %2497 = vmatmul.mubr.bf16.vlgmr.msra.gmra.mrb[0].mxu1 %v2199_v13  ;;  %972 = vmatmul.mubr.bf16.vlgmr.msra.gmra.mrb[16].mxu0 %v2194_v14 }
  0x87   : > { %2505 = vmatpush3.bf16.msra.mxu1 %v2666_v11  ;;  %2405 = vmatpush3.bf16.msra.mxu0 %v2667_v15 }
  0x88   : > { %2506 = vmatprep.subr.bf16.mxu1 %v2669_v49  ;;  %2406 = vmatprep.subr.bf16.mxu0 %v2668_v0 }
  0x89   : > { %979 = vmatprep.mubr.bf16.mxu0 %v2198_v16  ;;  %2500 = vmatprep.mubr.bf16.mxu1 %v2202_v17 }
  0x8b   : > { %2507 = vmatpush3.bf16.msra.mxu1 %v2669_v49  ;;  %2407 = vmatpush3.bf16.msra.mxu0 %v2670_v46 }
  0x8c   : > { %2508 = vmatprep.subr.bf16.mxu1 %v2673_v50  ;;  %2408 = vmatprep.subr.bf16.mxu0 %v2672_v25 }
  0x8e   : > { %980 = vmatmul.mubr.bf16.gmra.mrb[20].mxu0 %v2197_v18  ;;  %2501 = vmatmul.mubr.bf16.gmra.mrb[4].mxu1 %v2205_v29 }
  0x8f   : > { %2509 = vmatpush3.bf16.msra.mxu1 %v2673_v50  ;;  %2409 = vmatpush3.bf16.msra.mxu0 %v2674_v32 }
  0x90   : > { %2510 = vmatprep.subr.bf16.mxu1 %v2676_v1  ;;  %2410 = vmatprep.subr.bf16.mxu0 %v2675_v21 }
  0x91   : > { %987 = vmatprep.mubr.bf16.mxu0 %v2201_v22  ;;  %2520 = vmatprep.mubr.bf16.mxu1 %v2927_v57  ;;  %v2690_v57 = vld [vmem:[#allocation3 + $0x1f8] sm:$0xff]  }
  0x93   : > { %2511 = vmatpush3.bf16.msra.mxu1 %v2676_v1  ;;  %2411 = vmatpush3.bf16.msra.mxu0 %v2677_v24 }
  0x94   : > { %2512 = vmatprep.subr.bf16.mxu1 %v2680_v30  ;;  %2412 = vmatprep.subr.bf16.mxu0 %v2679_v31 }
  0x96   : > { %988 = vmatmul.mubr.bf16.gmra.mrb[24].mxu0 %v2200_v37 }
  0x97   : > { %2513 = vmatpush3.bf16.msra.mxu1 %v2680_v30  ;;  %2413 = vmatpush3.bf16.msra.mxu0 %v2681_v41 }
  0x98   : > { %2514 = vmatprep.subr.bf16.mxu1 %v2683_v44  ;;  %2414 = vmatprep.subr.bf16.mxu0 %v2682_v45 }
  0x99   : > { %995 = vmatprep.mubr.bf16.mxu0 %v2204_v47 }
  0x9b   : > { %2515 = vmatpush3.bf16.msra.mxu1 %v2683_v44  ;;  %2415 = vmatpush3.bf16.msra.mxu0 %v2684_v39 }
  0x9c   : > { %2516 = vmatprep.subr.bf16.mxu1 %v2688_v8  ;;  %2416 = vmatprep.subr.bf16.mxu0 %v2687_v26 }
  0x9e   : > { %996 = vmatmul.mubr.bf16.gmra.mrb[28].mxu0 %v2203_v51 }
  0x9f   : > { %2517 = vmatpush3.bf16.msra.mxu1 %v2688_v8  ;;  %2417 = vmatpush3.bf16.msra.mxu0 %v2689_v52 }
  0xa0   : > { %2518 = vmatprep.subr.bf16.mxu1 %v2691_v53  ;;  %2418 = vmatprep.subr.bf16.mxu0 %v2690_v57 }
  0xa1   : > { %1326 = vmatprep.mubr.bf16.mxu0 %v2938_v4  ;;  %v339_v4 = vor.u32 %v338_v2, %v334_v63 }
  0xa3   : > { %2519 = vmatpush3.bf16.msra.mxu1 %v2691_v53  ;;  %2419 = vmatpush3.bf16.msra.mxu0 %v2692_v58  ;;  %v2231_v3 = vcombine.low %v332_v38, %v339_v4 }
  0xa6   : > { %2521 = vmatmul.mubr.bf16.vlgmr.msra.gmra.mrb[0].mxu1 %v2997_v54  ;;  %1327 = vmatmul.mubr.bf16.vlgmr.msra.gmra.mrb[32].mxu0 %v2949_v9  ;;  %v2230_v9 = vcombine.low %v3037_v19, %v218_v55 }
  0xa7   : > { %2524 = vmatprep.mubr.bf16.mxu1 %v3008_v62  ;;  %1334 = vmatprep.mubr.bf16.mxu0 %v2990_v43 }
  0xae   : > { %2525 = vmatmul.mubr.bf16.gmra.mrb[4].mxu1 %v2232_v61  ;;  %1335 = vmatmul.mubr.bf16.gmra.mrb[36].mxu0 %v2979_v35  ;;  %v2771_v35 = vmov 0  }
  0xaf   : > { %1342 = vmatprep.mubr.bf16.mxu0 %v3018_v28  ;;  %1743 = vst [vmem:[%s3071_s25] sm:$0x7] %v2771_v35  ;;  %1744 = vst [vmem:[%s3071_s25 + $0x4] sm:$0x7] %v2771_v35 }
  0xb0   : > { %1748 = vst [vmem:[%s3071_s25 + $0x14] sm:$0x7] %v2771_v35  ;;  %1745 = vst [vmem:[%s3071_s25 + $0x8] sm:$0x7] %v2771_v35 }
  0xb1   : > { %1746 = vst [vmem:[%s3071_s25 + $0xc] sm:$0x7] %v2771_v35  ;;  %1747 = vst [vmem:[%s3071_s25 + $0x10] sm:$0x7] %v2771_v35 }
  0xb6   : > { %1343 = vmatmul.mubr.bf16.gmra.mrb[40].mxu0 %v3022_v36 }
  0xb7   : > { %1350 = vmatprep.mubr.bf16.mxu0 %v2231_v3 }
  0xbe   : > { %1351 = vmatmul.mubr.bf16.gmra.mrb[44].mxu0 %v2230_v9 }
 0x139   : > { %v2316_v43 = vpop.f32.mrb[0].mxu0 }
 0x13a   : > { %v2317_v54 = vpop.f32.mrb[1].mxu0 }
 0x13b   : > { %v2318_v62 = vadd.f32 %v2317_v54, %v2316_v43  ;;  %v2319_v28 = vpop.f32.mrb[2].mxu0 }
 0x13c   : > { %v2320_v36 = vpop.f32.mrb[3].mxu0 }
 0x13d   : > { %v2321_v42 = vadd.f32 %v2320_v36, %v2319_v28  ;;  %v3087_v28 = vld [vmem:[#allocation5] ss:$0 sm:$0xff]  ;;  %v2772_v36 = vmov 1966171168  }
 0x141   : > { %v2322_v48 = vpop.f32.mrb[4].mxu0 }
 0x142   : > { %v2323_v5 = vpop.f32.mrb[5].mxu0 }
 0x143   : > { %v2324_v7 = vadd.f32 %v2323_v5, %v2322_v48  ;;  %v2325_v10 = vpop.f32.mrb[6].mxu0  ;;  %v1522_v48 = vlaneseq }
 0x144   : > { %v2326_v11 = vpop.f32.mrb[7].mxu0 }
 0x145   : > { %v2327_v12 = vadd.f32 %v2326_v11, %v2325_v10 }
 0x149   : > { %v2328_v13 = vpop.f32.mrb[8].mxu0 }
 0x14a   : > { %v2329_v14 = vpop.f32.mrb[9].mxu0 }
 0x14b   : > { %v2330_v15 = vadd.f32 %v2329_v14, %v2328_v13  ;;  %v2331_v49 = vpop.f32.mrb[10].mxu0 }
 0x14c   : > { %v2332_v0 = vpop.f32.mrb[11].mxu0 }
 0x14d   : > { %v2333_v16 = vadd.f32 %v2332_v0, %v2331_v49  ;;  %v1523_v49 = vshrl.u32 %v1522_v48, 7 }
 0x151   : > { %v2334_v17 = vpop.f32.mrb[12].mxu0 }
 0x152   : > { %v2335_v46 = vpop.f32.mrb[13].mxu0 }
 0x153   : > { %v2336_v50 = vadd.f32 %v2335_v46, %v2334_v17  ;;  %v2337_v25 = vpop.f32.mrb[14].mxu0 }
 0x154   : > { %v2338_v32 = vpop.f32.mrb[15].mxu0 }
 0x155   : > { %v2339_v18 = vadd.f32 %v2338_v32, %v2337_v25 }
 0x159   : > { %v2368_v1 = vpop.f32.mrb[16].mxu0 }
 0x15a   : > { %v2369_v19 = vpop.f32.mrb[17].mxu0 }
 0x15b   : > { %v2370_v20 = vadd.f32 %v2369_v19, %v2368_v1  ;;  %v2371_v21 = vpop.f32.mrb[18].mxu0 }
 0x15c   : > { %v2372_v22 = vpop.f32.mrb[19].mxu0 }
 0x15d   : > { %v2531_v23 = vadd.f32 %v2370_v20, %v2318_v62  ;;  %v2373_v24 = vadd.f32 %v2372_v22, %v2371_v21  ;;  %v2773_v22 = vmov 1935823168  }
 0x15f   : > { %v2537_v27 = vadd.f32 %v2373_v24, %v2321_v42  ;;  %v1520_v42 = vunpack.c.l.s4 %v2772_v36 }
 0x161   : > { %v2374_v40 = vpop.f32.mrb[20].mxu0 }
 0x162   : > { %v2375_v6 = vpop.f32.mrb[21].mxu0 }
 0x163   : > { %v2376_v30 = vadd.f32 %v2375_v6, %v2374_v40  ;;  %v2377_v31 = vpop.f32.mrb[22].mxu0 }
 0x164   : > { %v2378_v34 = vpop.f32.mrb[23].mxu0 }
 0x165   : > { %v2528_v29 = vadd.f32 %v2376_v30, %v2324_v7  ;;  %v2379_v37 = vadd.f32 %v2378_v34, %v2377_v31 }
 0x167   : > { %v2534_v38 = vadd.f32 %v2379_v37, %v2327_v12 }
 0x169   : > { %v2380_v41 = vpop.f32.mrb[24].mxu0 }
 0x16a   : > { %v2381_v44 = vpop.f32.mrb[25].mxu0 }
 0x16b   : > { %v2382_v45 = vadd.f32 %v2381_v44, %v2380_v41  ;;  %v2383_v47 = vpop.f32.mrb[26].mxu0 }
 0x16c   : > { %v2384_v39 = vpop.f32.mrb[27].mxu0 }
 0x16d   : > { %v3079_v8 = vadd.f32 %v2382_v45, %v2330_v15  ;;  %v2385_v26 = vadd.f32 %v2384_v39, %v2383_v47  ;;  %v1521_v15 = vunpack.c.0.s8 %v1520_v42 }
 0x16f   : > { %v3081_v51 = vadd.f32 %v2385_v26, %v2333_v16  ;;  %v3095_v21 = vsub.s32 %v1521_v15, %v1523_v49 }
 0x171   : > { %v2386_v52 = vpop.f32.mrb[28].mxu0 }
 0x172   : > { %v2387_v53 = vpop.f32.mrb[29].mxu0 }
 0x173   : > { %v2388_v57 = vadd.f32 %v2387_v53, %v2386_v52  ;;  %v2389_v55 = vpop.f32.mrb[30].mxu0 }
 0x174   : > { %v2390_v56 = vpop.f32.mrb[31].mxu0 }
 0x175   : > { %v3083_v58 = vadd.f32 %v2388_v57, %v2336_v50  ;;  %v2391_v59 = vadd.f32 %v2390_v56, %v2389_v55 }
 0x177   : > { %v3085_v33 = vadd.f32 %v2391_v59, %v2339_v18 }
 0x179   : > { %v2522_v60 = vpop.f32.mrb[0].mxu1  ;;  %v2420_v61 = vpop.f32.mrb[32].mxu0 }
 0x17a   : > { %v1393_v63 = vpop.f32.mrb[1].mxu1  ;;  %v2421_v2 = vpop.f32.mrb[33].mxu0 }
 0x17b   : > { %v2523_v4 = vpop.f32.mrb[2].mxu1  ;;  %v2422_v3 = vadd.f32 %v2421_v2, %v2420_v61  ;;  %v2423_v9 = vpop.f32.mrb[34].mxu0 }
 0x17c   : > { %v1396_v35 = vpop.f32.mrb[3].mxu1  ;;  %v2424_v43 = vpop.f32.mrb[35].mxu0 }
 0x17d   : > { %v2532_v54 = vadd.f32 %v2531_v23, %v2422_v3  ;;  %v2425_v62 = vadd.f32 %v2424_v43, %v2423_v9  ;;  %v1766_v23 = vunpack.c.l.s4 %v2773_v22 }
 0x17f   : > { %v2533_v5 = vadd.f32 %v2532_v54, %v1393_v63  ;;  %v2538_v7 = vadd.f32 %v2537_v27, %v2425_v62  ;;  %v1767_v41 = vunpack.c.0.s8 %v1766_v23 }
 0x181   : > { %v3089_v10 = vpop.f32.mrb[4].mxu1  ;;  %v1463_v11 = vadd.f32 %v2533_v5, %v3087_v28  ;;  %v2539_v12 = vadd.f32 %v2538_v7, %v1396_v35  ;;  %v2426_v13 = vpop.f32.mrb[36].mxu0 }
 0x182   : > { %v1409_v14 = vpop.f32.mrb[5].mxu1  ;;  %v2427_v0 = vpop.f32.mrb[37].mxu0 }
 0x183   : > { %v3092_v16 = vpop.f32.mrb[6].mxu1  ;;  %v1471_v17 = vmax.f32 %v1463_v11, 0.0  ;;  %v1464_v46 = vadd.f32 %v2539_v12, %v3087_v28  ;;  %v2428_v50 = vadd.f32 %v2427_v0, %v2426_v13  ;;  %v2429_v25 = vpop.f32.mrb[38].mxu0 }
 0x184   : > { %v1412_v32 = vpop.f32.mrb[7].mxu1  ;;  %v2430_v18 = vpop.f32.mrb[39].mxu0 }
 0x185   : > { %v1472_v1 = vmax.f32 %v1464_v46, 0.0  ;;  %v2529_v19 = vadd.f32 %v2528_v29, %v2428_v50  ;;  %v2431_v20 = vadd.f32 %v2430_v18, %v2429_v25  ;;  %v2292_v24 = vpack.c.bf16 %v1471_v17, %v1471_v17 }
 0x187   : > { %v2293_v27 = vpack.c.bf16 %v1472_v1, %v1472_v1  ;;  %v2530_v40 = vadd.f32 %v2529_v19, %v2522_v60  ;;  %v2535_v6 = vadd.f32 %v2534_v38, %v2431_v20  ;;  %v3101_v38 = vsub.s32 %v1767_v41, %v1523_v49 }
 0x189   : > { %v1511_v30 = vmax.bf16 %v2293_v27, %v2292_v24  ;;  %v1465_v31 = vadd.f32 %v2530_v40, %v3087_v28  ;;  %v2536_v34 = vadd.f32 %v2535_v6, %v2523_v4  ;;  %v2432_v37 = vpop.f32.mrb[40].mxu0 }
 0x18a   : > { %v2433_v44 = vpop.f32.mrb[41].mxu0 }
 0x18b   : > { %v1525_v45 = vrot.slane %v1511_v30, %v3095_v21  ;;  %v1466_v29 = vadd.f32 %v2536_v34, %v3087_v28  ;;  %v2434_v47 = vadd.f32 %v2433_v44, %v2432_v37  ;;  %v2435_v39 = vpop.f32.mrb[42].mxu0  ;;  %v1473_v26 = vmax.f32 %v1465_v31, 0.0 }
 0x18c   : > { %v2436_v52 = vpop.f32.mrb[43].mxu0 }
 0x18d   : > { %v1526_v53 = vcombine.high %v1525_v45, %v1525_v45  ;;  %v1533_v57 = vrot.slane %v1525_v45, %v3095_v21  ;;  %v1474_v55 = vmax.f32 %v1466_v29, 0.0  ;;  %v2544_v56 = vadd.f32 %v3079_v8, %v2434_v47 }
 0x18e   : > { %v2437_v59 = vadd.f32 %v2436_v52, %v2435_v39  ;;  %v2294_v4 = vpack.c.bf16 %v1473_v26, %v1473_v26 }
 0x18f   : > { %v1540_v60 = vrot.slane %v1526_v53, %v3095_v21  ;;  %v1541_v61 = vcombine.high %v1533_v57, %v1533_v57  ;;  %v1632_v63 = vshrl.u32 %v1533_v57, 16  ;;  %v2295_v2 = vpack.c.bf16 %v1474_v55, %v1474_v55 }
 0x190   : > { %v2545_v3 = vadd.f32 %v2544_v56, %v1409_v14  ;;  %v2550_v9 = vadd.f32 %v3081_v51, %v2437_v59 }
 0x191   : > { %v1542_v35 = vcombine.high %v1540_v60, %v1540_v60  ;;  %v1637_v43 = vshrl.u32 %v1540_v60, 16  ;;  %v1642_v54 = vshrl.u32 %v1541_v61, 16  ;;  %v1727_v62 = vmax.bf16 %v1632_v63, %v1533_v57  ;;  %v2438_v36 = vpop.f32.mrb[44].mxu0 }
 0x192   : > { %v1512_v42 = vmax.bf16 %v2295_v2, %v2294_v4  ;;  %v1467_v48 = vadd.f32 %v2545_v3, %v3087_v28  ;;  %v2551_v8 = vadd.f32 %v2550_v9, %v1412_v32  ;;  %v2439_v5 = vpop.f32.mrb[45].mxu0 }
 0x193   : > { %v1647_v7 = vshrl.u32 %v1542_v35, 16  ;;  %v1728_v11 = vmax.bf16 %v1637_v43, %v1540_v60  ;;  %v1729_v12 = vmax.bf16 %v1642_v54, %v1541_v61  ;;  %v1771_v13 = vrot.slane %v1727_v62, %v3101_v38  ;;  %v3108_v14 = vpop.f32.mrb[46].mxu0 }
 0x194   : > { %v1549_v51 = vrot.slane %v1512_v42, %v3095_v21  ;;  %v1475_v15 = vmax.f32 %v1467_v48, 0.0  ;;  %v1468_v49 = vadd.f32 %v2551_v8, %v3087_v28  ;;  %v2440_v0 = vadd.f32 %v2439_v5, %v2438_v36  ;;  %v3112_v17 = vpop.f32.mrb[47].mxu0  ;;  %v2282_v36 = vld [vmem:[%s3071_s25 + $0x4] sm:$0x7] }
 0x195   : > { %v1730_v46 = vmax.bf16 %v1647_v7, %v1542_v35  ;;  %v1778_v50 = vrot.slane %v1771_v13, %v3101_v38  ;;  %v1785_v25 = vrot.slane %v1728_v11, %v3101_v38  ;;  %v1799_v32 = vrot.slane %v1729_v12, %v3101_v38 }
 0x196   : > { %v1550_v18 = vcombine.high %v1549_v51, %v1549_v51  ;;  %v1557_v1 = vrot.slane %v1549_v51, %v3095_v21  ;;  %v2296_v19 = vpack.c.bf16 %v1475_v15, %v1475_v15  ;;  %v1476_v20 = vmax.f32 %v1468_v49, 0.0 }
 0x197   : > { %v1792_v22 = vrot.slane %v1785_v25, %v3101_v38  ;;  %v1806_v23 = vrot.slane %v1799_v32, %v3101_v38  ;;  %v1813_v24 = vrot.slane %v1730_v46, %v3101_v38  ;;  %v1989_v27 = vunpack.c.l.b16 %v1778_v50 }
 0x198   : > { %v1564_v40 = vrot.slane %v1550_v18, %v3095_v21  ;;  %v1565_v6 = vcombine.high %v1557_v1, %v1557_v1  ;;  %v1652_v30 = vshrl.u32 %v1557_v1, 16  ;;  %v2297_v31 = vpack.c.bf16 %v1476_v20, %v1476_v20 }
 0x199   : > { %v1820_v34 = vrot.slane %v1813_v24, %v3101_v38  ;;  %v1990_v37 = vunpack.c.l.b16 %v1792_v22  ;;  %v1991_v41 = vunpack.c.l.b16 %v1806_v23  ;;  %v2005_v44 = vrot.slane %v1989_v27, 7 }
 0x19a   : > { %v1566_v45 = vcombine.high %v1564_v40, %v1564_v40  ;;  %v1657_v29 = vshrl.u32 %v1564_v40, 16  ;;  %v1662_v47 = vshrl.u32 %v1565_v6, 16  ;;  %v1731_v39 = vmax.bf16 %v1652_v30, %v1557_v1 }
 0x19b   : > { %v1992_v26 = vunpack.c.l.b16 %v1820_v34  ;;  %v2006_v52 = vrot.slane %v1990_v37, 6  ;;  %v2009_v53 = vrot.slane %v1991_v41, 5  ;;  %v1513_v57 = vmax.bf16 %v2297_v31, %v2296_v19 }
 0x19c   : > { %v1667_v55 = vshrl.u32 %v1566_v45, 16  ;;  %v1732_v56 = vmax.bf16 %v1657_v29, %v1564_v40  ;;  %v1733_v59 = vmax.bf16 %v1662_v47, %v1565_v6  ;;  %v1827_v60 = vrot.slane %v1731_v39, %v3101_v38 }
 0x19d   : > { %v2008_v61 = vsel %vm2007_vm0, %v2006_v52, %v2005_v44  ;;  %v2012_v63 = vrot.slane %v1992_v26, 4  ;;  %v1573_v2 = vrot.slane %v1513_v57, %v3095_v21  ;;  %v2541_v4 = vadd.f32 %v3083_v58, %v2440_v0 }
 0x19e   : > { %v2011_v3 = vsel %vm2010_vm1, %v2009_v53, %v2008_v61  ;;  %v1734_v9 = vmax.bf16 %v1667_v55, %v1566_v45  ;;  %v1834_v35 = vrot.slane %v1827_v60, %v3101_v38  ;;  %v1841_v43 = vrot.slane %v1732_v56, %v3101_v38 }
 0x19f   : > { %v2014_v54 = vsel %vm2013_vm2, %v2012_v63, %v2011_v3  ;;  %v1855_v42 = vrot.slane %v1733_v59, %v3101_v38  ;;  %v1574_v58 = vcombine.high %v1573_v2, %v1573_v2  ;;  %v1581_v48 = vrot.slane %v1573_v2, %v3095_v21 }
 0x1a0   : > { %v2036_v8 = vpack.c.b16 %v2014_v54, %v2014_v54  ;;  %v1848_v5 = vrot.slane %v1841_v43, %v3101_v38  ;;  %v1869_v7 = vrot.slane %v1734_v9, %v3101_v38  ;;  %v1993_v11 = vunpack.c.l.b16 %v1834_v35 }
 0x1a1   : > { %v1862_v12 = vrot.slane %v1855_v42, %v3101_v38  ;;  %v1588_v13 = vrot.slane %v1574_v58, %v3095_v21  ;;  %v1589_v51 = vcombine.high %v1581_v48, %v1581_v48  ;;  %v1672_v15 = vshrl.u32 %v1581_v48, 16 }
 0x1a2   : > { %v2049_v49 = vsel %vm3133_vm5, %v2036_v8, %v2282_v36  ;;  %v1876_v0 = vrot.slane %v1869_v7, %v3101_v38  ;;  %v1994_v46 = vunpack.c.l.b16 %v1848_v5  ;;  %v2015_v50 = vrot.slane %v1993_v11, 7 }
 0x1a3   : > { %2283 = vst [vmem:[%s3071_s25 + $0x4] sm:$0x7] %v2049_v49  ;;  %v1995_v25 = vunpack.c.l.b16 %v1862_v12  ;;  %v1590_v32 = vcombine.high %v1588_v13, %v1588_v13  ;;  %v1677_v18 = vshrl.u32 %v1588_v13, 16  ;;  %v1682_v1 = vshrl.u32 %v1589_v51, 16 }
 0x1a4   : > { %v1996_v19 = vunpack.c.l.b16 %v1876_v0  ;;  %v2016_v20 = vrot.slane %v1994_v46, 6  ;;  %v1735_v22 = vmax.bf16 %v1672_v15, %v1581_v48  ;;  %v2542_v23 = vadd.f32 %v2541_v4, %v3089_v10  ;;  %v2284_v10 = vld [vmem:[%s3071_s25 + $0x8] sm:$0x7]  ;;  %v2286_v48 = vld [vmem:[%s3071_s25 + $0xc] sm:$0x7] }
 0x1a5   : > { %v2018_v24 = vrot.slane %v1995_v25, 5  ;;  %v1687_v27 = vshrl.u32 %v1590_v32, 16  ;;  %v1736_v40 = vmax.bf16 %v1677_v18, %v1588_v13  ;;  %v1737_v6 = vmax.bf16 %v1682_v1, %v1589_v51 }
 0x1a6   : > { %v2017_v30 = vsel %vm2007_vm0, %v2016_v20, %v2015_v50  ;;  %v2020_v31 = vrot.slane %v1996_v19, 4  ;;  %v1883_v34 = vrot.slane %v1735_v22, %v3101_v38  ;;  %v2443_v39 = vadd.f32 %v3112_v17, %v3108_v14 }
 0x1a7   : > { %v2019_v37 = vsel %vm2010_vm1, %v2018_v24, %v2017_v30  ;;  %v1738_v41 = vmax.bf16 %v1687_v27, %v1590_v32  ;;  %v1897_v44 = vrot.slane %v1736_v40, %v3101_v38  ;;  %v1911_v45 = vrot.slane %v1737_v6, %v3101_v38 }
 0x1a8   : > { %v2021_v29 = vsel %vm2013_vm2, %v2020_v31, %v2019_v37  ;;  %v1890_v47 = vrot.slane %v1883_v34, %v3101_v38  ;;  %v1469_v56 = vadd.f32 %v2542_v23, %v3087_v28  ;;  %v2547_v59 = vadd.f32 %v3085_v33, %v2443_v39 }
 0x1a9   : > { %v2037_v26 = vpack.c.b16 %v2021_v29, %v2021_v29  ;;  %v1904_v52 = vrot.slane %v1897_v44, %v3101_v38  ;;  %v1918_v53 = vrot.slane %v1911_v45, %v3101_v38  ;;  %v1925_v57 = vrot.slane %v1738_v41, %v3101_v38 }
 0x1aa   : > { %v1997_v55 = vunpack.c.l.b16 %v1890_v47  ;;  %v2548_v17 = vadd.f32 %v2547_v59, %v3092_v16  ;;  %v1477_v35 = vmax.f32 %v1469_v56, 0.0 }
 0x1ab   : > { %v2052_v60 = vsel %vm3133_vm5, %v2037_v26, %v2284_v10  ;;  %v1932_v61 = vrot.slane %v1925_v57, %v3101_v38  ;;  %v1998_v63 = vunpack.c.l.b16 %v1904_v52  ;;  %v1999_v14 = vunpack.c.l.b16 %v1918_v53  ;;  %v2288_v26 = vld [vmem:[%s3071_s25 + $0x10] sm:$0x7] }
 0x1ac   : > { %2285 = vst [vmem:[%s3071_s25 + $0x8] sm:$0x7] %v2052_v60  ;;  %v2022_v4 = vrot.slane %v1997_v55, 7  ;;  %v1470_v43 = vadd.f32 %v2548_v17, %v3087_v28  ;;  %v2298_v5 = vpack.c.bf16 %v1477_v35, %v1477_v35 }
 0x1ad   : > { %v2000_v2 = vunpack.c.l.b16 %v1932_v61  ;;  %v2023_v3 = vrot.slane %v1998_v63, 6  ;;  %v2025_v9 = vrot.slane %v1999_v14, 5 }
 0x1ae   : > { %v1478_v42 = vmax.f32 %v1470_v43, 0.0 }
 0x1af   : > { %v2024_v33 = vsel %vm2007_vm0, %v2023_v3, %v2022_v4  ;;  %v2027_v54 = vrot.slane %v2000_v2, 4 }
 0x1b0   : > { %v2026_v36 = vsel %vm2010_vm1, %v2025_v9, %v2024_v33  ;;  %v2299_v16 = vpack.c.bf16 %v1478_v42, %v1478_v42 }
 0x1b1   : > { %v2028_v58 = vsel %vm2013_vm2, %v2027_v54, %v2026_v36 }
 0x1b2   : > { %v2038_v8 = vpack.c.b16 %v2028_v58, %v2028_v58  ;;  %v1514_v11 = vmax.bf16 %v2299_v16, %v2298_v5 }
 0x1b4   : > { %v2055_v7 = vsel %vm3133_vm5, %v2038_v8, %v2286_v48  ;;  %v1597_v12 = vrot.slane %v1514_v11, %v3095_v21 }
 0x1b5   : > { %2287 = vst [vmem:[%s3071_s25 + $0xc] sm:$0x7] %v2055_v7 }
 0x1b6   : > { %v1598_v28 = vcombine.high %v1597_v12, %v1597_v12  ;;  %v1605_v13 = vrot.slane %v1597_v12, %v3095_v21 }
 0x1b8   : > { %v1612_v51 = vrot.slane %v1598_v28, %v3095_v21  ;;  %v1613_v15 = vcombine.high %v1605_v13, %v1605_v13  ;;  %v1692_v49 = vshrl.u32 %v1605_v13, 16 }
 0x1ba   : > { %v1614_v0 = vcombine.high %v1612_v51, %v1612_v51  ;;  %v1697_v46 = vshrl.u32 %v1612_v51, 16  ;;  %v1702_v50 = vshrl.u32 %v1613_v15, 16  ;;  %v1739_v25 = vmax.bf16 %v1692_v49, %v1605_v13 }
 0x1bc   : > { %v1707_v32 = vshrl.u32 %v1614_v0, 16  ;;  %v1740_v18 = vmax.bf16 %v1697_v46, %v1612_v51  ;;  %v1741_v1 = vmax.bf16 %v1702_v50, %v1613_v15  ;;  %v1939_v19 = vrot.slane %v1739_v25, %v3101_v38 }
 0x1be   : > { %v1742_v20 = vmax.bf16 %v1707_v32, %v1614_v0  ;;  %v1946_v22 = vrot.slane %v1939_v19, %v3101_v38  ;;  %v1953_v23 = vrot.slane %v1740_v18, %v3101_v38  ;;  %v1967_v24 = vrot.slane %v1741_v1, %v3101_v38 }
 0x1c0   : > { %v1960_v21 = vrot.slane %v1953_v23, %v3101_v38  ;;  %v1974_v27 = vrot.slane %v1967_v24, %v3101_v38  ;;  %v1981_v40 = vrot.slane %v1742_v20, %v3101_v38  ;;  %v2001_v6 = vunpack.c.l.b16 %v1946_v22 }
 0x1c2   : > { %v1988_v30 = vrot.slane %v1981_v40, %v3101_v38  ;;  %v2002_v31 = vunpack.c.l.b16 %v1960_v21  ;;  %v2003_v34 = vunpack.c.l.b16 %v1974_v27  ;;  %v2029_v41 = vrot.slane %v2001_v6, 7 }
 0x1c4   : > { %v2004_v37 = vunpack.c.l.b16 %v1988_v30  ;;  %v2030_v44 = vrot.slane %v2002_v31, 6  ;;  %v2032_v45 = vrot.slane %v2003_v34, 5 }
 0x1c6   : > { %v2031_v29 = vsel %vm2007_vm0, %v2030_v44, %v2029_v41  ;;  %v2034_v10 = vrot.slane %v2004_v37, 4 }
 0x1c7   : > { %v2033_v47 = vsel %vm2010_vm1, %v2032_v45, %v2031_v29 }
 0x1c8   : > { %v2035_v39 = vsel %vm2013_vm2, %v2034_v10, %v2033_v47 }
 0x1c9   : > { %v2039_v52 = vpack.c.b16 %v2035_v39, %v2035_v39 }
 0x1cb   : > { %v2058_v53 = vsel %vm3133_vm5, %v2039_v52, %v2288_v26 }
 0x1cc   : > { %2289 = vst [vmem:[%s3071_s25 + $0x10] sm:$0x7] %v2058_v53 }
 0x1cd PF: > { %s15_s12 = sadd.s32 1, %s2765_s12  }
 0x1ce   : > { %p12_p9 = scmp.ge.s32.totalorder %s15_s12, 4  }
 0x1d0   :  { %14 = sbr.rel (!%p12_p9) target bundleno = 2 (0x2), region = 74 }
 0x1d7   :  { %2081 = vsyncpa [#allocation4], 1 }
 0x1d8   :  { %2083 = vsyncpa [#allocation4 + $0x1], 1 }
 0x1d9   :  { %2084 = vsyncpa [#allocation6], 1 }

// kernel: lcnet_forward.8
= control target key start
LH: loop header
LB: loop body
LE: loop exit
PB: predicated region body
PF: predicated region fallthrough
CT: control target
= control target key end

     0   :  { %s2336_s12 = smov 0   ;;  %s2952_s0 = inlined_call_operand.vmem [shape: bf16[2,6,6,128], index: 0, kind: input, shape index: {}]   ;;  %s2953_s1 = inlined_call_operand.vmem [shape: bf16[3,384,256], index: 1, kind: input, shape index: {}]   ;;  %s2954_s2 = inlined_call_operand.vmem [shape: f32[1,256], index: 2, kind: input, shape index: {}]   ;;  %s2955_s3 = inlined_call_operand.vmem [shape: bf16[2,6,6,256], index: 3, kind: output, shape index: {}]  }
   0x1 LB: > { %s1777_s13 = sadd.s32 4294967295, %s2312_s12   ;;  %p1781_p0 = scmp.ge.s32.totalorder %s2312_s12, 1  ;;  %s2312_s12 = sphi %s2336_s12, %s13_s12  }
   0x2   : > { %p137_p1 = scmp.lt.s32.totalorder %s2312_s12, 3 }
   0x4   : > { %p138_p2 = pnand %p1781_p0, %p137_p1 }
   0x5   : > { %v2084_v0 = vld [vmem:[%s2953_s1 + $0x4] ss:$8 sps:$4 sm:$0xff] (!%p138_p2)   ;;  %p161_p3 = scmp.lt.s32.totalorder (!%p138_p2), %s1777_s13, 1  ;;  %v2314_v2 = vmov (!%p138_p2), 0   ;;  %v2088_v3 = vld [vmem:[%s2953_s1] ss:$8 sps:$4 sm:$0xff] (!%p138_p2)   ;;  %v248_v23 = vlaneseq (!%p138_p2) }
   0x6   : > { %141 = sbr.rel (%p138_p2) target bundleno = 404 (0x194), region = 32  ;;  %v2086_v1 = vld [vmem:[%s2953_s1 + $0x104] ss:$8 sps:$4 sm:$0xff] (!%p138_p2)   ;;  %709 = vmatprep.mubr.bf16.mxu0 (!%p138_p2), %v2314_v2  ;;  %634 = vmatprep.subr.bf16.mxu1 (!%p138_p2), %v2084_v0  ;;  %v2089_v4 = vld [vmem:[%s2953_s1 + $0x100] ss:$8 sps:$4 sm:$0xff] (!%p138_p2)   ;;  %vm1703_vm0 = vcmask (!%p138_p2), 1042432  }
   0x7   : > { %677 = vmatprep.subr.bf16.mxu0 (!%p138_p2), %v2086_v1  ;;  %v2090_v5 = vld [vmem:[%s2953_s1 + $0x14] ss:$8 sps:$4 sm:$0xff] (!%p138_p2)   ;;  %635 = vmatpush1.bf16.msra.mxu1 (!%p138_p2), %v2088_v3  ;;  %v2094_v7 = vld [vmem:[%s2953_s1 + $0x10] ss:$8 sps:$4 sm:$0xff] (!%p138_p2)   ;;  %v2096_v9 = vld [vmem:[%s2953_s1 + $0x24] ss:$8 sps:$4 sm:$0xff] (!%p138_p2)  }
   0x8   : > { %678 = vmatpush1.bf16.msra.mxu0 (!%p138_p2), %v2089_v4  ;;  %v2092_v6 = vld [vmem:[%s2953_s1 + $0x114] ss:$8 sps:$4 sm:$0xff] (!%p138_p2)   ;;  %636 = vmatprep.subr.bf16.mxu1 (!%p138_p2), %v2090_v5  ;;  %v2095_v8 = vld [vmem:[%s2953_s1 + $0x110] ss:$8 sps:$4 sm:$0xff] (!%p138_p2)   ;;  %v2098_v10 = vld [vmem:[%s2953_s1 + $0x124] ss:$8 sps:$4 sm:$0xff] (!%p138_p2)  }
   0x9   : > { %679 = vmatprep.subr.bf16.mxu0 (!%p138_p2), %v2092_v6  ;;  %v2100_v11 = vld [vmem:[%s2953_s1 + $0x20] ss:$8 sps:$4 sm:$0xff] (!%p138_p2)   ;;  %v2102_v13 = vld [vmem:[%s2953_s1 + $0x34] ss:$8 sps:$4 sm:$0xff] (!%p138_p2)   ;;  %v2106_v15 = vld [vmem:[%s2953_s1 + $0x30] ss:$8 sps:$4 sm:$0xff] (!%p138_p2)  }
   0xa   : > { %v2101_v12 = vld [vmem:[%s2953_s1 + $0x120] ss:$8 sps:$4 sm:$0xff] (!%p138_p2)   ;;  %v2104_v14 = vld [vmem:[%s2953_s1 + $0x134] ss:$8 sps:$4 sm:$0xff] (!%p138_p2)   ;;  %v2107_v16 = vld [vmem:[%s2953_s1 + $0x130] ss:$8 sps:$4 sm:$0xff] (!%p138_p2)  }
   0xb   : > { %637 = vmatpush1.bf16.msra.mxu1 (!%p138_p2), %v2094_v7  ;;  %v2108_v17 = vld [vmem:[%s2953_s1 + $0x44] ss:$8 sps:$4 sm:$0xff] (!%p138_p2)   ;;  %v2112_v19 = vld [vmem:[%s2953_s1 + $0x40] ss:$8 sps:$4 sm:$0xff] (!%p138_p2)   ;;  %v2315_v21 = vmov (!%p138_p2), 1983009808  }
   0xc   : > { %680 = vmatpush1.bf16.msra.mxu0 (!%p138_p2), %v2095_v8  ;;  %638 = vmatprep.subr.bf16.mxu1 (!%p138_p2), %v2096_v9  ;;  %v2110_v18 = vld [vmem:[%s2953_s1 + $0x144] ss:$8 sps:$4 sm:$0xff] (!%p138_p2)   ;;  %v2113_v20 = vld [vmem:[%s2953_s1 + $0x140] ss:$8 sps:$4 sm:$0xff] (!%p138_p2)   ;;  %v246_v22 = vunpack.c.l.s4 (!%p138_p2), %v2315_v21  ;;  %v2114_v24 = vld [vmem:[%s2953_s1 + $0x54] ss:$8 sps:$4 sm:$0xff] (!%p138_p2)  }
   0xd   : > { %s2959_s13 = smov (!%p161_p3, %s1777_s13), 1  ;;  %681 = vmatprep.subr.bf16.mxu0 %v2098_v10  ;;  %v2116_v25 = vld [vmem:[%s2953_s1 + $0x154] ss:$8 sps:$4 sm:$0xff]   ;;  %v2118_v26 = vld [vmem:[%s2953_s1 + $0x50] ss:$8 sps:$4 sm:$0xff]   ;;  %v2440_v28 = vshrl.u32 %v248_v23, 7 }
   0xe   : > { %s2073_s30 = smul.u32 48, %s2959_s13  ;;  %v247_v27 = vunpack.c.0.s8 %v246_v22  ;;  %v2119_v29 = vld [vmem:[%s2953_s1 + $0x150] ss:$8 sps:$4 sm:$0xff]   ;;  %v2120_v30 = vld [vmem:[%s2953_s1 + $0x64] ss:$8 sps:$4 sm:$0xff]   ;;  %vm1706_vm2 = vcmask 1046532  }
   0xf   : > { %639 = vmatpush1.bf16.msra.mxu1 %v2100_v11  ;;  %s2072_s6 = smul.u32 24, %s2959_s13  ;;  %v2122_v31 = vld [vmem:[%s2953_s1 + $0x164] ss:$8 sps:$4 sm:$0xff]   ;;  %v2124_v32 = vld [vmem:[%s2953_s1 + $0x60] ss:$8 sps:$4 sm:$0xff]  }
  0x10   : > { %s2387_s16 = scalar_lea.vmem %s2955_s3, %s2073_s30  ;;  %682 = vmatpush1.bf16.msra.mxu0 %v2101_v12  ;;  %640 = vmatprep.subr.bf16.mxu1 %v2102_v13  ;;  %v2471_v39 = vsub.s32 %v247_v27, %v2440_v28  ;;  %v2125_v40 = vld [vmem:[%s2953_s1 + $0x160] ss:$8 sps:$4 sm:$0xff]   ;;  %v2126_v41 = vld [vmem:[%s2953_s1 + $0x74] ss:$8 sps:$4 sm:$0xff]   ;;  %v2130_v49 = vld [vmem:[%s2953_s1 + $0x70] ss:$8 sps:$4 sm:$0xff]  }
  0x11   : > { %1636 = vst [vmem:[%s2387_s16] sm:$0x77] %v2314_v2  ;;  %1641 = vst [vmem:[%s2387_s16 + $0x28] sm:$0x77] %v2314_v2  ;;  %683 = vmatprep.subr.bf16.mxu0 %v2104_v14  ;;  %s2438_s17 = scalar_lea.vmem %s2952_s0, %s2072_s6  ;;  %v2128_v44 = vld [vmem:[%s2953_s1 + $0x174] ss:$8 sps:$4 sm:$0xff]  }
  0x12   : > { %1637 = vst [vmem:[%s2387_s16 + $0x8] sm:$0x77] %v2314_v2  ;;  %1638 = vst [vmem:[%s2387_s16 + $0x10] sm:$0x77] %v2314_v2  ;;  %v2455_v33 = vld [vmem:[%s2438_s17] sm:$0x7] }
  0x13   : > { %1639 = vst [vmem:[%s2387_s16 + $0x18] sm:$0x77] %v2314_v2  ;;  %1640 = vst [vmem:[%s2387_s16 + $0x20] sm:$0x77] %v2314_v2  ;;  %641 = vmatpush1.bf16.msra.mxu1 %v2106_v15  ;;  %v2458_v34 = vld [vmem:[%s2438_s17 + $0x4] sm:$0x7]  ;;  %v1784_v37 = vcombine.low %v2455_v33, %v2455_v33 }
  0x14   : > { %684 = vmatpush1.bf16.msra.mxu0 %v2107_v16  ;;  %642 = vmatprep.subr.bf16.mxu1 %v2108_v17  ;;  %v2461_v35 = vld [vmem:[%s2438_s17 + $0x8] sm:$0x7]  ;;  %v2464_v36 = vld [vmem:[%s2438_s17 + $0xc] sm:$0x7]  ;;  %v1785_v38 = vcombine.low %v2458_v34, %v2458_v34  ;;  %v2131_v50 = vld [vmem:[%s2953_s1 + $0x170] ss:$8 sps:$4 sm:$0xff]  }
  0x15   : > { %685 = vmatprep.subr.bf16.mxu0 %v2110_v18  ;;  %v1786_v42 = vcombine.low %v2461_v35, %v2461_v35  ;;  %v1787_v43 = vcombine.low %v2464_v36, %v2464_v36  ;;  %v238_v45 = vrot.slane %v1784_v37, 1  ;;  %v2132_v53 = vld [vmem:[%s2953_s1 + $0x84] ss:$8 sps:$4 sm:$0xff]   ;;  %v197_v56 = vshrl.u32 %v1784_v37, 16  ;;  %v2138_v1 = vld [vmem:[%s2953_s1 + $0x280] ss:$8 sps:$4 sm:$0xff]  }
  0x16   : > { %v239_v46 = vrot.slane %v1785_v38, 1  ;;  %v199_v57 = vshll.u32 %v1784_v37, 16  ;;  %v2140_v59 = vld [vmem:[%s2953_s1 + $0x284] ss:$8 sps:$4 sm:$0xff]   ;;  %v204_v60 = vshrl.u32 %v1785_v38, 16  ;;  %v206_v61 = vshll.u32 %v1785_v38, 16 }
  0x17   : > { %643 = vmatpush1.bf16.msra.mxu1 %v2112_v19  ;;  %v240_v47 = vrot.slane %v1786_v42, 1  ;;  %v241_v48 = vrot.slane %v1787_v43, 1  ;;  %v258_v51 = vrot.slane %v238_v45, %v2471_v39  ;;  %v2141_v5 = vld [vmem:[%s2953_s1 + $0x80] ss:$8 sps:$4 sm:$0xff]   ;;  %v211_v7 = vshrl.u32 %v1786_v42, 16 }
  0x18   : > { %686 = vmatpush1.bf16.msra.mxu0 %v2113_v20  ;;  %644 = vmatprep.subr.bf16.mxu1 %v2114_v24  ;;  %v2494_v52 = vrot.slane %v239_v46, %v2471_v39  ;;  %v201_v63 = vrot.slane %v199_v57, 1  ;;  %v208_v3 = vrot.slane %v206_v61, 1  ;;  %v213_v8 = vshll.u32 %v1786_v42, 16  ;;  %v2142_v9 = vld [vmem:[%s2953_s1 + $0x94] ss:$8 sps:$4 sm:$0xff]  }
  0x19   : > { %687 = vmatprep.subr.bf16.mxu0 %v2116_v25  ;;  %v2500_v54 = vrot.slane %v240_v47, %v2471_v39  ;;  %v2503_v55 = vrot.slane %v241_v48, %v2471_v39  ;;  %v220_v11 = vshll.u32 %v1787_v43, 16  ;;  %v2146_v13 = vld [vmem:[%s2953_s1 + $0x294] ss:$8 sps:$4 sm:$0xff]   ;;  %v218_v15 = vshrl.u32 %v1787_v43, 16  ;;  %v2144_v17 = vld [vmem:[%s2953_s1 + $0x290] ss:$8 sps:$4 sm:$0xff]  }
  0x1a   : > { %v1791_v58 = vcombine.low %v258_v51, %v2494_v52  ;;  %v202_v6 = vor.u32 %v201_v63, %v197_v56  ;;  %v209_v10 = vor.u32 %v208_v3, %v204_v60  ;;  %v215_v14 = vrot.slane %v213_v8, 1  ;;  %v2147_v19 = vld [vmem:[%s2953_s1 + $0x90] ss:$8 sps:$4 sm:$0xff]   ;;  %v2148_v23 = vld [vmem:[%s2953_s1 + $0xa4] ss:$8 sps:$4 sm:$0xff]  }
  0x1b   : > { %645 = vmatpush1.bf16.msra.mxu1 %v2118_v26  ;;  %v1793_v62 = vcombine.low %v2500_v54, %v2503_v55  ;;  %v222_v21 = vrot.slane %v220_v11, 1  ;;  %v2152_v25 = vld [vmem:[%s2953_s1 + $0x2a4] ss:$8 sps:$4 sm:$0xff]   ;;  %v2159_v38 = vld [vmem:[%s2953_s1 + $0xb0] ss:$8 sps:$4 sm:$0xff]   ;;  %v1891_v3 = vcombine.low %v2494_v52, %v2500_v54 }
  0x1c   : > { %688 = vmatpush1.bf16.msra.mxu0 %v2119_v29  ;;  %646 = vmatprep.subr.bf16.mxu1 %v2120_v30  ;;  %v373_v0 = vrot.slane %v1791_v58, %v2471_v39  ;;  %v244_v16 = vcombine.low %v2455_v33, %v202_v6  ;;  %v260_v18 = vcombine.low %v2458_v34, %v209_v10  ;;  %v2150_v29 = vld [vmem:[%s2953_s1 + $0x2a0] ss:$8 sps:$4 sm:$0xff]   ;;  %v2154_v34 = vld [vmem:[%s2953_s1 + $0xb4] ss:$8 sps:$4 sm:$0xff]   ;;  %v2160_v42 = vld [vmem:[%s2953_s1 + $0xc4] ss:$8 sps:$4 sm:$0xff]  }
  0x1d   : > { %689 = vmatprep.subr.bf16.mxu0 %v2122_v31  ;;  %v2516_v4 = vrot.slane %v1793_v62, %v2471_v39  ;;  %v216_v20 = vor.u32 %v215_v14, %v211_v7  ;;  %v223_v26 = vor.u32 %v222_v21, %v218_v15  ;;  %v2153_v30 = vld [vmem:[%s2953_s1 + $0xa0] ss:$8 sps:$4 sm:$0xff]   ;;  %v2164_v43 = vld [vmem:[%s2953_s1 + $0x2c4] ss:$8 sps:$4 sm:$0xff]   ;;  %v176_v45 = vld [vmem:[%s2438_s17 + $0x10] sm:$0x7]  ;;  %v806_v10 = vrot.slane %v1891_v3, %v2471_v39 }
  0x1e   : > { %v251_v22 = vrot.slane %v244_v16, %v2471_v39  ;;  %v2541_v24 = vrot.slane %v260_v18, %v2471_v39  ;;  %v1788_v46 = vcombine.low %v176_v45, %v176_v45  ;;  %v2165_v47 = vld [vmem:[%s2953_s1 + $0xc0] ss:$8 sps:$4 sm:$0xff]   ;;  %v2171_v58 = vld [vmem:[%s2953_s1 + $0xd0] ss:$8 sps:$4 sm:$0xff]   ;;  %v2172_v61 = vld [vmem:[%s2953_s1 + $0xe4] ss:$8 sps:$4 sm:$0xff]  }
  0x1f   : > { %647 = vmatpush1.bf16.msra.mxu1 %v2124_v32  ;;  %v390_v12 = vcombine.low %v373_v0, %v2516_v4  ;;  %v276_v27 = vcombine.low %v2461_v35, %v216_v20  ;;  %v292_v32 = vcombine.low %v2464_v36, %v223_v26  ;;  %v2158_v35 = vld [vmem:[%s2953_s1 + $0x2b4] ss:$8 sps:$4 sm:$0xff]   ;;  %v2156_v36 = vld [vmem:[%s2953_s1 + $0x2b0] ss:$8 sps:$4 sm:$0xff]   ;;  %v2176_v63 = vld [vmem:[%s2953_s1 + $0x2e4] ss:$8 sps:$4 sm:$0xff]  }
  0x20   : > { %690 = vmatpush1.bf16.msra.mxu0 %v2125_v40  ;;  %648 = vmatprep.subr.bf16.mxu1 %v2126_v41  ;;  %v1790_v33 = vcombine.low %v251_v22, %v2541_v24  ;;  %v242_v51 = vrot.slane %v1788_v46, 1  ;;  %v225_v56 = vshrl.u32 %v1788_v46, 16  ;;  %v227_v57 = vshll.u32 %v1788_v46, 16  ;;  %v2168_v60 = vld [vmem:[%s2953_s1 + $0x2d0] ss:$8 sps:$4 sm:$0xff]  }
  0x21   : > { %691 = vmatprep.subr.bf16.mxu0 %v2128_v44  ;;  %v2555_v31 = vrot.slane %v276_v27, %v2471_v39  ;;  %v2566_v37 = vrot.slane %v292_v32, %v2471_v39  ;;  %v2174_v6 = vld [vmem:[%s2953_s1 + $0x2e0] ss:$8 sps:$4 sm:$0xff]   ;;  %v2178_v7 = vld [vmem:[%s2953_s1 + $0xf4] ss:$8 sps:$4 sm:$0xff]   ;;  %v2189_v15 = vld [vmem:[%s2953_s1 + $0x304] ss:$8 sps:$4 sm:$0xff]  }
  0x22   : > { %v2577_v41 = vrot.slane %v1790_v33, %v2471_v39  ;;  %v229_v62 = vrot.slane %v227_v57, 1  ;;  %v2187_v21 = vld [vmem:[%s2953_s1 + $0x300] ss:$8 sps:$4 sm:$0xff]   ;;  %v2193_v22 = vld [vmem:[%s2953_s1 + $0x194] ss:$8 sps:$4 sm:$0xff]  }
  0x23   : > { %649 = vmatpush1.bf16.msra.mxu1 %v2130_v49  ;;  %v1792_v40 = vcombine.low %v2555_v31, %v2566_v37  ;;  %v2162_v49 = vld [vmem:[%s2953_s1 + $0x2c0] ss:$8 sps:$4 sm:$0xff]   ;;  %v1890_v52 = vcombine.low %v2541_v24, %v2555_v31  ;;  %v2194_v26 = vld [vmem:[%s2953_s1 + $0x310] ss:$8 sps:$4 sm:$0xff]   ;;  %v2199_v27 = vld [vmem:[%s2953_s1 + $0x1a4] ss:$8 sps:$4 sm:$0xff]  }
  0x24   : > { %692 = vmatpush1.bf16.msra.mxu0 %v2131_v50  ;;  %650 = vmatprep.subr.bf16.mxu1 %v2132_v53  ;;  %v2166_v50 = vld [vmem:[%s2953_s1 + $0xd4] ss:$8 sps:$4 sm:$0xff]   ;;  %v230_v0 = vor.u32 %v229_v62, %v225_v56  ;;  %v2200_v31 = vld [vmem:[%s2953_s1 + $0x320] ss:$8 sps:$4 sm:$0xff]   ;;  %v2223_v46 = vld [vmem:[%s2953_s1 + $0x1e4] ss:$8 sps:$4 sm:$0xff]  }
  0x25   : > { %1110 = vmatprep.subr.bf16.mxu0 %v2140_v59  ;;  %v2586_v44 = vrot.slane %v1792_v40, %v2471_v39  ;;  %v2170_v53 = vld [vmem:[%s2953_s1 + $0x2d4] ss:$8 sps:$4 sm:$0xff]   ;;  %v2607_v59 = vrot.slane %v242_v51, %v2471_v39  ;;  %v2656_v16 = vrot.slane %v1890_v52, %v2471_v39  ;;  %v2212_v40 = vld [vmem:[%s2953_s1 + $0x340] ss:$8 sps:$4 sm:$0xff]   ;;  %v2238_v3 = vld [vmem:[%s2953_s1 + $0x384] ss:$8 sps:$4 sm:$0xff]  }
  0x26   : > { %v724_v8 = vcombine.low %v176_v45, %v230_v0  ;;  %v2205_v32 = vld [vmem:[%s2953_s1 + $0x1b4] ss:$8 sps:$4 sm:$0xff]   ;;  %v2218_v45 = vld [vmem:[%s2953_s1 + $0x350] ss:$8 sps:$4 sm:$0xff]   ;;  %v2224_v51 = vld [vmem:[%s2953_s1 + $0x360] ss:$8 sps:$4 sm:$0xff]  }
  0x27   : > { %710 = vmatmul.mubr.bf16.vlgmr.msra.gmra.mrb[0].mxu0 %v390_v12  ;;  %651 = vmatpush1.bf16.msra.mxu1 %v2141_v5  ;;  %v389_v48 = vcombine.high %v2577_v41, %v2586_v44  ;;  %v1893_v5 = vcombine.low %v2503_v55, %v2607_v59  ;;  %v2183_v55 = vld [vmem:[%s2953_s1 + $0xf0] ss:$8 sps:$4 sm:$0xff]   ;;  %v2208_v33 = vld [vmem:[%s2953_s1 + $0x334] ss:$8 sps:$4 sm:$0xff]   ;;  %v2235_v0 = vld [vmem:[%s2953_s1 + $0x204] ss:$8 sps:$4 sm:$0xff]  }
  0x28   : > { %1111 = vmatpush1.bf16.msra.mxu0 %v2138_v1  ;;  %652 = vmatprep.subr.bf16.mxu1 %v2142_v9  ;;  %v2177_v1 = vld [vmem:[%s2953_s1 + $0xe0] ss:$8 sps:$4 sm:$0xff]   ;;  %v2182_v9 = vld [vmem:[%s2953_s1 + $0x2f4] ss:$8 sps:$4 sm:$0xff]   ;;  %v2637_v54 = vrot.slane %v724_v8, %v2471_v39  ;;  %v2180_v12 = vld [vmem:[%s2953_s1 + $0x2f0] ss:$8 sps:$4 sm:$0xff]  }
  0x29   : > { %1112 = vmatprep.subr.bf16.mxu0 %v2146_v13  ;;  %1142 = vmatprep.mubr.bf16.mxu0 %v2314_v2  ;;  %v820_v11 = vrot.slane %v1893_v5, %v2471_v39  ;;  %v2186_v13 = vld [vmem:[%s2953_s1 + $0x184] ss:$8 sps:$4 sm:$0xff]   ;;  %v2232_v56 = vld [vmem:[%s2953_s1 + $0x374] ss:$8 sps:$4 sm:$0xff]   ;;  %vm1704_vm1 = vsmask.f32 2306 }
  0x2a   : > { %666 = vmatprep.mubr.bf16.mxu1 %v389_v48  ;;  %v1892_v14 = vcombine.low %v2566_v37, %v2637_v54  ;;  %v2211_v37 = vld [vmem:[%s2953_s1 + $0x1c4] ss:$8 sps:$4 sm:$0xff]   ;;  %v177_v48 = vld [vmem:[%s2438_s17 + $0x14] sm:$0x7]  ;;  %vm1707_vm3 = vsmask.f32 6418  ;;  %vm1705_vm4 = vmand %vm1703_vm0, %vm1704_vm1 }
  0x2b   : > { %653 = vmatpush1.bf16.msra.mxu1 %v2147_v19  ;;  %v2184_v19 = vld [vmem:[%s2953_s1 + $0x180] ss:$8 sps:$4 sm:$0xff]   ;;  %v823_v20 = vcombine.low %v806_v10, %v820_v11  ;;  %v2241_v52 = vld [vmem:[%s2953_s1 + $0x214] ss:$8 sps:$4 sm:$0xff]   ;;  %v2239_v11 = vld [vmem:[%s2953_s1 + $0x210] ss:$8 sps:$4 sm:$0xff]  }
  0x2c   : > { %1113 = vmatpush1.bf16.msra.mxu0 %v2144_v17  ;;  %654 = vmatprep.subr.bf16.mxu1 %v2148_v23  ;;  %v388_v17 = vcombine.low %v2577_v41, %v2586_v44  ;;  %v2661_v18 = vrot.slane %v1892_v14, %v2471_v39  ;;  %v2196_v23 = vld [vmem:[%s2953_s1 + $0x314] ss:$8 sps:$4 sm:$0xff]   ;;  %v2247_v14 = vld [vmem:[%s2953_s1 + $0x224] ss:$8 sps:$4 sm:$0xff]   ;;  %vm1708_vm5 = vmand %vm1706_vm2, %vm1707_vm3 }
  0x2d   : > { %1114 = vmatprep.subr.bf16.mxu0 %v2152_v25  ;;  %v2191_v25 = vld [vmem:[%s2953_s1 + $0x190] ss:$8 sps:$4 sm:$0xff]   ;;  %v2217_v41 = vld [vmem:[%s2953_s1 + $0x1d4] ss:$8 sps:$4 sm:$0xff]   ;;  %vm2929_vm6 = vmor %vm1708_vm5, %vm1705_vm4 }
  0x2e   : > { %v822_v24 = vcombine.high %v2656_v16, %v2661_v18 }
  0x2f   : > { %655 = vmatpush1.bf16.msra.mxu1 %v2153_v30  ;;  %v2197_v30 = vld [vmem:[%s2953_s1 + $0x1a0] ss:$8 sps:$4 sm:$0xff]  }
  0x30   : > { %1115 = vmatpush1.bf16.msra.mxu0 %v2150_v29  ;;  %656 = vmatprep.subr.bf16.mxu1 %v2154_v34  ;;  %v2202_v29 = vld [vmem:[%s2953_s1 + $0x324] ss:$8 sps:$4 sm:$0xff]   ;;  %v2203_v34 = vld [vmem:[%s2953_s1 + $0x1b0] ss:$8 sps:$4 sm:$0xff]  }
  0x31   : > { %1116 = vmatprep.subr.bf16.mxu0 %v2158_v35  ;;  %v2206_v35 = vld [vmem:[%s2953_s1 + $0x330] ss:$8 sps:$4 sm:$0xff]  }
  0x33   : > { %657 = vmatpush1.bf16.msra.mxu1 %v2159_v38  ;;  %v2209_v38 = vld [vmem:[%s2953_s1 + $0x1c0] ss:$8 sps:$4 sm:$0xff]  }
  0x34   : > { %1117 = vmatpush1.bf16.msra.mxu0 %v2156_v36  ;;  %658 = vmatprep.subr.bf16.mxu1 %v2160_v42  ;;  %v2214_v36 = vld [vmem:[%s2953_s1 + $0x344] ss:$8 sps:$4 sm:$0xff]   ;;  %v2220_v42 = vld [vmem:[%s2953_s1 + $0x354] ss:$8 sps:$4 sm:$0xff]  }
  0x35   : > { %1118 = vmatprep.subr.bf16.mxu0 %v2164_v43  ;;  %v2215_v43 = vld [vmem:[%s2953_s1 + $0x1d0] ss:$8 sps:$4 sm:$0xff]  }
  0x37   : > { %659 = vmatpush1.bf16.msra.mxu1 %v2165_v47  ;;  %v2226_v47 = vld [vmem:[%s2953_s1 + $0x364] ss:$8 sps:$4 sm:$0xff]  }
  0x38   : > { %1119 = vmatpush1.bf16.msra.mxu0 %v2162_v49  ;;  %660 = vmatprep.subr.bf16.mxu1 %v2166_v50  ;;  %v2221_v49 = vld [vmem:[%s2953_s1 + $0x1e0] ss:$8 sps:$4 sm:$0xff]   ;;  %v1789_v50 = vcombine.low %v177_v48, %v177_v48 }
  0x39   : > { %1120 = vmatprep.subr.bf16.mxu0 %v2170_v53  ;;  %v2229_v53 = vld [vmem:[%s2953_s1 + $0x1f4] ss:$8 sps:$4 sm:$0xff]  }
  0x3a   : > { %v232_v57 = vshrl.u32 %v1789_v50, 16 }
  0x3b   : > { %661 = vmatpush1.bf16.msra.mxu1 %v2171_v58  ;;  %v234_v58 = vshll.u32 %v1789_v50, 16 }
  0x3c   : > { %1121 = vmatpush1.bf16.msra.mxu0 %v2168_v60  ;;  %662 = vmatprep.subr.bf16.mxu1 %v2172_v61  ;;  %v243_v60 = vrot.slane %v1789_v50, 1  ;;  %v2227_v61 = vld [vmem:[%s2953_s1 + $0x1f0] ss:$8 sps:$4 sm:$0xff]   ;;  %v2296_v50 = vld [vmem:[%s2953_s1 + $0x444] ss:$8 sps:$4 sm:$0xff]  }
  0x3d   : > { %1122 = vmatprep.subr.bf16.mxu0 %v2176_v63  ;;  %v236_v62 = vrot.slane %v234_v58, 1  ;;  %v2230_v63 = vld [vmem:[%s2953_s1 + $0x370] ss:$8 sps:$4 sm:$0xff]   ;;  %v2300_v58 = vld [vmem:[%s2953_s1 + $0x460] ss:$8 sps:$4 sm:$0xff]  }
  0x3f   : > { %663 = vmatpush1.bf16.msra.mxu1 %v2177_v1  ;;  %v2760_v1 = vrot.slane %v243_v60, %v2471_v39  ;;  %v237_v5 = vor.u32 %v236_v62, %v232_v57  ;;  %v2302_v57 = vld [vmem:[%s2953_s1 + $0x464] ss:$8 sps:$4 sm:$0xff]   ;;  %v2305_v60 = vld [vmem:[%s2953_s1 + $0x474] ss:$8 sps:$4 sm:$0xff]   ;;  %v2303_v62 = vld [vmem:[%s2953_s1 + $0x470] ss:$8 sps:$4 sm:$0xff]  }
  0x40   : > { %1123 = vmatpush1.bf16.msra.mxu0 %v2174_v6  ;;  %664 = vmatprep.subr.bf16.mxu1 %v2178_v7  ;;  %v2233_v7 = vld [vmem:[%s2953_s1 + $0x200] ss:$8 sps:$4 sm:$0xff]  }
  0x41   : > { %1124 = vmatprep.subr.bf16.mxu0 %v2182_v9  ;;  %v1991_v6 = vcombine.low %v2607_v59, %v2760_v1  ;;  %v1165_v8 = vcombine.low %v177_v48, %v237_v5  ;;  %v2236_v9 = vld [vmem:[%s2953_s1 + $0x380] ss:$8 sps:$4 sm:$0xff]   ;;  %v2285_v48 = vld [vmem:[%s2953_s1 + $0x410] ss:$8 sps:$4 sm:$0xff]  }
  0x43   : > { %665 = vmatpush1.bf16.msra.mxu1 %v2183_v55  ;;  %v2244_v55 = vld [vmem:[%s2953_s1 + $0x394] ss:$8 sps:$4 sm:$0xff]   ;;  %v1172_v10 = vrot.slane %v1165_v8, %v2471_v39 }
  0x44   : > { %1125 = vmatpush1.bf16.msra.mxu0 %v2180_v12  ;;  %1067 = vmatprep.subr.bf16.mxu1 %v2186_v13  ;;  %v2242_v13 = vld [vmem:[%s2953_s1 + $0x390] ss:$8 sps:$4 sm:$0xff]  }
  0x45   : > { %1492 = vmatprep.subr.bf16.mxu0 %v2189_v15  ;;  %v1990_v12 = vcombine.low %v2637_v54, %v1172_v10  ;;  %v2250_v15 = vld [vmem:[%s2953_s1 + $0x3a4] ss:$8 sps:$4 sm:$0xff]   ;;  %v2245_v54 = vld [vmem:[%s2953_s1 + $0x220] ss:$8 sps:$4 sm:$0xff]  }
  0x46   : > { %667 = vmatmul.mubr.bf16.vlgmr.msra.gmra.mrb[0].mxu1 %v388_v17 }
  0x47   : > { %1068 = vmatpush1.bf16.msra.mxu1 %v2184_v19  ;;  %1143 = vmatmul.mubr.bf16.vlgmr.msra.gmra.mrb[4].mxu0 %v823_v20  ;;  %v1238_v17 = vrot.slane %v1990_v12, %v2471_v39 }
  0x48   : > { %1493 = vmatpush1.bf16.msra.mxu0 %v2187_v21  ;;  %1069 = vmatprep.subr.bf16.mxu1 %v2193_v22  ;;  %v2248_v21 = vld [vmem:[%s2953_s1 + $0x3a0] ss:$8 sps:$4 sm:$0xff]   ;;  %v2253_v22 = vld [vmem:[%s2953_s1 + $0x234] ss:$8 sps:$4 sm:$0xff]  }
  0x49   : > { %1494 = vmatprep.subr.bf16.mxu0 %v2196_v23  ;;  %1099 = vmatprep.mubr.bf16.mxu1 %v822_v24  ;;  %v1247_v19 = vcombine.high %v2586_v44, %v1238_v17  ;;  %v1246_v20 = vcombine.low %v2586_v44, %v1238_v17  ;;  %v2256_v23 = vld [vmem:[%s2953_s1 + $0x3b4] ss:$8 sps:$4 sm:$0xff]   ;;  %v2251_v44 = vld [vmem:[%s2953_s1 + $0x230] ss:$8 sps:$4 sm:$0xff]  }
  0x4a   : > { %v2254_v24 = vld [vmem:[%s2953_s1 + $0x3b0] ss:$8 sps:$4 sm:$0xff]  }
  0x4b   : > { %1070 = vmatpush1.bf16.msra.mxu1 %v2191_v25  ;;  %1524 = vmatprep.mubr.bf16.mxu0 %v1247_v19  ;;  %v2259_v25 = vld [vmem:[%s2953_s1 + $0x244] ss:$8 sps:$4 sm:$0xff]   ;;  %v1598_v19 = vsub.s32 0, %v2440_v28 }
  0x4c   : > { %1495 = vmatpush1.bf16.msra.mxu0 %v2194_v26  ;;  %1071 = vmatprep.subr.bf16.mxu1 %v2199_v27  ;;  %v2262_v26 = vld [vmem:[%s2953_s1 + $0x3c4] ss:$8 sps:$4 sm:$0xff]   ;;  %v2257_v27 = vld [vmem:[%s2953_s1 + $0x240] ss:$8 sps:$4 sm:$0xff]  }
  0x4d   : > { %1496 = vmatprep.subr.bf16.mxu0 %v2202_v29  ;;  %v2260_v29 = vld [vmem:[%s2953_s1 + $0x3c0] ss:$8 sps:$4 sm:$0xff]  }
  0x4f   : > { %1072 = vmatpush1.bf16.msra.mxu1 %v2197_v30  ;;  %v2265_v30 = vld [vmem:[%s2953_s1 + $0x254] ss:$8 sps:$4 sm:$0xff]  }
  0x50   : > { %1497 = vmatpush1.bf16.msra.mxu0 %v2200_v31  ;;  %1073 = vmatprep.subr.bf16.mxu1 %v2205_v32  ;;  %v2268_v31 = vld [vmem:[%s2953_s1 + $0x3d4] ss:$8 sps:$4 sm:$0xff]   ;;  %v2263_v32 = vld [vmem:[%s2953_s1 + $0x250] ss:$8 sps:$4 sm:$0xff]  }
  0x51   : > { %1498 = vmatprep.subr.bf16.mxu0 %v2208_v33  ;;  %v2266_v33 = vld [vmem:[%s2953_s1 + $0x3d0] ss:$8 sps:$4 sm:$0xff]  }
  0x53   : > { %1074 = vmatpush1.bf16.msra.mxu1 %v2203_v34  ;;  %v2271_v34 = vld [vmem:[%s2953_s1 + $0x264] ss:$8 sps:$4 sm:$0xff]  }
  0x54   : > { %1499 = vmatpush1.bf16.msra.mxu0 %v2206_v35  ;;  %1075 = vmatprep.subr.bf16.mxu1 %v2211_v37  ;;  %v2274_v35 = vld [vmem:[%s2953_s1 + $0x3e4] ss:$8 sps:$4 sm:$0xff]   ;;  %v2269_v37 = vld [vmem:[%s2953_s1 + $0x260] ss:$8 sps:$4 sm:$0xff]  }
  0x55   : > { %1500 = vmatprep.subr.bf16.mxu0 %v2214_v36  ;;  %v2272_v36 = vld [vmem:[%s2953_s1 + $0x3e0] ss:$8 sps:$4 sm:$0xff]  }
  0x57   : > { %1076 = vmatpush1.bf16.msra.mxu1 %v2209_v38  ;;  %v2277_v38 = vld [vmem:[%s2953_s1 + $0x274] ss:$8 sps:$4 sm:$0xff]  }
  0x58   : > { %1501 = vmatpush1.bf16.msra.mxu0 %v2212_v40  ;;  %1077 = vmatprep.subr.bf16.mxu1 %v2217_v41  ;;  %v2280_v40 = vld [vmem:[%s2953_s1 + $0x3f4] ss:$8 sps:$4 sm:$0xff]   ;;  %v2275_v41 = vld [vmem:[%s2953_s1 + $0x270] ss:$8 sps:$4 sm:$0xff]  }
  0x59   : > { %1502 = vmatprep.subr.bf16.mxu0 %v2220_v42  ;;  %v2278_v42 = vld [vmem:[%s2953_s1 + $0x3f0] ss:$8 sps:$4 sm:$0xff]  }
  0x5b   : > { %1078 = vmatpush1.bf16.msra.mxu1 %v2215_v43  ;;  %v2284_v43 = vld [vmem:[%s2953_s1 + $0x404] ss:$8 sps:$4 sm:$0xff]  }
  0x5c   : > { %1503 = vmatpush1.bf16.msra.mxu0 %v2218_v45  ;;  %1079 = vmatprep.subr.bf16.mxu1 %v2223_v46  ;;  %v821_v45 = vcombine.low %v2656_v16, %v2661_v18  ;;  %v2282_v46 = vld [vmem:[%s2953_s1 + $0x400] ss:$8 sps:$4 sm:$0xff]   ;;  %v2290_v16 = vld [vmem:[%s2953_s1 + $0x424] ss:$8 sps:$4 sm:$0xff]  }
  0x5d   : > { %1504 = vmatprep.subr.bf16.mxu0 %v2226_v47  ;;  %v2287_v47 = vld [vmem:[%s2953_s1 + $0x414] ss:$8 sps:$4 sm:$0xff]   ;;  %v2288_v18 = vld [vmem:[%s2953_s1 + $0x420] ss:$8 sps:$4 sm:$0xff]  }
  0x5f   : > { %1080 = vmatpush1.bf16.msra.mxu1 %v2221_v49  ;;  %v2293_v49 = vld [vmem:[%s2953_s1 + $0x434] ss:$8 sps:$4 sm:$0xff]  }
  0x60   : > { %1505 = vmatpush1.bf16.msra.mxu0 %v2224_v51  ;;  %1081 = vmatprep.subr.bf16.mxu1 %v2229_v53  ;;  %v2294_v51 = vld [vmem:[%s2953_s1 + $0x440] ss:$8 sps:$4 sm:$0xff]   ;;  %v2299_v53 = vld [vmem:[%s2953_s1 + $0x454] ss:$8 sps:$4 sm:$0xff]  }
  0x61   : > { %1506 = vmatprep.subr.bf16.mxu0 %v2232_v56  ;;  %v2297_v56 = vld [vmem:[%s2953_s1 + $0x450] ss:$8 sps:$4 sm:$0xff]  }
  0x63   : > { %1082 = vmatpush1.bf16.msra.mxu1 %v2227_v61  ;;  %v1245_v61 = vrot.slane %v1991_v6, %v2471_v39 }
  0x64   : > { %1507 = vmatpush1.bf16.msra.mxu0 %v2230_v63  ;;  %1083 = vmatprep.subr.bf16.mxu1 %v2235_v0 }
  0x65   : > { %1508 = vmatprep.subr.bf16.mxu0 %v2238_v3  ;;  %v1248_v63 = vcombine.low %v2516_v4, %v1245_v61 }
  0x67   : > { %1084 = vmatpush1.bf16.msra.mxu1 %v2233_v7 }
  0x68   : > { %1509 = vmatpush1.bf16.msra.mxu0 %v2236_v9  ;;  %1085 = vmatprep.subr.bf16.mxu1 %v2241_v52 }
  0x69   : > { %1510 = vmatprep.subr.bf16.mxu0 %v2244_v55 }
  0x6b   : > { %1086 = vmatpush1.bf16.msra.mxu1 %v2239_v11 }
  0x6c   : > { %1511 = vmatpush1.bf16.msra.mxu0 %v2242_v13  ;;  %1087 = vmatprep.subr.bf16.mxu1 %v2247_v14 }
  0x6d   : > { %1512 = vmatprep.subr.bf16.mxu0 %v2250_v15 }
  0x6f   : > { %1088 = vmatpush1.bf16.msra.mxu1 %v2245_v54 }
  0x70   : > { %1513 = vmatpush1.bf16.msra.mxu0 %v2248_v21  ;;  %1089 = vmatprep.subr.bf16.mxu1 %v2253_v22  ;;  %v1602_v21 = vsub.s32 1, %v2440_v28 }
  0x71   : > { %1514 = vmatprep.subr.bf16.mxu0 %v2256_v23 }
  0x73   : > { %1090 = vmatpush1.bf16.msra.mxu1 %v2251_v44 }
  0x74   : > { %1515 = vmatpush1.bf16.msra.mxu0 %v2254_v24  ;;  %1091 = vmatprep.subr.bf16.mxu1 %v2259_v25 }
  0x75   : > { %1516 = vmatprep.subr.bf16.mxu0 %v2262_v26 }
  0x77   : > { %1092 = vmatpush1.bf16.msra.mxu1 %v2257_v27 }
  0x78   : > { %1517 = vmatpush1.bf16.msra.mxu0 %v2260_v29  ;;  %1093 = vmatprep.subr.bf16.mxu1 %v2265_v30 }
  0x79   : > { %1518 = vmatprep.subr.bf16.mxu0 %v2268_v31 }
  0x7b   : > { %1094 = vmatpush1.bf16.msra.mxu1 %v2263_v32 }
  0x7c   : > { %1519 = vmatpush1.bf16.msra.mxu0 %v2266_v33  ;;  %1095 = vmatprep.subr.bf16.mxu1 %v2271_v34 }
  0x7d   : > { %1520 = vmatprep.subr.bf16.mxu0 %v2274_v35 }
  0x7f   : > { %1096 = vmatpush1.bf16.msra.mxu1 %v2269_v37 }
  0x80   : > { %1521 = vmatpush1.bf16.msra.mxu0 %v2272_v36  ;;  %1097 = vmatprep.subr.bf16.mxu1 %v2277_v38 }
  0x81   : > { %1522 = vmatprep.subr.bf16.mxu0 %v2280_v40 }
  0x83   : > { %1098 = vmatpush1.bf16.msra.mxu1 %v2275_v41 }
  0x84   : > { %1523 = vmatpush1.bf16.msra.mxu0 %v2278_v42 }
  0x85   : > { %1535 = vmatprep.subr.bf16.mxu0 %v2284_v43 }
  0x86   : > { %1100 = vmatmul.mubr.bf16.vlgmr.msra.gmra.mrb[4].mxu1 %v821_v45 }
  0x87   : > { %1525 = vmatmul.mubr.bf16.vlgmr.msra.gmra.mrb[4].mxu0 %v1246_v20  ;;  %v1594_v20 = vld [vmem:[%s2954_s2] sm:$0x3] }
  0x88   : > { %1536 = vmatpush1.bf16.msra.mxu0 %v2282_v46  ;;  %1567 = vmatprep.mubr.bf16.mxu0 %v2314_v2  ;;  %v2291_v2 = vld [vmem:[%s2953_s1 + $0x430] ss:$8 sps:$4 sm:$0xff]   ;;  %v1599_v22 = vrot.slane %v1594_v20, %v1598_v19  ;;  %v1603_v44 = vrot.slane %v1594_v20, %v1602_v21 }
  0x89   : > { %1537 = vmatprep.subr.bf16.mxu0 %v2287_v47 }
  0x8c   : > { %1538 = vmatpush1.bf16.msra.mxu0 %v2285_v48 }
  0x8d   : > { %1539 = vmatprep.subr.bf16.mxu0 %v2290_v16 }
  0x90   : > { %1540 = vmatpush1.bf16.msra.mxu0 %v2288_v18 }
  0x91   : > { %1541 = vmatprep.subr.bf16.mxu0 %v2293_v49 }
  0x94   : > { %1542 = vmatpush1.bf16.msra.mxu0 %v2291_v2 }
  0x95   : > { %1543 = vmatprep.subr.bf16.mxu0 %v2296_v50 }
  0x98   : > { %1544 = vmatpush1.bf16.msra.mxu0 %v2294_v51 }
  0x99   : > { %1545 = vmatprep.subr.bf16.mxu0 %v2299_v53 }
  0x9c   : > { %1546 = vmatpush1.bf16.msra.mxu0 %v2297_v56  ;;  %v2042_v56 = vld [vmem:[%s2387_s16 + $0x8] sm:$0x77] }
  0x9d   : > { %1547 = vmatprep.subr.bf16.mxu0 %v2302_v57 }
  0xa0   : > { %1548 = vmatpush1.bf16.msra.mxu0 %v2300_v58 }
  0xa1   : > { %1549 = vmatprep.subr.bf16.mxu0 %v2305_v60 }
  0xa4   : > { %1550 = vmatpush1.bf16.msra.mxu0 %v2303_v62 }
  0xa7   : > { %1568 = vmatmul.mubr.bf16.vlgmr.msra.gmra.mrb[4].mxu0 %v1248_v63  ;;  %v2044_v63 = vld [vmem:[%s2387_s16 + $0x10] sm:$0x77] }
  0xfa   : > { %v711_v0 = vpop.f32.mrb[0].mxu0 }
  0xfb   : > { %v713_v3 = vpop.f32.mrb[1].mxu0 }
  0xfc   : > { %v715_v5 = vpop.f32.mrb[2].mxu0 }
  0xfd   : > { %v717_v7 = vpop.f32.mrb[3].mxu0 }
 0x119   : > { %v668_v8 = vpop.f32.mrb[0].mxu1 }
 0x11a   : > { %v712_v9 = vadd.f32 %v711_v0, %v668_v8  ;;  %v670_v52 = vpop.f32.mrb[1].mxu1 }
 0x11b   : > { %v714_v55 = vadd.f32 %v713_v3, %v670_v52  ;;  %v672_v59 = vpop.f32.mrb[2].mxu1 }
 0x11c   : > { %v716_v1 = vadd.f32 %v715_v5, %v672_v59  ;;  %v674_v6 = vpop.f32.mrb[3].mxu1 }
 0x11d   : > { %v718_v10 = vadd.f32 %v717_v7, %v674_v6 }
 0x159   : > { %v1101_v11 = vpop.f32.mrb[4].mxu1 }
 0x15a   : > { %v2053_v12 = vadd.f32 %v1101_v11, %v712_v9  ;;  %v1103_v13 = vpop.f32.mrb[5].mxu1  ;;  %v2046_v9 = vld [vmem:[%s2387_s16 + $0x18] sm:$0x77] }
 0x15b   : > { %v2056_v14 = vadd.f32 %v1103_v13, %v714_v55  ;;  %v1105_v15 = vpop.f32.mrb[6].mxu1  ;;  %v2048_v55 = vld [vmem:[%s2387_s16 + $0x20] sm:$0x77] }
 0x15c   : > { %v2059_v4 = vadd.f32 %v1105_v15, %v716_v1  ;;  %v1107_v17 = vpop.f32.mrb[7].mxu1 }
 0x15d   : > { %v2062_v54 = vadd.f32 %v1107_v17, %v718_v10 }
 0x17a   : > { %v1569_v23 = vpop.f32.mrb[4].mxu0 }
 0x17b   : > { %v2054_v24 = vadd.f32 %v2053_v12, %v1569_v23  ;;  %v1571_v25 = vpop.f32.mrb[5].mxu0 }
 0x17c   : > { %v2057_v26 = vadd.f32 %v2056_v14, %v1571_v25  ;;  %v1573_v27 = vpop.f32.mrb[6].mxu0 }
 0x17d   : > { %v1606_v29 = vadd.f32 %v2054_v24, %v1599_v22  ;;  %v2060_v30 = vadd.f32 %v2059_v4, %v1573_v27  ;;  %v1575_v31 = vpop.f32.mrb[7].mxu0 }
 0x17e   : > { %v1607_v32 = vadd.f32 %v2057_v26, %v1603_v44  ;;  %v2063_v33 = vadd.f32 %v2062_v54, %v1575_v31 }
 0x17f   : > { %v1610_v34 = vmax.f32 %v1606_v29, 0.0  ;;  %v1608_v35 = vadd.f32 %v2060_v30, %v1599_v22 }
 0x180   : > { %v1611_v37 = vmax.f32 %v1607_v32, 0.0  ;;  %v1609_v36 = vadd.f32 %v2063_v33, %v1603_v44 }
 0x181   : > { %v1612_v38 = vmax.f32 %v1608_v35, 0.0 }
 0x182   : > { %v2040_v40 = vpack.c.bf16 %v1611_v37, %v1610_v34  ;;  %v1613_v41 = vmax.f32 %v1609_v36, 0.0 }
 0x184   : > { %v1626_v28 = vrot.slane %v2040_v40, %v2471_v39  ;;  %v2041_v42 = vpack.c.bf16 %v1613_v41, %v1612_v38 }
 0x186   : > { %v1634_v43 = vcombine.high %v1626_v28, %v1626_v28  ;;  %v1648_v45 = vrot.slane %v1626_v28, %v2471_v39  ;;  %v1633_v46 = vrot.slane %v2041_v42, %v2471_v39 }
 0x188   : > { %v1655_v47 = vrot.slane %v1634_v43, %v2471_v39  ;;  %v1671_v48 = vshrl.u32 %v1648_v45, 16  ;;  %v1635_v16 = vcombine.high %v1633_v46, %v1633_v46  ;;  %v1662_v18 = vrot.slane %v1633_v46, %v2471_v39 }
 0x189   : > { %v1674_v2 = vshll.u32 %v1648_v45, 16 }
 0x18a   : > { %v1673_v49 = vrot.slane %v1671_v48, 7  ;;  %v1678_v50 = vshrl.u32 %v1655_v47, 16  ;;  %v1669_v51 = vrot.slane %v1635_v16, %v2471_v39  ;;  %v1685_v57 = vshrl.u32 %v1662_v18, 16 }
 0x18b   : > { %v1681_v61 = vshll.u32 %v1655_v47, 16  ;;  %v1688_v3 = vshll.u32 %v1662_v18, 16 }
 0x18c   : > { %v1676_v58 = vor.u32 %v1674_v2, %v1673_v49  ;;  %v1680_v60 = vrot.slane %v1678_v50, 7  ;;  %v1692_v62 = vshrl.u32 %v1669_v51, 16  ;;  %v1687_v0 = vrot.slane %v1685_v57, 7 }
 0x18d   : > { %v1695_v8 = vshll.u32 %v1669_v51, 16 }
 0x18e   : > { %v1683_v5 = vor.u32 %v1681_v61, %v1680_v60  ;;  %v1711_v39 = vsel %vm2929_vm6, %v1676_v58, %v2042_v56  ;;  %v1694_v7 = vrot.slane %v1692_v62, 7  ;;  %v1690_v52 = vor.u32 %v1688_v3, %v1687_v0 }
 0x18f   : > { %2043 = vst [vmem:[%s2387_s16 + $0x8] sm:$0x77] %v1711_v39 }
 0x190   : > { %v1714_v59 = vsel %vm2929_vm6, %v1683_v5, %v2044_v63  ;;  %v1697_v1 = vor.u32 %v1695_v8, %v1694_v7  ;;  %v1717_v6 = vsel %vm2929_vm6, %v1690_v52, %v2046_v9 }
 0x191   : > { %2045 = vst [vmem:[%s2387_s16 + $0x10] sm:$0x77] %v1714_v59  ;;  %2047 = vst [vmem:[%s2387_s16 + $0x18] sm:$0x77] %v1717_v6 }
 0x192   : > { %v1720_v10 = vsel %vm2929_vm6, %v1697_v1, %v2048_v55 }
 0x193   : > { %2049 = vst [vmem:[%s2387_s16 + $0x20] sm:$0x77] %v1720_v10 }
 0x194 PF: > { %s13_s12 = sadd.s32 1, %s2312_s12  }
 0x195   : > { %p10_p4 = scmp.ge.s32.totalorder %s13_s12, 4  }
 0x197   :  { %12 = sbr.rel (!%p10_p4) target bundleno = 1 (0x1), region = 65 }

// kernel: lcnet_forward.6
= control target key start
LH: loop header
LB: loop body
LE: loop exit
PB: predicated region body
PF: predicated region fallthrough
CT: control target
= control target key end

     0   :  { %8 = vsyncpa [#allocation4], 0  ;;  %s5550_s0 = inlined_call_operand.vmem [shape: bf16[2,18,18,4], index: 0, kind: input, shape index: {}]   ;;  %s5551_s1 = inlined_call_operand.hbm [shape: bf16[3,12,128], index: 1, kind: input, shape index: {}]   ;;  %s5552_s2 = inlined_call_operand.hbm [shape: f32[1,128], index: 2, kind: input, shape index: {}]   ;;  %s5553_s3 = inlined_call_operand.vmem [shape: bf16[2,10,10,128], index: 3, kind: output, shape index: {}]  }
   0x1   :  { %9 = vsyncpa [#allocation6], 0  ;;  %s4557_s12 = smov 0  }
   0x2 LB: > { %s4563_s13 = sadd.s32 4294967295, %s4526_s12   ;;  %p3952_p0 = scmp.ge.s32.totalorder %s4526_s12, 1  ;;  %s4526_s12 = sphi %s4557_s12, %s15_s12  }
   0x3   : > { %p114_p1 = scmp.lt.s32.totalorder %s4526_s12, 3  ;;  %s4528_s14 = smov [#allocation3]  }
   0x4   : > { %s126_s15 = sshll.u32 %s4528_s14, 4  ;;  %p5554_p3 = scmp.eq.s32.totalorder %s4563_s13, 0  ;;  %s127_s15 = int_to_ptr.vmem [resolvable:$true] %s126_s15 }
   0x5   : > { %p4567_p2 = pnand %p3952_p0, %p114_p1  ;;  %s4529_s17 = smov [#allocation5]  }
   0x6   : > { %s140_s18 = sshll.u32 %s4529_s17, 4  ;;  %s4456_s22 = scalar_lea.hbm %s5551_s1, 384  ;;  %s4580_s18 = int_to_ptr.vmem [resolvable:$true] %s140_s18 }
   0x7   : > { %s5556_s16 = scalar_select %p4567_p2, 1, 0 }
   0x8   : > { %p4388_p4 = pneg %p4567_p2  ;;  %p4457_p6 = scmp.ne.s32.totalorder %s5551_s1, %s4456_s22 }
   0x9   : > { %p4463_p10 = scmp.lt.u32.totalorder %s4456_s22, %s5551_s1 }
   0xa   : > { %p4576_p5 = pnand %p5554_p3, %p4388_p4 }
   0xc   : > { %p4458_p7 = pneg %p4576_p5 }
   0xe   : > { %p4459_p8 = pnand %p4458_p7, %p4457_p6 }
  0x10   : > { %p4460_p9 = pneg %p4459_p8 }
  0x12   : > { %p4465_p11 = pnand %p4463_p10, %p4460_p9 }
  0x14   : > { %4468 = shalt.err (!%p4465_p11)
}
  0x15   : > { %s4469_s27 = scalar_lea.vmem %s127_s15, 384  ;;  %p4477_p1 = scmp.lt.s32.totalorder %s127_s15, %s127_s15 }
  0x16   : > { %p4470_p12 = scmp.ne.s32.totalorder %s127_s15, %s4469_s27  ;;  %p4478_p4 = scmp.lt.s32.totalorder %s4469_s27, %s4469_s27 }
  0x18   : > { %p4472_p13 = pnand %p4470_p12, %p4458_p7  ;;  %p4479_p3 = por %p4478_p4, %p4477_p1 }
  0x1a   : > { %p4473_p0 = pneg %p4472_p13 }
  0x1c   : > { %p4480_p2 = pnand %p4479_p3, %p4473_p0 }
  0x1e   : > { %4483 = shalt.err (!%p4480_p2)
}
  0x1f   : > { %s4530_s28 = smov 64   ;;  %s4531_s29 = smov 4  }
  0x20   : > { %4391 = dma.hbm_to_vmem [thread:$0]  (!%p4576_p5), %s5551_s1, 384, %s127_s15, [#allocation4], %s4530_s28, %s4530_s28, %s4531_s29  }
  0x21   : > { %s4484_s7 = scalar_lea.hbm %s5552_s2, 16 }
  0x22   : > { %p4485_p6 = scmp.ne.s32.totalorder %s5552_s2, %s4484_s7  ;;  %p4491_p8 = scmp.lt.u32.totalorder %s4484_s7, %s5552_s2 }
  0x24   : > { %p4487_p2 = pnand %p4485_p6, %p4458_p7 }
  0x26   : > { %p4488_p3 = pneg %p4487_p2 }
  0x28   : > { %p4493_p9 = pnand %p4491_p8, %p4488_p3 }
  0x2a   : > { %4496 = shalt.err (!%p4493_p9)
}
  0x2b   : > { %s4497_s14 = scalar_lea.vmem %s4580_s18, 16  ;;  %s4504_s15 = scalar_lea.vmem %s4580_s18, 32 }
  0x2c   : > { %p4498_p10 = scmp.ne.s32.totalorder %s4580_s18, %s4497_s14  ;;  %p4505_p13 = scmp.lt.s32.totalorder %s4580_s18, %s4580_s18 }
  0x2d   : > { %p4506_p0 = scmp.lt.s32.totalorder %s4504_s15, %s4497_s14 }
  0x2e   : > { %p4500_p11 = pnand %p4498_p10, %p4458_p7 }
  0x2f   : > { %p4507_p1 = por %p4506_p0, %p4505_p13 }
  0x30   : > { %p4501_p12 = pneg %p4500_p11 }
  0x32   : > { %p4508_p4 = pnand %p4507_p1, %p4501_p12 }
  0x34   : > { %4511 = shalt.err (!%p4508_p4)
}
  0x35   : > { %4394 = dma.hbm_to_vmem [thread:$0]  (!%p4576_p5), %s5552_s2, 16, %s4580_s18, [#allocation6]  }
  0x36   : > { %p5558_p6 = scmp.ne.s32.totalorder %s5556_s16, 0 }
  0x37   : > { %p5559_p7 = scmp.eq.s32.totalorder (!%p5558_p6), %s4563_s13, 0 }
  0x38   : > { %161 = sbr.rel (%p5558_p6) target bundleno = 653 (0x28d), region = 32 }
  0x3f   : > { %4517 = dma.done.wait (%p5559_p7), [#allocation4], 384   ;;  %p5560_p2 = pmov %p5559_p7 }
  0x41   : > { %4519 = vsyncadd (%p5560_p2), [#allocation4], 4294966912  ;;  %p5561_p3 = pmov %p5560_p2 }
  0x42   : > { %p5562_p8 = pmov %p5560_p2 }
  0x43   : > { %4521 = dma.done.wait (%p5561_p3), [#allocation6], 16  }
  0x44   : > { %4523 = vsyncadd (%p5562_p8), [#allocation6], 4294967280  ;;  %p189_p9 = scmp.lt.s32.totalorder %s4563_s13, 1  ;;  %vm651_vm0 = vcmask 1046528   ;;  %vm398_vm1 = vsmask.f32 7424 }
  0x45   : > { %v4532_v0 = vmov 0   ;;  %s4533_s25 = smov 8   ;;  %s4534_s26 = smov 4   ;;  %vm856_vm2 = vcmask 1045504   ;;  %vm742_vm3 = vcmask 31744   ;;  %vm779_vm4 = vcmask 64512  }
  0x46   : > { %s5568_s13 = smov (!%p189_p9, %s4563_s13), 1  ;;  %vm823_vm5 = vcmask 97280   ;;  %vm3825_vm6 = vcmask 1040384   ;;  %vm3826_vm7 = vsmask.f32 256  ;;  %vm3678_vm8 = vcmask 1042434  }
  0x47   : > { %s4379_s18 = smul.u32 80, %s5568_s13  ;;  %vm3681_vm9 = vcmask 1043459   ;;  %vm3684_vm10 = vcmask 1044484   ;;  %vm3687_vm11 = vcmask 1045509   ;;  %vm3690_vm12 = vcmask 1046534  }
  0x48   : > { %s4378_s19 = smul.u32 216, %s5568_s13  ;;  %vm3693_vm13 = vcmask 1047559   ;;  %vm3819_vm14 = vcmask 1043456   ;;  %vm3820_vm15 = vsmask.f32 7938 }
  0x49   : > { %s4645_s22 = scalar_lea.vmem %s5553_s3, %s4379_s18 }
  0x4a   : > { %2632 = vst [vmem:[%s4645_s22] sm:$0xf] %v4532_v0  ;;  %2633 = vst [vmem:[%s4645_s22 + $0x4] sm:$0x1] %v4532_v0  ;;  %s4670_s24 = scalar_lea.vmem %s5550_s0, %s4378_s19 }
  0x4b   : > { %2650 = vst [vmem:[%s4645_s22 + $0x48] sm:$0xf] %v4532_v0  ;;  %2651 = vst [vmem:[%s4645_s22 + $0x4c] sm:$0x1] %v4532_v0  ;;  %v4673_v1 = vld [vmem:[%s4670_s24] sm:$0xff]   ;;  %v4677_v3 = vld [vmem:[%s4670_s24 + $0x18] sm:$0xff]  }
  0x4c   : > { %2634 = vst [vmem:[%s4645_s22 + $0x8] sm:$0xf] %v4532_v0  ;;  %2635 = vst [vmem:[%s4645_s22 + $0xc] sm:$0x1] %v4532_v0  ;;  %v652_v4 = vrot.slane %v4673_v1, 1  ;;  %v400_v6 = vshrl.u32 %v4673_v1, 16 }
  0x4d   : > { %2636 = vst [vmem:[%s4645_s22 + $0x10] sm:$0xf] %v4532_v0  ;;  %2637 = vst [vmem:[%s4645_s22 + $0x14] sm:$0x1] %v4532_v0  ;;  %v402_v7 = vshll.u32 %v4673_v1, 16  ;;  %v424_v10 = vshrl.u32 %v4677_v3, 16 }
  0x4e   : > { %2638 = vst [vmem:[%s4645_s22 + $0x18] sm:$0xf] %v4532_v0  ;;  %2639 = vst [vmem:[%s4645_s22 + $0x1c] sm:$0x1] %v4532_v0  ;;  %v426_v11 = vshll.u32 %v4677_v3, 16  ;;  %v4687_v14 = vld [vmem:[%s4670_s24 + $0xc] sm:$0xff]  }
  0x4f   : > { %2640 = vst [vmem:[%s4645_s22 + $0x20] sm:$0xf] %v4532_v0  ;;  %2641 = vst [vmem:[%s4645_s22 + $0x24] sm:$0x1] %v4532_v0  ;;  %v404_v13 = vrot.slane %v402_v7, 1  ;;  %v412_v20 = vshrl.u32 %v4687_v14, 16 }
  0x50   : > { %2642 = vst [vmem:[%s4645_s22 + $0x28] sm:$0xf] %v4532_v0  ;;  %2643 = vst [vmem:[%s4645_s22 + $0x2c] sm:$0x1] %v4532_v0  ;;  %v428_v16 = vrot.slane %v426_v11, 1  ;;  %v414_v21 = vshll.u32 %v4687_v14, 16 }
  0x51   : > { %2644 = vst [vmem:[%s4645_s22 + $0x30] sm:$0xf] %v4532_v0  ;;  %2645 = vst [vmem:[%s4645_s22 + $0x34] sm:$0x1] %v4532_v0  ;;  %v405_v19 = vor.u32 %v404_v13, %v400_v6  ;;  %v658_v22 = vrot.slane %v4677_v3, 1  ;;  %v4695_v23 = vld [vmem:[%s4670_s24 + $0x30] sm:$0xff]  }
  0x52   : > { %2646 = vst [vmem:[%s4645_s22 + $0x38] sm:$0xf] %v4532_v0  ;;  %2647 = vst [vmem:[%s4645_s22 + $0x3c] sm:$0x1] %v4532_v0  ;;  %v429_v24 = vor.u32 %v428_v16, %v424_v10  ;;  %v416_v29 = vrot.slane %v414_v21, 1  ;;  %v655_v30 = vrot.slane %v4687_v14, 1 }
  0x53   : > { %2648 = vst [vmem:[%s4645_s22 + $0x40] sm:$0xf] %v4532_v0  ;;  %2649 = vst [vmem:[%s4645_s22 + $0x44] sm:$0x1] %v4532_v0  ;;  %v4700_v32 = vld [vmem:[%s4670_s24 + $0x24] sm:$0xff]   ;;  %v448_v38 = vshrl.u32 %v4695_v23, 16 }
  0x54   : > { %v4417_v2 = vld [vmem:[%s4670_s24 + $0x8] ss:$0 sps:$4 sm:$0x11]   ;;  %v4419_v9 = vld [vmem:[%s4670_s24 + $0x20] ss:$0 sps:$4 sm:$0x11]   ;;  %v417_v37 = vor.u32 %v416_v29, %v412_v20 }
  0x55   : > { %v653_v5 = vrot.slane %v4417_v2, 1  ;;  %v407_v8 = vshll.u32 %v4417_v2, 16  ;;  %v431_v17 = vshll.u32 %v4419_v9, 16  ;;  %v4421_v18 = vld [vmem:[%s4670_s24 + $0x14] ss:$0 sps:$4 sm:$0x11]  }
  0x56   : > { %v419_v26 = vshll.u32 %v4421_v18, 16  ;;  %v659_v27 = vrot.slane %v4419_v9, 1  ;;  %v656_v31 = vrot.slane %v4421_v18, 1  ;;  %v4423_v35 = vld [vmem:[%s4670_s24 + $0x38] ss:$0 sps:$4 sm:$0x11]  }
  0x57   : > { %v654_v12 = vsel %vm651_vm0, %v652_v4, %v653_v5  ;;  %v409_v15 = vrot.slane %v407_v8, 1  ;;  %v433_v25 = vrot.slane %v431_v17, 1  ;;  %v4706_v36 = vld [vmem:[%s4670_s24 + $0x48] sm:$0xff]   ;;  %v450_v39 = vshll.u32 %v4695_v23, 16  ;;  %v4718_v48 = vld [vmem:[%s4670_s24 + $0x3c] sm:$0xff]   ;;  %v4739_v13 = vld [vmem:[%s4670_s24 + $0x54] sm:$0xff]  }
  0x58   : > { %706 = vrot.lane.b32.xlu1 %v654_v12, %s4533_s25  ;;  %v421_v34 = vrot.slane %v419_v26, 1  ;;  %v660_v40 = vsel %vm651_vm0, %v658_v22, %v659_v27  ;;  %v657_v41 = vsel %vm651_vm0, %v655_v30, %v656_v31  ;;  %v455_v42 = vshll.u32 %v4423_v35, 16  ;;  %v4425_v43 = vld [vmem:[%s4670_s24 + $0x2c] ss:$0 sps:$4 sm:$0x11]   ;;  %v4736_v8 = vld [vmem:[%s4670_s24 + $0x60] sm:$0xff]  }
  0x59   : > { %v410_v28 = vsel %vm398_vm1, %v405_v19, %v409_v15  ;;  %v434_v33 = vsel %vm398_vm1, %v429_v24, %v433_v25  ;;  %v452_v45 = vrot.slane %v450_v39, 1  ;;  %v436_v46 = vshrl.u32 %v4700_v32, 16  ;;  %v4427_v58 = vld [vmem:[%s4670_s24 + $0x50] ss:$0 sps:$4 sm:$0x11]  }
  0x5a   : > { %615 = vrot.lane.b32.xlu0 %v410_v28, %s4534_s26  ;;  %v422_v44 = vsel %vm398_vm1, %v417_v37, %v421_v34  ;;  %v438_v47 = vshll.u32 %v4700_v32, 16  ;;  %v457_v49 = vrot.slane %v455_v42, 1  ;;  %v443_v50 = vshll.u32 %v4425_v43, 16  ;;  %v4429_v2 = vld [vmem:[%s4670_s24 + $0x44] ss:$0 sps:$4 sm:$0x11]  }
  0x5b   : > { %v664_v51 = vrot.slane %v4695_v23, 1  ;;  %v665_v52 = vrot.slane %v4423_v35, 1  ;;  %v453_v53 = vor.u32 %v452_v45, %v448_v38  ;;  %v661_v55 = vrot.slane %v4700_v32, 1  ;;  %v4431_v15 = vld [vmem:[%s4670_s24 + $0x68] ss:$0 sps:$4 sm:$0x11]  }
  0x5c   : > { %619 = vrot.lane.b32.xlu1 %v434_v33, %s4534_s26  ;;  %v440_v54 = vrot.slane %v438_v47, 1  ;;  %v662_v56 = vrot.slane %v4425_v43, 1  ;;  %v445_v57 = vrot.slane %v443_v50, 1  ;;  %v472_v59 = vshrl.u32 %v4706_v36, 16  ;;  %v4748_v22 = vld [vmem:[%s4670_s24 + $0x6c] sm:$0xff]   ;;  %v4758_v35 = vld [vmem:[%s4670_s24 + $0x84] sm:$0xff]  }
  0x5d   : > { %v474_v60 = vshll.u32 %v4706_v36, 16  ;;  %v458_v61 = vsel %vm398_vm1, %v453_v53, %v457_v49  ;;  %v479_v0 = vshll.u32 %v4427_v58, 16  ;;  %v462_v4 = vshll.u32 %v4718_v48, 16  ;;  %v4433_v27 = vld [vmem:[%s4670_s24 + $0x5c] ss:$0 sps:$4 sm:$0x11]  }
  0x5e   : > { %617 = vrot.lane.b32.xlu0 %v422_v44, %s4534_s26  ;;  %v441_v62 = vor.u32 %v440_v54, %v436_v46  ;;  %v666_v6 = vsel %vm651_vm0, %v664_v51, %v665_v52  ;;  %v460_v7 = vshrl.u32 %v4718_v48, 16  ;;  %v467_v12 = vshll.u32 %v4429_v2, 16  ;;  %v4435_v39 = vld [vmem:[%s4670_s24 + $0x74] ss:$0 sps:$4 sm:$0x11]   ;;  %v4770_v51 = vld [vmem:[%s4670_s24 + $0x78] sm:$0xff]  }
  0x5f   : > { %v476_v63 = vrot.slane %v474_v60, 1  ;;  %v481_v10 = vrot.slane %v479_v0, 1  ;;  %v464_v11 = vrot.slane %v462_v4, 1  ;;  %v663_v16 = vsel %vm651_vm0, %v661_v55, %v662_v56  ;;  %v4437_v60 = vld [vmem:[%s4670_s24 + $0x80] ss:$0 sps:$4 sm:$0x11]  }
  0x60   : > { %710 = vrot.lane.b32.xlu1 %v660_v40, %s4533_s25  ;;  %v446_v5 = vsel %vm398_vm1, %v441_v62, %v445_v57  ;;  %v670_v17 = vrot.slane %v4706_v36, 1  ;;  %v469_v19 = vrot.slane %v467_v12, 1  ;;  %v671_v20 = vrot.slane %v4427_v58, 1  ;;  %v4780_v62 = vld [vmem:[%s4670_s24 + $0x90] sm:$0xff]   ;;  %v4785_v0 = vld [vmem:[%s4670_s24 + $0x9c] sm:$0xff]  }
  0x61   : > { %v477_v9 = vor.u32 %v476_v63, %v472_v59  ;;  %v465_v18 = vor.u32 %v464_v11, %v460_v7  ;;  %v498_v21 = vshll.u32 %v4736_v8, 16  ;;  %v496_v25 = vshrl.u32 %v4736_v8, 16  ;;  %v4796_v11 = vld [vmem:[%s4670_s24 + $0xa4] ss:$0 sps:$4 sm:$0x11]  }
  0x62   : > { %708 = vrot.lane.b32.xlu0 %v657_v41, %s4533_s25  ;;  %v503_v26 = vshll.u32 %v4431_v15, 16  ;;  %v486_v28 = vshll.u32 %v4739_v13, 16  ;;  %v667_v29 = vrot.slane %v4718_v48, 1  ;;  %v668_v31 = vrot.slane %v4429_v2, 1 }
  0x63   : > { %v482_v24 = vsel %vm398_vm1, %v477_v9, %v481_v10  ;;  %v500_v30 = vrot.slane %v498_v21, 1  ;;  %v484_v33 = vshrl.u32 %v4739_v13, 16  ;;  %v491_v34 = vshll.u32 %v4433_v27, 16  ;;  %v4792_v9 = vld [vmem:[%s4670_s24 + $0x98] ss:$0 sps:$4 sm:$0x11]  }
  0x64   : > { %623 = vrot.lane.b32.xlu1 %v458_v61, %s4534_s26  ;;  %v470_v37 = vsel %vm398_vm1, %v465_v18, %v469_v19  ;;  %v488_v38 = vrot.slane %v486_v28, 1  ;;  %v672_v40 = vsel %vm651_vm0, %v670_v17, %v671_v20  ;;  %v505_v42 = vrot.slane %v503_v26, 1  ;;  %v4439_v61 = vld [vmem:[%s4670_s24 + $0x8c] ss:$0 sps:$4 sm:$0x11]  }
  0x65   : > { %v501_v41 = vor.u32 %v500_v30, %v496_v25  ;;  %v510_v43 = vshll.u32 %v4748_v22, 16  ;;  %v676_v44 = vrot.slane %v4736_v8, 1  ;;  %v677_v45 = vrot.slane %v4431_v15, 1 }
  0x66   : > { %621 = vrot.lane.b32.xlu0 %v446_v5, %s4534_s26  ;;  %v493_v46 = vrot.slane %v491_v34, 1  ;;  %v673_v47 = vrot.slane %v4739_v13, 1  ;;  %v674_v49 = vrot.slane %v4433_v27, 1  ;;  %v508_v50 = vshrl.u32 %v4748_v22, 16 }
  0x67   : > { %v669_v52 = vsel %vm651_vm0, %v667_v29, %v668_v31  ;;  %v489_v53 = vor.u32 %v488_v38, %v484_v33  ;;  %v679_v54 = vrot.slane %v4748_v22, 1  ;;  %v534_v55 = vshll.u32 %v4758_v35, 16  ;;  %v4810_v33 = vld [vmem:[%s4670_s24 + $0xb4] sm:$0xff]  }
  0x68   : > { %714 = vrot.lane.b32.xlu1 %v666_v6, %s4533_s25  ;;  %v506_v56 = vsel %vm398_vm1, %v501_v41, %v505_v42  ;;  %v512_v57 = vrot.slane %v510_v43, 1  ;;  %v515_v58 = vshll.u32 %v4435_v39, 16  ;;  %v680_v59 = vrot.slane %v4435_v39, 1 }
  0x69   : > { %v522_v63 = vshll.u32 %v4770_v51, 16  ;;  %v494_v2 = vsel %vm398_vm1, %v489_v53, %v493_v46  ;;  %v532_v4 = vshrl.u32 %v4758_v35, 16  ;;  %v536_v5 = vrot.slane %v534_v55, 1  ;;  %v4449_v55 = vld [vmem:[%s4670_s24 + $0xc8] ss:$0 sps:$4 sm:$0x11]  }
  0x6a   : > { %712 = vrot.lane.b32.xlu0 %v663_v16, %s4533_s25  ;;  %v678_v6 = vsel %vm651_vm0, %v676_v44, %v677_v45  ;;  %v539_v7 = vshll.u32 %v4439_v61, 16  ;;  %v675_v10 = vsel %vm651_vm0, %v673_v47, %v674_v49  ;;  %v513_v12 = vor.u32 %v512_v57, %v508_v50  ;;  %v4818_v44 = vld [vmem:[%s4670_s24 + $0xa8] sm:$0xff]   ;;  %v4821_v45 = vld [vmem:[%s4670_s24 + $0xc0] sm:$0xff]  }
  0x6b   : > { %v517_v15 = vrot.slane %v515_v58, 1  ;;  %v681_v16 = vsel %vm651_vm0, %v679_v54, %v680_v59  ;;  %v520_v17 = vshrl.u32 %v4770_v51, 16  ;;  %v524_v18 = vrot.slane %v522_v63, 1  ;;  %v4836_v58 = vld [vmem:[%s4670_s24 + $0xcc] sm:$0xff]  }
  0x6c   : > { %627 = vrot.lane.b32.xlu1 %v482_v24, %s4534_s26  ;;  %v527_v19 = vshll.u32 %v4437_v60, 16  ;;  %v682_v20 = vrot.slane %v4770_v51, 1  ;;  %v546_v21 = vshll.u32 %v4780_v62, 16  ;;  %v537_v24 = vor.u32 %v536_v5, %v532_v4 }
  0x6d   : > { %v541_v25 = vrot.slane %v539_v7, 1  ;;  %v683_v26 = vrot.slane %v4437_v60, 1  ;;  %v558_v27 = vshll.u32 %v4785_v0, 16  ;;  %v685_v28 = vrot.slane %v4758_v35, 1 }
  0x6e   : > { %625 = vrot.lane.b32.xlu0 %v470_v37, %s4534_s26  ;;  %v544_v29 = vshrl.u32 %v4780_v62, 16  ;;  %v551_v30 = vshll.u32 %v4792_v9, 16  ;;  %v563_v31 = vshll.u32 %v4796_v11, 16  ;;  %v518_v34 = vsel %vm398_vm1, %v513_v12, %v517_v15  ;;  %v4451_v7 = vld [vmem:[%s4670_s24 + $0xd4] ss:$0 sps:$4 sm:$0x11]  }
  0x6f   : > { %v525_v37 = vor.u32 %v524_v18, %v520_v17  ;;  %v529_v38 = vrot.slane %v527_v19, 1  ;;  %v686_v39 = vrot.slane %v4439_v61, 1  ;;  %v542_v41 = vsel %vm398_vm1, %v537_v24, %v541_v25 }
  0x70   : > { %718 = vrot.lane.b32.xlu1 %v672_v40, %s4533_s25  ;;  %v548_v40 = vrot.slane %v546_v21, 1  ;;  %v556_v42 = vshrl.u32 %v4785_v0, 16  ;;  %v560_v43 = vrot.slane %v558_v27, 1  ;;  %v553_v46 = vrot.slane %v551_v30, 1  ;;  %v4454_v30 = vld [vmem:[#allocation3 + $0x10] sm:$0x3f]  }
  0x71   : > { %v565_v47 = vrot.slane %v563_v31, 1  ;;  %v691_v49 = vrot.slane %v4785_v0, 1  ;;  %v692_v50 = vrot.slane %v4796_v11, 1  ;;  %v582_v53 = vshll.u32 %v4810_v33, 16 }
  0x72   : > { %716 = vrot.lane.b32.xlu0 %v669_v52, %s4533_s25  ;;  %v4827_v52 = vld [vmem:[%s4670_s24 + $0xbc] ss:$0 sps:$4 sm:$0x11]   ;;  %v530_v54 = vsel %vm398_vm1, %v525_v37, %v529_v38  ;;  %v594_v57 = vshll.u32 %v4821_v45, 16  ;;  %v684_v59 = vsel %vm651_vm0, %v682_v20, %v683_v26  ;;  %v687_v60 = vsel %vm651_vm0, %v685_v28, %v686_v39  ;;  %v4453_v26 = vld [vmem:[#allocation3 + $0x8] sm:$0x3f]  }
  0x73   : > { %v561_v61 = vor.u32 %v560_v43, %v556_v42  ;;  %v549_v63 = vor.u32 %v548_v40, %v544_v29  ;;  %v570_v4 = vshll.u32 %v4818_v44, 16  ;;  %v700_v11 = vrot.slane %v4821_v45, 1  ;;  %4375 = vmatprep.subr.msk.bf16.mxu0 %vm856_vm2, %v4453_v26 }
  0x74   : > { %631 = vrot.lane.b32.xlu1 %v506_v56, %s4534_s26  ;;  %v592_v56 = vshrl.u32 %v4821_v45, 16  ;;  %v596_v5 = vrot.slane %v594_v57, 1  ;;  %v701_v12 = vrot.slane %v4449_v55, 1  ;;  %v703_v15 = vrot.slane %v4836_v58, 1 }
  0x75   : > { %v584_v17 = vrot.slane %v582_v53, 1  ;;  %v587_v18 = vshll.u32 %v4827_v52, 16  ;;  %v566_v21 = vsel %vm398_vm1, %v561_v61, %v565_v47  ;;  %v704_v25 = vrot.slane %v4451_v7, 1 }
  0x76   : > { %629 = vrot.lane.b32.xlu0 %v494_v2, %s4534_s26  ;;  %v4841_v2 = vld [vmem:[%s4670_s24 + $0xb0] ss:$0 sps:$4 sm:$0x11]   ;;  %v597_v19 = vor.u32 %v596_v5, %v592_v56  ;;  %v702_v24 = vsel %vm651_vm0, %v700_v11, %v701_v12  ;;  %v688_v28 = vrot.slane %v4780_v62, 1  ;;  %v689_v31 = vrot.slane %v4792_v9, 1 }
  0x77   : > { %v705_v37 = vsel %vm651_vm0, %v703_v15, %v704_v25  ;;  %v1064_v38 = vsel %vm856_vm2, %v4453_v26, 0  ;;  %v554_v39 = vsel %vm398_vm1, %v549_v63, %v553_v46  ;;  %v572_v40 = vrot.slane %v570_v4, 1 }
  0x78   : > { %722 = vrot.lane.b32.xlu1 %v678_v6, %s4533_s25  ;;  %v599_v6 = vshll.u32 %v4449_v55, 16  ;;  %4241 = vmatpush3.bf16.msra.mxu0 %v1064_v38  ;;  %v1334_v42 = vsel %vm856_vm2, %v4454_v30, 0  ;;  %v693_v9 = vsel %vm651_vm0, %v691_v49, %v692_v50  ;;  %v589_v47 = vrot.slane %v587_v18, 1 }
  0x79   : > { %v606_v53 = vshll.u32 %v4836_v58, 16  ;;  %4377 = vmatprep.subr.msk.bf16.mxu0 %vm856_vm2, %v4454_v30  ;;  %v690_v46 = vsel %vm651_vm0, %v688_v28, %v689_v31  ;;  %v697_v56 = vrot.slane %v4810_v33, 1  ;;  %v698_v49 = vrot.slane %v4827_v52, 1 }
  0x7a   : > { %720 = vrot.lane.b32.xlu0 %v675_v10, %s4533_s25  ;;  %v580_v10 = vshrl.u32 %v4810_v33, 16  ;;  %v601_v20 = vrot.slane %v599_v6, 1  ;;  %v604_v57 = vshrl.u32 %v4836_v58, 16  ;;  %v694_v63 = vrot.slane %v4818_v44, 1 }
  0x7b   : > { %v695_v4 = vrot.slane %v4841_v2, 1  ;;  %v699_v5 = vsel %vm651_vm0, %v697_v56, %v698_v49 }
  0x7c   : > { %724 = vrot.lane.b32.xlu1 %v681_v16, %s4533_s25  ;;  %v4452_v16 = vld [vmem:[#allocation3] sm:$0x3f]   ;;  %v602_v29 = vsel %vm398_vm1, %v597_v19, %v601_v20  ;;  %v585_v43 = vor.u32 %v584_v17, %v580_v10 }
  0x7d   : > { %4374 = vmatprep.subr.msk.bf16.mxu1 %vm856_vm2, %v4452_v16  ;;  %v858_v27 = vsel %vm856_vm2, %v4452_v16, 0  ;;  %v696_v10 = vsel %vm651_vm0, %v694_v63, %v695_v4  ;;  %vm5069_vm0 = vmand %vm3825_vm6, %vm3826_vm7 }
  0x7e   : > { %633 = vrot.lane.b32.xlu0 %v518_v34, %s4534_s26  ;;  %4207 = vmatpush3.bf16.msra.mxu1 %v858_v27  ;;  %v568_v34 = vshrl.u32 %v4818_v44, 16  ;;  %v590_v50 = vsel %vm398_vm1, %v585_v43, %v589_v47 }
  0x7f   : > { %4376 = vmatprep.subr.msk.bf16.mxu1 %vm856_vm2, %v4453_v26 }
  0x80   : > { %637 = vrot.lane.b32.xlu1 %v542_v41, %s4534_s26  ;;  %v575_v41 = vshll.u32 %v4841_v2, 16 }
  0x82   : > { %635 = vrot.lane.b32.xlu0 %v530_v54, %s4534_s26  ;;  %v573_v54 = vor.u32 %v572_v40, %v568_v34  ;;  %v577_v55 = vrot.slane %v575_v41, 1 }
  0x84   : > { %728 = vrot.lane.b32.xlu1 %v687_v60, %s4533_s25  ;;  %v611_v60 = vshll.u32 %v4451_v7, 16  ;;  %v578_v61 = vsel %vm398_vm1, %v573_v54, %v577_v55 }
  0x86   : > { %726 = vrot.lane.b32.xlu0 %v684_v59, %s4533_s25  ;;  %v608_v59 = vrot.slane %v606_v53, 1  ;;  %v613_v52 = vrot.slane %v611_v60, 1 }
  0x88   : > { %641 = vrot.lane.b32.xlu1 %v566_v21, %s4534_s26  ;;  %v609_v6 = vor.u32 %v608_v59, %v604_v57 }
  0x8a   : > { %639 = vrot.lane.b32.xlu0 %v554_v39, %s4534_s26  ;;  %v614_v7 = vsel %vm398_vm1, %v609_v6, %v613_v52  ;;  %vm5119_vm1 = vmand %vm3819_vm14, %vm3820_vm15 }
  0x8c   : > { %732 = vrot.lane.b32.xlu1 %v693_v9, %s4533_s25 }
  0x8e   : > { %730 = vrot.lane.b32.xlu0 %v690_v46, %s4533_s25 }
  0x90   : > { %645 = vrot.lane.b32.xlu1 %v590_v50, %s4534_s26 }
  0x92   : > { %643 = vrot.lane.b32.xlu0 %v578_v61, %s4534_s26 }
  0x94   : > { %736 = vrot.lane.b32.xlu1 %v699_v5, %s4533_s25 }
  0x96   : > { %734 = vrot.lane.b32.xlu0 %v696_v10, %s4533_s25 }
  0x98   : > { %649 = vrot.lane.b32.xlu1 %v614_v7, %s4534_s26 }
  0x9a   : > { %647 = vrot.lane.b32.xlu0 %v602_v29, %s4534_s26 }
  0x9c   : > { %740 = vrot.lane.b32.xlu1 %v705_v37, %s4533_s25 }
  0x9e   : > { %738 = vrot.lane.b32.xlu0 %v702_v24, %s4533_s25 }
  0xca   : > { %v707_v2 = vpop.permute.xlu1 %706 }
  0xcc   : > { %v616_v11 = vpop.permute.xlu0 %615 }
  0xcd   : > { %v744_v12 = vsel %vm742_vm3, %v4673_v1, %v616_v11 }
  0xce   : > { %v620_v15 = vpop.permute.xlu1 %619  ;;  %v781_v16 = vsel %vm779_vm4, %v744_v12, %v707_v2 }
  0xcf   : > { %4208 = vmatprep.mubr.msk.bf16.mxu1 %vm823_vm5, %v781_v16  ;;  %v748_v19 = vsel %vm742_vm3, %v4677_v3, %v620_v15 }
  0xd0   : > { %v618_v17 = vpop.permute.xlu0 %617 }
  0xd1   : > { %v746_v20 = vsel %vm742_vm3, %v4687_v14, %v618_v17 }
  0xd2   : > { %v711_v18 = vpop.permute.xlu1 %710 }
  0xd3   : > { %v785_v26 = vsel %vm779_vm4, %v748_v19, %v711_v18 }
  0xd4   : > { %v709_v21 = vpop.permute.xlu0 %708 }
  0xd5   : > { %v783_v24 = vsel %vm779_vm4, %v746_v20, %v709_v21 }
  0xd6   : > { %v624_v25 = vpop.permute.xlu1 %623  ;;  %4209 = vmatmul.mubr.msk.bf16.vlgmr.msra.gmra.mrb[0].mxu1 %vm823_vm5, %v783_v24  ;;  %4242 = vmatprep.mubr.msk.bf16.mxu0 %vm823_vm5, %v783_v24 }
  0xd7   : > { %4212 = vmatprep.mubr.msk.bf16.mxu1 %vm823_vm5, %v785_v26  ;;  %4309 = vmatpush3.bf16.msra.mxu1 %v1064_v38  ;;  %v752_v14 = vsel %vm742_vm3, %v4695_v23, %v624_v25 }
  0xd8   : > { %4243 = vmatmul.mubr.msk.bf16.vlgmr.msra.gmra.mrb[0].mxu0 %vm823_vm5, %v785_v26  ;;  %v622_v1 = vpop.permute.xlu0 %621 }
  0xd9   : > { %4275 = vmatpush3.bf16.msra.mxu0 %v1334_v42  ;;  %v750_v27 = vsel %vm742_vm3, %v4700_v32, %v622_v1 }
  0xda   : > { %v715_v3 = vpop.permute.xlu1 %714 }
  0xdb   : > { %v789_v31 = vsel %vm779_vm4, %v752_v14, %v715_v3 }
  0xdc   : > { %v713_v28 = vpop.permute.xlu0 %712 }
  0xdd   : > { %v787_v29 = vsel %vm779_vm4, %v750_v27, %v713_v28 }
  0xde   : > { %v628_v30 = vpop.permute.xlu1 %627  ;;  %4213 = vmatmul.mubr.msk.bf16.gmra.mrb[4].mxu1 %vm823_vm5, %v787_v29  ;;  %4246 = vmatprep.mubr.msk.bf16.mxu0 %vm823_vm5, %v787_v29 }
  0xdf   : > { %4216 = vmatprep.mubr.msk.bf16.mxu1 %vm823_vm5, %v789_v31  ;;  %v756_v23 = vsel %vm742_vm3, %v4706_v36, %v628_v30 }
  0xe0   : > { %4247 = vmatmul.mubr.msk.bf16.gmra.mrb[4].mxu0 %vm823_vm5, %v789_v31  ;;  %v626_v34 = vpop.permute.xlu0 %625 }
  0xe1   : > { %v754_v32 = vsel %vm742_vm3, %v4718_v48, %v626_v34 }
  0xe2   : > { %v719_v37 = vpop.permute.xlu1 %718 }
  0xe3   : > { %v793_v41 = vsel %vm779_vm4, %v756_v23, %v719_v37 }
  0xe4   : > { %v717_v38 = vpop.permute.xlu0 %716 }
  0xe5   : > { %v791_v39 = vsel %vm779_vm4, %v754_v32, %v717_v38  ;;  %v5009_v38 = vld [vmem:[#allocation5] ss:$0 sm:$0xff] }
  0xe6   : > { %v632_v40 = vpop.permute.xlu1 %631  ;;  %4217 = vmatmul.mubr.msk.bf16.gmra.mrb[8].mxu1 %vm823_vm5, %v791_v39  ;;  %4250 = vmatprep.mubr.msk.bf16.mxu0 %vm823_vm5, %v791_v39 }
  0xe7   : > { %4220 = vmatprep.mubr.msk.bf16.mxu1 %vm823_vm5, %v793_v41  ;;  %v760_v36 = vsel %vm742_vm3, %v4736_v8, %v632_v40 }
  0xe8   : > { %4251 = vmatmul.mubr.msk.bf16.gmra.mrb[8].mxu0 %vm823_vm5, %v793_v41  ;;  %v630_v42 = vpop.permute.xlu0 %629 }
  0xe9   : > { %v758_v48 = vsel %vm742_vm3, %v4739_v13, %v630_v42 }
  0xea   : > { %v723_v9 = vpop.permute.xlu1 %722 }
  0xeb   : > { %v797_v46 = vsel %vm779_vm4, %v760_v36, %v723_v9  ;;  %v4535_v9 = vmov 1966171168  }
  0xec   : > { %v721_v43 = vpop.permute.xlu0 %720  ;;  %v1730_v36 = vunpack.c.l.s4 %v4535_v9 }
  0xed   : > { %v795_v47 = vsel %vm779_vm4, %v758_v48, %v721_v43  ;;  %v1732_v48 = vlaneseq }
  0xee   : > { %v725_v53 = vpop.permute.xlu1 %724  ;;  %4221 = vmatmul.mubr.msk.bf16.gmra.mrb[12].mxu1 %vm823_vm5, %v795_v47  ;;  %4254 = vmatprep.mubr.msk.bf16.mxu0 %vm823_vm5, %v795_v47 }
  0xef   : > { %4224 = vmatprep.mubr.msk.bf16.mxu1 %vm823_vm5, %v797_v46 }
  0xf0   : > { %4255 = vmatmul.mubr.msk.bf16.gmra.mrb[12].mxu0 %vm823_vm5, %v797_v46  ;;  %v634_v54 = vpop.permute.xlu0 %633 }
  0xf1   : > { %4276 = vmatprep.mubr.msk.bf16.mxu0 %vm823_vm5, %v785_v26  ;;  %v762_v8 = vsel %vm742_vm3, %v4748_v22, %v634_v54 }
  0xf2   : > { %v638_v13 = vpop.permute.xlu1 %637  ;;  %v799_v55 = vsel %vm779_vm4, %v762_v8, %v725_v53 }
  0xf3   : > { %v766_v22 = vsel %vm742_vm3, %v4758_v35, %v638_v13 }
  0xf4   : > { %v636_v56 = vpop.permute.xlu0 %635 }
  0xf5   : > { %v764_v50 = vsel %vm742_vm3, %v4770_v51, %v636_v56  ;;  %v1733_v56 = vshrl.u32 %v1732_v48, 7 }
  0xf6   : > { %v729_v49 = vpop.permute.xlu1 %728  ;;  %4225 = vmatmul.mubr.msk.bf16.gmra.mrb[16].mxu1 %vm823_vm5, %v799_v55 }
  0xf7   : > { %v803_v63 = vsel %vm779_vm4, %v766_v22, %v729_v49 }
  0xf8   : > { %4277 = vmatmul.mubr.msk.bf16.vlgmr.msra.gmra.mrb[0].mxu0 %vm823_vm5, %v787_v29  ;;  %v727_v57 = vpop.permute.xlu0 %726 }
  0xf9   : > { %4280 = vmatprep.mubr.msk.bf16.mxu0 %vm823_vm5, %v789_v31  ;;  %v801_v59 = vsel %vm779_vm4, %v764_v50, %v727_v57 }
  0xfa   : > { %v642_v60 = vpop.permute.xlu1 %641  ;;  %4228 = vmatprep.mubr.msk.bf16.mxu1 %vm823_vm5, %v801_v59 }
  0xfb   : > { %v770_v35 = vsel %vm742_vm3, %v4785_v0, %v642_v60 }
  0xfc   : > { %v640_v61 = vpop.permute.xlu0 %639 }
  0xfd   : > { %v768_v51 = vsel %vm742_vm3, %v4780_v62, %v640_v61  ;;  %v4536_v61 = vmov 1935823168  }
  0xfe   : > { %4229 = vmatmul.mubr.msk.bf16.gmra.mrb[20].mxu1 %vm823_vm5, %v803_v63  ;;  %v733_v4 = vpop.permute.xlu1 %732 }
  0xff   : > { %v807_v7 = vsel %vm779_vm4, %v770_v35, %v733_v4 }
 0x100   : > { %4281 = vmatmul.mubr.msk.bf16.gmra.mrb[4].mxu0 %vm823_vm5, %v791_v39  ;;  %v731_v5 = vpop.permute.xlu0 %730 }
 0x101   : > { %4284 = vmatprep.mubr.msk.bf16.mxu0 %vm823_vm5, %v793_v41  ;;  %v805_v6 = vsel %vm779_vm4, %v768_v51, %v731_v5 }
 0x102   : > { %4232 = vmatprep.mubr.msk.bf16.mxu1 %vm823_vm5, %v805_v6  ;;  %v646_v10 = vpop.permute.xlu1 %645 }
 0x103   : > { %v774_v0 = vsel %vm742_vm3, %v4810_v33, %v646_v10 }
 0x104   : > { %v644_v52 = vpop.permute.xlu0 %643 }
 0x105   : > { %v772_v62 = vsel %vm742_vm3, %v4818_v44, %v644_v52 }
 0x106   : > { %4233 = vmatmul.mubr.msk.bf16.gmra.mrb[24].mxu1 %vm823_vm5, %v807_v7  ;;  %v737_v12 = vpop.permute.xlu1 %736 }
 0x107   : > { %v811_v15 = vsel %vm779_vm4, %v774_v0, %v737_v12 }
 0x108   : > { %4285 = vmatmul.mubr.msk.bf16.gmra.mrb[8].mxu0 %vm823_vm5, %v795_v47  ;;  %v735_v2 = vpop.permute.xlu0 %734 }
 0x109   : > { %4288 = vmatprep.mubr.msk.bf16.mxu0 %vm823_vm5, %v797_v46  ;;  %v809_v11 = vsel %vm779_vm4, %v772_v62, %v735_v2 }
 0x10a   : > { %4236 = vmatprep.mubr.msk.bf16.mxu1 %vm823_vm5, %v809_v11  ;;  %v650_v17 = vpop.permute.xlu1 %649 }
 0x10b   : > { %v778_v19 = vsel %vm742_vm3, %v4836_v58, %v650_v17 }
 0x10c   : > { %v648_v33 = vpop.permute.xlu0 %647 }
 0x10d   : > { %v776_v44 = vsel %vm742_vm3, %v4821_v45, %v648_v33 }
 0x10e   : > { %4237 = vmatmul.mubr.msk.bf16.gmra.mrb[28].mxu1 %vm823_vm5, %v811_v15  ;;  %v741_v20 = vpop.permute.xlu1 %740 }
 0x10f   : > { %4258 = vmatprep.mubr.msk.bf16.mxu1 %vm823_vm5, %v799_v55  ;;  %v815_v45 = vsel %vm779_vm4, %v778_v19, %v741_v20 }
 0x110   : > { %4289 = vmatmul.mubr.msk.bf16.gmra.mrb[12].mxu0 %vm823_vm5, %v799_v55  ;;  %v739_v16 = vpop.permute.xlu0 %738  ;;  %v1731_v55 = vunpack.c.0.s8 %v1730_v36 }
 0x111   : > { %4292 = vmatprep.mubr.msk.bf16.mxu0 %vm823_vm5, %v801_v59  ;;  %v813_v18 = vsel %vm779_vm4, %v776_v44, %v739_v16 }
 0x116   : > { %4259 = vmatmul.mubr.msk.bf16.vlgmr.msra.gmra.mrb[16].mxu1 %vm823_vm5, %v801_v59 }
 0x117   : > { %4262 = vmatprep.mubr.msk.bf16.mxu1 %vm823_vm5, %v803_v63 }
 0x118   : > { %4293 = vmatmul.mubr.msk.bf16.gmra.mrb[16].mxu0 %vm823_vm5, %v803_v63  ;;  %v2717_v63 = vunpack.c.l.s4 %v4536_v61 }
 0x119   : > { %4296 = vmatprep.mubr.msk.bf16.mxu0 %vm823_vm5, %v805_v6 }
 0x11a   : > { %v2718_v0 = vunpack.c.0.s8 %v2717_v63 }
 0x11e   : > { %4263 = vmatmul.mubr.msk.bf16.gmra.mrb[20].mxu1 %vm823_vm5, %v805_v6  ;;  %v5015_v6 = vsub.s32 %v1731_v55, %v1733_v56 }
 0x11f   : > { %4266 = vmatprep.mubr.msk.bf16.mxu1 %vm823_vm5, %v807_v7 }
 0x120   : > { %4297 = vmatmul.mubr.msk.bf16.gmra.mrb[20].mxu0 %vm823_vm5, %v807_v7 }
 0x121   : > { %4300 = vmatprep.mubr.msk.bf16.mxu0 %vm823_vm5, %v809_v11 }
 0x126   : > { %4267 = vmatmul.mubr.msk.bf16.gmra.mrb[24].mxu1 %vm823_vm5, %v809_v11 }
 0x127   : > { %4270 = vmatprep.mubr.msk.bf16.mxu1 %vm823_vm5, %v811_v15 }
 0x128   : > { %4301 = vmatmul.mubr.msk.bf16.gmra.mrb[24].mxu0 %vm823_vm5, %v811_v15 }
 0x129   : > { %4304 = vmatprep.mubr.msk.bf16.mxu0 %vm823_vm5, %v813_v18 }
 0x12e   : > { %4271 = vmatmul.mubr.msk.bf16.gmra.mrb[28].mxu1 %vm823_vm5, %v813_v18 }
 0x130   : > { %4305 = vmatmul.mubr.msk.bf16.gmra.mrb[28].mxu0 %vm823_vm5, %v815_v45 }
 0x1a9   : > { %v4210_v21 = vpop.f32.mrb[0].mxu1 }
 0x1aa   : > { %v894_v24 = vpop.f32.mrb[1].mxu1 }
 0x1ab   : > { %v4211_v25 = vpop.f32.mrb[2].mxu1 }
 0x1ac   : > { %v897_v26 = vpop.f32.mrb[3].mxu1 }
 0x1b1   : > { %v4214_v1 = vpop.f32.mrb[4].mxu1 }
 0x1b2   : > { %v910_v3 = vpop.f32.mrb[5].mxu1 }
 0x1b3   : > { %v4215_v14 = vpop.f32.mrb[6].mxu1 }
 0x1b4   : > { %v913_v27 = vpop.f32.mrb[7].mxu1 }
 0x1b9   : > { %v4218_v28 = vpop.f32.mrb[8].mxu1 }
 0x1ba   : > { %v4995_v29 = vpop.f32.mrb[9].mxu1 }
 0x1bb   : > { %v4997_v30 = vpop.f32.mrb[10].mxu1 }
 0x1bc   : > { %v4999_v58 = vpop.f32.mrb[11].mxu1 }
 0x1c1   : > { %v5001_v31 = vpop.f32.mrb[12].mxu1 }
 0x1c2   : > { %v5003_v34 = vpop.f32.mrb[13].mxu1 }
 0x1c3   : > { %v5005_v37 = vpop.f32.mrb[14].mxu1 }
 0x1c4   : > { %v5007_v23 = vpop.f32.mrb[15].mxu1 }
 0x1cb   : > { %v4278_v32 = vpop.f32.mrb[0].mxu0 }
 0x1cc   : > { %v4310_v39 = vadd.f32 %v4278_v32, %v4210_v21  ;;  %v1370_v40 = vpop.f32.mrb[1].mxu0 }
 0x1cd   : > { %v4311_v41 = vadd.f32 %v1370_v40, %v894_v24  ;;  %v4279_v42 = vpop.f32.mrb[2].mxu0 }
 0x1ce   : > { %v1634_v43 = vadd.f32 %v4310_v39, %v5009_v38  ;;  %v4312_v47 = vadd.f32 %v4279_v42, %v4211_v25  ;;  %v1373_v53 = vpop.f32.mrb[3].mxu0  ;;  %v5024_v25 = vsub.s32 %v2718_v0, %v1733_v56 }
 0x1cf   : > { %v1632_v46 = vadd.f32 %v4311_v41, %v5009_v38  ;;  %v4313_v54 = vadd.f32 %v1373_v53, %v897_v26 }
 0x1d0   : > { %v1635_v8 = vadd.f32 %v4312_v47, %v5009_v38  ;;  %v1666_v49 = vmax.f32 %v1634_v43, 0.0 }
 0x1d1   : > { %v1633_v13 = vadd.f32 %v4313_v54, %v5009_v38  ;;  %v1664_v57 = vmax.f32 %v1632_v46, 0.0 }
 0x1d2   : > { %v1667_v50 = vmax.f32 %v1635_v8, 0.0 }
 0x1d3   : > { %v1665_v59 = vmax.f32 %v1633_v13, 0.0  ;;  %v4282_v60 = vpop.f32.mrb[4].mxu0 }
 0x1d4   : > { %v1697_v22 = vpack.c.bf16 %v1667_v50, %v1666_v49  ;;  %v4314_v51 = vadd.f32 %v4282_v60, %v4214_v1  ;;  %v1386_v4 = vpop.f32.mrb[5].mxu0 }
 0x1d5   : > { %v1696_v5 = vpack.c.bf16 %v1665_v59, %v1664_v57  ;;  %v4315_v35 = vadd.f32 %v1386_v4, %v910_v3  ;;  %v4283_v52 = vpop.f32.mrb[6].mxu0 }
 0x1d6   : > { %v1638_v10 = vadd.f32 %v4314_v51, %v5009_v38  ;;  %v4316_v7 = vadd.f32 %v4283_v52, %v4215_v14  ;;  %v1389_v62 = vpop.f32.mrb[7].mxu0 }
 0x1d7   : > { %v1712_v2 = vmax.bf16 %v1697_v22, %v1696_v5  ;;  %v4317_v11 = vadd.f32 %v1389_v62, %v913_v27  ;;  %v1636_v12 = vadd.f32 %v4315_v35, %v5009_v38 }
 0x1d8   : > { %v1639_v15 = vadd.f32 %v4316_v7, %v5009_v38  ;;  %v1670_v17 = vmax.f32 %v1638_v10, 0.0 }
 0x1d9   : > { %v1728_v33 = vcombine.high %v1712_v2, %v1712_v2  ;;  %v1735_v44 = vrot.slane %v1712_v2, %v5015_v6  ;;  %v1637_v16 = vadd.f32 %v4317_v11, %v5009_v38  ;;  %v1668_v26 = vmax.f32 %v1636_v12, 0.0 }
 0x1da   : > { %v1671_v18 = vmax.f32 %v1639_v15, 0.0 }
 0x1db   : > { %v1742_v19 = vrot.slane %v1728_v33, %v5015_v6  ;;  %v1743_v20 = vcombine.high %v1735_v44, %v1735_v44  ;;  %v1751_v45 = vrot.slane %v1735_v44, %v5015_v6  ;;  %v1669_v21 = vmax.f32 %v1637_v16, 0.0  ;;  %v4286_v24 = vpop.f32.mrb[8].mxu0 }
 0x1dc   : > { %v1699_v1 = vpack.c.bf16 %v1671_v18, %v1670_v17  ;;  %v4318_v3 = vadd.f32 %v4286_v24, %v4218_v28  ;;  %v1402_v14 = vpop.f32.mrb[9].mxu0 }
 0x1dd   : > { %v1744_v27 = vcombine.high %v1742_v19, %v1742_v19  ;;  %v1758_v32 = vrot.slane %v1742_v19, %v5015_v6  ;;  %v1765_v39 = vrot.slane %v1743_v20, %v5015_v6  ;;  %v1773_v40 = vcombine.high %v1751_v45, %v1751_v45  ;;  %v5028_v41 = vpop.f32.mrb[10].mxu0 }
 0x1de   : > { %v2185_v42 = vshrl.u32 %v1751_v45, 16  ;;  %v1698_v9 = vpack.c.bf16 %v1669_v21, %v1668_v26  ;;  %v5031_v36 = vadd.f32 %v4318_v3, %v5009_v38  ;;  %v5034_v48 = vadd.f32 %v1402_v14, %v4995_v29  ;;  %v5036_v43 = vpop.f32.mrb[11].mxu0 }
 0x1df   : > { %v1772_v28 = vrot.slane %v1744_v27, %v5015_v6  ;;  %v1774_v47 = vcombine.high %v1758_v32, %v1758_v32  ;;  %v1775_v53 = vcombine.high %v1765_v39, %v1765_v39  ;;  %v2190_v46 = vshrl.u32 %v1765_v39, 16 }
 0x1e0   : > { %v2195_v54 = vshrl.u32 %v1773_v40, 16  ;;  %v2205_v8 = vshrl.u32 %v1758_v32, 16  ;;  %v2568_v13 = vmax.bf16 %v2185_v42, %v1751_v45  ;;  %v5039_v55 = vmax.bf16 %v1699_v1, %v1698_v9 }
 0x1e1   : > { %v1776_v56 = vcombine.high %v1772_v28, %v1772_v28  ;;  %v2200_v49 = vshrl.u32 %v1775_v53, 16  ;;  %v2210_v50 = vshrl.u32 %v1772_v28, 16  ;;  %v2215_v57 = vshrl.u32 %v1774_v47, 16 }
 0x1e2   : > { %v2569_v29 = vmax.bf16 %v2190_v46, %v1765_v39  ;;  %v2570_v59 = vmax.bf16 %v2195_v54, %v1773_v40  ;;  %v2572_v60 = vmax.bf16 %v2205_v8, %v1758_v32  ;;  %v2722_v22 = vrot.slane %v2568_v13, %v5024_v25 }
 0x1e3   : > { %v2220_v61 = vshrl.u32 %v1776_v56, 16  ;;  %v2571_v63 = vmax.bf16 %v2200_v49, %v1775_v53  ;;  %v2573_v51 = vmax.bf16 %v2210_v50, %v1772_v28  ;;  %v2574_v4 = vmax.bf16 %v2215_v57, %v1774_v47  ;;  %v5042_v5 = vpop.f32.mrb[12].mxu0  ;;  %v4123_v53 = vld [vmem:[%s4645_s22 + $0xc] sm:$0x1] }
 0x1e4   : > { %v2729_v35 = vrot.slane %v2722_v22, %v5024_v25  ;;  %v2736_v52 = vrot.slane %v2569_v29, %v5024_v25  ;;  %v2750_v10 = vrot.slane %v2570_v59, %v5024_v25  ;;  %v2778_v7 = vrot.slane %v2572_v60, %v5024_v25  ;;  %v5048_v62 = vpop.f32.mrb[13].mxu0 }
 0x1e5   : > { %v2575_v2 = vmax.bf16 %v2220_v61, %v1776_v56  ;;  %v2764_v11 = vrot.slane %v2571_v63, %v5024_v25  ;;  %v2792_v0 = vrot.slane %v2573_v51, %v5024_v25  ;;  %v2806_v12 = vrot.slane %v2574_v4, %v5024_v25  ;;  %v5053_v15 = vpop.f32.mrb[14].mxu0 }
 0x1e6   : > { %v2743_v33 = vrot.slane %v2736_v52, %v5024_v25  ;;  %v2757_v44 = vrot.slane %v2750_v10, %v5024_v25  ;;  %v2785_v16 = vrot.slane %v2778_v7, %v5024_v25  ;;  %v3612_v17 = vunpack.c.l.b16 %v2729_v35  ;;  %v5058_v18 = vpop.f32.mrb[15].mxu0 }
 0x1e7   : > { %v2771_v19 = vrot.slane %v2764_v11, %v5024_v25  ;;  %v2799_v20 = vrot.slane %v2792_v0, %v5024_v25  ;;  %v2813_v45 = vrot.slane %v2806_v12, %v5024_v25  ;;  %v2820_v21 = vrot.slane %v2575_v2, %v5024_v25 }
 0x1e8   : > { %v3613_v24 = vunpack.c.l.b16 %v2743_v33  ;;  %v3614_v26 = vunpack.c.l.b16 %v2757_v44  ;;  %v3616_v1 = vunpack.c.l.b16 %v2785_v16  ;;  %v3676_v3 = vrot.slane %v3612_v17, 7 }
 0x1e9   : > { %v2827_v14 = vrot.slane %v2820_v21, %v5024_v25  ;;  %v3615_v27 = vunpack.c.l.b16 %v2771_v19  ;;  %v3617_v32 = vunpack.c.l.b16 %v2799_v20  ;;  %v3618_v39 = vunpack.c.l.b16 %v2813_v45  ;;  %v5065_v40 = vpop.f32.mrb[16].mxu1  ;;  %v4121_v45 = vld [vmem:[%s4645_s22 + $0x8] sm:$0xf] }
 0x1ea   : > { %v3677_v42 = vrot.slane %v3613_v24, 6  ;;  %v3680_v9 = vrot.slane %v3614_v26, 5  ;;  %v3686_v28 = vrot.slane %v3616_v1, 3  ;;  %v1777_v46 = vcombine.high %v5039_v55, %v5039_v55  ;;  %v5076_v54 = vpop.f32.mrb[17].mxu1 }
 0x1eb   : > { %v3683_v8 = vrot.slane %v3615_v27, 4  ;;  %v3689_v13 = vrot.slane %v3617_v32, 2  ;;  %v3692_v56 = vrot.slane %v3618_v39, 1  ;;  %v4113_v49 = vcombine.low %v2827_v14, %v2827_v14  ;;  %v5078_v50 = vpop.f32.mrb[16].mxu0  ;;  %v5080_v57 = vpop.f32.mrb[18].mxu1 }
 0x1ec   : > { %v3679_v29 = vsel %vm3678_vm8, %v3677_v42, %v3676_v3  ;;  %v1784_v59 = vrot.slane %v5039_v55, %v5015_v6  ;;  %v1791_v60 = vrot.slane %v1777_v46, %v5015_v6  ;;  %v1674_v22 = vmax.f32 %v5031_v36, 0.0  ;;  %v5087_v61 = vpop.f32.mrb[17].mxu0  ;;  %v5089_v63 = vpop.f32.mrb[19].mxu1  ;;  %v4125_v36 = vld [vmem:[%s4645_s22 + $0x10] sm:$0xf] }
 0x1ed   : > { %v3682_v51 = vsel %vm3681_vm9, %v3680_v9, %v3679_v29  ;;  %v3829_v4 = vsel %vm5069_vm0, %v4113_v49, %v4123_v53  ;;  %v5096_v35 = vadd.f32 %v5034_v48, %v5009_v38  ;;  %v4320_v55 = vadd.f32 %v5028_v41, %v4997_v30  ;;  %v5100_v52 = vpop.f32.mrb[18].mxu0 }
 0x1ee   : > { %v3685_v10 = vsel %vm3684_vm10, %v3683_v8, %v3682_v51  ;;  %4124 = vst [vmem:[%s4645_s22 + $0xc] sm:$0x1] %v3829_v4  ;;  %v1792_v7 = vcombine.high %v1784_v59, %v1784_v59  ;;  %v1793_v2 = vcombine.high %v1791_v60, %v1791_v60  ;;  %v1800_v11 = vrot.slane %v1784_v59, %v5015_v6  ;;  %v5105_v0 = vpop.f32.mrb[19].mxu0 }
 0x1ef   : > { %v3688_v12 = vsel %vm3687_vm11, %v3686_v28, %v3685_v10  ;;  %v1807_v48 = vrot.slane %v1791_v60, %v5015_v6  ;;  %v1672_v33 = vmax.f32 %v5096_v35, 0.0  ;;  %v5111_v30 = vadd.f32 %v4320_v55, %v5009_v38 }
 0x1f0   : > { %v3691_v41 = vsel %vm3690_vm12, %v3689_v13, %v3688_v12  ;;  %v1814_v44 = vrot.slane %v1792_v7, %v5015_v6  ;;  %v1821_v16 = vrot.slane %v1793_v2, %v5015_v6  ;;  %v1822_v17 = vcombine.high %v1800_v11, %v1800_v11 }
 0x1f1   : > { %v3694_v19 = vsel %vm3693_vm13, %v3692_v56, %v3691_v41  ;;  %v1823_v21 = vcombine.high %v1807_v48, %v1807_v48  ;;  %v2225_v24 = vshrl.u32 %v1800_v11, 16  ;;  %v2245_v26 = vshrl.u32 %v1807_v48, 16  ;;  %v5124_v1 = vpop.f32.mrb[20].mxu1 }
 0x1f2   : > { %v3786_v3 = vpack.c.b16 %v3694_v19, %v3694_v19  ;;  %v1824_v14 = vcombine.high %v1814_v44, %v1814_v44  ;;  %v1825_v27 = vcombine.high %v1821_v16, %v1821_v16  ;;  %v2230_v32 = vshrl.u32 %v1814_v44, 16  ;;  %v5126_v39 = vpop.f32.mrb[21].mxu1 }
 0x1f3   : > { %v2235_v42 = vshrl.u32 %v1822_v17, 16  ;;  %v2250_v9 = vshrl.u32 %v1821_v16, 16  ;;  %v2255_v28 = vshrl.u32 %v1823_v21, 16  ;;  %v2576_v53 = vmax.bf16 %v2225_v24, %v1800_v11  ;;  %v5128_v46 = vpop.f32.mrb[20].mxu0  ;;  %v5130_v8 = vpop.f32.mrb[22].mxu1 }
 0x1f4   : > { %v3823_v13 = vsel %vm5119_vm1, %v3786_v3, %v4121_v45  ;;  %v2240_v56 = vshrl.u32 %v1824_v14, 16  ;;  %v2260_v49 = vshrl.u32 %v1825_v27, 16  ;;  %v2577_v29 = vmax.bf16 %v2230_v32, %v1814_v44  ;;  %v5134_v59 = vpop.f32.mrb[21].mxu0  ;;  %v5136_v60 = vpop.f32.mrb[23].mxu1 }
 0x1f5   : > { %4122 = vst [vmem:[%s4645_s22 + $0x8] sm:$0xf] %v3823_v13  ;;  %v2578_v51 = vmax.bf16 %v2235_v42, %v1822_v17  ;;  %v2580_v4 = vmax.bf16 %v2245_v26, %v1807_v48  ;;  %v2581_v55 = vmax.bf16 %v2250_v9, %v1821_v16  ;;  %v2582_v10 = vmax.bf16 %v2255_v28, %v1823_v21  ;;  %v5139_v7 = vpop.f32.mrb[22].mxu0 }
 0x1f6   : > { %v2579_v2 = vmax.bf16 %v2240_v56, %v1824_v14  ;;  %v2583_v11 = vmax.bf16 %v2260_v49, %v1825_v27  ;;  %v2834_v12 = vrot.slane %v2576_v53, %v5024_v25  ;;  %v2848_v41 = vrot.slane %v2577_v29, %v5024_v25  ;;  %v5143_v19 = vpop.f32.mrb[23].mxu0 }
 0x1f7   : > { %v2862_v44 = vrot.slane %v2578_v51, %v5024_v25  ;;  %v2890_v45 = vrot.slane %v2580_v4, %v5024_v25  ;;  %v2904_v24 = vrot.slane %v2581_v55, %v5024_v25  ;;  %v2918_v48 = vrot.slane %v2582_v10, %v5024_v25  ;;  %v4127_v55 = vld [vmem:[%s4645_s22 + $0x14] sm:$0x1] }
 0x1f8   : > { %v2841_v16 = vrot.slane %v2834_v12, %v5024_v25  ;;  %v2855_v17 = vrot.slane %v2848_v41, %v5024_v25  ;;  %v2876_v21 = vrot.slane %v2579_v2, %v5024_v25  ;;  %v2932_v26 = vrot.slane %v2583_v11, %v5024_v25 }
 0x1f9   : > { %v2869_v3 = vrot.slane %v2862_v44, %v5024_v25  ;;  %v2897_v14 = vrot.slane %v2890_v45, %v5024_v25  ;;  %v2911_v27 = vrot.slane %v2904_v24, %v5024_v25  ;;  %v2925_v32 = vrot.slane %v2918_v48, %v5024_v25  ;;  %v5157_v42 = vpop.f32.mrb[24].mxu1 }
 0x1fa   : > { %v2883_v9 = vrot.slane %v2876_v21, %v5024_v25  ;;  %v2939_v28 = vrot.slane %v2932_v26, %v5024_v25  ;;  %v3620_v53 = vunpack.c.l.b16 %v2841_v16  ;;  %v3621_v13 = vunpack.c.l.b16 %v2855_v17  ;;  %v5161_v56 = vpop.f32.mrb[25].mxu1 }
 0x1fb   : > { %v3622_v49 = vunpack.c.l.b16 %v2869_v3  ;;  %v3624_v29 = vunpack.c.l.b16 %v2897_v14  ;;  %v3625_v51 = vunpack.c.l.b16 %v2911_v27  ;;  %v3626_v4 = vunpack.c.l.b16 %v2925_v32  ;;  %v5164_v10 = vpop.f32.mrb[24].mxu0  ;;  %v5166_v2 = vpop.f32.mrb[26].mxu1 }
 0x1fc   : > { %v3623_v11 = vunpack.c.l.b16 %v2883_v9  ;;  %v3695_v12 = vrot.slane %v3620_v53, 7  ;;  %v3696_v41 = vrot.slane %v3621_v13, 6  ;;  %v4114_v44 = vcombine.low %v2939_v28, %v2939_v28  ;;  %v5168_v45 = vpop.f32.mrb[25].mxu0  ;;  %v5170_v24 = vpop.f32.mrb[27].mxu1 }
 0x1fd   : > { %v3698_v48 = vrot.slane %v3622_v49, 5  ;;  %v3702_v16 = vrot.slane %v3624_v29, 3  ;;  %v3704_v17 = vrot.slane %v3625_v51, 2  ;;  %v3706_v21 = vrot.slane %v3626_v4, 1  ;;  %v5172_v26 = vpop.f32.mrb[26].mxu0 }
 0x1fe   : > { %v3697_v3 = vsel %vm3678_vm8, %v3696_v41, %v3695_v12  ;;  %v3700_v14 = vrot.slane %v3623_v11, 4  ;;  %v3835_v27 = vsel %vm5069_vm0, %v4114_v44, %v4127_v55  ;;  %v1675_v32 = vmax.f32 %v5111_v30, 0.0  ;;  %v5178_v9 = vpop.f32.mrb[27].mxu0 }
 0x1ff   : > { %v3699_v28 = vsel %vm3681_vm9, %v3698_v48, %v3697_v3  ;;  %4128 = vst [vmem:[%s4645_s22 + $0x14] sm:$0x1] %v3835_v27  ;;  %v4321_v53 = vadd.f32 %v5036_v43, %v4999_v58  ;;  %v4322_v13 = vadd.f32 %v5042_v5, %v5001_v31  ;;  %v4323_v49 = vadd.f32 %v5048_v62, %v5003_v34 }
 0x200   : > { %v3701_v29 = vsel %vm3684_vm10, %v3700_v14, %v3699_v28  ;;  %v1701_v30 = vpack.c.bf16 %v1675_v32, %v1674_v22  ;;  %v4324_v51 = vadd.f32 %v5053_v15, %v5005_v37  ;;  %v4325_v4 = vadd.f32 %v5058_v18, %v5007_v23 }
 0x201   : > { %v3703_v55 = vsel %vm3687_vm11, %v3702_v16, %v3701_v29  ;;  %v1641_v58 = vadd.f32 %v4321_v53, %v5009_v38  ;;  %v1646_v31 = vadd.f32 %v4322_v13, %v5009_v38  ;;  %v1644_v43 = vadd.f32 %v4323_v49, %v5009_v38  ;;  %v5199_v34 = vpop.f32.mrb[28].mxu1 }
 0x202   : > { %v3705_v5 = vsel %vm3690_vm12, %v3704_v17, %v3703_v55  ;;  %v1647_v62 = vadd.f32 %v4324_v51, %v5009_v38  ;;  %v1645_v37 = vadd.f32 %v4325_v4, %v5009_v38  ;;  %v4326_v23 = vadd.f32 %v5078_v50, %v5065_v40  ;;  %v5207_v15 = vpop.f32.mrb[29].mxu1 }
 0x203   : > { %v3707_v18 = vsel %vm3693_vm13, %v3706_v21, %v3705_v5  ;;  %v1673_v22 = vmax.f32 %v1641_v58, 0.0  ;;  %v1678_v11 = vmax.f32 %v1646_v31, 0.0  ;;  %v1676_v12 = vmax.f32 %v1644_v43, 0.0  ;;  %v5210_v41 = vpop.f32.mrb[28].mxu0  ;;  %v5212_v44 = vpop.f32.mrb[30].mxu1 }
 0x204   : > { %v3788_v48 = vpack.c.b16 %v3707_v18, %v3707_v18  ;;  %v1679_v16 = vmax.f32 %v1647_v62, 0.0  ;;  %v1677_v17 = vmax.f32 %v1645_v37, 0.0  ;;  %v1650_v3 = vadd.f32 %v4326_v23, %v5009_v38  ;;  %v5215_v14 = vpop.f32.mrb[29].mxu0  ;;  %v5217_v40 = vpop.f32.mrb[31].mxu1 }
 0x205   : > { %v1700_v50 = vpack.c.bf16 %v1673_v22, %v1672_v33  ;;  %v4327_v21 = vadd.f32 %v5087_v61, %v5076_v54  ;;  %v4328_v27 = vadd.f32 %v5100_v52, %v5080_v57  ;;  %v4329_v32 = vadd.f32 %v5105_v0, %v5089_v63  ;;  %v5227_v28 = vpop.f32.mrb[30].mxu0 }
 0x206   : > { %v3832_v53 = vsel %vm5119_vm1, %v3788_v48, %v4125_v36  ;;  %v1703_v13 = vpack.c.bf16 %v1679_v16, %v1678_v11  ;;  %v1702_v49 = vpack.c.bf16 %v1677_v17, %v1676_v12  ;;  %v1682_v29 = vmax.f32 %v1650_v3, 0.0  ;;  %v5231_v51 = vpop.f32.mrb[31].mxu0 }
 0x207   : > { %4126 = vst [vmem:[%s4645_s22 + $0x10] sm:$0xf] %v3832_v53  ;;  %v1714_v35 = vmax.bf16 %v1701_v30, %v1700_v50  ;;  %v1648_v54 = vadd.f32 %v4327_v21, %v5009_v38  ;;  %v1651_v61 = vadd.f32 %v4328_v27, %v5009_v38  ;;  %v1649_v57 = vadd.f32 %v4329_v32, %v5009_v38 }
 0x208   : > { %v1715_v52 = vmax.bf16 %v1703_v13, %v1702_v49  ;;  %v4330_v63 = vadd.f32 %v5128_v46, %v5124_v1  ;;  %v5241_v0 = vadd.f32 %v5134_v59, %v5126_v39  ;;  %v5245_v33 = vadd.f32 %v5139_v7, %v5130_v8 }
 0x209   : > { %v1826_v4 = vcombine.high %v1714_v35, %v1714_v35  ;;  %v1833_v30 = vrot.slane %v1714_v35, %v5015_v6  ;;  %v1680_v55 = vmax.f32 %v1648_v54, 0.0  ;;  %v1683_v58 = vmax.f32 %v1651_v61, 0.0 }
 0x20a   : > { %v1875_v31 = vcombine.high %v1715_v52, %v1715_v52  ;;  %v1882_v43 = vrot.slane %v1715_v52, %v5015_v6  ;;  %v1681_v5 = vmax.f32 %v1649_v57, 0.0  ;;  %v5250_v36 = vadd.f32 %v4330_v63, %v5009_v38 }
 0x20b   : > { %v1840_v1 = vrot.slane %v1826_v4, %v5015_v6  ;;  %v1841_v39 = vcombine.high %v1833_v30, %v1833_v30  ;;  %v1849_v46 = vrot.slane %v1833_v30, %v5015_v6  ;;  %v5254_v59 = vpack.c.bf16 %v1683_v58, %v1682_v29 }
 0x20c   : > { %v1889_v8 = vrot.slane %v1875_v31, %v5015_v6  ;;  %v1890_v7 = vcombine.high %v1882_v43, %v1882_v43  ;;  %v5258_v62 = vrot.slane %v1882_v43, %v5015_v6  ;;  %v5260_v37 = vpack.c.bf16 %v1681_v5, %v1680_v55 }
 0x20d   : > { %v1842_v23 = vcombine.high %v1840_v1, %v1840_v1  ;;  %v1856_v18 = vrot.slane %v1840_v1, %v5015_v6  ;;  %v1863_v22 = vrot.slane %v1841_v39, %v5015_v6  ;;  %v1871_v11 = vcombine.high %v1849_v46, %v1849_v46 }
 0x20e   : > { %v2265_v12 = vshrl.u32 %v1849_v46, 16  ;;  %v1891_v48 = vcombine.high %v1889_v8, %v1889_v8  ;;  %v5265_v16 = vrot.slane %v1889_v8, %v5015_v6  ;;  %v5268_v17 = vrot.slane %v1890_v7, %v5015_v6 }
 0x20f   : > { %v1870_v3 = vrot.slane %v1842_v23, %v5015_v6  ;;  %v1872_v50 = vcombine.high %v1856_v18, %v1856_v18  ;;  %v1873_v21 = vcombine.high %v1863_v22, %v1863_v22  ;;  %v2270_v27 = vshrl.u32 %v1863_v22, 16 }
 0x210   : > { %v2275_v32 = vshrl.u32 %v1871_v11, 16  ;;  %v2285_v53 = vshrl.u32 %v1856_v18, 16  ;;  %v2584_v13 = vmax.bf16 %v2265_v12, %v1849_v46  ;;  %v5272_v49 = vrot.slane %v1891_v48, %v5015_v6 }
 0x211   : > { %v1874_v29 = vcombine.high %v1870_v3, %v1870_v3  ;;  %v2280_v35 = vshrl.u32 %v1873_v21, 16  ;;  %v2290_v54 = vshrl.u32 %v1870_v3, 16  ;;  %v2295_v61 = vshrl.u32 %v1872_v50, 16 }
 0x212   : > { %v2585_v57 = vmax.bf16 %v2270_v27, %v1863_v22  ;;  %v2586_v52 = vmax.bf16 %v2275_v32, %v1871_v11  ;;  %v2588_v63 = vmax.bf16 %v2285_v53, %v1856_v18  ;;  %v2946_v4 = vrot.slane %v2584_v13, %v5024_v25 }
 0x213   : > { %v2300_v30 = vshrl.u32 %v1874_v29, 16  ;;  %v2587_v55 = vmax.bf16 %v2280_v35, %v1873_v21  ;;  %v2589_v58 = vmax.bf16 %v2290_v54, %v1870_v3  ;;  %v2590_v31 = vmax.bf16 %v2295_v61, %v1872_v50 }
 0x214   : > { %v2953_v43 = vrot.slane %v2946_v4, %v5024_v25  ;;  %v2960_v5 = vrot.slane %v2585_v57, %v5024_v25  ;;  %v2974_v1 = vrot.slane %v2586_v52, %v5024_v25  ;;  %v3002_v39 = vrot.slane %v2588_v63, %v5024_v25  ;;  %v4131_v4 = vld [vmem:[%s4645_s22 + $0x1c] sm:$0x1] }
 0x215   : > { %v2591_v46 = vmax.bf16 %v2300_v30, %v1874_v29  ;;  %v2988_v8 = vrot.slane %v2587_v55, %v5024_v25  ;;  %v3016_v7 = vrot.slane %v2589_v58, %v5024_v25  ;;  %v3030_v23 = vrot.slane %v2590_v31, %v5024_v25 }
 0x216   : > { %v2967_v18 = vrot.slane %v2960_v5, %v5024_v25  ;;  %v2981_v22 = vrot.slane %v2974_v1, %v5024_v25  ;;  %v3009_v11 = vrot.slane %v3002_v39, %v5024_v25  ;;  %v3628_v12 = vunpack.c.l.b16 %v2953_v43 }
 0x217   : > { %v2995_v48 = vrot.slane %v2988_v8, %v5024_v25  ;;  %v3023_v3 = vrot.slane %v3016_v7, %v5024_v25  ;;  %v3037_v50 = vrot.slane %v3030_v23, %v5024_v25  ;;  %v3044_v21 = vrot.slane %v2591_v46, %v5024_v25 }
 0x218   : > { %v3629_v27 = vunpack.c.l.b16 %v2967_v18  ;;  %v3630_v32 = vunpack.c.l.b16 %v2981_v22  ;;  %v3632_v53 = vunpack.c.l.b16 %v3009_v11  ;;  %v3708_v13 = vrot.slane %v3628_v12, 7 }
 0x219   : > { %v3051_v29 = vrot.slane %v3044_v21, %v5024_v25  ;;  %v3631_v35 = vunpack.c.l.b16 %v2995_v48  ;;  %v3633_v54 = vunpack.c.l.b16 %v3023_v3  ;;  %v3634_v61 = vunpack.c.l.b16 %v3037_v50 }
 0x21a   : > { %v3709_v57 = vrot.slane %v3629_v27, 6  ;;  %v3711_v52 = vrot.slane %v3630_v32, 5  ;;  %v3715_v63 = vrot.slane %v3632_v53, 3  ;;  %v1920_v30 = vcombine.high %v5258_v62, %v5258_v62 }
 0x21b   : > { %v3713_v55 = vrot.slane %v3631_v35, 4  ;;  %v3717_v58 = vrot.slane %v3633_v54, 2  ;;  %v3719_v31 = vrot.slane %v3634_v61, 1  ;;  %v4115_v43 = vcombine.low %v3051_v29, %v3051_v29  ;;  %v4129_v54 = vld [vmem:[%s4645_s22 + $0x18] sm:$0xf] }
 0x21c   : > { %v3710_v5 = vsel %vm3678_vm8, %v3709_v57, %v3708_v13  ;;  %v1921_v1 = vcombine.high %v5265_v16, %v5265_v16  ;;  %v1922_v39 = vcombine.high %v5268_v17, %v5268_v17  ;;  %v1923_v46 = vcombine.high %v5272_v49, %v5272_v49 }
 0x21d   : > { %v3712_v8 = vsel %vm3681_vm9, %v3711_v52, %v3710_v5  ;;  %v3841_v7 = vsel %vm5069_vm0, %v4115_v43, %v4131_v4  ;;  %v2305_v23 = vshrl.u32 %v5258_v62, 16  ;;  %v2310_v18 = vshrl.u32 %v5268_v17, 16 }
 0x21e   : > { %v3714_v22 = vsel %vm3684_vm10, %v3713_v55, %v3712_v8  ;;  %4132 = vst [vmem:[%s4645_s22 + $0x1c] sm:$0x1] %v3841_v7  ;;  %v2315_v11 = vshrl.u32 %v1920_v30, 16  ;;  %v2320_v12 = vshrl.u32 %v1922_v39, 16  ;;  %v2325_v48 = vshrl.u32 %v5265_v16, 16 }
 0x21f   : > { %v3716_v3 = vsel %vm3687_vm11, %v3715_v63, %v3714_v22  ;;  %v2330_v50 = vshrl.u32 %v5272_v49, 16  ;;  %v2335_v21 = vshrl.u32 %v1921_v1, 16  ;;  %v2340_v27 = vshrl.u32 %v1923_v46, 16 }
 0x220   : > { %v3718_v32 = vsel %vm3690_vm12, %v3717_v58, %v3716_v3  ;;  %v2592_v53 = vmax.bf16 %v2305_v23, %v5258_v62  ;;  %v2593_v13 = vmax.bf16 %v2310_v18, %v5268_v17  ;;  %v2594_v29 = vmax.bf16 %v2315_v11, %v1920_v30 }
 0x221   : > { %v3720_v35 = vsel %vm3693_vm13, %v3719_v31, %v3718_v32  ;;  %v2595_v61 = vmax.bf16 %v2320_v12, %v1922_v39  ;;  %v2596_v57 = vmax.bf16 %v2325_v48, %v5265_v16  ;;  %v2597_v52 = vmax.bf16 %v2330_v50, %v5272_v49 }
 0x222   : > { %v3790_v63 = vpack.c.b16 %v3720_v35, %v3720_v35  ;;  %v2598_v4 = vmax.bf16 %v2335_v21, %v1921_v1  ;;  %v2599_v55 = vmax.bf16 %v2340_v27, %v1923_v46  ;;  %v3058_v43 = vrot.slane %v2592_v53, %v5024_v25 }
 0x223   : > { %v3072_v58 = vrot.slane %v2593_v13, %v5024_v25  ;;  %v3086_v62 = vrot.slane %v2594_v29, %v5024_v25  ;;  %v3100_v17 = vrot.slane %v2595_v61, %v5024_v25  ;;  %v3114_v30 = vrot.slane %v2596_v57, %v5024_v25 }
 0x224   : > { %v3838_v31 = vsel %vm5119_vm1, %v3790_v63, %v4129_v54  ;;  %v3065_v16 = vrot.slane %v3058_v43, %v5024_v25  ;;  %v3128_v49 = vrot.slane %v2597_v52, %v5024_v25  ;;  %v3142_v5 = vrot.slane %v2598_v4, %v5024_v25  ;;  %v4135_v54 = vld [vmem:[%s4645_s22 + $0x24] sm:$0x1] }
 0x225   : > { %4130 = vst [vmem:[%s4645_s22 + $0x18] sm:$0xf] %v3838_v31  ;;  %v3079_v1 = vrot.slane %v3072_v58, %v5024_v25  ;;  %v3093_v39 = vrot.slane %v3086_v62, %v5024_v25  ;;  %v3107_v46 = vrot.slane %v3100_v17, %v5024_v25  ;;  %v3121_v8 = vrot.slane %v3114_v30, %v5024_v25 }
 0x226   : > { %v3135_v7 = vrot.slane %v3128_v49, %v5024_v25  ;;  %v3149_v23 = vrot.slane %v3142_v5, %v5024_v25  ;;  %v3156_v18 = vrot.slane %v2599_v55, %v5024_v25  ;;  %v3636_v22 = vunpack.c.l.b16 %v3065_v16 }
 0x227   : > { %v3637_v11 = vunpack.c.l.b16 %v3079_v1  ;;  %v3638_v12 = vunpack.c.l.b16 %v3093_v39  ;;  %v3639_v48 = vunpack.c.l.b16 %v3107_v46  ;;  %v3640_v3 = vunpack.c.l.b16 %v3121_v8 }
 0x228   : > { %v3163_v50 = vrot.slane %v3156_v18, %v5024_v25  ;;  %v3641_v21 = vunpack.c.l.b16 %v3135_v7  ;;  %v3642_v27 = vunpack.c.l.b16 %v3149_v23  ;;  %v3721_v32 = vrot.slane %v3636_v22, 7 }
 0x229   : > { %v3722_v53 = vrot.slane %v3637_v11, 6  ;;  %v3724_v13 = vrot.slane %v3638_v12, 5  ;;  %v3726_v29 = vrot.slane %v3639_v48, 4  ;;  %v3728_v35 = vrot.slane %v3640_v3, 3 }
 0x22a   : > { %v3730_v61 = vrot.slane %v3641_v21, 2  ;;  %v3732_v57 = vrot.slane %v3642_v27, 1  ;;  %v4116_v52 = vcombine.low %v3163_v50, %v3163_v50  ;;  %v1716_v63 = vmax.bf16 %v5254_v59, %v5260_v37 }
 0x22b   : > { %v3723_v4 = vsel %vm3678_vm8, %v3722_v53, %v3721_v32  ;;  %v1686_v55 = vmax.f32 %v5250_v36, 0.0  ;;  %v5343_v43 = vadd.f32 %v5241_v0, %v5009_v38  ;;  %v1655_v58 = vadd.f32 %v5245_v33, %v5009_v38 }
 0x22c   : > { %v3725_v62 = vsel %vm3681_vm9, %v3724_v13, %v3723_v4  ;;  %v3847_v17 = vsel %vm5069_vm0, %v4116_v52, %v4135_v54  ;;  %v1924_v30 = vcombine.high %v1716_v63, %v1716_v63  ;;  %v1931_v59 = vrot.slane %v1716_v63, %v5015_v6 }
 0x22d   : > { %v3727_v37 = vsel %vm3684_vm10, %v3726_v29, %v3725_v62  ;;  %4136 = vst [vmem:[%s4645_s22 + $0x24] sm:$0x1] %v3847_v17  ;;  %v1684_v36 = vmax.f32 %v5343_v43, 0.0  ;;  %v1687_v31 = vmax.f32 %v1655_v58, 0.0  ;;  %v4333_v0 = vadd.f32 %v5143_v19, %v5136_v60  ;;  %v4133_v60 = vld [vmem:[%s4645_s22 + $0x20] sm:$0xf] }
 0x22e   : > { %v3729_v33 = vsel %vm3687_vm11, %v3728_v35, %v3727_v37  ;;  %v1938_v16 = vrot.slane %v1924_v30, %v5015_v6  ;;  %v1939_v49 = vcombine.high %v1931_v59, %v1931_v59  ;;  %v1947_v5 = vrot.slane %v1931_v59, %v5015_v6 }
 0x22f   : > { %v3731_v1 = vsel %vm3690_vm12, %v3730_v61, %v3729_v33  ;;  %v5360_v39 = vpack.c.bf16 %v1687_v31, %v1686_v55  ;;  %v1653_v46 = vadd.f32 %v4333_v0, %v5009_v38  ;;  %v5365_v8 = vadd.f32 %v5164_v10, %v5157_v42 }
 0x230   : > { %v3733_v7 = vsel %vm3693_vm13, %v3732_v57, %v3731_v1  ;;  %v1940_v19 = vcombine.high %v1938_v16, %v1938_v16  ;;  %v1954_v23 = vrot.slane %v1938_v16, %v5015_v6  ;;  %v1961_v18 = vrot.slane %v1939_v49, %v5015_v6 }
 0x231   : > { %v3792_v22 = vpack.c.b16 %v3733_v7, %v3733_v7  ;;  %v1969_v11 = vcombine.high %v1947_v5, %v1947_v5  ;;  %v2345_v12 = vshrl.u32 %v1947_v5, 16  ;;  %v1685_v48 = vmax.f32 %v1653_v46, 0.0 }
 0x232   : > { %v1968_v3 = vrot.slane %v1940_v19, %v5015_v6  ;;  %v1970_v38 = vcombine.high %v1954_v23, %v1954_v23  ;;  %v1971_v50 = vcombine.high %v1961_v18, %v1961_v18  ;;  %v2350_v21 = vshrl.u32 %v1961_v18, 16 }
 0x233   : > { %v3844_v42 = vsel %vm5119_vm1, %v3792_v22, %v4133_v60  ;;  %v2355_v10 = vshrl.u32 %v1969_v11, 16  ;;  %v2365_v27 = vshrl.u32 %v1954_v23, 16  ;;  %v2600_v32 = vmax.bf16 %v2345_v12, %v1947_v5 }
 0x234   : > { %4134 = vst [vmem:[%s4645_s22 + $0x20] sm:$0xf] %v3844_v42  ;;  %v1972_v53 = vcombine.high %v1968_v3, %v1968_v3  ;;  %v2360_v13 = vshrl.u32 %v1971_v50, 16  ;;  %v2370_v29 = vshrl.u32 %v1968_v3, 16  ;;  %v2375_v35 = vshrl.u32 %v1970_v38, 16 }
 0x235   : > { %v2601_v54 = vmax.bf16 %v2350_v21, %v1961_v18  ;;  %v2602_v61 = vmax.bf16 %v2355_v10, %v1969_v11  ;;  %v2604_v57 = vmax.bf16 %v2365_v27, %v1954_v23  ;;  %v3170_v52 = vrot.slane %v2600_v32, %v5024_v25  ;;  %v4139_v27 = vld [vmem:[%s4645_s22 + $0x2c] sm:$0x1] }
 0x236   : > { %v2380_v63 = vshrl.u32 %v1972_v53, 16  ;;  %v2603_v4 = vmax.bf16 %v2360_v13, %v1971_v50  ;;  %v2605_v55 = vmax.bf16 %v2370_v29, %v1968_v3  ;;  %v2606_v58 = vmax.bf16 %v2375_v35, %v1970_v38 }
 0x237   : > { %v3177_v62 = vrot.slane %v3170_v52, %v5024_v25  ;;  %v3184_v17 = vrot.slane %v2601_v54, %v5024_v25  ;;  %v3198_v30 = vrot.slane %v2602_v61, %v5024_v25  ;;  %v3226_v59 = vrot.slane %v2604_v57, %v5024_v25  ;;  %v5396_v57 = vld [vmem:[#allocation5] ss:$0 sm:$0xff] }
 0x238   : > { %v2607_v37 = vmax.bf16 %v2380_v63, %v1972_v53  ;;  %v3212_v31 = vrot.slane %v2603_v4, %v5024_v25  ;;  %v3240_v0 = vrot.slane %v2605_v55, %v5024_v25  ;;  %v3254_v33 = vrot.slane %v2606_v58, %v5024_v25 }
 0x239   : > { %v3191_v16 = vrot.slane %v3184_v17, %v5024_v25  ;;  %v3205_v49 = vrot.slane %v3198_v30, %v5024_v25  ;;  %v3233_v5 = vrot.slane %v3226_v59, %v5024_v25  ;;  %v3644_v1 = vunpack.c.l.b16 %v3177_v62  ;;  %v4137_v59 = vld [vmem:[%s4645_s22 + $0x28] sm:$0xf] }
 0x23a   : > { %v3219_v46 = vrot.slane %v3212_v31, %v5024_v25  ;;  %v3247_v7 = vrot.slane %v3240_v0, %v5024_v25  ;;  %v3261_v60 = vrot.slane %v3254_v33, %v5024_v25  ;;  %v3268_v19 = vrot.slane %v2607_v37, %v5024_v25 }
 0x23b   : > { %v3645_v23 = vunpack.c.l.b16 %v3191_v16  ;;  %v3646_v18 = vunpack.c.l.b16 %v3205_v49  ;;  %v3648_v22 = vunpack.c.l.b16 %v3233_v5  ;;  %v3734_v11 = vrot.slane %v3644_v1, 7 }
 0x23c   : > { %v3275_v12 = vrot.slane %v3268_v19, %v5024_v25  ;;  %v3647_v3 = vunpack.c.l.b16 %v3219_v46  ;;  %v3649_v38 = vunpack.c.l.b16 %v3247_v7  ;;  %v3650_v50 = vunpack.c.l.b16 %v3261_v60 }
 0x23d   : > { %v3735_v21 = vrot.slane %v3645_v23, 6  ;;  %v3737_v42 = vrot.slane %v3646_v18, 5  ;;  %v3741_v10 = vrot.slane %v3648_v22, 3  ;;  %v1706_v32 = vpack.c.bf16 %v1685_v48, %v1684_v36 }
 0x23e   : > { %v3739_v53 = vrot.slane %v3647_v3, 4  ;;  %v3743_v13 = vrot.slane %v3649_v38, 2  ;;  %v3745_v29 = vrot.slane %v3650_v50, 1  ;;  %v4117_v35 = vcombine.low %v3275_v12, %v3275_v12 }
 0x23f   : > { %v3736_v54 = vsel %vm3678_vm8, %v3735_v21, %v3734_v11  ;;  %v1717_v61 = vmax.bf16 %v5360_v39, %v1706_v32  ;;  %v1658_v52 = vadd.f32 %v5396_v57, %v5365_v8  ;;  %v4335_v63 = vadd.f32 %v5168_v45, %v5161_v56 }
 0x240   : > { %v3738_v43 = vsel %vm3681_vm9, %v3737_v42, %v3736_v54  ;;  %v3853_v36 = vsel %vm5069_vm0, %v4117_v35, %v4139_v27  ;;  %v4336_v48 = vadd.f32 %v5172_v26, %v5166_v2  ;;  %v4337_v39 = vadd.f32 %v5178_v9, %v5170_v24 }
 0x241   : > { %v3740_v4 = vsel %vm3684_vm10, %v3739_v53, %v3738_v43  ;;  %4140 = vst [vmem:[%s4645_s22 + $0x2c] sm:$0x1] %v3853_v36  ;;  %v1973_v55 = vcombine.high %v1717_v61, %v1717_v61  ;;  %v1980_v8 = vrot.slane %v1717_v61, %v5015_v6  ;;  %v1690_v58 = vmax.f32 %v1658_v52, 0.0 }
 0x242   : > { %v3742_v56 = vsel %vm3687_vm11, %v3741_v10, %v3740_v4  ;;  %v1656_v45 = vadd.f32 %v5396_v57, %v4335_v63  ;;  %v1659_v62 = vadd.f32 %v5396_v57, %v4336_v48  ;;  %v1657_v17 = vadd.f32 %v5396_v57, %v4337_v39 }
 0x243   : > { %v3744_v2 = vsel %vm3690_vm12, %v3743_v13, %v3742_v56  ;;  %v1987_v26 = vrot.slane %v1973_v55, %v5015_v6  ;;  %v1988_v24 = vcombine.high %v1980_v8, %v1980_v8  ;;  %v1996_v9 = vrot.slane %v1980_v8, %v5015_v6 }
 0x244   : > { %v3746_v30 = vsel %vm3693_vm13, %v3745_v29, %v3744_v2  ;;  %v1688_v37 = vmax.f32 %v1656_v45, 0.0  ;;  %v1691_v31 = vmax.f32 %v1659_v62, 0.0  ;;  %v1689_v0 = vmax.f32 %v1657_v17, 0.0 }
 0x245   : > { %v3794_v33 = vpack.c.b16 %v3746_v30, %v3746_v30  ;;  %v1989_v16 = vcombine.high %v1987_v26, %v1987_v26  ;;  %v2003_v49 = vrot.slane %v1987_v26, %v5015_v6  ;;  %v2010_v5 = vrot.slane %v1988_v24, %v5015_v6 }
 0x246   : > { %v2018_v1 = vcombine.high %v1996_v9, %v1996_v9  ;;  %v2385_v46 = vshrl.u32 %v1996_v9, 16  ;;  %v1709_v7 = vpack.c.bf16 %v1691_v31, %v1690_v58  ;;  %v1708_v60 = vpack.c.bf16 %v1689_v0, %v1688_v37 }
 0x247   : > { %v3850_v19 = vsel %vm5119_vm1, %v3794_v33, %v4137_v59  ;;  %v2017_v23 = vrot.slane %v1989_v16, %v5015_v6  ;;  %v2019_v18 = vcombine.high %v2003_v49, %v2003_v49  ;;  %v2020_v22 = vcombine.high %v2010_v5, %v2010_v5 }
 0x248   : > { %4138 = vst [vmem:[%s4645_s22 + $0x28] sm:$0xf] %v3850_v19  ;;  %v2390_v11 = vshrl.u32 %v2010_v5, 16  ;;  %v2395_v12 = vshrl.u32 %v2018_v1, 16  ;;  %v2405_v3 = vshrl.u32 %v2003_v49, 16  ;;  %v2608_v38 = vmax.bf16 %v2385_v46, %v1996_v9 }
 0x249   : > { %v2021_v50 = vcombine.high %v2017_v23, %v2017_v23  ;;  %v2400_v21 = vshrl.u32 %v2020_v22, 16  ;;  %v2410_v42 = vshrl.u32 %v2017_v23, 16  ;;  %v2415_v10 = vshrl.u32 %v2019_v18, 16 }
 0x24a   : > { %v2609_v27 = vmax.bf16 %v2390_v11, %v2010_v5  ;;  %v2610_v32 = vmax.bf16 %v2395_v12, %v2018_v1  ;;  %v2612_v53 = vmax.bf16 %v2405_v3, %v2003_v49  ;;  %v3282_v13 = vrot.slane %v2608_v38, %v5024_v25  ;;  %v4143_v5 = vld [vmem:[%s4645_s22 + $0x34] sm:$0x1] }
 0x24b   : > { %v2420_v29 = vshrl.u32 %v2021_v50, 16  ;;  %v2611_v35 = vmax.bf16 %v2400_v21, %v2020_v22  ;;  %v2613_v54 = vmax.bf16 %v2410_v42, %v2017_v23  ;;  %v2614_v61 = vmax.bf16 %v2415_v10, %v2019_v18 }
 0x24c   : > { %v3289_v52 = vrot.slane %v3282_v13, %v5024_v25  ;;  %v3296_v63 = vrot.slane %v2609_v27, %v5024_v25  ;;  %v3310_v43 = vrot.slane %v2610_v32, %v5024_v25  ;;  %v3338_v36 = vrot.slane %v2612_v53, %v5024_v25 }
 0x24d   : > { %v2615_v48 = vmax.bf16 %v2420_v29, %v2021_v50  ;;  %v3324_v39 = vrot.slane %v2611_v35, %v5024_v25  ;;  %v3352_v4 = vrot.slane %v2613_v54, %v5024_v25  ;;  %v3366_v55 = vrot.slane %v2614_v61, %v5024_v25 }
 0x24e   : > { %v3303_v8 = vrot.slane %v3296_v63, %v5024_v25  ;;  %v3317_v58 = vrot.slane %v3310_v43, %v5024_v25  ;;  %v3345_v56 = vrot.slane %v3338_v36, %v5024_v25  ;;  %v3652_v45 = vunpack.c.l.b16 %v3289_v52 }
 0x24f   : > { %v3331_v62 = vrot.slane %v3324_v39, %v5024_v25  ;;  %v3359_v17 = vrot.slane %v3352_v4, %v5024_v25  ;;  %v3373_v2 = vrot.slane %v3366_v55, %v5024_v25  ;;  %v3380_v26 = vrot.slane %v2615_v48, %v5024_v25 }
 0x250   : > { %v3653_v24 = vunpack.c.l.b16 %v3303_v8  ;;  %v3654_v9 = vunpack.c.l.b16 %v3317_v58  ;;  %v3656_v30 = vunpack.c.l.b16 %v3345_v56  ;;  %v3747_v0 = vrot.slane %v3652_v45, 7 }
 0x251   : > { %v3387_v59 = vrot.slane %v3380_v26, %v5024_v25  ;;  %v3655_v37 = vunpack.c.l.b16 %v3331_v62  ;;  %v3657_v31 = vunpack.c.l.b16 %v3359_v17  ;;  %v3658_v33 = vunpack.c.l.b16 %v3373_v2 }
 0x252   : > { %v3748_v16 = vrot.slane %v3653_v24, 6  ;;  %v3750_v49 = vrot.slane %v3654_v9, 5  ;;  %v1718_v1 = vmax.bf16 %v1709_v7, %v1708_v60  ;;  %v3754_v19 = vrot.slane %v3656_v30, 3 }
 0x253   : > { %v3752_v46 = vrot.slane %v3655_v37, 4  ;;  %v3756_v23 = vrot.slane %v3657_v31, 2  ;;  %v4118_v18 = vcombine.low %v3387_v59, %v3387_v59  ;;  %v4338_v3 = vadd.f32 %v5210_v41, %v5199_v34 }
 0x254   : > { %v3749_v22 = vsel %vm3678_vm8, %v3748_v16, %v3747_v0  ;;  %v2022_v11 = vcombine.high %v1718_v1, %v1718_v1  ;;  %v2029_v12 = vrot.slane %v1718_v1, %v5015_v6  ;;  %v5453_v7 = vadd.f32 %v5215_v14, %v5207_v15 }
 0x255   : > { %v3751_v38 = vsel %vm3681_vm9, %v3750_v49, %v3749_v22  ;;  %v3859_v50 = vsel %vm5069_vm0, %v4118_v18, %v4143_v5  ;;  %v4340_v60 = vadd.f32 %v5227_v28, %v5212_v44  ;;  %v3758_v27 = vrot.slane %v3658_v33, 1  ;;  %v4141_v28 = vld [vmem:[%s4645_s22 + $0x30] sm:$0xf] }
 0x256   : > { %v3753_v21 = vsel %vm3684_vm10, %v3752_v46, %v3751_v38  ;;  %4144 = vst [vmem:[%s4645_s22 + $0x34] sm:$0x1] %v3859_v50  ;;  %v2036_v42 = vrot.slane %v2022_v11, %v5015_v6  ;;  %v2037_v10 = vcombine.high %v2029_v12, %v2029_v12  ;;  %v2045_v34 = vrot.slane %v2029_v12, %v5015_v6 }
 0x257   : > { %v3755_v41 = vsel %vm3687_vm11, %v3754_v19, %v3753_v21  ;;  %v5468_v35 = vadd.f32 %v5396_v57, %v4338_v3  ;;  %v1663_v50 = vadd.f32 %v5396_v57, %v4340_v60 }
 0x258   : > { %v3757_v32 = vsel %vm3690_vm12, %v3756_v23, %v3755_v41  ;;  %v2038_v53 = vcombine.high %v2036_v42, %v2036_v42  ;;  %v2052_v15 = vrot.slane %v2036_v42, %v5015_v6  ;;  %v2059_v14 = vrot.slane %v2037_v10, %v5015_v6 }
 0x259   : > { %v3759_v44 = vsel %vm3693_vm13, %v3758_v27, %v3757_v32  ;;  %v2067_v13 = vcombine.high %v2045_v34, %v2045_v34  ;;  %v2425_v29 = vshrl.u32 %v2045_v34, 16  ;;  %v1694_v60 = vmax.f32 %v5468_v35, 0.0 }
 0x25a   : > { %v3796_v54 = vpack.c.b16 %v3759_v44, %v3759_v44  ;;  %v2066_v61 = vrot.slane %v2038_v53, %v5015_v6  ;;  %v2068_v52 = vcombine.high %v2052_v15, %v2052_v15  ;;  %v2069_v63 = vcombine.high %v2059_v14, %v2059_v14  ;;  %v4147_v53 = vld [vmem:[%s4645_s22 + $0x3c] sm:$0x1] }
 0x25b   : > { %v2430_v43 = vshrl.u32 %v2059_v14, 16  ;;  %v2435_v36 = vshrl.u32 %v2067_v13, 16  ;;  %v2445_v48 = vshrl.u32 %v2052_v15, 16  ;;  %v2616_v39 = vmax.bf16 %v2425_v29, %v2045_v34 }
 0x25c   : > { %v3856_v4 = vsel %vm5119_vm1, %v3796_v54, %v4141_v28  ;;  %v2070_v55 = vcombine.high %v2066_v61, %v2066_v61  ;;  %v2440_v8 = vshrl.u32 %v2069_v63, 16  ;;  %v2450_v58 = vshrl.u32 %v2066_v61, 16 }
 0x25d   : > { %4142 = vst [vmem:[%s4645_s22 + $0x30] sm:$0xf] %v3856_v4  ;;  %v2455_v56 = vshrl.u32 %v2068_v52, 16  ;;  %v2617_v45 = vmax.bf16 %v2430_v43, %v2059_v14  ;;  %v2618_v62 = vmax.bf16 %v2435_v36, %v2067_v13  ;;  %v2620_v17 = vmax.bf16 %v2445_v48, %v2052_v15 }
 0x25e   : > { %v2460_v2 = vshrl.u32 %v2070_v55, 16  ;;  %v2619_v26 = vmax.bf16 %v2440_v8, %v2069_v63  ;;  %v2621_v24 = vmax.bf16 %v2450_v58, %v2066_v61  ;;  %v3394_v9 = vrot.slane %v2616_v39, %v5024_v25  ;;  %v4145_v8 = vld [vmem:[%s4645_s22 + $0x38] sm:$0xf] }
 0x25f   : > { %v2622_v30 = vmax.bf16 %v2455_v56, %v2068_v52  ;;  %v3408_v59 = vrot.slane %v2617_v45, %v5024_v25  ;;  %v3422_v37 = vrot.slane %v2618_v62, %v5024_v25  ;;  %v3450_v31 = vrot.slane %v2620_v17, %v5024_v25 }
 0x260   : > { %v2623_v0 = vmax.bf16 %v2460_v2, %v2070_v55  ;;  %v3401_v33 = vrot.slane %v3394_v9, %v5024_v25  ;;  %v3436_v16 = vrot.slane %v2619_v26, %v5024_v25  ;;  %v3464_v49 = vrot.slane %v2621_v24, %v5024_v25 }
 0x261   : > { %v3415_v5 = vrot.slane %v3408_v59, %v5024_v25  ;;  %v3429_v1 = vrot.slane %v3422_v37, %v5024_v25  ;;  %v3457_v46 = vrot.slane %v3450_v31, %v5024_v25  ;;  %v3478_v19 = vrot.slane %v2622_v30, %v5024_v25 }
 0x262   : > { %v3443_v23 = vrot.slane %v3436_v16, %v5024_v25  ;;  %v3471_v18 = vrot.slane %v3464_v49, %v5024_v25  ;;  %v3492_v22 = vrot.slane %v2623_v0, %v5024_v25  ;;  %v3660_v11 = vunpack.c.l.b16 %v3401_v33 }
 0x263   : > { %v3485_v12 = vrot.slane %v3478_v19, %v5024_v25  ;;  %v3661_v3 = vunpack.c.l.b16 %v3415_v5  ;;  %v3662_v38 = vunpack.c.l.b16 %v3429_v1  ;;  %v3664_v10 = vunpack.c.l.b16 %v3457_v46 }
 0x264   : > { %v3499_v21 = vrot.slane %v3492_v22, %v5024_v25  ;;  %v3663_v42 = vunpack.c.l.b16 %v3443_v23  ;;  %v3665_v34 = vunpack.c.l.b16 %v3471_v18  ;;  %v3760_v41 = vrot.slane %v3660_v11, 7 }
 0x265   : > { %v3761_v27 = vrot.slane %v3661_v3, 6  ;;  %v3763_v32 = vrot.slane %v3662_v38, 5  ;;  %v3666_v15 = vunpack.c.l.b16 %v3485_v12  ;;  %v1660_v28 = vadd.f32 %v5396_v57, %v5453_v7 }
 0x266   : > { %v3765_v14 = vrot.slane %v3663_v42, 4  ;;  %v4119_v44 = vcombine.low %v3499_v21, %v3499_v21  ;;  %v1695_v29 = vmax.f32 %v1663_v50, 0.0  ;;  %v4341_v54 = vadd.f32 %v5231_v51, %v5217_v40 }
 0x267   : > { %v3762_v13 = vsel %vm3678_vm8, %v3761_v27, %v3760_v41  ;;  %v3767_v52 = vrot.slane %v3664_v10, 3  ;;  %v3769_v36 = vrot.slane %v3665_v34, 2  ;;  %v3771_v39 = vrot.slane %v3666_v15, 1 }
 0x268   : > { %v3764_v61 = vsel %vm3681_vm9, %v3763_v32, %v3762_v13  ;;  %v3865_v63 = vsel %vm5069_vm0, %v4119_v44, %v4147_v53  ;;  %v1711_v7 = vpack.c.bf16 %v1695_v29, %v1694_v60  ;;  %v1661_v48 = vadd.f32 %v5396_v57, %v4341_v54 }
 0x269   : > { %v3766_v43 = vsel %vm3684_vm10, %v3765_v14, %v3764_v61  ;;  %4148 = vst [vmem:[%s4645_s22 + $0x3c] sm:$0x1] %v3865_v63  ;;  %v1692_v40 = vmax.f32 %v1660_v28, 0.0 }
 0x26a   : > { %v3768_v35 = vsel %vm3687_vm11, %v3767_v52, %v3766_v43  ;;  %v1693_v51 = vmax.f32 %v1661_v48, 0.0 }
 0x26b   : > { %v3770_v4 = vsel %vm3690_vm12, %v3769_v36, %v3768_v35 }
 0x26c   : > { %v3772_v55 = vsel %vm3693_vm13, %v3771_v39, %v3770_v4  ;;  %v1710_v56 = vpack.c.bf16 %v1693_v51, %v1692_v40  ;;  %v4151_v51 = vld [vmem:[%s4645_s22 + $0x44] sm:$0x1] }
 0x26d   : > { %v3798_v58 = vpack.c.b16 %v3772_v55, %v3772_v55 }
 0x26e   : > { %v1719_v62 = vmax.bf16 %v1711_v7, %v1710_v56 }
 0x26f   : > { %v3862_v45 = vsel %vm5119_vm1, %v3798_v58, %v4145_v8 }
 0x270   : > { %4146 = vst [vmem:[%s4645_s22 + $0x38] sm:$0xf] %v3862_v45  ;;  %v2071_v17 = vcombine.high %v1719_v62, %v1719_v62  ;;  %v2078_v57 = vrot.slane %v1719_v62, %v5015_v6 }
 0x272   : > { %v2085_v2 = vrot.slane %v2071_v17, %v5015_v6  ;;  %v2086_v26 = vcombine.high %v2078_v57, %v2078_v57  ;;  %v2094_v24 = vrot.slane %v2078_v57, %v5015_v6 }
 0x274   : > { %v2087_v9 = vcombine.high %v2085_v2, %v2085_v2  ;;  %v2101_v30 = vrot.slane %v2085_v2, %v5015_v6  ;;  %v2108_v59 = vrot.slane %v2086_v26, %v5015_v6  ;;  %v2116_v37 = vcombine.high %v2094_v24, %v2094_v24 }
 0x275   : > { %v2465_v31 = vshrl.u32 %v2094_v24, 16 }
 0x276   : > { %v2115_v0 = vrot.slane %v2087_v9, %v5015_v6  ;;  %v2117_v33 = vcombine.high %v2101_v30, %v2101_v30  ;;  %v2118_v16 = vcombine.high %v2108_v59, %v2108_v59  ;;  %v2470_v49 = vshrl.u32 %v2108_v59, 16 }
 0x277   : > { %v2475_v5 = vshrl.u32 %v2116_v37, 16  ;;  %v2485_v1 = vshrl.u32 %v2101_v30, 16  ;;  %v2624_v46 = vmax.bf16 %v2465_v31, %v2094_v24 }
 0x278   : > { %v2119_v19 = vcombine.high %v2115_v0, %v2115_v0  ;;  %v2480_v23 = vshrl.u32 %v2118_v16, 16  ;;  %v2490_v18 = vshrl.u32 %v2115_v0, 16  ;;  %v2495_v22 = vshrl.u32 %v2117_v33, 16 }
 0x279   : > { %v2625_v11 = vmax.bf16 %v2470_v49, %v2108_v59  ;;  %v2626_v12 = vmax.bf16 %v2475_v5, %v2116_v37  ;;  %v2628_v3 = vmax.bf16 %v2485_v1, %v2101_v30  ;;  %v3506_v38 = vrot.slane %v2624_v46, %v5024_v25  ;;  %v4149_v30 = vld [vmem:[%s4645_s22 + $0x40] sm:$0xf] }
 0x27a   : > { %v2500_v50 = vshrl.u32 %v2119_v19, 16  ;;  %v2627_v21 = vmax.bf16 %v2480_v23, %v2118_v16  ;;  %v2629_v42 = vmax.bf16 %v2490_v18, %v2115_v0  ;;  %v2630_v10 = vmax.bf16 %v2495_v22, %v2117_v33 }
 0x27b   : > { %v3513_v6 = vrot.slane %v3506_v38, %v5024_v25  ;;  %v3520_v34 = vrot.slane %v2625_v11, %v5024_v25  ;;  %v3534_v41 = vrot.slane %v2626_v12, %v5024_v25  ;;  %v3562_v27 = vrot.slane %v2628_v3, %v5024_v25 }
 0x27c   : > { %v2631_v32 = vmax.bf16 %v2500_v50, %v2119_v19  ;;  %v3548_v53 = vrot.slane %v2627_v21, %v5024_v25  ;;  %v3576_v15 = vrot.slane %v2629_v42, %v5024_v25  ;;  %v3590_v14 = vrot.slane %v2630_v10, %v5024_v25 }
 0x27d   : > { %v3527_v44 = vrot.slane %v3520_v34, %v5024_v25  ;;  %v3541_v28 = vrot.slane %v3534_v41, %v5024_v25  ;;  %v3569_v13 = vrot.slane %v3562_v27, %v5024_v25  ;;  %v3668_v60 = vunpack.c.l.b16 %v3513_v6 }
 0x27e   : > { %v3555_v29 = vrot.slane %v3548_v53, %v5024_v25  ;;  %v3583_v54 = vrot.slane %v3576_v15, %v5024_v25  ;;  %v3597_v61 = vrot.slane %v3590_v14, %v5024_v25  ;;  %v3604_v52 = vrot.slane %v2631_v32, %v5024_v25 }
 0x27f   : > { %v3669_v63 = vunpack.c.l.b16 %v3527_v44  ;;  %v3670_v43 = vunpack.c.l.b16 %v3541_v28  ;;  %v3672_v48 = vunpack.c.l.b16 %v3569_v13  ;;  %v3773_v39 = vrot.slane %v3668_v60, 7 }
 0x280   : > { %v3611_v36 = vrot.slane %v3604_v52, %v5024_v25  ;;  %v3671_v7 = vunpack.c.l.b16 %v3555_v29  ;;  %v3673_v35 = vunpack.c.l.b16 %v3583_v54  ;;  %v3674_v55 = vunpack.c.l.b16 %v3597_v61 }
 0x281   : > { %v3774_v4 = vrot.slane %v3669_v63, 6  ;;  %v3776_v40 = vrot.slane %v3670_v43, 5  ;;  %v3780_v62 = vrot.slane %v3672_v48, 3 }
 0x282   : > { %v3778_v8 = vrot.slane %v3671_v7, 4  ;;  %v4120_v58 = vcombine.low %v3611_v36, %v3611_v36  ;;  %v3782_v57 = vrot.slane %v3673_v35, 2  ;;  %v3784_v26 = vrot.slane %v3674_v55, 1 }
 0x283   : > { %v3775_v56 = vsel %vm3678_vm8, %v3774_v4, %v3773_v39 }
 0x284   : > { %v3777_v45 = vsel %vm3681_vm9, %v3776_v40, %v3775_v56  ;;  %v3871_v25 = vsel %vm5069_vm0, %v4120_v58, %v4151_v51 }
 0x285   : > { %v3779_v17 = vsel %vm3684_vm10, %v3778_v8, %v3777_v45  ;;  %4152 = vst [vmem:[%s4645_s22 + $0x44] sm:$0x1] %v3871_v25 }
 0x286   : > { %v3781_v2 = vsel %vm3687_vm11, %v3780_v62, %v3779_v17 }
 0x287   : > { %v3783_v24 = vsel %vm3690_vm12, %v3782_v57, %v3781_v2 }
 0x288   : > { %v3785_v9 = vsel %vm3693_vm13, %v3784_v26, %v3783_v24 }
 0x289   : > { %v3800_v59 = vpack.c.b16 %v3785_v9, %v3785_v9 }
 0x28b   : > { %v3868_v37 = vsel %vm5119_vm1, %v3800_v59, %v4149_v30 }
 0x28c   : > { %4150 = vst [vmem:[%s4645_s22 + $0x40] sm:$0xf] %v3868_v37 }
 0x28d PF: > { %s15_s12 = sadd.s32 1, %s4526_s12  }
 0x28e   : > { %p12_p5 = scmp.ge.s32.totalorder %s15_s12, 4  }
 0x290   :  { %14 = sbr.rel (!%p12_p5) target bundleno = 2 (0x2), region = 74 }
 0x297   :  { %3894 = vsyncpa [#allocation4], 1 }
 0x298   :  { %3896 = vsyncpa [#allocation4 + $0x1], 1 }
 0x299   :  { %3897 = vsyncpa [#allocation6], 1 }

// kernel: lcnet_forward.9
= control target key start
LH: loop header
LB: loop body
LE: loop exit
PB: predicated region body
PF: predicated region fallthrough
CT: control target
= control target key end

     0   :  { %s3948_s12 = smov 0   ;;  %s5088_s0 = inlined_call_operand.vmem [shape: bf16[2,6,6,256], index: 0, kind: input, shape index: {}]   ;;  %s5089_s1 = inlined_call_operand.vmem [shape: bf16[3,768,256], index: 1, kind: input, shape index: {}]   ;;  %s5090_s2 = inlined_call_operand.vmem [shape: f32[1,256], index: 2, kind: input, shape index: {}]   ;;  %s5091_s3 = inlined_call_operand.vmem [shape: bf16[2,4,6,256], index: 3, kind: output, shape index: {}]  }
   0x1 LB: > { %s2912_s13 = sadd.s32 4294967295, %s3924_s12   ;;  %p2916_p0 = scmp.ge.s32.totalorder %s3924_s12, 1  ;;  %s3924_s12 = sphi %s3948_s12, %s13_s12  }
   0x2   : > { %p137_p1 = scmp.lt.s32.totalorder %s3924_s12, 3 }
   0x4   : > { %p138_p2 = pnand %p2916_p0, %p137_p1 }
   0x5   : > { %v3474_v0 = vld [vmem:[%s5089_s1 + $0x4] ss:$8 sps:$4 sm:$0xff] (!%p138_p2)   ;;  %v3478_v2 = vld [vmem:[%s5089_s1] ss:$8 sps:$4 sm:$0xff] (!%p138_p2)   ;;  %v3480_v4 = vld [vmem:[%s5089_s1 + $0x14] ss:$8 sps:$4 sm:$0xff] (!%p138_p2)   ;;  %v309_v38 = vlaneseq (!%p138_p2) }
   0x6   : > { %141 = sbr.rel (%p138_p2) target bundleno = 568 (0x238), region = 32  ;;  %v3476_v1 = vld [vmem:[%s5089_s1 + $0x404] ss:$8 sps:$4 sm:$0xff] (!%p138_p2)   ;;  %1040 = vmatprep.subr.bf16.mxu1 (!%p138_p2), %v3474_v0  ;;  %v3479_v3 = vld [vmem:[%s5089_s1 + $0x400] ss:$8 sps:$4 sm:$0xff] (!%p138_p2)   ;;  %p161_p3 = scmp.lt.s32.totalorder (!%p138_p2), %s2912_s13, 1 }
   0x7   : > { %1878 = vmatprep.subr.bf16.mxu0 (!%p138_p2), %v3476_v1  ;;  %1041 = vmatpush1.bf16.msra.mxu1 (!%p138_p2), %v3478_v2  ;;  %v3482_v5 = vld [vmem:[%s5089_s1 + $0x414] ss:$8 sps:$4 sm:$0xff] (!%p138_p2)   ;;  %v3484_v6 = vld [vmem:[%s5089_s1 + $0x10] ss:$8 sps:$4 sm:$0xff] (!%p138_p2)   ;;  %v3486_v8 = vld [vmem:[%s5089_s1 + $0x24] ss:$8 sps:$4 sm:$0xff] (!%p138_p2)  }
   0x8   : > { %1879 = vmatpush1.bf16.msra.mxu0 (!%p138_p2), %v3479_v3  ;;  %1042 = vmatprep.subr.bf16.mxu1 (!%p138_p2), %v3480_v4  ;;  %v3485_v7 = vld [vmem:[%s5089_s1 + $0x410] ss:$8 sps:$4 sm:$0xff] (!%p138_p2)   ;;  %v3488_v9 = vld [vmem:[%s5089_s1 + $0x424] ss:$8 sps:$4 sm:$0xff] (!%p138_p2)   ;;  %v3490_v10 = vld [vmem:[%s5089_s1 + $0x20] ss:$8 sps:$4 sm:$0xff] (!%p138_p2)  }
   0x9   : > { %1880 = vmatprep.subr.bf16.mxu0 (!%p138_p2), %v3482_v5  ;;  %v3491_v11 = vld [vmem:[%s5089_s1 + $0x420] ss:$8 sps:$4 sm:$0xff] (!%p138_p2)   ;;  %v3492_v12 = vld [vmem:[%s5089_s1 + $0x34] ss:$8 sps:$4 sm:$0xff] (!%p138_p2)   ;;  %v3496_v14 = vld [vmem:[%s5089_s1 + $0x30] ss:$8 sps:$4 sm:$0xff] (!%p138_p2)  }
   0xa   : > { %v3494_v13 = vld [vmem:[%s5089_s1 + $0x434] ss:$8 sps:$4 sm:$0xff] (!%p138_p2)   ;;  %v3497_v15 = vld [vmem:[%s5089_s1 + $0x430] ss:$8 sps:$4 sm:$0xff] (!%p138_p2)   ;;  %v3498_v16 = vld [vmem:[%s5089_s1 + $0x44] ss:$8 sps:$4 sm:$0xff] (!%p138_p2)  }
   0xb   : > { %1043 = vmatpush1.bf16.msra.mxu1 (!%p138_p2), %v3484_v6  ;;  %v3500_v17 = vld [vmem:[%s5089_s1 + $0x444] ss:$8 sps:$4 sm:$0xff] (!%p138_p2)   ;;  %v3502_v18 = vld [vmem:[%s5089_s1 + $0x40] ss:$8 sps:$4 sm:$0xff] (!%p138_p2)   ;;  %v3504_v20 = vld [vmem:[%s5089_s1 + $0x54] ss:$8 sps:$4 sm:$0xff] (!%p138_p2)  }
   0xc   : > { %1881 = vmatpush1.bf16.msra.mxu0 (!%p138_p2), %v3485_v7  ;;  %1044 = vmatprep.subr.bf16.mxu1 (!%p138_p2), %v3486_v8  ;;  %v3503_v19 = vld [vmem:[%s5089_s1 + $0x440] ss:$8 sps:$4 sm:$0xff] (!%p138_p2)   ;;  %v3506_v21 = vld [vmem:[%s5089_s1 + $0x454] ss:$8 sps:$4 sm:$0xff] (!%p138_p2)   ;;  %v3508_v22 = vld [vmem:[%s5089_s1 + $0x50] ss:$8 sps:$4 sm:$0xff] (!%p138_p2)  }
   0xd   : > { %1882 = vmatprep.subr.bf16.mxu0 %v3488_v9  ;;  %v3509_v23 = vld [vmem:[%s5089_s1 + $0x450] ss:$8 sps:$4 sm:$0xff]   ;;  %v3510_v24 = vld [vmem:[%s5089_s1 + $0x64] ss:$8 sps:$4 sm:$0xff]   ;;  %v3514_v26 = vld [vmem:[%s5089_s1 + $0x60] ss:$8 sps:$4 sm:$0xff]  }
   0xe   : > { %v3512_v25 = vld [vmem:[%s5089_s1 + $0x464] ss:$8 sps:$4 sm:$0xff]   ;;  %v3515_v27 = vld [vmem:[%s5089_s1 + $0x460] ss:$8 sps:$4 sm:$0xff]   ;;  %v3516_v28 = vld [vmem:[%s5089_s1 + $0x74] ss:$8 sps:$4 sm:$0xff]  }
   0xf   : > { %1045 = vmatpush1.bf16.msra.mxu1 %v3490_v10  ;;  %v3518_v29 = vld [vmem:[%s5089_s1 + $0x474] ss:$8 sps:$4 sm:$0xff]   ;;  %v3520_v30 = vld [vmem:[%s5089_s1 + $0x70] ss:$8 sps:$4 sm:$0xff]   ;;  %v3522_v32 = vld [vmem:[%s5089_s1 + $0x84] ss:$8 sps:$4 sm:$0xff]  }
  0x10   : > { %1883 = vmatpush1.bf16.msra.mxu0 %v3491_v11  ;;  %1046 = vmatprep.subr.bf16.mxu1 %v3492_v12  ;;  %v3521_v31 = vld [vmem:[%s5089_s1 + $0x470] ss:$8 sps:$4 sm:$0xff]   ;;  %v3524_v33 = vld [vmem:[%s5089_s1 + $0x484] ss:$8 sps:$4 sm:$0xff]   ;;  %v3526_v34 = vld [vmem:[%s5089_s1 + $0x80] ss:$8 sps:$4 sm:$0xff]  }
  0x11   : > { %1884 = vmatprep.subr.bf16.mxu0 %v3494_v13  ;;  %v3527_v35 = vld [vmem:[%s5089_s1 + $0x480] ss:$8 sps:$4 sm:$0xff]   ;;  %v3926_v36 = vmov 1983009808   ;;  %v3528_v39 = vld [vmem:[%s5089_s1 + $0x94] ss:$8 sps:$4 sm:$0xff]  }
  0x12   : > { %v307_v37 = vunpack.c.l.s4 %v3926_v36  ;;  %s5095_s13 = smov (!%p161_p3, %s2912_s13), 1  ;;  %v3530_v40 = vld [vmem:[%s5089_s1 + $0x494] ss:$8 sps:$4 sm:$0xff]   ;;  %v3532_v41 = vld [vmem:[%s5089_s1 + $0x90] ss:$8 sps:$4 sm:$0xff]   ;;  %v4079_v43 = vshrl.u32 %v309_v38, 7 }
  0x13   : > { %1047 = vmatpush1.bf16.msra.mxu1 %v3496_v14  ;;  %v3533_v44 = vld [vmem:[%s5089_s1 + $0x490] ss:$8 sps:$4 sm:$0xff]   ;;  %v3534_v45 = vld [vmem:[%s5089_s1 + $0xa4] ss:$8 sps:$4 sm:$0xff]   ;;  %s3463_s21 = smul.u32 48, %s5095_s13  ;;  %s3430_s25 = sshll.u32 %s5095_s13, 5 }
  0x14   : > { %1885 = vmatpush1.bf16.msra.mxu0 %v3497_v15  ;;  %1048 = vmatprep.subr.bf16.mxu1 %v3498_v16  ;;  %v308_v42 = vunpack.c.0.s8 %v307_v37  ;;  %v3536_v46 = vld [vmem:[%s5089_s1 + $0x4a4] ss:$8 sps:$4 sm:$0xff]   ;;  %v3538_v47 = vld [vmem:[%s5089_s1 + $0xa0] ss:$8 sps:$4 sm:$0xff]   ;;  %v3540_v50 = vld [vmem:[%s5089_s1 + $0xb4] ss:$8 sps:$4 sm:$0xff]   ;;  %s5060_s28 = scalar_lea.vmem %s5091_s3, %s3430_s25 }
  0x15   : > { %1886 = vmatprep.subr.bf16.mxu0 %v3500_v17  ;;  %v3539_v48 = vld [vmem:[%s5089_s1 + $0x4a0] ss:$8 sps:$4 sm:$0xff]   ;;  %s4106_s5 = scalar_lea.vmem %s5088_s0, %s3463_s21  ;;  %v3542_v51 = vld [vmem:[%s5089_s1 + $0x4b4] ss:$8 sps:$4 sm:$0xff]   ;;  %v3544_v52 = vld [vmem:[%s5089_s1 + $0xb0] ss:$8 sps:$4 sm:$0xff]  }
  0x16   : > { %v4098_v49 = vsub.s32 %v308_v42, %v4079_v43  ;;  %v3545_v53 = vld [vmem:[%s5089_s1 + $0x4b0] ss:$8 sps:$4 sm:$0xff]   ;;  %v172_v54 = vld [vmem:[%s4106_s5] sm:$0x77]  ;;  %v173_v56 = vld [vmem:[%s4106_s5 + $0x8] sm:$0x77] }
  0x17   : > { %1049 = vmatpush1.bf16.msra.mxu1 %v3502_v18  ;;  %v3546_v55 = vld [vmem:[%s5089_s1 + $0xc4] ss:$8 sps:$4 sm:$0xff]   ;;  %v174_v57 = vld [vmem:[%s4106_s5 + $0x10] sm:$0x77]  ;;  %v4123_v58 = vcombine.low %v172_v54, %v172_v54  ;;  %v4125_v59 = vcombine.high %v172_v54, %v172_v54  ;;  %v175_v61 = vld [vmem:[%s4106_s5 + $0x18] sm:$0x77]  ;;  %v4129_v62 = vcombine.low %v173_v56, %v173_v56  ;;  %v4137_v1 = vcombine.high %v173_v56, %v173_v56 }
  0x18   : > { %1887 = vmatpush1.bf16.msra.mxu0 %v3503_v19  ;;  %1050 = vmatprep.subr.bf16.mxu1 %v3504_v20  ;;  %v312_v60 = vrot.slane %v172_v54, %v4098_v49  ;;  %v4132_v63 = vrot.slane %v173_v56, %v4098_v49  ;;  %v3548_v0 = vld [vmem:[%s5089_s1 + $0x4c4] ss:$8 sps:$4 sm:$0xff]   ;;  %v4143_v5 = vrot.slane %v174_v57, %v4098_v49  ;;  %v3550_v10 = vld [vmem:[%s5089_s1 + $0xc0] ss:$8 sps:$4 sm:$0xff]   ;;  %v3552_v16 = vld [vmem:[%s5089_s1 + $0xd4] ss:$8 sps:$4 sm:$0xff]  }
  0x19   : > { %1888 = vmatprep.subr.bf16.mxu0 %v3506_v21  ;;  %v209_v2 = vshrl.u32 %v4123_v58, 16  ;;  %v211_v3 = vshll.u32 %v4123_v58, 16  ;;  %v216_v4 = vshrl.u32 %v4125_v59, 16  ;;  %v4146_v6 = vrot.slane %v175_v61, %v4098_v49  ;;  %v4150_v8 = vld [vmem:[%s4106_s5 + $0x20] sm:$0x77] }
  0x1a   : > { %v2932_v7 = vcombine.low %v312_v60, %v4132_v63  ;;  %v4152_v9 = vcombine.low %v174_v57, %v174_v57  ;;  %v3551_v11 = vld [vmem:[%s5089_s1 + $0x4c0] ss:$8 sps:$4 sm:$0xff]   ;;  %v218_v13 = vshll.u32 %v4125_v59, 16  ;;  %v4163_v14 = vcombine.high %v174_v57, %v174_v57  ;;  %v3554_v21 = vld [vmem:[%s5089_s1 + $0x4d4] ss:$8 sps:$4 sm:$0xff]  }
  0x1b   : > { %1051 = vmatpush1.bf16.msra.mxu1 %v3508_v22  ;;  %v4160_v12 = vrot.slane %v211_v3, 1  ;;  %v4165_v15 = vcombine.low %v175_v61, %v175_v61  ;;  %v2934_v17 = vcombine.low %v4143_v5, %v4146_v6  ;;  %v4175_v19 = vcombine.high %v175_v61, %v175_v61  ;;  %v3558_v36 = vld [vmem:[%s5089_s1 + $0xe4] ss:$8 sps:$4 sm:$0xff]   ;;  %v3563_v57 = vld [vmem:[%s5089_s1 + $0x4e0] ss:$8 sps:$4 sm:$0xff]  }
  0x1c   : > { %1889 = vmatpush1.bf16.msra.mxu0 %v3509_v23  ;;  %1052 = vmatprep.subr.bf16.mxu1 %v3510_v24  ;;  %v4173_v18 = vrot.slane %v2932_v7, %v4098_v49  ;;  %v223_v20 = vshrl.u32 %v4129_v62, 16  ;;  %v4183_v22 = vcombine.low %v4150_v8, %v4150_v8  ;;  %v4187_v23 = vcombine.high %v4150_v8, %v4150_v8  ;;  %v3564_v7 = vld [vmem:[%s5089_s1 + $0xf4] ss:$8 sps:$4 sm:$0xff]  }
  0x1d   : > { %1890 = vmatprep.subr.bf16.mxu0 %v3512_v25  ;;  %v225_v24 = vshll.u32 %v4129_v62, 16  ;;  %v230_v25 = vshrl.u32 %v4137_v1, 16  ;;  %vm2844_vm0 = vcmask 1042432   ;;  %vm2845_vm1 = vsmask.f32 2306 }
  0x1e   : > { %v267_v56 = vshll.u32 %v4183_v22, 16  ;;  %v272_v61 = vshrl.u32 %v4187_v23, 16  ;;  %vm2847_vm2 = vcmask 1046532   ;;  %vm2848_vm3 = vsmask.f32 6418  ;;  %vm5074_vm4 = vmand %vm2844_vm0, %vm2845_vm1 }
  0x1f   : > { %1053 = vmatpush1.bf16.msra.mxu1 %v3514_v26  ;;  %v3556_v26 = vld [vmem:[%s5089_s1 + $0xd0] ss:$8 sps:$4 sm:$0xff]   ;;  %vm2849_vm5 = vmand %vm2847_vm2, %vm2848_vm3 }
  0x20   : > { %1891 = vmatpush1.bf16.msra.mxu0 %v3515_v27  ;;  %1054 = vmatprep.subr.bf16.mxu1 %v3516_v28  ;;  %v4195_v27 = vrot.slane %v2934_v17, %v4098_v49  ;;  %v232_v28 = vshll.u32 %v4137_v1, 16  ;;  %v214_v17 = vor.u32 %v4160_v12, %v209_v2  ;;  %v3568_v2 = vld [vmem:[%s5089_s1 + $0xf0] ss:$8 sps:$4 sm:$0xff]   ;;  %vm2850_vm6 = vmor %vm2849_vm5, %vm5074_vm4 }
  0x21   : > { %1892 = vmatprep.subr.bf16.mxu0 %v3518_v29  ;;  %v237_v29 = vshrl.u32 %v4152_v9, 16  ;;  %v3569_v12 = vld [vmem:[%s5089_s1 + $0x4f0] ss:$8 sps:$4 sm:$0xff]  }
  0x22   : > { %v533_v37 = vcombine.high %v4173_v18, %v4195_v27  ;;  %v234_v38 = vrot.slane %v232_v28, 1 }
  0x23   : > { %1055 = vmatpush1.bf16.msra.mxu1 %v3520_v30  ;;  %v239_v30 = vshll.u32 %v4152_v9, 16 }
  0x24   : > { %1893 = vmatpush1.bf16.msra.mxu0 %v3521_v31  ;;  %1056 = vmatprep.subr.bf16.mxu1 %v3522_v32  ;;  %v3557_v31 = vld [vmem:[%s5089_s1 + $0x4d0] ss:$8 sps:$4 sm:$0xff]   ;;  %v227_v32 = vrot.slane %v225_v24, 1 }
  0x25   : > { %1894 = vmatprep.subr.bf16.mxu0 %v3524_v33  ;;  %v244_v33 = vshrl.u32 %v4163_v14, 16  ;;  %1072 = vmatprep.mubr.bf16.mxu1 %v533_v37 }
  0x26   : > { %v228_v42 = vor.u32 %v227_v32, %v223_v20 }
  0x27   : > { %1057 = vmatpush1.bf16.msra.mxu1 %v3526_v34  ;;  %v246_v34 = vshll.u32 %v4163_v14, 16 }
  0x28   : > { %1895 = vmatpush1.bf16.msra.mxu0 %v3527_v35  ;;  %1058 = vmatprep.subr.bf16.mxu1 %v3528_v39  ;;  %v251_v35 = vshrl.u32 %v4165_v15, 16  ;;  %v241_v39 = vrot.slane %v239_v30, 1  ;;  %v295_v30 = vrot.slane %v4137_v1, 1  ;;  %v3576_v1 = vld [vmem:[%s5089_s1 + $0x104] ss:$8 sps:$4 sm:$0xff]  }
  0x29   : > { %1896 = vmatprep.subr.bf16.mxu0 %v3530_v40  ;;  %v253_v40 = vshll.u32 %v4165_v15, 16 }
  0x2b   : > { %1059 = vmatpush1.bf16.msra.mxu1 %v3532_v41  ;;  %v3560_v41 = vld [vmem:[%s5089_s1 + $0x4e4] ss:$8 sps:$4 sm:$0xff]  }
  0x2c   : > { %1897 = vmatpush1.bf16.msra.mxu0 %v3533_v44  ;;  %1060 = vmatprep.subr.bf16.mxu1 %v3534_v45  ;;  %v248_v44 = vrot.slane %v246_v34, 1  ;;  %v258_v45 = vshrl.u32 %v4175_v19, 16  ;;  %v3585_v34 = vld [vmem:[%s5089_s1 + $0x504] ss:$8 sps:$4 sm:$0xff]  }
  0x2d   : > { %1898 = vmatprep.subr.bf16.mxu0 %v3536_v46  ;;  %v260_v46 = vshll.u32 %v4175_v19, 16 }
  0x2f   : > { %1061 = vmatpush1.bf16.msra.mxu1 %v3538_v47  ;;  %v220_v47 = vrot.slane %v218_v13, 1  ;;  %v262_v54 = vrot.slane %v260_v46, 1  ;;  %v269_v13 = vrot.slane %v267_v56, 1  ;;  %v292_v46 = vrot.slane %v4123_v58, 1 }
  0x30   : > { %1899 = vmatpush1.bf16.msra.mxu0 %v3539_v48  ;;  %1062 = vmatprep.subr.bf16.mxu1 %v3540_v50  ;;  %v235_v48 = vor.u32 %v234_v38, %v230_v25  ;;  %v242_v50 = vor.u32 %v241_v39, %v237_v29  ;;  %v294_v25 = vrot.slane %v4129_v62, 1  ;;  %v296_v62 = vrot.slane %v4152_v9, 1 }
  0x31   : > { %1900 = vmatprep.subr.bf16.mxu0 %v3542_v51  ;;  %v255_v51 = vrot.slane %v253_v40, 1  ;;  %v221_v24 = vor.u32 %v220_v47, %v216_v4  ;;  %v298_v9 = vrot.slane %v4165_v15, 1  ;;  %v299_v39 = vrot.slane %v4175_v19, 1 }
  0x32   : > { %v330_v3 = vcombine.low %v228_v42, %v235_v48  ;;  %v300_v42 = vrot.slane %v4183_v22, 1  ;;  %v293_v48 = vrot.slane %v4125_v59, 1  ;;  %v3586_v59 = vld [vmem:[%s5089_s1 + $0x110] ss:$8 sps:$4 sm:$0xff]  }
  0x33   : > { %1063 = vmatpush1.bf16.msra.mxu1 %v3544_v52  ;;  %v3562_v52 = vld [vmem:[%s5089_s1 + $0xe0] ss:$8 sps:$4 sm:$0xff]   ;;  %v256_v60 = vor.u32 %v255_v51, %v251_v35  ;;  %v305_v4 = vcombine.low %v214_v17, %v221_v24  ;;  %v297_v35 = vrot.slane %v4163_v14, 1  ;;  %v396_v47 = vcombine.low %v298_v9, %v299_v39  ;;  %v3589_v24 = vld [vmem:[%s5089_s1 + $0x510] ss:$8 sps:$4 sm:$0xff]  }
  0x34   : > { %1901 = vmatpush1.bf16.msra.mxu0 %v3545_v53  ;;  %1064 = vmatprep.subr.bf16.mxu1 %v3546_v55  ;;  %v249_v53 = vor.u32 %v248_v44, %v244_v33  ;;  %v265_v55 = vshrl.u32 %v4183_v22, 16  ;;  %v301_v44 = vrot.slane %v4187_v23, 1  ;;  %v3574_v14 = vld [vmem:[%s5089_s1 + $0x100] ss:$8 sps:$4 sm:$0xff]   ;;  %v3588_v22 = vld [vmem:[%s5089_s1 + $0x114] ss:$8 sps:$4 sm:$0xff]  }
  0x35   : > { %1902 = vmatprep.subr.bf16.mxu0 %v3548_v0  ;;  %v274_v0 = vshll.u32 %v4187_v23, 16  ;;  %v319_v38 = vrot.slane %v305_v4, %v4098_v49  ;;  %v371_v23 = vcombine.low %v296_v62, %v297_v35  ;;  %v3592_v17 = vld [vmem:[%s5089_s1 + $0x120] ss:$8 sps:$4 sm:$0xff]   ;;  %v3601_v4 = vld [vmem:[%s5089_s1 + $0x530] ss:$8 sps:$4 sm:$0xff]  }
  0x36   : > { %v1190_v58 = vcombine.low %v300_v42, %v301_v44  ;;  %v3609_v62 = vld [vmem:[%s5089_s1 + $0x544] ss:$8 sps:$4 sm:$0xff]   ;;  %v3616_v35 = vld [vmem:[%s5089_s1 + $0x160] ss:$8 sps:$4 sm:$0xff]   ;;  %v3622_v9 = vld [vmem:[%s5089_s1 + $0x170] ss:$8 sps:$4 sm:$0xff]  }
  0x37   : > { %1065 = vmatpush1.bf16.msra.mxu1 %v3550_v10  ;;  %v3566_v10 = vld [vmem:[%s5089_s1 + $0x4f4] ss:$8 sps:$4 sm:$0xff]   ;;  %v276_v20 = vrot.slane %v274_v0, 1  ;;  %v3630_v39 = vld [vmem:[%s5089_s1 + $0x184] ss:$8 sps:$4 sm:$0xff]  }
  0x38   : > { %1903 = vmatpush1.bf16.msra.mxu0 %v3551_v11  ;;  %1066 = vmatprep.subr.bf16.mxu1 %v3552_v16  ;;  %v263_v11 = vor.u32 %v262_v54, %v258_v45  ;;  %v355_v16 = vcombine.low %v242_v50, %v249_v53  ;;  %v4287_v53 = vrot.slane %v371_v23, %v4098_v49  ;;  %v3628_v42 = vld [vmem:[%s5089_s1 + $0x180] ss:$8 sps:$4 sm:$0xff]   ;;  %v3636_v44 = vld [vmem:[%s5089_s1 + $0x194] ss:$8 sps:$4 sm:$0xff]  }
  0x39   : > { %1904 = vmatprep.subr.bf16.mxu0 %v3554_v21  ;;  %v344_v21 = vrot.slane %v330_v3, %v4098_v49  ;;  %v4290_v54 = vrot.slane %v396_v47, %v4098_v49  ;;  %v3631_v23 = vld [vmem:[%s5089_s1 + $0x580] ss:$8 sps:$4 sm:$0xff]   ;;  %v3639_v47 = vld [vmem:[%s5089_s1 + $0x594] ss:$8 sps:$4 sm:$0xff]  }
  0x3a   : > { %v369_v28 = vrot.slane %v355_v16, %v4098_v49  ;;  %v380_v29 = vcombine.low %v256_v60, %v263_v11  ;;  %v4301_v60 = vrot.slane %v1190_v58, %v4098_v49  ;;  %v3645_v58 = vld [vmem:[%s5089_s1 + $0x5a4] ss:$8 sps:$4 sm:$0xff]  }
  0x3b   : > { %1067 = vmatpush1.bf16.msra.mxu1 %v3556_v26  ;;  %v270_v26 = vor.u32 %v269_v13, %v265_v55  ;;  %v2933_v15 = vcombine.low %v319_v38, %v344_v21  ;;  %v4292_v55 = vcombine.low %v292_v46, %v293_v48  ;;  %v3591_v13 = vld [vmem:[%s5089_s1 + $0x514] ss:$8 sps:$4 sm:$0xff]   ;;  %v3621_v38 = vld [vmem:[%s5089_s1 + $0x564] ss:$8 sps:$4 sm:$0xff]   ;;  %v3634_v46 = vld [vmem:[%s5089_s1 + $0x190] ss:$8 sps:$4 sm:$0xff]  }
  0x3c   : > { %1905 = vmatpush1.bf16.msra.mxu0 %v3557_v31  ;;  %1068 = vmatprep.subr.bf16.mxu1 %v3558_v36  ;;  %v277_v31 = vor.u32 %v276_v20, %v272_v61  ;;  %v394_v32 = vrot.slane %v380_v29, %v4098_v49  ;;  %v3129_v33 = vcombine.low %v344_v21, %v369_v28  ;;  %v3594_v61 = vld [vmem:[%s5089_s1 + $0x124] ss:$8 sps:$4 sm:$0xff]   ;;  %v3600_v21 = vld [vmem:[%s5089_s1 + $0x134] ss:$8 sps:$4 sm:$0xff]   ;;  %v3640_v48 = vld [vmem:[%s5089_s1 + $0x1a0] ss:$8 sps:$4 sm:$0xff]  }
  0x3d   : > { %1906 = vmatprep.subr.bf16.mxu0 %v3560_v41  ;;  %v346_v36 = vcombine.low %v294_v25, %v295_v30  ;;  %v532_v41 = vcombine.low %v4173_v18, %v4195_v27  ;;  %v1332_v11 = vcombine.low %v4290_v54, %v4301_v60  ;;  %v3606_v29 = vld [vmem:[%s5089_s1 + $0x144] ss:$8 sps:$4 sm:$0xff]   ;;  %v3595_v30 = vld [vmem:[%s5089_s1 + $0x520] ss:$8 sps:$4 sm:$0xff]  }
  0x3e   : > { %v1174_v37 = vcombine.low %v270_v26, %v277_v31  ;;  %v2935_v40 = vcombine.low %v369_v28, %v394_v32  ;;  %v1312_v51 = vrot.slane %v3129_v33, %v4098_v49  ;;  %v3597_v26 = vld [vmem:[%s5089_s1 + $0x524] ss:$8 sps:$4 sm:$0xff]   ;;  %v3598_v28 = vld [vmem:[%s5089_s1 + $0x130] ss:$8 sps:$4 sm:$0xff]   ;;  %v3612_v31 = vld [vmem:[%s5089_s1 + $0x154] ss:$8 sps:$4 sm:$0xff]  }
  0x3f   : > { %1069 = vmatpush1.bf16.msra.mxu1 %v3562_v52  ;;  %v4271_v19 = vrot.slane %v346_v36, %v4098_v49  ;;  %v4284_v52 = vrot.slane %v2933_v15, %v4098_v49  ;;  %v4323_v20 = vrot.slane %v1332_v11, %v4098_v49  ;;  %v3607_v33 = vld [vmem:[%s5089_s1 + $0x540] ss:$8 sps:$4 sm:$0xff]   ;;  %v3624_v36 = vld [vmem:[%s5089_s1 + $0x174] ss:$8 sps:$4 sm:$0xff]   ;;  %v3633_v15 = vld [vmem:[%s5089_s1 + $0x584] ss:$8 sps:$4 sm:$0xff]  }
  0x40   : > { %1907 = vmatpush1.bf16.msra.mxu0 %v3563_v57  ;;  %1070 = vmatprep.subr.bf16.mxu1 %v3564_v7  ;;  %v4268_v45 = vrot.slane %v1174_v37, %v4098_v49  ;;  %v4275_v18 = vrot.slane %v2935_v40, %v4098_v49  ;;  %v3583_v7 = vld [vmem:[%s5089_s1 + $0x500] ss:$8 sps:$4 sm:$0xff]   ;;  %v3613_v37 = vld [vmem:[%s5089_s1 + $0x550] ss:$8 sps:$4 sm:$0xff]  }
  0x41   : > { %1908 = vmatprep.subr.bf16.mxu0 %v3566_v10  ;;  %v1331_v0 = vcombine.low %v4271_v19, %v4287_v53  ;;  %v3619_v40 = vld [vmem:[%s5089_s1 + $0x560] ss:$8 sps:$4 sm:$0xff]   ;;  %v3658_v11 = vld [vmem:[%s5089_s1 + $0x1d0] ss:$8 sps:$4 sm:$0xff]  }
  0x42   : > { %v3131_v50 = vcombine.low %v394_v32, %v4268_v45  ;;  %v535_v57 = vcombine.high %v4284_v52, %v4275_v18  ;;  %v3618_v32 = vld [vmem:[%s5089_s1 + $0x164] ss:$8 sps:$4 sm:$0xff]  }
  0x43   : > { %1071 = vmatpush1.bf16.msra.mxu1 %v3568_v2  ;;  %v4317_v16 = vrot.slane %v1331_v0, %v4098_v49  ;;  %v3603_v2 = vld [vmem:[%s5089_s1 + $0x534] ss:$8 sps:$4 sm:$0xff]   ;;  %v3652_v0 = vld [vmem:[%s5089_s1 + $0x1c0] ss:$8 sps:$4 sm:$0xff]  }
  0x44   : > { %1909 = vmatpush1.bf16.msra.mxu0 %v3569_v12  ;;  %1083 = vmatprep.subr.bf16.mxu1 %v3576_v1  ;;  %v1326_v56 = vrot.slane %v3131_v50, %v4098_v49  ;;  %v3604_v12 = vld [vmem:[%s5089_s1 + $0x140] ss:$8 sps:$4 sm:$0xff]   ;;  %v3610_v1 = vld [vmem:[%s5089_s1 + $0x150] ss:$8 sps:$4 sm:$0xff]   ;;  %v3648_v50 = vld [vmem:[%s5089_s1 + $0x1b4] ss:$8 sps:$4 sm:$0xff]  }
  0x45   : > { %1921 = vmatprep.subr.bf16.mxu0 %v3585_v34  ;;  %v1348_v25 = vcombine.high %v4317_v16, %v4323_v20  ;;  %v3615_v34 = vld [vmem:[%s5089_s1 + $0x554] ss:$8 sps:$4 sm:$0xff]  }
  0x46   : > { %1073 = vmatmul.mubr.bf16.vlgmr.msra.gmra.mrb[0].mxu1 %v532_v41  ;;  %v1330_v3 = vcombine.high %v1312_v51, %v1326_v56  ;;  %v1329_v10 = vcombine.low %v1312_v51, %v1326_v56  ;;  %v3627_v41 = vld [vmem:[%s5089_s1 + $0x574] ss:$8 sps:$4 sm:$0xff]   ;;  %v3637_v51 = vld [vmem:[%s5089_s1 + $0x590] ss:$8 sps:$4 sm:$0xff]  }
  0x47   : > { %1084 = vmatpush1.bf16.msra.mxu1 %v3574_v14  ;;  %1115 = vmatprep.mubr.bf16.mxu1 %v535_v57  ;;  %v3625_v14 = vld [vmem:[%s5089_s1 + $0x570] ss:$8 sps:$4 sm:$0xff]   ;;  %v3643_v57 = vld [vmem:[%s5089_s1 + $0x5a0] ss:$8 sps:$4 sm:$0xff]  }
  0x48   : > { %1085 = vmatprep.subr.bf16.mxu1 %v3588_v22  ;;  %1910 = vmatprep.mubr.bf16.mxu0 %v1330_v3  ;;  %v3642_v22 = vld [vmem:[%s5089_s1 + $0x1a4] ss:$8 sps:$4 sm:$0xff]   ;;  %v3646_v56 = vld [vmem:[%s5089_s1 + $0x1b0] ss:$8 sps:$4 sm:$0xff]   ;;  %v3660_v3 = vld [vmem:[%s5089_s1 + $0x1d4] ss:$8 sps:$4 sm:$0xff]  }
  0x49   : > { %1911 = vmatmul.mubr.bf16.vlgmr.msra.gmra.mrb[0].mxu0 %v1329_v10  ;;  %v3657_v10 = vld [vmem:[%s5089_s1 + $0x5c4] ss:$8 sps:$4 sm:$0xff]  }
  0x4a   : > { %1922 = vmatpush1.bf16.msra.mxu0 %v3583_v7  ;;  %1953 = vmatprep.mubr.bf16.mxu0 %v1348_v25  ;;  %v3649_v7 = vld [vmem:[%s5089_s1 + $0x5b0] ss:$8 sps:$4 sm:$0xff]   ;;  %v537_v25 = vcombine.low %v4287_v53, %v4290_v54 }
  0x4b   : > { %1086 = vmatpush1.bf16.msra.mxu1 %v3586_v59  ;;  %1923 = vmatprep.subr.bf16.mxu0 %v3591_v13  ;;  %v3654_v59 = vld [vmem:[%s5089_s1 + $0x1c4] ss:$8 sps:$4 sm:$0xff]   ;;  %v328_v13 = vrot.slane %v4292_v55, %v4098_v49  ;;  %v3664_v55 = vld [vmem:[%s5089_s1 + $0x1e0] ss:$8 sps:$4 sm:$0xff]  }
  0x4c   : > { %1087 = vmatprep.subr.bf16.mxu1 %v3594_v61  ;;  %v3651_v61 = vld [vmem:[%s5089_s1 + $0x5b4] ss:$8 sps:$4 sm:$0xff]   ;;  %v4492_v54 = vrot.slane %v537_v25, %v4098_v49 }
  0x4d   : > { %v3732_v25 = vld [vmem:[%s5089_s1 + $0x294] ss:$8 sps:$4 sm:$0xff]  }
  0x4e   : > { %1924 = vmatpush1.bf16.msra.mxu0 %v3589_v24  ;;  %v3663_v24 = vld [vmem:[%s5089_s1 + $0x5d4] ss:$8 sps:$4 sm:$0xff]  }
  0x4f   : > { %1088 = vmatpush1.bf16.msra.mxu1 %v3592_v17  ;;  %1925 = vmatprep.subr.bf16.mxu0 %v3597_v26  ;;  %v3666_v17 = vld [vmem:[%s5089_s1 + $0x1e4] ss:$8 sps:$4 sm:$0xff]   ;;  %v536_v26 = vcombine.low %v328_v13, %v4271_v19  ;;  %v3670_v19 = vld [vmem:[%s5089_s1 + $0x1f0] ss:$8 sps:$4 sm:$0xff]  }
  0x50   : > { %1089 = vmatprep.subr.bf16.mxu1 %v3600_v21  ;;  %v3655_v21 = vld [vmem:[%s5089_s1 + $0x5c0] ss:$8 sps:$4 sm:$0xff]   ;;  %v3718_v13 = vld [vmem:[%s5089_s1 + $0x270] ss:$8 sps:$4 sm:$0xff]  }
  0x51   : > { %v4489_v53 = vrot.slane %v536_v26, %v4098_v49  ;;  %v3721_v26 = vld [vmem:[%s5089_s1 + $0x670] ss:$8 sps:$4 sm:$0xff]  }
  0x52   : > { %1926 = vmatpush1.bf16.msra.mxu0 %v3595_v30  ;;  %v3669_v30 = vld [vmem:[%s5089_s1 + $0x5e4] ss:$8 sps:$4 sm:$0xff]  }
  0x53   : > { %1090 = vmatpush1.bf16.msra.mxu1 %v3598_v28  ;;  %1927 = vmatprep.subr.bf16.mxu0 %v3603_v2  ;;  %v3672_v28 = vld [vmem:[%s5089_s1 + $0x1f4] ss:$8 sps:$4 sm:$0xff]   ;;  %v3678_v2 = vld [vmem:[%s5089_s1 + $0x204] ss:$8 sps:$4 sm:$0xff]  }
  0x54   : > { %1091 = vmatprep.subr.bf16.mxu1 %v3606_v29  ;;  %v3661_v29 = vld [vmem:[%s5089_s1 + $0x5d0] ss:$8 sps:$4 sm:$0xff]  }
  0x56   : > { %1928 = vmatpush1.bf16.msra.mxu0 %v3601_v4  ;;  %v534_v4 = vcombine.low %v4284_v52, %v4275_v18  ;;  %v3673_v52 = vld [vmem:[%s5089_s1 + $0x5f0] ss:$8 sps:$4 sm:$0xff]  }
  0x57   : > { %1092 = vmatpush1.bf16.msra.mxu1 %v3604_v12  ;;  %1929 = vmatprep.subr.bf16.mxu0 %v3609_v62  ;;  %v3667_v12 = vld [vmem:[%s5089_s1 + $0x5e0] ss:$8 sps:$4 sm:$0xff]  }
  0x58   : > { %1093 = vmatprep.subr.bf16.mxu1 %v3612_v31  ;;  %v3675_v31 = vld [vmem:[%s5089_s1 + $0x5f4] ss:$8 sps:$4 sm:$0xff]   ;;  %v3676_v62 = vld [vmem:[%s5089_s1 + $0x200] ss:$8 sps:$4 sm:$0xff]  }
  0x5a   : > { %1930 = vmatpush1.bf16.msra.mxu0 %v3607_v33  ;;  %v3684_v33 = vld [vmem:[%s5089_s1 + $0x214] ss:$8 sps:$4 sm:$0xff]  }
  0x5b   : > { %1094 = vmatpush1.bf16.msra.mxu1 %v3610_v1  ;;  %1931 = vmatprep.subr.bf16.mxu0 %v3615_v34  ;;  %v553_v1 = vcombine.high %v4489_v53, %v4492_v54  ;;  %v3128_v34 = vcombine.low %v4132_v63, %v4143_v5  ;;  %v3679_v63 = vld [vmem:[%s5089_s1 + $0x600] ss:$8 sps:$4 sm:$0xff]   ;;  %v1347_v5 = vcombine.low %v4317_v16, %v4323_v20  ;;  %v3696_v20 = vld [vmem:[%s5089_s1 + $0x234] ss:$8 sps:$4 sm:$0xff]  }
  0x5c   : > { %1095 = vmatprep.subr.bf16.mxu1 %v3618_v32  ;;  %v1181_v32 = vrot.slane %v4150_v8, %v4098_v49  ;;  %v3681_v8 = vld [vmem:[%s5089_s1 + $0x604] ss:$8 sps:$4 sm:$0xff]   ;;  %v3688_v16 = vld [vmem:[%s5089_s1 + $0x220] ss:$8 sps:$4 sm:$0xff]  }
  0x5e   : > { %1932 = vmatpush1.bf16.msra.mxu0 %v3613_v37  ;;  %v4528_v37 = vrot.slane %v3128_v34, %v4098_v49  ;;  %v3739_v34 = vld [vmem:[%s5089_s1 + $0x6a0] ss:$8 sps:$4 sm:$0xff]  }
  0x5f   : > { %1096 = vmatpush1.bf16.msra.mxu1 %v3616_v35  ;;  %1933 = vmatprep.subr.bf16.mxu0 %v3621_v38  ;;  %v3130_v35 = vcombine.low %v4146_v6, %v1181_v32  ;;  %v3690_v6 = vld [vmem:[%s5089_s1 + $0x224] ss:$8 sps:$4 sm:$0xff]  }
  0x60   : > { %1097 = vmatprep.subr.bf16.mxu1 %v3624_v36  ;;  %v3682_v36 = vld [vmem:[%s5089_s1 + $0x210] ss:$8 sps:$4 sm:$0xff]  }
  0x61   : > { %v4531_v38 = vrot.slane %v3130_v35, %v4098_v49  ;;  %v3742_v35 = vld [vmem:[%s5089_s1 + $0x2b0] ss:$8 sps:$4 sm:$0xff]  }
  0x62   : > { %1934 = vmatpush1.bf16.msra.mxu0 %v3619_v40  ;;  %v3687_v40 = vld [vmem:[%s5089_s1 + $0x614] ss:$8 sps:$4 sm:$0xff]  }
  0x63   : > { %1098 = vmatpush1.bf16.msra.mxu1 %v3622_v9  ;;  %1935 = vmatprep.subr.bf16.mxu0 %v3627_v41  ;;  %v4542_v9 = vld [vmem:[%s4106_s5 + $0x28] sm:$0x77] }
  0x64   : > { %1099 = vmatprep.subr.bf16.mxu1 %v3630_v39  ;;  %v1327_v39 = vcombine.low %v4528_v37, %v4531_v38  ;;  %v1984_v41 = vrot.slane %v4542_v9, %v4098_v49 }
  0x66   : > { %1936 = vmatpush1.bf16.msra.mxu0 %v3625_v14  ;;  %v3693_v14 = vld [vmem:[%s5089_s1 + $0x624] ss:$8 sps:$4 sm:$0xff]  }
  0x67   : > { %1100 = vmatpush1.bf16.msra.mxu1 %v3628_v42  ;;  %1937 = vmatprep.subr.bf16.mxu0 %v3633_v15  ;;  %v3324_v42 = vcombine.low %v1181_v32, %v1984_v41  ;;  %v3756_v41 = vld [vmem:[%s5089_s1 + $0x2d4] ss:$8 sps:$4 sm:$0xff]  }
  0x68   : > { %1101 = vmatprep.subr.bf16.mxu1 %v3636_v44  ;;  %v3685_v44 = vld [vmem:[%s5089_s1 + $0x610] ss:$8 sps:$4 sm:$0xff]  }
  0x69   : > { %v4564_v15 = vrot.slane %v3324_v42, %v4098_v49 }
  0x6a   : > { %1938 = vmatpush1.bf16.msra.mxu0 %v3631_v23 }
  0x6b   : > { %1102 = vmatpush1.bf16.msra.mxu1 %v3634_v46  ;;  %1939 = vmatprep.subr.bf16.mxu0 %v3639_v47  ;;  %v3694_v46 = vld [vmem:[%s5089_s1 + $0x230] ss:$8 sps:$4 sm:$0xff]   ;;  %v2115_v23 = vcombine.high %v4195_v27, %v4564_v15  ;;  %v3691_v47 = vld [vmem:[%s5089_s1 + $0x620] ss:$8 sps:$4 sm:$0xff]  }
  0x6c   : > { %1103 = vmatprep.subr.bf16.mxu1 %v3642_v22  ;;  %v3702_v22 = vld [vmem:[%s5089_s1 + $0x244] ss:$8 sps:$4 sm:$0xff]  }
  0x6e   : > { %1940 = vmatpush1.bf16.msra.mxu0 %v3637_v51  ;;  %v3708_v51 = vld [vmem:[%s5089_s1 + $0x254] ss:$8 sps:$4 sm:$0xff]  }
  0x6f   : > { %1104 = vmatpush1.bf16.msra.mxu1 %v3640_v48  ;;  %1941 = vmatprep.subr.bf16.mxu0 %v3645_v58  ;;  %v3699_v48 = vld [vmem:[%s5089_s1 + $0x634] ss:$8 sps:$4 sm:$0xff]   ;;  %v3697_v58 = vld [vmem:[%s5089_s1 + $0x630] ss:$8 sps:$4 sm:$0xff]  }
  0x70   : > { %1105 = vmatprep.subr.bf16.mxu1 %v3648_v50  ;;  %v3700_v50 = vld [vmem:[%s5089_s1 + $0x240] ss:$8 sps:$4 sm:$0xff]  }
  0x72   : > { %1942 = vmatpush1.bf16.msra.mxu0 %v3643_v57  ;;  %v3714_v57 = vld [vmem:[%s5089_s1 + $0x264] ss:$8 sps:$4 sm:$0xff]  }
  0x73   : > { %1106 = vmatpush1.bf16.msra.mxu1 %v3646_v56  ;;  %1943 = vmatprep.subr.bf16.mxu0 %v3651_v61  ;;  %v3705_v56 = vld [vmem:[%s5089_s1 + $0x644] ss:$8 sps:$4 sm:$0xff]   ;;  %v3703_v61 = vld [vmem:[%s5089_s1 + $0x640] ss:$8 sps:$4 sm:$0xff]  }
  0x74   : > { %1107 = vmatprep.subr.bf16.mxu1 %v3654_v59  ;;  %v3706_v59 = vld [vmem:[%s5089_s1 + $0x250] ss:$8 sps:$4 sm:$0xff]  }
  0x76   : > { %1944 = vmatpush1.bf16.msra.mxu0 %v3649_v7  ;;  %v3720_v7 = vld [vmem:[%s5089_s1 + $0x274] ss:$8 sps:$4 sm:$0xff]  }
  0x77   : > { %1108 = vmatpush1.bf16.msra.mxu1 %v3652_v0  ;;  %1945 = vmatprep.subr.bf16.mxu0 %v3657_v10  ;;  %v3711_v0 = vld [vmem:[%s5089_s1 + $0x654] ss:$8 sps:$4 sm:$0xff]   ;;  %v3709_v10 = vld [vmem:[%s5089_s1 + $0x650] ss:$8 sps:$4 sm:$0xff]  }
  0x78   : > { %1109 = vmatprep.subr.bf16.mxu1 %v3660_v3  ;;  %v3712_v3 = vld [vmem:[%s5089_s1 + $0x260] ss:$8 sps:$4 sm:$0xff]  }
  0x7a   : > { %1946 = vmatpush1.bf16.msra.mxu0 %v3655_v21  ;;  %v3715_v21 = vld [vmem:[%s5089_s1 + $0x660] ss:$8 sps:$4 sm:$0xff]  }
  0x7b   : > { %1110 = vmatpush1.bf16.msra.mxu1 %v3658_v11  ;;  %1947 = vmatprep.subr.bf16.mxu0 %v3663_v24  ;;  %v3717_v11 = vld [vmem:[%s5089_s1 + $0x664] ss:$8 sps:$4 sm:$0xff]   ;;  %v3723_v24 = vld [vmem:[%s5089_s1 + $0x674] ss:$8 sps:$4 sm:$0xff]  }
  0x7c   : > { %1111 = vmatprep.subr.bf16.mxu1 %v3666_v17  ;;  %v3726_v17 = vld [vmem:[%s5089_s1 + $0x284] ss:$8 sps:$4 sm:$0xff]  }
  0x7e   : > { %1948 = vmatpush1.bf16.msra.mxu0 %v3661_v29  ;;  %v3730_v29 = vld [vmem:[%s5089_s1 + $0x290] ss:$8 sps:$4 sm:$0xff]  }
  0x7f   : > { %1112 = vmatpush1.bf16.msra.mxu1 %v3664_v55  ;;  %1949 = vmatprep.subr.bf16.mxu0 %v3669_v30  ;;  %v3724_v55 = vld [vmem:[%s5089_s1 + $0x280] ss:$8 sps:$4 sm:$0xff]   ;;  %v3738_v30 = vld [vmem:[%s5089_s1 + $0x2a4] ss:$8 sps:$4 sm:$0xff]  }
  0x80   : > { %1113 = vmatprep.subr.bf16.mxu1 %v3672_v28  ;;  %v3729_v28 = vld [vmem:[%s5089_s1 + $0x684] ss:$8 sps:$4 sm:$0xff]  }
  0x82   : > { %1950 = vmatpush1.bf16.msra.mxu0 %v3667_v12  ;;  %v4655_v12 = vcombine.high %v4542_v9, %v4542_v9 }
  0x83   : > { %1114 = vmatpush1.bf16.msra.mxu1 %v3670_v19  ;;  %1951 = vmatprep.subr.bf16.mxu0 %v3675_v31  ;;  %v3727_v19 = vld [vmem:[%s5089_s1 + $0x680] ss:$8 sps:$4 sm:$0xff]   ;;  %v3735_v31 = vld [vmem:[%s5089_s1 + $0x694] ss:$8 sps:$4 sm:$0xff]  }
  0x84   : > { %1126 = vmatprep.subr.bf16.mxu1 %v3678_v2  ;;  %v4651_v2 = vcombine.low %v4542_v9, %v4542_v9  ;;  %v3747_v9 = vld [vmem:[%s5089_s1 + $0x6b4] ss:$8 sps:$4 sm:$0xff]  }
  0x86   : > { %1116 = vmatmul.mubr.bf16.vlgmr.msra.gmra.mrb[0].mxu1 %v534_v4  ;;  %1952 = vmatpush1.bf16.msra.mxu0 %v3673_v52  ;;  %v3736_v4 = vld [vmem:[%s5089_s1 + $0x2a0] ss:$8 sps:$4 sm:$0xff]   ;;  %v281_v32 = vshll.u32 %v4651_v2, 16  ;;  %v3741_v52 = vld [vmem:[%s5089_s1 + $0x6a4] ss:$8 sps:$4 sm:$0xff]  }
  0x87   : > { %1127 = vmatpush1.bf16.msra.mxu1 %v3676_v62  ;;  %1158 = vmatprep.mubr.bf16.mxu1 %v553_v1  ;;  %v3744_v62 = vld [vmem:[%s5089_s1 + $0x2b4] ss:$8 sps:$4 sm:$0xff]   ;;  %v3733_v1 = vld [vmem:[%s5089_s1 + $0x690] ss:$8 sps:$4 sm:$0xff]  }
  0x88   : > { %1128 = vmatprep.subr.bf16.mxu1 %v3684_v33  ;;  %2614 = vmatprep.subr.bf16.mxu0 %v3681_v8  ;;  %v288_v33 = vshll.u32 %v4655_v12, 16  ;;  %v3750_v8 = vld [vmem:[%s5089_s1 + $0x2c4] ss:$8 sps:$4 sm:$0xff]  }
  0x89   : > { %1954 = vmatmul.mubr.bf16.vlgmr.msra.gmra.mrb[0].mxu0 %v1347_v5  ;;  %v286_v5 = vshrl.u32 %v4655_v12, 16 }
  0x8a   : > { %2615 = vmatpush1.bf16.msra.mxu0 %v3679_v63  ;;  %2646 = vmatprep.mubr.bf16.mxu0 %v2115_v23  ;;  %v283_v63 = vrot.slane %v281_v32, 1  ;;  %v3798_v32 = vld [vmem:[%s5089_s1 + $0x340] ss:$8 sps:$4 sm:$0xff]  }
  0x8b   : > { %1129 = vmatpush1.bf16.msra.mxu1 %v3682_v36  ;;  %2616 = vmatprep.subr.bf16.mxu0 %v3687_v40  ;;  %v279_v36 = vshrl.u32 %v4651_v2, 16  ;;  %v3748_v40 = vld [vmem:[%s5089_s1 + $0x2c0] ss:$8 sps:$4 sm:$0xff]  }
  0x8c   : > { %1130 = vmatprep.subr.bf16.mxu1 %v3690_v6  ;;  %v290_v6 = vrot.slane %v288_v33, 1  ;;  %v3806_v33 = vld [vmem:[%s5089_s1 + $0x354] ss:$8 sps:$4 sm:$0xff]  }
  0x8e   : > { %2617 = vmatpush1.bf16.msra.mxu0 %v3685_v44  ;;  %v291_v42 = vor.u32 %v290_v6, %v286_v5  ;;  %v3753_v44 = vld [vmem:[%s5089_s1 + $0x6c4] ss:$8 sps:$4 sm:$0xff]   ;;  %v3810_v5 = vld [vmem:[%s5089_s1 + $0x360] ss:$8 sps:$4 sm:$0xff]   ;;  %v3818_v6 = vld [vmem:[%s5089_s1 + $0x374] ss:$8 sps:$4 sm:$0xff]  }
  0x8f   : > { %1131 = vmatpush1.bf16.msra.mxu1 %v3688_v16  ;;  %2618 = vmatprep.subr.bf16.mxu0 %v3693_v14  ;;  %v3745_v16 = vld [vmem:[%s5089_s1 + $0x6b0] ss:$8 sps:$4 sm:$0xff]  }
  0x90   : > { %1132 = vmatprep.subr.bf16.mxu1 %v3696_v20  ;;  %v284_v20 = vor.u32 %v283_v63, %v279_v36  ;;  %v3754_v14 = vld [vmem:[%s5089_s1 + $0x2d0] ss:$8 sps:$4 sm:$0xff]   ;;  %v3801_v36 = vld [vmem:[%s5089_s1 + $0x740] ss:$8 sps:$4 sm:$0xff]   ;;  %v3809_v63 = vld [vmem:[%s5089_s1 + $0x754] ss:$8 sps:$4 sm:$0xff]  }
  0x92   : > { %2619 = vmatpush1.bf16.msra.mxu0 %v3691_v47  ;;  %v1977_v23 = vcombine.low %v284_v20, %v291_v42  ;;  %v3759_v47 = vld [vmem:[%s5089_s1 + $0x6d4] ss:$8 sps:$4 sm:$0xff]   ;;  %v3813_v20 = vld [vmem:[%s5089_s1 + $0x760] ss:$8 sps:$4 sm:$0xff]  }
  0x93   : > { %1133 = vmatpush1.bf16.msra.mxu1 %v3694_v46  ;;  %2620 = vmatprep.subr.bf16.mxu0 %v3699_v48  ;;  %v3762_v46 = vld [vmem:[%s5089_s1 + $0x2e4] ss:$8 sps:$4 sm:$0xff]   ;;  %v3760_v48 = vld [vmem:[%s5089_s1 + $0x2e0] ss:$8 sps:$4 sm:$0xff]   ;;  %v3821_v42 = vld [vmem:[%s5089_s1 + $0x774] ss:$8 sps:$4 sm:$0xff]  }
  0x94   : > { %1134 = vmatprep.subr.bf16.mxu1 %v3702_v22  ;;  %v3751_v22 = vld [vmem:[%s5089_s1 + $0x6c0] ss:$8 sps:$4 sm:$0xff]  }
  0x96   : > { %2621 = vmatpush1.bf16.msra.mxu0 %v3697_v58  ;;  %v1991_v58 = vrot.slane %v1977_v23, %v4098_v49  ;;  %v3828_v23 = vld [vmem:[%s5089_s1 + $0x390] ss:$8 sps:$4 sm:$0xff]  }
  0x97   : > { %1135 = vmatpush1.bf16.msra.mxu1 %v3700_v50  ;;  %2622 = vmatprep.subr.bf16.mxu0 %v3705_v56  ;;  %v3768_v50 = vld [vmem:[%s5089_s1 + $0x2f4] ss:$8 sps:$4 sm:$0xff]   ;;  %v3765_v56 = vld [vmem:[%s5089_s1 + $0x6e4] ss:$8 sps:$4 sm:$0xff]  }
  0x98   : > { %1136 = vmatprep.subr.bf16.mxu1 %v3708_v51  ;;  %v3757_v51 = vld [vmem:[%s5089_s1 + $0x6d0] ss:$8 sps:$4 sm:$0xff]  }
  0x9a   : > { %2623 = vmatpush1.bf16.msra.mxu0 %v3703_v61  ;;  %v3774_v61 = vld [vmem:[%s5089_s1 + $0x304] ss:$8 sps:$4 sm:$0xff]  }
  0x9b   : > { %1137 = vmatpush1.bf16.msra.mxu1 %v3706_v59  ;;  %2624 = vmatprep.subr.bf16.mxu0 %v3711_v0  ;;  %v3766_v59 = vld [vmem:[%s5089_s1 + $0x2f0] ss:$8 sps:$4 sm:$0xff]   ;;  %v303_v0 = vrot.slane %v4655_v12, 1  ;;  %v3791_v12 = vld [vmem:[%s5089_s1 + $0x724] ss:$8 sps:$4 sm:$0xff]  }
  0x9c   : > { %1138 = vmatprep.subr.bf16.mxu1 %v3714_v57  ;;  %v302_v57 = vrot.slane %v4651_v2, 1  ;;  %v3783_v2 = vld [vmem:[%s5089_s1 + $0x710] ss:$8 sps:$4 sm:$0xff]  }
  0x9e   : > { %2625 = vmatpush1.bf16.msra.mxu0 %v3709_v10  ;;  %v3771_v10 = vld [vmem:[%s5089_s1 + $0x6f4] ss:$8 sps:$4 sm:$0xff]  }
  0x9f   : > { %1139 = vmatpush1.bf16.msra.mxu1 %v3712_v3  ;;  %2626 = vmatprep.subr.bf16.mxu0 %v3717_v11  ;;  %v3763_v3 = vld [vmem:[%s5089_s1 + $0x6e0] ss:$8 sps:$4 sm:$0xff]   ;;  %v552_v11 = vcombine.low %v4489_v53, %v4492_v54  ;;  %v3769_v53 = vld [vmem:[%s5089_s1 + $0x6f0] ss:$8 sps:$4 sm:$0xff]  }
  0xa0   : > { %1140 = vmatprep.subr.bf16.mxu1 %v3720_v7  ;;  %v3325_v7 = vcombine.low %v4268_v45, %v1991_v58  ;;  %v3782_v45 = vld [vmem:[%s5089_s1 + $0x314] ss:$8 sps:$4 sm:$0xff]  }
  0xa1   : > { %v3842_v58 = vld [vmem:[%s5089_s1 + $0x3b4] ss:$8 sps:$4 sm:$0xff]  }
  0xa2   : > { %2627 = vmatpush1.bf16.msra.mxu0 %v3715_v21  ;;  %v1328_v21 = vcombine.high %v4528_v37, %v4531_v38  ;;  %v3875_v37 = vld [vmem:[%s5089_s1 + $0x814] ss:$8 sps:$4 sm:$0xff]   ;;  %v3873_v38 = vld [vmem:[%s5089_s1 + $0x810] ss:$8 sps:$4 sm:$0xff]  }
  0xa3   : > { %1141 = vmatpush1.bf16.msra.mxu1 %v3718_v13  ;;  %2628 = vmatprep.subr.bf16.mxu0 %v3723_v24  ;;  %v4742_v13 = vcombine.low %v302_v57, %v303_v0  ;;  %v4756_v24 = vrot.slane %v3325_v7, %v4098_v49  ;;  %v3840_v57 = vld [vmem:[%s5089_s1 + $0x3b0] ss:$8 sps:$4 sm:$0xff]   ;;  %v3837_v0 = vld [vmem:[%s5089_s1 + $0x7a0] ss:$8 sps:$4 sm:$0xff]  }
  0xa4   : > { %1142 = vmatprep.subr.bf16.mxu1 %v3726_v17  ;;  %v3772_v17 = vld [vmem:[%s5089_s1 + $0x300] ss:$8 sps:$4 sm:$0xff]  }
  0xa5   : > { %v3846_v7 = vld [vmem:[%s5089_s1 + $0x3c0] ss:$8 sps:$4 sm:$0xff]  }
  0xa6   : > { %2629 = vmatpush1.bf16.msra.mxu0 %v3721_v26  ;;  %v2114_v26 = vcombine.low %v4195_v27, %v4564_v15  ;;  %v3786_v27 = vld [vmem:[%s5089_s1 + $0x320] ss:$8 sps:$4 sm:$0xff]   ;;  %v3794_v15 = vld [vmem:[%s5089_s1 + $0x334] ss:$8 sps:$4 sm:$0xff]  }
  0xa7   : > { %1143 = vmatpush1.bf16.msra.mxu1 %v3724_v55  ;;  %2630 = vmatprep.subr.bf16.mxu0 %v3729_v28  ;;  %v3779_v55 = vld [vmem:[%s5089_s1 + $0x704] ss:$8 sps:$4 sm:$0xff]  }
  0xa8   : > { %1144 = vmatprep.subr.bf16.mxu1 %v3732_v25  ;;  %v3780_v25 = vld [vmem:[%s5089_s1 + $0x310] ss:$8 sps:$4 sm:$0xff]   ;;  %v3788_v28 = vld [vmem:[%s5089_s1 + $0x324] ss:$8 sps:$4 sm:$0xff]  }
  0xaa   : > { %2631 = vmatpush1.bf16.msra.mxu0 %v3727_v19  ;;  %v3785_v19 = vld [vmem:[%s5089_s1 + $0x714] ss:$8 sps:$4 sm:$0xff]  }
  0xab   : > { %1145 = vmatpush1.bf16.msra.mxu1 %v3730_v29  ;;  %2632 = vmatprep.subr.bf16.mxu0 %v3735_v31  ;;  %v3777_v29 = vld [vmem:[%s5089_s1 + $0x700] ss:$8 sps:$4 sm:$0xff]   ;;  %v3792_v31 = vld [vmem:[%s5089_s1 + $0x330] ss:$8 sps:$4 sm:$0xff]  }
  0xac   : > { %1146 = vmatprep.subr.bf16.mxu1 %v3738_v30  ;;  %v2117_v30 = vcombine.high %v4275_v18, %v4756_v24 }
  0xae   : > { %2633 = vmatpush1.bf16.msra.mxu0 %v3733_v1  ;;  %v3797_v1 = vld [vmem:[%s5089_s1 + $0x734] ss:$8 sps:$4 sm:$0xff]  }
  0xaf   : > { %1147 = vmatpush1.bf16.msra.mxu1 %v3736_v4  ;;  %2634 = vmatprep.subr.bf16.mxu0 %v3741_v52  ;;  %v3800_v4 = vld [vmem:[%s5089_s1 + $0x344] ss:$8 sps:$4 sm:$0xff]   ;;  %v3795_v52 = vld [vmem:[%s5089_s1 + $0x730] ss:$8 sps:$4 sm:$0xff]  }
  0xb0   : > { %1148 = vmatprep.subr.bf16.mxu1 %v3744_v62  ;;  %v3789_v62 = vld [vmem:[%s5089_s1 + $0x720] ss:$8 sps:$4 sm:$0xff]  }
  0xb2   : > { %2635 = vmatpush1.bf16.msra.mxu0 %v3739_v34  ;;  %v3803_v34 = vld [vmem:[%s5089_s1 + $0x744] ss:$8 sps:$4 sm:$0xff]  }
  0xb3   : > { %1149 = vmatpush1.bf16.msra.mxu1 %v3742_v35  ;;  %2636 = vmatprep.subr.bf16.mxu0 %v3747_v9  ;;  %v3804_v35 = vld [vmem:[%s5089_s1 + $0x350] ss:$8 sps:$4 sm:$0xff]  }
  0xb4   : > { %1150 = vmatprep.subr.bf16.mxu1 %v3750_v8  ;;  %v3812_v8 = vld [vmem:[%s5089_s1 + $0x364] ss:$8 sps:$4 sm:$0xff]   ;;  %v3807_v9 = vld [vmem:[%s5089_s1 + $0x750] ss:$8 sps:$4 sm:$0xff]  }
  0xb6   : > { %2637 = vmatpush1.bf16.msra.mxu0 %v3745_v16  ;;  %v3824_v16 = vld [vmem:[%s5089_s1 + $0x384] ss:$8 sps:$4 sm:$0xff]  }
  0xb7   : > { %1151 = vmatpush1.bf16.msra.mxu1 %v3748_v40  ;;  %2638 = vmatprep.subr.bf16.mxu0 %v3753_v44  ;;  %v3815_v40 = vld [vmem:[%s5089_s1 + $0x764] ss:$8 sps:$4 sm:$0xff]   ;;  %v3822_v44 = vld [vmem:[%s5089_s1 + $0x380] ss:$8 sps:$4 sm:$0xff]  }
  0xb8   : > { %1152 = vmatprep.subr.bf16.mxu1 %v3756_v41  ;;  %v3816_v41 = vld [vmem:[%s5089_s1 + $0x370] ss:$8 sps:$4 sm:$0xff]  }
  0xba   : > { %2639 = vmatpush1.bf16.msra.mxu0 %v3751_v22  ;;  %v3827_v22 = vld [vmem:[%s5089_s1 + $0x784] ss:$8 sps:$4 sm:$0xff]  }
  0xbb   : > { %1153 = vmatpush1.bf16.msra.mxu1 %v3754_v14  ;;  %2640 = vmatprep.subr.bf16.mxu0 %v3759_v47  ;;  %v3830_v14 = vld [vmem:[%s5089_s1 + $0x394] ss:$8 sps:$4 sm:$0xff]   ;;  %v3836_v47 = vld [vmem:[%s5089_s1 + $0x3a4] ss:$8 sps:$4 sm:$0xff]  }
  0xbc   : > { %1154 = vmatprep.subr.bf16.mxu1 %v3762_v46  ;;  %v3819_v46 = vld [vmem:[%s5089_s1 + $0x770] ss:$8 sps:$4 sm:$0xff]  }
  0xbe   : > { %2641 = vmatpush1.bf16.msra.mxu0 %v3757_v51  ;;  %v3834_v51 = vld [vmem:[%s5089_s1 + $0x3a0] ss:$8 sps:$4 sm:$0xff]  }
  0xbf   : > { %1155 = vmatpush1.bf16.msra.mxu1 %v3760_v48  ;;  %2642 = vmatprep.subr.bf16.mxu0 %v3765_v56  ;;  %v3825_v48 = vld [vmem:[%s5089_s1 + $0x780] ss:$8 sps:$4 sm:$0xff]   ;;  %v3831_v56 = vld [vmem:[%s5089_s1 + $0x790] ss:$8 sps:$4 sm:$0xff]  }
  0xc0   : > { %1156 = vmatprep.subr.bf16.mxu1 %v3768_v50  ;;  %v3833_v50 = vld [vmem:[%s5089_s1 + $0x794] ss:$8 sps:$4 sm:$0xff]  }
  0xc2   : > { %2643 = vmatpush1.bf16.msra.mxu0 %v3763_v3  ;;  %v3845_v3 = vld [vmem:[%s5089_s1 + $0x7b4] ss:$8 sps:$4 sm:$0xff]  }
  0xc3   : > { %1157 = vmatpush1.bf16.msra.mxu1 %v3766_v59  ;;  %2644 = vmatprep.subr.bf16.mxu0 %v3771_v10  ;;  %v3839_v59 = vld [vmem:[%s5089_s1 + $0x7a4] ss:$8 sps:$4 sm:$0xff]   ;;  %v3854_v10 = vld [vmem:[%s5089_s1 + $0x3d4] ss:$8 sps:$4 sm:$0xff]  }
  0xc4   : > { %1835 = vmatprep.subr.bf16.mxu1 %v3774_v61  ;;  %v3848_v61 = vld [vmem:[%s5089_s1 + $0x3c4] ss:$8 sps:$4 sm:$0xff]  }
  0xc6   : > { %1159 = vmatmul.mubr.bf16.vlgmr.msra.gmra.mrb[0].mxu1 %v552_v11  ;;  %2645 = vmatpush1.bf16.msra.mxu0 %v3769_v53  ;;  %v3843_v11 = vld [vmem:[%s5089_s1 + $0x7b0] ss:$8 sps:$4 sm:$0xff]   ;;  %v3849_v53 = vld [vmem:[%s5089_s1 + $0x7c0] ss:$8 sps:$4 sm:$0xff]  }
  0xc7   : > { %1836 = vmatpush1.bf16.msra.mxu1 %v3772_v17  ;;  %1867 = vmatprep.mubr.bf16.mxu1 %v1328_v21  ;;  %v3851_v17 = vld [vmem:[%s5089_s1 + $0x7c4] ss:$8 sps:$4 sm:$0xff]   ;;  %v3852_v21 = vld [vmem:[%s5089_s1 + $0x3d0] ss:$8 sps:$4 sm:$0xff]  }
  0xc8   : > { %1837 = vmatprep.subr.bf16.mxu1 %v3782_v45  ;;  %2657 = vmatprep.subr.bf16.mxu0 %v3779_v55  ;;  %v3860_v45 = vld [vmem:[%s5089_s1 + $0x3e4] ss:$8 sps:$4 sm:$0xff]   ;;  %v3857_v55 = vld [vmem:[%s5089_s1 + $0x7d4] ss:$8 sps:$4 sm:$0xff]  }
  0xc9   : > { %2647 = vmatmul.mubr.bf16.vlgmr.msra.gmra.mrb[0].mxu0 %v2114_v26  ;;  %v3866_v26 = vld [vmem:[%s5089_s1 + $0x3f4] ss:$8 sps:$4 sm:$0xff]  }
  0xca   : > { %2658 = vmatpush1.bf16.msra.mxu0 %v3777_v29  ;;  %2689 = vmatprep.mubr.bf16.mxu0 %v2117_v30  ;;  %v2000_v29 = vrot.slane %v4742_v13, %v4098_v49  ;;  %v3863_v30 = vld [vmem:[%s5089_s1 + $0x7e4] ss:$8 sps:$4 sm:$0xff]   ;;  %v3869_v13 = vld [vmem:[%s5089_s1 + $0x7f4] ss:$8 sps:$4 sm:$0xff]  }
  0xcb   : > { %1838 = vmatpush1.bf16.msra.mxu1 %v3780_v25  ;;  %2659 = vmatprep.subr.bf16.mxu0 %v3785_v19  ;;  %v3858_v25 = vld [vmem:[%s5089_s1 + $0x3e0] ss:$8 sps:$4 sm:$0xff]   ;;  %v3864_v19 = vld [vmem:[%s5089_s1 + $0x3f0] ss:$8 sps:$4 sm:$0xff]  }
  0xcc   : > { %1839 = vmatprep.subr.bf16.mxu1 %v3788_v28  ;;  %v3855_v28 = vld [vmem:[%s5089_s1 + $0x7d0] ss:$8 sps:$4 sm:$0xff]  }
  0xce   : > { %2660 = vmatpush1.bf16.msra.mxu0 %v3783_v2  ;;  %v3867_v2 = vld [vmem:[%s5089_s1 + $0x7f0] ss:$8 sps:$4 sm:$0xff]  }
  0xcf   : > { %1840 = vmatpush1.bf16.msra.mxu1 %v3786_v27  ;;  %2661 = vmatprep.subr.bf16.mxu0 %v3791_v12  ;;  %v3861_v27 = vld [vmem:[%s5089_s1 + $0x7e0] ss:$8 sps:$4 sm:$0xff]  }
  0xd0   : > { %1841 = vmatprep.subr.bf16.mxu1 %v3794_v15  ;;  %v2118_v15 = vcombine.low %v4301_v60, %v2000_v29  ;;  %v3872_v60 = vld [vmem:[%s5089_s1 + $0x804] ss:$8 sps:$4 sm:$0xff]  }
  0xd2   : > { %2662 = vmatpush1.bf16.msra.mxu0 %v3789_v62  ;;  %v4949_v12 = vrot.slane %v2118_v15, %v4098_v49 }
  0xd3   : > { %1842 = vmatpush1.bf16.msra.mxu1 %v3792_v31  ;;  %2663 = vmatprep.subr.bf16.mxu0 %v3797_v1  ;;  %v2116_v31 = vcombine.low %v4275_v18, %v4756_v24  ;;  %v3878_v18 = vld [vmem:[%s5089_s1 + $0x824] ss:$8 sps:$4 sm:$0xff]   ;;  %v3881_v24 = vld [vmem:[%s5089_s1 + $0x834] ss:$8 sps:$4 sm:$0xff]   ;;  %v3879_v1 = vld [vmem:[%s5089_s1 + $0x830] ss:$8 sps:$4 sm:$0xff]  }
  0xd4   : > { %1843 = vmatprep.subr.bf16.mxu1 %v3800_v4  ;;  %v3870_v4 = vld [vmem:[%s5089_s1 + $0x800] ss:$8 sps:$4 sm:$0xff]   ;;  %v2127_v62 = vcombine.high %v4492_v54, %v4949_v12 }
  0xd6   : > { %2664 = vmatpush1.bf16.msra.mxu0 %v3795_v52  ;;  %v3887_v52 = vld [vmem:[%s5089_s1 + $0x854] ss:$8 sps:$4 sm:$0xff]  }
  0xd7   : > { %1844 = vmatpush1.bf16.msra.mxu1 %v3798_v32  ;;  %2665 = vmatprep.subr.bf16.mxu0 %v3803_v34  ;;  %v3884_v32 = vld [vmem:[%s5089_s1 + $0x844] ss:$8 sps:$4 sm:$0xff]   ;;  %v3885_v34 = vld [vmem:[%s5089_s1 + $0x850] ss:$8 sps:$4 sm:$0xff]  }
  0xd8   : > { %1845 = vmatprep.subr.bf16.mxu1 %v3806_v33  ;;  %v3882_v33 = vld [vmem:[%s5089_s1 + $0x840] ss:$8 sps:$4 sm:$0xff]  }
  0xda   : > { %2666 = vmatpush1.bf16.msra.mxu0 %v3801_v36  ;;  %v3893_v36 = vld [vmem:[%s5089_s1 + $0x874] ss:$8 sps:$4 sm:$0xff]  }
  0xdb   : > { %1846 = vmatpush1.bf16.msra.mxu1 %v3804_v35  ;;  %2667 = vmatprep.subr.bf16.mxu0 %v3809_v63  ;;  %v3890_v35 = vld [vmem:[%s5089_s1 + $0x864] ss:$8 sps:$4 sm:$0xff]   ;;  %v3891_v63 = vld [vmem:[%s5089_s1 + $0x870] ss:$8 sps:$4 sm:$0xff]  }
  0xdc   : > { %1847 = vmatprep.subr.bf16.mxu1 %v3812_v8  ;;  %v3888_v8 = vld [vmem:[%s5089_s1 + $0x860] ss:$8 sps:$4 sm:$0xff]  }
  0xde   : > { %2668 = vmatpush1.bf16.msra.mxu0 %v3807_v9  ;;  %v3899_v9 = vld [vmem:[%s5089_s1 + $0x894] ss:$8 sps:$4 sm:$0xff]  }
  0xdf   : > { %1848 = vmatpush1.bf16.msra.mxu1 %v3810_v5  ;;  %2669 = vmatprep.subr.bf16.mxu0 %v3815_v40  ;;  %v3896_v5 = vld [vmem:[%s5089_s1 + $0x884] ss:$8 sps:$4 sm:$0xff]   ;;  %v3897_v40 = vld [vmem:[%s5089_s1 + $0x890] ss:$8 sps:$4 sm:$0xff]  }
  0xe0   : > { %1849 = vmatprep.subr.bf16.mxu1 %v3818_v6  ;;  %v3894_v6 = vld [vmem:[%s5089_s1 + $0x880] ss:$8 sps:$4 sm:$0xff]  }
  0xe2   : > { %2670 = vmatpush1.bf16.msra.mxu0 %v3813_v20  ;;  %v3905_v20 = vld [vmem:[%s5089_s1 + $0x8b4] ss:$8 sps:$4 sm:$0xff]  }
  0xe3   : > { %1850 = vmatpush1.bf16.msra.mxu1 %v3816_v41  ;;  %2671 = vmatprep.subr.bf16.mxu0 %v3821_v42  ;;  %v3902_v41 = vld [vmem:[%s5089_s1 + $0x8a4] ss:$8 sps:$4 sm:$0xff]   ;;  %v3903_v42 = vld [vmem:[%s5089_s1 + $0x8b0] ss:$8 sps:$4 sm:$0xff]  }
  0xe4   : > { %1851 = vmatprep.subr.bf16.mxu1 %v3824_v16  ;;  %v3900_v16 = vld [vmem:[%s5089_s1 + $0x8a0] ss:$8 sps:$4 sm:$0xff]  }
  0xe6   : > { %2672 = vmatpush1.bf16.msra.mxu0 %v3819_v46  ;;  %v3911_v46 = vld [vmem:[%s5089_s1 + $0x8d4] ss:$8 sps:$4 sm:$0xff]  }
  0xe7   : > { %1852 = vmatpush1.bf16.msra.mxu1 %v3822_v44  ;;  %2673 = vmatprep.subr.bf16.mxu0 %v3827_v22  ;;  %v3908_v44 = vld [vmem:[%s5089_s1 + $0x8c4] ss:$8 sps:$4 sm:$0xff]   ;;  %v3909_v22 = vld [vmem:[%s5089_s1 + $0x8d0] ss:$8 sps:$4 sm:$0xff]  }
  0xe8   : > { %1853 = vmatprep.subr.bf16.mxu1 %v3830_v14  ;;  %v3906_v14 = vld [vmem:[%s5089_s1 + $0x8c0] ss:$8 sps:$4 sm:$0xff]  }
  0xea   : > { %2674 = vmatpush1.bf16.msra.mxu0 %v3825_v48  ;;  %v3917_v48 = vld [vmem:[%s5089_s1 + $0x8f4] ss:$8 sps:$4 sm:$0xff]  }
  0xeb   : > { %1854 = vmatpush1.bf16.msra.mxu1 %v3828_v23  ;;  %2675 = vmatprep.subr.bf16.mxu0 %v3833_v50  ;;  %v3914_v23 = vld [vmem:[%s5089_s1 + $0x8e4] ss:$8 sps:$4 sm:$0xff]   ;;  %v3915_v50 = vld [vmem:[%s5089_s1 + $0x8f0] ss:$8 sps:$4 sm:$0xff]  }
  0xec   : > { %1855 = vmatprep.subr.bf16.mxu1 %v3836_v47  ;;  %v3912_v47 = vld [vmem:[%s5089_s1 + $0x8e0] ss:$8 sps:$4 sm:$0xff]  }
  0xee   : > { %2676 = vmatpush1.bf16.msra.mxu0 %v3831_v56 }
  0xef   : > { %1856 = vmatpush1.bf16.msra.mxu1 %v3834_v51  ;;  %2677 = vmatprep.subr.bf16.mxu0 %v3839_v59  ;;  %v2126_v51 = vcombine.low %v4492_v54, %v4949_v12 }
  0xf0   : > { %1857 = vmatprep.subr.bf16.mxu1 %v3842_v58  ;;  %v3927_v58 = vmov 0  }
  0xf1   : > { %2807 = vst [vmem:[%s5060_s28] sm:$0x77] %v3927_v58  ;;  %2808 = vst [vmem:[%s5060_s28 + $0x8] sm:$0x77] %v3927_v58 }
  0xf2   : > { %2678 = vmatpush1.bf16.msra.mxu0 %v3837_v0  ;;  %2810 = vst [vmem:[%s5060_s28 + $0x18] sm:$0x77] %v3927_v58  ;;  %2809 = vst [vmem:[%s5060_s28 + $0x10] sm:$0x77] %v3927_v58  ;;  %v2759_v0 = vld [vmem:[%s5090_s2] sm:$0x3] }
  0xf3   : > { %1858 = vmatpush1.bf16.msra.mxu1 %v3840_v57  ;;  %2679 = vmatprep.subr.bf16.mxu0 %v3845_v3  ;;  %v2767_v3 = vsub.s32 1, %v4079_v43 }
  0xf4   : > { %1859 = vmatprep.subr.bf16.mxu1 %v3848_v61  ;;  %v2763_v61 = vsub.s32 0, %v4079_v43 }
  0xf6   : > { %2680 = vmatpush1.bf16.msra.mxu0 %v3843_v11  ;;  %v2768_v11 = vrot.slane %v2759_v0, %v2767_v3 }
  0xf7   : > { %1860 = vmatpush1.bf16.msra.mxu1 %v3846_v7  ;;  %2681 = vmatprep.subr.bf16.mxu0 %v3851_v17  ;;  %v2764_v7 = vrot.slane %v2759_v0, %v2763_v61 }
  0xf8   : > { %1861 = vmatprep.subr.bf16.mxu1 %v3854_v10 }
  0xfa   : > { %2682 = vmatpush1.bf16.msra.mxu0 %v3849_v53 }
  0xfb   : > { %1862 = vmatpush1.bf16.msra.mxu1 %v3852_v21  ;;  %2683 = vmatprep.subr.bf16.mxu0 %v3857_v55 }
  0xfc   : > { %1863 = vmatprep.subr.bf16.mxu1 %v3860_v45 }
  0xfe   : > { %2684 = vmatpush1.bf16.msra.mxu0 %v3855_v28 }
  0xff   : > { %1864 = vmatpush1.bf16.msra.mxu1 %v3858_v25  ;;  %2685 = vmatprep.subr.bf16.mxu0 %v3863_v30 }
 0x100   : > { %1865 = vmatprep.subr.bf16.mxu1 %v3866_v26 }
 0x102   : > { %2686 = vmatpush1.bf16.msra.mxu0 %v3861_v27 }
 0x103   : > { %1866 = vmatpush1.bf16.msra.mxu1 %v3864_v19  ;;  %2687 = vmatprep.subr.bf16.mxu0 %v3869_v13 }
 0x106   : > { %1868 = vmatmul.mubr.bf16.vlgmr.msra.gmra.mrb[0].mxu1 %v1327_v39  ;;  %2688 = vmatpush1.bf16.msra.mxu0 %v3867_v2  ;;  %v3876_v39 = vld [vmem:[%s5089_s1 + $0x820] ss:$8 sps:$4 sm:$0xff]  }
 0x107   : > { %2700 = vmatprep.subr.bf16.mxu0 %v3872_v60 }
 0x109   : > { %2690 = vmatmul.mubr.bf16.vlgmr.msra.gmra.mrb[0].mxu0 %v2116_v31 }
 0x10a   : > { %2701 = vmatpush1.bf16.msra.mxu0 %v3870_v4  ;;  %2732 = vmatprep.mubr.bf16.mxu0 %v2127_v62 }
 0x10b   : > { %2702 = vmatprep.subr.bf16.mxu0 %v3875_v37 }
 0x10e   : > { %2703 = vmatpush1.bf16.msra.mxu0 %v3873_v38 }
 0x10f   : > { %2704 = vmatprep.subr.bf16.mxu0 %v3878_v18 }
 0x112   : > { %2705 = vmatpush1.bf16.msra.mxu0 %v3876_v39 }
 0x113   : > { %2706 = vmatprep.subr.bf16.mxu0 %v3881_v24 }
 0x116   : > { %2707 = vmatpush1.bf16.msra.mxu0 %v3879_v1 }
 0x117   : > { %2708 = vmatprep.subr.bf16.mxu0 %v3884_v32 }
 0x11a   : > { %2709 = vmatpush1.bf16.msra.mxu0 %v3882_v33 }
 0x11b   : > { %2710 = vmatprep.subr.bf16.mxu0 %v3887_v52 }
 0x11e   : > { %2711 = vmatpush1.bf16.msra.mxu0 %v3885_v34  ;;  %v3424_v34 = vld [vmem:[%s5060_s28 + $0x8] sm:$0x77] }
 0x11f   : > { %2712 = vmatprep.subr.bf16.mxu0 %v3890_v35 }
 0x122   : > { %2713 = vmatpush1.bf16.msra.mxu0 %v3888_v8 }
 0x123   : > { %2714 = vmatprep.subr.bf16.mxu0 %v3893_v36 }
 0x126   : > { %2715 = vmatpush1.bf16.msra.mxu0 %v3891_v63  ;;  %v3426_v63 = vld [vmem:[%s5060_s28 + $0x10] sm:$0x77] }
 0x127   : > { %2716 = vmatprep.subr.bf16.mxu0 %v3896_v5 }
 0x12a   : > { %2717 = vmatpush1.bf16.msra.mxu0 %v3894_v6 }
 0x12b   : > { %2718 = vmatprep.subr.bf16.mxu0 %v3899_v9 }
 0x12e   : > { %2719 = vmatpush1.bf16.msra.mxu0 %v3897_v40 }
 0x12f   : > { %2720 = vmatprep.subr.bf16.mxu0 %v3902_v41 }
 0x132   : > { %2721 = vmatpush1.bf16.msra.mxu0 %v3900_v16 }
 0x133   : > { %2722 = vmatprep.subr.bf16.mxu0 %v3905_v20 }
 0x136   : > { %2723 = vmatpush1.bf16.msra.mxu0 %v3903_v42 }
 0x137   : > { %2724 = vmatprep.subr.bf16.mxu0 %v3908_v44 }
 0x13a   : > { %2725 = vmatpush1.bf16.msra.mxu0 %v3906_v14 }
 0x13b   : > { %2726 = vmatprep.subr.bf16.mxu0 %v3911_v46 }
 0x13e   : > { %2727 = vmatpush1.bf16.msra.mxu0 %v3909_v22 }
 0x13f   : > { %2728 = vmatprep.subr.bf16.mxu0 %v3914_v23 }
 0x142   : > { %2729 = vmatpush1.bf16.msra.mxu0 %v3912_v47 }
 0x143   : > { %2730 = vmatprep.subr.bf16.mxu0 %v3917_v48 }
 0x146   : > { %2731 = vmatpush1.bf16.msra.mxu0 %v3915_v50 }
 0x149   : > { %2733 = vmatmul.mubr.bf16.vlgmr.msra.gmra.mrb[0].mxu0 %v2126_v51 }
 0x1d9   : > { %v1869_v56 = vpop.f32.mrb[0].mxu1 }
 0x1da   : > { %v1871_v59 = vpop.f32.mrb[1].mxu1 }
 0x1db   : > { %v1873_v54 = vpop.f32.mrb[2].mxu1 }
 0x1dc   : > { %v1875_v57 = vpop.f32.mrb[3].mxu1 }
 0x21c   : > { %v2734_v10 = vpop.f32.mrb[0].mxu0 }
 0x21d   : > { %v3431_v17 = vadd.f32 %v2734_v10, %v1869_v56  ;;  %v2736_v21 = vpop.f32.mrb[1].mxu0 }
 0x21e   : > { %v3432_v45 = vadd.f32 %v2736_v21, %v1871_v59  ;;  %v2738_v53 = vpop.f32.mrb[2].mxu0 }
 0x21f   : > { %v2771_v55 = vadd.f32 %v3431_v17, %v2764_v7  ;;  %v3433_v25 = vadd.f32 %v2738_v53, %v1873_v54  ;;  %v2740_v26 = vpop.f32.mrb[3].mxu0 }
 0x220   : > { %v2772_v28 = vadd.f32 %v3432_v45, %v2768_v11  ;;  %v3434_v29 = vadd.f32 %v2740_v26, %v1875_v57 }
 0x221   : > { %v2775_v30 = vmax.f32 %v2771_v55, 0.0  ;;  %v2773_v19 = vadd.f32 %v3433_v25, %v2764_v7 }
 0x222   : > { %v2776_v27 = vmax.f32 %v2772_v28, 0.0  ;;  %v2774_v15 = vadd.f32 %v3434_v29, %v2768_v11 }
 0x223   : > { %v2777_v13 = vmax.f32 %v2773_v19, 0.0 }
 0x224   : > { %v3422_v2 = vpack.c.bf16 %v2776_v27, %v2775_v30  ;;  %v2778_v12 = vmax.f32 %v2774_v15, 0.0 }
 0x226   : > { %v2791_v43 = vrot.slane %v3422_v2, %v4098_v49  ;;  %v3423_v60 = vpack.c.bf16 %v2778_v12, %v2777_v13 }
 0x228   : > { %v2799_v31 = vcombine.high %v2791_v43, %v2791_v43  ;;  %v2798_v4 = vrot.slane %v3423_v60, %v4098_v49 }
 0x22a   : > { %v2805_v62 = vmax.bf16 %v2799_v31, %v2791_v43  ;;  %v2800_v37 = vcombine.high %v2798_v4, %v2798_v4 }
 0x22c   : > { %v2819_v38 = vrot.slane %v2805_v62, %v4098_v49  ;;  %v2806_v18 = vmax.bf16 %v2800_v37, %v2798_v4 }
 0x22e   : > { %v2828_v24 = vshrl.u32 %v2819_v38, 16  ;;  %v2826_v1 = vrot.slane %v2806_v18, %v4098_v49  ;;  %v2831_v33 = vshll.u32 %v2819_v38, 16 }
 0x230   : > { %v2830_v32 = vrot.slane %v2828_v24, 7  ;;  %v2835_v52 = vshrl.u32 %v2826_v1, 16  ;;  %v2838_v36 = vshll.u32 %v2826_v1, 16 }
 0x232   : > { %v2833_v35 = vor.u32 %v2831_v33, %v2830_v32  ;;  %v2837_v8 = vrot.slane %v2835_v52, 7 }
 0x234   : > { %v2852_v5 = vsel %vm2850_vm6, %v2833_v35, %v3424_v34  ;;  %v2840_v6 = vor.u32 %v2838_v36, %v2837_v8 }
 0x235   : > { %3425 = vst [vmem:[%s5060_s28 + $0x8] sm:$0x77] %v2852_v5 }
 0x236   : > { %v2855_v9 = vsel %vm2850_vm6, %v2840_v6, %v3426_v63 }
 0x237   : > { %3427 = vst [vmem:[%s5060_s28 + $0x10] sm:$0x77] %v2855_v9 }
 0x238 PF: > { %s13_s12 = sadd.s32 1, %s3924_s12  }
 0x239   : > { %p10_p4 = scmp.ge.s32.totalorder %s13_s12, 4  }
 0x23b   :  { %12 = sbr.rel (!%p10_p4) target bundleno = 1 (0x1), region = 65 }

// kernel: lcnet_forward.10
= control target key start
LH: loop header
LB: loop body
LE: loop exit
PB: predicated region body
PF: predicated region fallthrough
CT: control target
= control target key end

     0   :  { %s6700_s12 = smov 0   ;;  %s8670_s0 = inlined_call_operand.vmem [shape: bf16[2,4,6,256], index: 0, kind: input, shape index: {}]   ;;  %s8671_s1 = inlined_call_operand.vmem [shape: bf16[3,768,512], index: 1, kind: input, shape index: {}]   ;;  %s8672_s2 = inlined_call_operand.vmem [shape: f32[1,512], index: 2, kind: input, shape index: {}]   ;;  %s8673_s3 = inlined_call_operand.vmem [shape: bf16[2,2,4,512], index: 3, kind: output, shape index: {}]  }
   0x1 LB: > { %s4801_s13 = sadd.s32 4294967295, %s6677_s12   ;;  %p4805_p0 = scmp.ge.s32.totalorder %s6677_s12, 1  ;;  %s6677_s12 = sphi %s6700_s12, %s13_s12  }
   0x2   : > { %p137_p1 = scmp.lt.s32.totalorder %s6677_s12, 3 }
   0x4   : > { %p138_p2 = pnand %p4805_p0, %p137_p1 }
   0x5   : > { %v5799_v0 = vld [vmem:[%s8671_s1 + $0x4] ss:$16 sps:$4 sm:$0xff] (!%p138_p2)   ;;  %v5803_v2 = vld [vmem:[%s8671_s1] ss:$16 sps:$4 sm:$0xff] (!%p138_p2)   ;;  %p161_p3 = scmp.lt.s32.totalorder (!%p138_p2), %s4801_s13, 1  ;;  %v264_v38 = vlaneseq (!%p138_p2) }
   0x6   : > { %141 = sbr.rel (%p138_p2) target bundleno = 812 (0x32c), region = 32  ;;  %v5801_v1 = vld [vmem:[%s8671_s1 + $0x204] ss:$16 sps:$4 sm:$0xff] (!%p138_p2)   ;;  %1494 = vmatprep.subr.bf16.mxu0 (!%p138_p2), %v5799_v0  ;;  %v5804_v3 = vld [vmem:[%s8671_s1 + $0x200] ss:$16 sps:$4 sm:$0xff] (!%p138_p2)  }
   0x7   : > { %1535 = vmatprep.subr.bf16.mxu1 (!%p138_p2), %v5801_v1  ;;  %v5805_v4 = vld [vmem:[%s8671_s1 + $0x24] ss:$16 sps:$4 sm:$0xff] (!%p138_p2)   ;;  %1495 = vmatpush1.bf16.msra.mxu0 (!%p138_p2), %v5803_v2  ;;  %v5809_v6 = vld [vmem:[%s8671_s1 + $0x20] ss:$16 sps:$4 sm:$0xff] (!%p138_p2)   ;;  %v6679_v36 = vmov (!%p138_p2), 1983009808  }
   0x8   : > { %1536 = vmatpush1.bf16.msra.mxu1 (!%p138_p2), %v5804_v3  ;;  %v5807_v5 = vld [vmem:[%s8671_s1 + $0x224] ss:$16 sps:$4 sm:$0xff] (!%p138_p2)   ;;  %1496 = vmatprep.subr.bf16.mxu0 (!%p138_p2), %v5805_v4  ;;  %v5810_v7 = vld [vmem:[%s8671_s1 + $0x220] ss:$16 sps:$4 sm:$0xff] (!%p138_p2)   ;;  %v262_v37 = vunpack.c.l.s4 (!%p138_p2), %v6679_v36  ;;  %v6831_v43 = vshrl.u32 (!%p138_p2), %v264_v38, 7 }
   0x9   : > { %1537 = vmatprep.subr.bf16.mxu1 (!%p138_p2), %v5807_v5  ;;  %v5811_v8 = vld [vmem:[%s8671_s1 + $0x44] ss:$16 sps:$4 sm:$0xff] (!%p138_p2)   ;;  %v5815_v10 = vld [vmem:[%s8671_s1 + $0x40] ss:$16 sps:$4 sm:$0xff] (!%p138_p2)  }
   0xa   : > { %v5813_v9 = vld [vmem:[%s8671_s1 + $0x244] ss:$16 sps:$4 sm:$0xff] (!%p138_p2)   ;;  %v5816_v11 = vld [vmem:[%s8671_s1 + $0x240] ss:$16 sps:$4 sm:$0xff] (!%p138_p2)   ;;  %v263_v42 = vunpack.c.0.s8 (!%p138_p2), %v262_v37 }
   0xb   : > { %1497 = vmatpush1.bf16.msra.mxu0 (!%p138_p2), %v5809_v6  ;;  %v5817_v12 = vld [vmem:[%s8671_s1 + $0x64] ss:$16 sps:$4 sm:$0xff] (!%p138_p2)   ;;  %v5821_v14 = vld [vmem:[%s8671_s1 + $0x60] ss:$16 sps:$4 sm:$0xff] (!%p138_p2)  }
   0xc   : > { %1538 = vmatpush1.bf16.msra.mxu1 (!%p138_p2), %v5810_v7  ;;  %1498 = vmatprep.subr.bf16.mxu0 (!%p138_p2), %v5811_v8  ;;  %v5819_v13 = vld [vmem:[%s8671_s1 + $0x264] ss:$16 sps:$4 sm:$0xff] (!%p138_p2)   ;;  %v5822_v15 = vld [vmem:[%s8671_s1 + $0x260] ss:$16 sps:$4 sm:$0xff] (!%p138_p2)   ;;  %v6855_v49 = vsub.s32 (!%p138_p2), %v263_v42, %v6831_v43 }
   0xd   : > { %1539 = vmatprep.subr.bf16.mxu1 %v5813_v9  ;;  %v5823_v16 = vld [vmem:[%s8671_s1 + $0x84] ss:$16 sps:$4 sm:$0xff]   ;;  %v5827_v18 = vld [vmem:[%s8671_s1 + $0x80] ss:$16 sps:$4 sm:$0xff]   ;;  %s8675_s13 = smov (!%p161_p3, %s4801_s13), 1 }
   0xe   : > { %v5825_v17 = vld [vmem:[%s8671_s1 + $0x284] ss:$16 sps:$4 sm:$0xff]   ;;  %v5828_v19 = vld [vmem:[%s8671_s1 + $0x280] ss:$16 sps:$4 sm:$0xff]   ;;  %s5788_s21 = sshll.u32 %s8675_s13, 5  ;;  %s5789_s22 = sshll.u32 %s8675_s13, 4 }
   0xf   : > { %1499 = vmatpush1.bf16.msra.mxu0 %v5815_v10  ;;  %v5829_v20 = vld [vmem:[%s8671_s1 + $0xa4] ss:$16 sps:$4 sm:$0xff]   ;;  %v5833_v22 = vld [vmem:[%s8671_s1 + $0xa0] ss:$16 sps:$4 sm:$0xff]   ;;  %s6852_s30 = scalar_lea.vmem %s8670_s0, %s5788_s21  ;;  %s170_s25 = scalar_lea.vmem %s8673_s3, %s5789_s22 }
  0x10   : > { %1540 = vmatpush1.bf16.msra.mxu1 %v5816_v11  ;;  %1500 = vmatprep.subr.bf16.mxu0 %v5817_v12  ;;  %v5831_v21 = vld [vmem:[%s8671_s1 + $0x2a4] ss:$16 sps:$4 sm:$0xff]   ;;  %v5834_v23 = vld [vmem:[%s8671_s1 + $0x2a0] ss:$16 sps:$4 sm:$0xff]   ;;  %v172_v55 = vld [vmem:[%s6852_s30 + $0x8] sm:$0x77] }
  0x11   : > { %1541 = vmatprep.subr.bf16.mxu1 %v5819_v13  ;;  %v5835_v24 = vld [vmem:[%s8671_s1 + $0xc4] ss:$16 sps:$4 sm:$0xff]   ;;  %v5839_v26 = vld [vmem:[%s8671_s1 + $0xc0] ss:$16 sps:$4 sm:$0xff]   ;;  %v4812_v61 = vcombine.low %v172_v55, %v172_v55  ;;  %v4813_v62 = vcombine.high %v172_v55, %v172_v55  ;;  %v6879_v63 = vrot.slane %v172_v55, %v6855_v49  ;;  %v5902_v55 = vld [vmem:[%s8671_s1 + $0x8] ss:$16 sps:$4 sm:$0xff]  }
  0x12   : > { %v5837_v25 = vld [vmem:[%s8671_s1 + $0x2c4] ss:$16 sps:$4 sm:$0xff]   ;;  %v5840_v27 = vld [vmem:[%s8671_s1 + $0x2c0] ss:$16 sps:$4 sm:$0xff]  }
  0x13   : > { %1501 = vmatpush1.bf16.msra.mxu0 %v5821_v14  ;;  %v5841_v28 = vld [vmem:[%s8671_s1 + $0xe4] ss:$16 sps:$4 sm:$0xff]   ;;  %v5845_v30 = vld [vmem:[%s8671_s1 + $0xe0] ss:$16 sps:$4 sm:$0xff]   ;;  %v210_v5 = vshrl.u32 %v4812_v61, 16  ;;  %v212_v6 = vshll.u32 %v4812_v61, 16 }
  0x14   : > { %1542 = vmatpush1.bf16.msra.mxu1 %v5822_v15  ;;  %1502 = vmatprep.subr.bf16.mxu0 %v5823_v16  ;;  %v5843_v29 = vld [vmem:[%s8671_s1 + $0x2e4] ss:$16 sps:$4 sm:$0xff]   ;;  %v5846_v31 = vld [vmem:[%s8671_s1 + $0x2e0] ss:$16 sps:$4 sm:$0xff]   ;;  %v217_v9 = vshrl.u32 %v4813_v62, 16  ;;  %v219_v10 = vshll.u32 %v4813_v62, 16 }
  0x15   : > { %1543 = vmatprep.subr.bf16.mxu1 %v5825_v17  ;;  %v5847_v32 = vld [vmem:[%s8671_s1 + $0x104] ss:$16 sps:$4 sm:$0xff]   ;;  %v5851_v34 = vld [vmem:[%s8671_s1 + $0x100] ss:$16 sps:$4 sm:$0xff]   ;;  %v214_v14 = vrot.slane %v212_v6, 1 }
  0x16   : > { %v5849_v33 = vld [vmem:[%s8671_s1 + $0x304] ss:$16 sps:$4 sm:$0xff]   ;;  %v5852_v35 = vld [vmem:[%s8671_s1 + $0x300] ss:$16 sps:$4 sm:$0xff]  }
  0x17   : > { %1503 = vmatpush1.bf16.msra.mxu0 %v5827_v18  ;;  %v5853_v39 = vld [vmem:[%s8671_s1 + $0x124] ss:$16 sps:$4 sm:$0xff]   ;;  %v5857_v41 = vld [vmem:[%s8671_s1 + $0x120] ss:$16 sps:$4 sm:$0xff]  }
  0x18   : > { %1544 = vmatpush1.bf16.msra.mxu1 %v5828_v19  ;;  %1504 = vmatprep.subr.bf16.mxu0 %v5829_v20  ;;  %v5855_v40 = vld [vmem:[%s8671_s1 + $0x324] ss:$16 sps:$4 sm:$0xff]   ;;  %v5858_v44 = vld [vmem:[%s8671_s1 + $0x320] ss:$16 sps:$4 sm:$0xff]   ;;  %v221_v19 = vrot.slane %v219_v10, 1 }
  0x19   : > { %1545 = vmatprep.subr.bf16.mxu1 %v5831_v21  ;;  %v5859_v45 = vld [vmem:[%s8671_s1 + $0x144] ss:$16 sps:$4 sm:$0xff]   ;;  %v5863_v47 = vld [vmem:[%s8671_s1 + $0x140] ss:$16 sps:$4 sm:$0xff]   ;;  %v215_v21 = vor.u32 %v214_v14, %v210_v5  ;;  %v5920_v5 = vld [vmem:[%s8671_s1 + $0x68] ss:$16 sps:$4 sm:$0xff]  }
  0x1a   : > { %v5861_v46 = vld [vmem:[%s8671_s1 + $0x344] ss:$16 sps:$4 sm:$0xff]   ;;  %v5864_v48 = vld [vmem:[%s8671_s1 + $0x340] ss:$16 sps:$4 sm:$0xff]   ;;  %v5932_v14 = vld [vmem:[%s8671_s1 + $0xa8] ss:$16 sps:$4 sm:$0xff]  }
  0x1b   : > { %1505 = vmatpush1.bf16.msra.mxu0 %v5833_v22  ;;  %v5865_v50 = vld [vmem:[%s8671_s1 + $0x164] ss:$16 sps:$4 sm:$0xff]   ;;  %v5869_v52 = vld [vmem:[%s8671_s1 + $0x160] ss:$16 sps:$4 sm:$0xff]  }
  0x1c   : > { %1546 = vmatpush1.bf16.msra.mxu1 %v5834_v23  ;;  %1506 = vmatprep.subr.bf16.mxu0 %v5835_v24  ;;  %v5867_v51 = vld [vmem:[%s8671_s1 + $0x364] ss:$16 sps:$4 sm:$0xff]   ;;  %v5870_v53 = vld [vmem:[%s8671_s1 + $0x360] ss:$16 sps:$4 sm:$0xff]   ;;  %v222_v24 = vor.u32 %v221_v19, %v217_v9  ;;  %v5926_v9 = vld [vmem:[%s8671_s1 + $0x88] ss:$16 sps:$4 sm:$0xff]  }
  0x1d   : > { %1547 = vmatprep.subr.bf16.mxu1 %v5837_v25  ;;  %v171_v54 = vld [vmem:[%s6852_s30] sm:$0x77] }
  0x1e   : > { %v4810_v56 = vcombine.low %v171_v54, %v171_v54  ;;  %v4811_v57 = vcombine.high %v171_v54, %v171_v54  ;;  %v267_v58 = vrot.slane %v171_v54, %v6855_v49  ;;  %v5871_v59 = vld [vmem:[%s8671_s1 + $0x184] ss:$16 sps:$4 sm:$0xff]   ;;  %v5875_v11 = vld [vmem:[%s8671_s1 + $0x180] ss:$16 sps:$4 sm:$0xff]  }
  0x1f   : > { %1507 = vmatpush1.bf16.msra.mxu0 %v5839_v26  ;;  %v5873_v60 = vld [vmem:[%s8671_s1 + $0x384] ss:$16 sps:$4 sm:$0xff]   ;;  %v5876_v12 = vld [vmem:[%s8671_s1 + $0x380] ss:$16 sps:$4 sm:$0xff]  }
  0x20   : > { %1548 = vmatpush1.bf16.msra.mxu1 %v5840_v27  ;;  %1508 = vmatprep.subr.bf16.mxu0 %v5841_v28  ;;  %v196_v0 = vshrl.u32 %v4810_v56, 16  ;;  %v198_v1 = vshll.u32 %v4810_v56, 16  ;;  %v203_v2 = vshrl.u32 %v4811_v57, 16  ;;  %v205_v3 = vshll.u32 %v4811_v57, 16  ;;  %v5877_v15 = vld [vmem:[%s8671_s1 + $0x1a4] ss:$16 sps:$4 sm:$0xff]  }
  0x21   : > { %1549 = vmatprep.subr.bf16.mxu1 %v5843_v29  ;;  %v4818_v4 = vcombine.low %v267_v58, %v6879_v63  ;;  %v5879_v16 = vld [vmem:[%s8671_s1 + $0x3a4] ss:$16 sps:$4 sm:$0xff]   ;;  %v251_v22 = vrot.slane %v4810_v56, 1  ;;  %v5881_v23 = vld [vmem:[%s8671_s1 + $0x1a0] ss:$16 sps:$4 sm:$0xff]   ;;  %v252_v26 = vrot.slane %v4811_v57, 1 }
  0x22   : > { %v200_v7 = vrot.slane %v198_v1, 1  ;;  %v207_v8 = vrot.slane %v205_v3, 1  ;;  %v253_v27 = vrot.slane %v4812_v61, 1  ;;  %v5882_v28 = vld [vmem:[%s8671_s1 + $0x3a0] ss:$16 sps:$4 sm:$0xff]   ;;  %v254_v29 = vrot.slane %v4813_v62, 1 }
  0x23   : > { %1509 = vmatpush1.bf16.msra.mxu0 %v5845_v30  ;;  %v6889_v13 = vrot.slane %v4818_v4, %v6855_v49  ;;  %v5883_v30 = vld [vmem:[%s8671_s1 + $0x1c4] ss:$16 sps:$4 sm:$0xff]   ;;  %v5887_v36 = vld [vmem:[%s8671_s1 + $0x1c0] ss:$16 sps:$4 sm:$0xff]   ;;  %v5910_v57 = vld [vmem:[%s8671_s1 + $0x2c] ss:$16 sps:$4 sm:$0xff]  }
  0x24   : > { %1550 = vmatpush1.bf16.msra.mxu1 %v5846_v31  ;;  %1510 = vmatprep.subr.bf16.mxu0 %v5847_v32  ;;  %v201_v17 = vor.u32 %v200_v7, %v196_v0  ;;  %v208_v18 = vor.u32 %v207_v8, %v203_v2  ;;  %v5885_v31 = vld [vmem:[%s8671_s1 + $0x3c4] ss:$16 sps:$4 sm:$0xff]   ;;  %v5899_v54 = vld [vmem:[%s8671_s1 + $0x400] ss:$16 sps:$4 sm:$0xff]   ;;  %v5916_v62 = vld [vmem:[%s8671_s1 + $0x4c] ss:$16 sps:$4 sm:$0xff]  }
  0x25   : > { %1551 = vmatprep.subr.bf16.mxu1 %v5849_v33  ;;  %v6899_v20 = vcombine.high %v6889_v13, %v6889_v13  ;;  %v285_v33 = vcombine.low %v215_v21, %v222_v24  ;;  %v5891_v42 = vld [vmem:[%s8671_s1 + $0x3e4] ss:$16 sps:$4 sm:$0xff]   ;;  %v5911_v0 = vld [vmem:[%s8671_s1 + $0x440] ss:$16 sps:$4 sm:$0xff]   ;;  %v5914_v1 = vld [vmem:[%s8671_s1 + $0x48] ss:$16 sps:$4 sm:$0xff]  }
  0x26   : > { %v260_v25 = vcombine.low %v201_v17, %v208_v18  ;;  %v5907_v56 = vld [vmem:[%s8671_s1 + $0x424] ss:$16 sps:$4 sm:$0xff]   ;;  %v5922_v3 = vld [vmem:[%s8671_s1 + $0x6c] ss:$16 sps:$4 sm:$0xff]   ;;  %v5917_v4 = vld [vmem:[%s8671_s1 + $0x460] ss:$16 sps:$4 sm:$0xff]  }
  0x27   : > { %1511 = vmatpush1.bf16.msra.mxu0 %v5851_v34  ;;  %v276_v34 = vcombine.low %v251_v22, %v252_v26  ;;  %1526 = vmatprep.mubr.bf16.mxu0 %v6899_v20  ;;  %v6919_v37 = vrot.slane %v285_v33, %v6855_v49  ;;  %v5913_v61 = vld [vmem:[%s8671_s1 + $0x444] ss:$16 sps:$4 sm:$0xff]   ;;  %v5928_v7 = vld [vmem:[%s8671_s1 + $0x8c] ss:$16 sps:$4 sm:$0xff]   ;;  %v5923_v8 = vld [vmem:[%s8671_s1 + $0x480] ss:$16 sps:$4 sm:$0xff]  }
  0x28   : > { %1552 = vmatpush1.bf16.msra.mxu1 %v5852_v35  ;;  %1512 = vmatprep.subr.bf16.mxu0 %v5853_v39  ;;  %v274_v32 = vrot.slane %v260_v25, %v6855_v49  ;;  %v301_v35 = vcombine.low %v253_v27, %v254_v29  ;;  %v5888_v39 = vld [vmem:[%s8671_s1 + $0x3c0] ss:$16 sps:$4 sm:$0xff]   ;;  %v5919_v2 = vld [vmem:[%s8671_s1 + $0x464] ss:$16 sps:$4 sm:$0xff]   ;;  %v5938_v18 = vld [vmem:[%s8671_s1 + $0xc8] ss:$16 sps:$4 sm:$0xff]  }
  0x29   : > { %1553 = vmatprep.subr.bf16.mxu1 %v5855_v40  ;;  %v283_v38 = vrot.slane %v276_v34, %v6855_v49  ;;  %v5925_v6 = vld [vmem:[%s8671_s1 + $0x484] ss:$16 sps:$4 sm:$0xff]   ;;  %v5935_v17 = vld [vmem:[%s8671_s1 + $0x4c0] ss:$16 sps:$4 sm:$0xff]   ;;  %v5944_v22 = vld [vmem:[%s8671_s1 + $0xe8] ss:$16 sps:$4 sm:$0xff]  }
  0x2a   : > { %v6926_v40 = vrot.slane %v301_v35, %v6855_v49  ;;  %v5931_v10 = vld [vmem:[%s8671_s1 + $0x4a4] ss:$16 sps:$4 sm:$0xff]   ;;  %v5941_v21 = vld [vmem:[%s8671_s1 + $0x4e0] ss:$16 sps:$4 sm:$0xff]   ;;  %v5952_v24 = vld [vmem:[%s8671_s1 + $0x10c] ss:$16 sps:$4 sm:$0xff]  }
  0x2b   : > { %1513 = vmatpush1.bf16.msra.mxu0 %v5857_v41  ;;  %v5889_v41 = vld [vmem:[%s8671_s1 + $0x1e4] ss:$16 sps:$4 sm:$0xff]   ;;  %v5947_v25 = vld [vmem:[%s8671_s1 + $0x500] ss:$16 sps:$4 sm:$0xff]   ;;  %v5950_v26 = vld [vmem:[%s8671_s1 + $0x108] ss:$16 sps:$4 sm:$0xff]  }
  0x2c   : > { %1554 = vmatpush1.bf16.msra.mxu1 %v5858_v44  ;;  %1514 = vmatprep.subr.bf16.mxu0 %v5859_v45  ;;  %v4819_v44 = vcombine.low %v274_v32, %v6919_v37  ;;  %v519_v45 = vcombine.low %v283_v38, %v6926_v40  ;;  %v5943_v19 = vld [vmem:[%s8671_s1 + $0x4e4] ss:$16 sps:$4 sm:$0xff]   ;;  %v5953_v29 = vld [vmem:[%s8671_s1 + $0x520] ss:$16 sps:$4 sm:$0xff]   ;;  %v5964_v32 = vld [vmem:[%s8671_s1 + $0x14c] ss:$16 sps:$4 sm:$0xff]  }
  0x2d   : > { %1555 = vmatprep.subr.bf16.mxu1 %v5861_v46  ;;  %v5893_v46 = vld [vmem:[%s8671_s1 + $0x1e0] ss:$16 sps:$4 sm:$0xff]   ;;  %v5955_v27 = vld [vmem:[%s8671_s1 + $0x524] ss:$16 sps:$4 sm:$0xff]   ;;  %v5962_v34 = vld [vmem:[%s8671_s1 + $0x148] ss:$16 sps:$4 sm:$0xff]  }
  0x2e   : > { %v5959_v33 = vld [vmem:[%s8671_s1 + $0x540] ss:$16 sps:$4 sm:$0xff]   ;;  %v5967_v35 = vld [vmem:[%s8671_s1 + $0x564] ss:$16 sps:$4 sm:$0xff]  }
  0x2f   : > { %1515 = vmatpush1.bf16.msra.mxu0 %v5863_v47  ;;  %v6940_v47 = vrot.slane %v4819_v44, %v6855_v49  ;;  %v5965_v38 = vld [vmem:[%s8671_s1 + $0x560] ss:$16 sps:$4 sm:$0xff]  }
  0x30   : > { %1556 = vmatpush1.bf16.msra.mxu1 %v5864_v48  ;;  %1516 = vmatprep.subr.bf16.mxu0 %v5865_v50  ;;  %v5894_v48 = vld [vmem:[%s8671_s1 + $0x3e0] ss:$16 sps:$4 sm:$0xff]  }
  0x31   : > { %1557 = vmatprep.subr.bf16.mxu1 %v5867_v51  ;;  %v6947_v50 = vcombine.high %v6940_v47, %v6940_v47  ;;  %v5901_v51 = vld [vmem:[%s8671_s1 + $0x404] ss:$16 sps:$4 sm:$0xff]   ;;  %v5971_v44 = vld [vmem:[%s8671_s1 + $0x580] ss:$16 sps:$4 sm:$0xff]  }
  0x33   : > { %1517 = vmatpush1.bf16.msra.mxu0 %v5869_v52  ;;  %v5904_v52 = vld [vmem:[%s8671_s1 + $0xc] ss:$16 sps:$4 sm:$0xff]   ;;  %1567 = vmatprep.mubr.bf16.mxu1 %v6947_v50 }
  0x34   : > { %1558 = vmatpush1.bf16.msra.mxu1 %v5870_v53  ;;  %1518 = vmatprep.subr.bf16.mxu0 %v5871_v59  ;;  %v6956_v53 = vrot.slane %v519_v45, %v6855_v49  ;;  %v5905_v59 = vld [vmem:[%s8671_s1 + $0x420] ss:$16 sps:$4 sm:$0xff]   ;;  %v5974_v45 = vld [vmem:[%s8671_s1 + $0x188] ss:$16 sps:$4 sm:$0xff]  }
  0x35   : > { %1559 = vmatprep.subr.bf16.mxu1 %v5873_v60  ;;  %v5908_v60 = vld [vmem:[%s8671_s1 + $0x28] ss:$16 sps:$4 sm:$0xff]  }
  0x36   : > { %v6973_v58 = vcombine.high %v6956_v53, %v6956_v53 }
  0x37   : > { %1519 = vmatpush1.bf16.msra.mxu0 %v5875_v11  ;;  %v5934_v11 = vld [vmem:[%s8671_s1 + $0xac] ss:$16 sps:$4 sm:$0xff]  }
  0x38   : > { %1560 = vmatpush1.bf16.msra.mxu1 %v5876_v12  ;;  %1520 = vmatprep.subr.bf16.mxu0 %v5877_v15  ;;  %v5929_v12 = vld [vmem:[%s8671_s1 + $0x4a0] ss:$16 sps:$4 sm:$0xff]   ;;  %v5937_v15 = vld [vmem:[%s8671_s1 + $0x4c4] ss:$16 sps:$4 sm:$0xff]  }
  0x39   : > { %1561 = vmatprep.subr.bf16.mxu1 %v5879_v16  ;;  %v5940_v16 = vld [vmem:[%s8671_s1 + $0xcc] ss:$16 sps:$4 sm:$0xff]  }
  0x3b   : > { %1521 = vmatpush1.bf16.msra.mxu0 %v5881_v23  ;;  %v5949_v23 = vld [vmem:[%s8671_s1 + $0x504] ss:$16 sps:$4 sm:$0xff]  }
  0x3c   : > { %1562 = vmatpush1.bf16.msra.mxu1 %v5882_v28  ;;  %1522 = vmatprep.subr.bf16.mxu0 %v5883_v30  ;;  %v5958_v28 = vld [vmem:[%s8671_s1 + $0x12c] ss:$16 sps:$4 sm:$0xff]   ;;  %v5956_v30 = vld [vmem:[%s8671_s1 + $0x128] ss:$16 sps:$4 sm:$0xff]  }
  0x3d   : > { %1563 = vmatprep.subr.bf16.mxu1 %v5885_v31  ;;  %v5961_v31 = vld [vmem:[%s8671_s1 + $0x544] ss:$16 sps:$4 sm:$0xff]  }
  0x3f   : > { %1523 = vmatpush1.bf16.msra.mxu0 %v5887_v36  ;;  %v5970_v36 = vld [vmem:[%s8671_s1 + $0x16c] ss:$16 sps:$4 sm:$0xff]  }
  0x40   : > { %1564 = vmatpush1.bf16.msra.mxu1 %v5888_v39  ;;  %1524 = vmatprep.subr.bf16.mxu0 %v5889_v41  ;;  %v5968_v39 = vld [vmem:[%s8671_s1 + $0x168] ss:$16 sps:$4 sm:$0xff]   ;;  %v5973_v41 = vld [vmem:[%s8671_s1 + $0x584] ss:$16 sps:$4 sm:$0xff]  }
  0x41   : > { %1565 = vmatprep.subr.bf16.mxu1 %v5891_v42  ;;  %v5976_v42 = vld [vmem:[%s8671_s1 + $0x18c] ss:$16 sps:$4 sm:$0xff]  }
  0x43   : > { %1525 = vmatpush1.bf16.msra.mxu0 %v5893_v46  ;;  %v5979_v46 = vld [vmem:[%s8671_s1 + $0x5a4] ss:$16 sps:$4 sm:$0xff]  }
  0x44   : > { %1566 = vmatpush1.bf16.msra.mxu1 %v5894_v48  ;;  %1576 = vmatprep.subr.bf16.mxu0 %v5901_v51  ;;  %v5982_v48 = vld [vmem:[%s8671_s1 + $0x1ac] ss:$16 sps:$4 sm:$0xff]   ;;  %v5977_v51 = vld [vmem:[%s8671_s1 + $0x5a0] ss:$16 sps:$4 sm:$0xff]  }
  0x45   : > { %1617 = vmatprep.subr.bf16.mxu1 %v5904_v52  ;;  %v5980_v52 = vld [vmem:[%s8671_s1 + $0x1a8] ss:$16 sps:$4 sm:$0xff]  }
  0x46   : > { %1527 = vmatmul.mubr.bf16.vlgmr.msra.gmra.mrb[0].mxu0 %v6889_v13 }
  0x47   : > { %1568 = vmatmul.mubr.bf16.vlgmr.msra.gmra.mrb[0].mxu1 %v6940_v47  ;;  %1577 = vmatpush1.bf16.msra.mxu0 %v5899_v54  ;;  %v5985_v54 = vld [vmem:[%s8671_s1 + $0x5c4] ss:$16 sps:$4 sm:$0xff]  }
  0x48   : > { %1618 = vmatpush1.bf16.msra.mxu1 %v5902_v55  ;;  %1578 = vmatprep.subr.bf16.mxu0 %v5907_v56  ;;  %v5988_v55 = vld [vmem:[%s8671_s1 + $0x1cc] ss:$16 sps:$4 sm:$0xff]   ;;  %v5983_v56 = vld [vmem:[%s8671_s1 + $0x5c0] ss:$16 sps:$4 sm:$0xff]  }
  0x49   : > { %1619 = vmatprep.subr.bf16.mxu1 %v5910_v57  ;;  %1608 = vmatprep.mubr.bf16.mxu0 %v6973_v58  ;;  %v5986_v57 = vld [vmem:[%s8671_s1 + $0x1c8] ss:$16 sps:$4 sm:$0xff]  }
  0x4a   : > { %1649 = vmatprep.mubr.bf16.mxu1 %v6899_v20  ;;  %v5946_v20 = vld [vmem:[%s8671_s1 + $0xec] ss:$16 sps:$4 sm:$0xff]  }
  0x4b   : > { %1579 = vmatpush1.bf16.msra.mxu0 %v5905_v59  ;;  %v5991_v59 = vld [vmem:[%s8671_s1 + $0x5e4] ss:$16 sps:$4 sm:$0xff]  }
  0x4c   : > { %1620 = vmatpush1.bf16.msra.mxu1 %v5908_v60  ;;  %1580 = vmatprep.subr.bf16.mxu0 %v5913_v61  ;;  %v5994_v60 = vld [vmem:[%s8671_s1 + $0x1ec] ss:$16 sps:$4 sm:$0xff]   ;;  %v5989_v61 = vld [vmem:[%s8671_s1 + $0x5e0] ss:$16 sps:$4 sm:$0xff]  }
  0x4d   : > { %1621 = vmatprep.subr.bf16.mxu1 %v5916_v62  ;;  %v5992_v62 = vld [vmem:[%s8671_s1 + $0x1e8] ss:$16 sps:$4 sm:$0xff]  }
  0x4f   : > { %1581 = vmatpush1.bf16.msra.mxu0 %v5911_v0  ;;  %v5997_v0 = vld [vmem:[%s8671_s1 + $0x20c] ss:$16 sps:$4 sm:$0xff]  }
  0x50   : > { %1622 = vmatpush1.bf16.msra.mxu1 %v5914_v1  ;;  %1582 = vmatprep.subr.bf16.mxu0 %v5919_v2  ;;  %v6000_v1 = vld [vmem:[%s8671_s1 + $0x40c] ss:$16 sps:$4 sm:$0xff]   ;;  %v5995_v2 = vld [vmem:[%s8671_s1 + $0x208] ss:$16 sps:$4 sm:$0xff]  }
  0x51   : > { %1623 = vmatprep.subr.bf16.mxu1 %v5922_v3  ;;  %v5998_v3 = vld [vmem:[%s8671_s1 + $0x408] ss:$16 sps:$4 sm:$0xff]  }
  0x53   : > { %1583 = vmatpush1.bf16.msra.mxu0 %v5917_v4  ;;  %v6003_v4 = vld [vmem:[%s8671_s1 + $0x22c] ss:$16 sps:$4 sm:$0xff]  }
  0x54   : > { %1624 = vmatpush1.bf16.msra.mxu1 %v5920_v5  ;;  %1584 = vmatprep.subr.bf16.mxu0 %v5925_v6  ;;  %v6006_v5 = vld [vmem:[%s8671_s1 + $0x42c] ss:$16 sps:$4 sm:$0xff]   ;;  %v6001_v6 = vld [vmem:[%s8671_s1 + $0x228] ss:$16 sps:$4 sm:$0xff]  }
  0x55   : > { %1625 = vmatprep.subr.bf16.mxu1 %v5928_v7  ;;  %v6004_v7 = vld [vmem:[%s8671_s1 + $0x428] ss:$16 sps:$4 sm:$0xff]  }
  0x57   : > { %1585 = vmatpush1.bf16.msra.mxu0 %v5923_v8  ;;  %v6009_v8 = vld [vmem:[%s8671_s1 + $0x24c] ss:$16 sps:$4 sm:$0xff]  }
  0x58   : > { %1626 = vmatpush1.bf16.msra.mxu1 %v5926_v9  ;;  %1586 = vmatprep.subr.bf16.mxu0 %v5931_v10  ;;  %v6007_v9 = vld [vmem:[%s8671_s1 + $0x248] ss:$16 sps:$4 sm:$0xff]  }
  0x59   : > { %1627 = vmatprep.subr.bf16.mxu1 %v5934_v11  ;;  %v6010_v10 = vld [vmem:[%s8671_s1 + $0x448] ss:$16 sps:$4 sm:$0xff]   ;;  %v6015_v11 = vld [vmem:[%s8671_s1 + $0x26c] ss:$16 sps:$4 sm:$0xff]  }
  0x5b   : > { %1587 = vmatpush1.bf16.msra.mxu0 %v5929_v12  ;;  %v6016_v12 = vld [vmem:[%s8671_s1 + $0x468] ss:$16 sps:$4 sm:$0xff]  }
  0x5c   : > { %1628 = vmatpush1.bf16.msra.mxu1 %v5932_v14  ;;  %1588 = vmatprep.subr.bf16.mxu0 %v5937_v15  ;;  %v6021_v14 = vld [vmem:[%s8671_s1 + $0x28c] ss:$16 sps:$4 sm:$0xff]  }
  0x5d   : > { %1629 = vmatprep.subr.bf16.mxu1 %v5940_v16  ;;  %v6024_v15 = vld [vmem:[%s8671_s1 + $0x48c] ss:$16 sps:$4 sm:$0xff]   ;;  %v6019_v16 = vld [vmem:[%s8671_s1 + $0x288] ss:$16 sps:$4 sm:$0xff]  }
  0x5f   : > { %1589 = vmatpush1.bf16.msra.mxu0 %v5935_v17  ;;  %v6022_v17 = vld [vmem:[%s8671_s1 + $0x488] ss:$16 sps:$4 sm:$0xff]  }
  0x60   : > { %1630 = vmatpush1.bf16.msra.mxu1 %v5938_v18  ;;  %1590 = vmatprep.subr.bf16.mxu0 %v5943_v19  ;;  %v6027_v18 = vld [vmem:[%s8671_s1 + $0x2ac] ss:$16 sps:$4 sm:$0xff]  }
  0x61   : > { %1631 = vmatprep.subr.bf16.mxu1 %v5946_v20  ;;  %v6030_v19 = vld [vmem:[%s8671_s1 + $0x4ac] ss:$16 sps:$4 sm:$0xff]   ;;  %v6025_v20 = vld [vmem:[%s8671_s1 + $0x2a8] ss:$16 sps:$4 sm:$0xff]  }
  0x63   : > { %1591 = vmatpush1.bf16.msra.mxu0 %v5941_v21  ;;  %v6028_v21 = vld [vmem:[%s8671_s1 + $0x4a8] ss:$16 sps:$4 sm:$0xff]  }
  0x64   : > { %1632 = vmatpush1.bf16.msra.mxu1 %v5944_v22  ;;  %1592 = vmatprep.subr.bf16.mxu0 %v5949_v23  ;;  %v6033_v22 = vld [vmem:[%s8671_s1 + $0x2cc] ss:$16 sps:$4 sm:$0xff]  }
  0x65   : > { %1633 = vmatprep.subr.bf16.mxu1 %v5952_v24  ;;  %v6036_v23 = vld [vmem:[%s8671_s1 + $0x4cc] ss:$16 sps:$4 sm:$0xff]   ;;  %v6031_v24 = vld [vmem:[%s8671_s1 + $0x2c8] ss:$16 sps:$4 sm:$0xff]  }
  0x67   : > { %1593 = vmatpush1.bf16.msra.mxu0 %v5947_v25  ;;  %v6034_v25 = vld [vmem:[%s8671_s1 + $0x4c8] ss:$16 sps:$4 sm:$0xff]  }
  0x68   : > { %1634 = vmatpush1.bf16.msra.mxu1 %v5950_v26  ;;  %1594 = vmatprep.subr.bf16.mxu0 %v5955_v27  ;;  %v6039_v26 = vld [vmem:[%s8671_s1 + $0x2ec] ss:$16 sps:$4 sm:$0xff]  }
  0x69   : > { %1635 = vmatprep.subr.bf16.mxu1 %v5958_v28  ;;  %v6042_v27 = vld [vmem:[%s8671_s1 + $0x4ec] ss:$16 sps:$4 sm:$0xff]   ;;  %v6037_v28 = vld [vmem:[%s8671_s1 + $0x2e8] ss:$16 sps:$4 sm:$0xff]  }
  0x6b   : > { %1595 = vmatpush1.bf16.msra.mxu0 %v5953_v29  ;;  %v6040_v29 = vld [vmem:[%s8671_s1 + $0x4e8] ss:$16 sps:$4 sm:$0xff]  }
  0x6c   : > { %1636 = vmatpush1.bf16.msra.mxu1 %v5956_v30  ;;  %1596 = vmatprep.subr.bf16.mxu0 %v5961_v31  ;;  %v6045_v30 = vld [vmem:[%s8671_s1 + $0x30c] ss:$16 sps:$4 sm:$0xff]  }
  0x6d   : > { %1637 = vmatprep.subr.bf16.mxu1 %v5964_v32  ;;  %v6048_v31 = vld [vmem:[%s8671_s1 + $0x50c] ss:$16 sps:$4 sm:$0xff]   ;;  %v6043_v32 = vld [vmem:[%s8671_s1 + $0x308] ss:$16 sps:$4 sm:$0xff]  }
  0x6f   : > { %1597 = vmatpush1.bf16.msra.mxu0 %v5959_v33  ;;  %v6046_v33 = vld [vmem:[%s8671_s1 + $0x508] ss:$16 sps:$4 sm:$0xff]  }
  0x70   : > { %1638 = vmatpush1.bf16.msra.mxu1 %v5962_v34  ;;  %1598 = vmatprep.subr.bf16.mxu0 %v5967_v35  ;;  %v6051_v34 = vld [vmem:[%s8671_s1 + $0x32c] ss:$16 sps:$4 sm:$0xff]  }
  0x71   : > { %1639 = vmatprep.subr.bf16.mxu1 %v5970_v36  ;;  %v6054_v35 = vld [vmem:[%s8671_s1 + $0x52c] ss:$16 sps:$4 sm:$0xff]   ;;  %v6049_v36 = vld [vmem:[%s8671_s1 + $0x328] ss:$16 sps:$4 sm:$0xff]  }
  0x73   : > { %1599 = vmatpush1.bf16.msra.mxu0 %v5965_v38  ;;  %v6052_v38 = vld [vmem:[%s8671_s1 + $0x528] ss:$16 sps:$4 sm:$0xff]  }
  0x74   : > { %1640 = vmatpush1.bf16.msra.mxu1 %v5968_v39  ;;  %1600 = vmatprep.subr.bf16.mxu0 %v5973_v41  ;;  %v6057_v39 = vld [vmem:[%s8671_s1 + $0x34c] ss:$16 sps:$4 sm:$0xff]  }
  0x75   : > { %1641 = vmatprep.subr.bf16.mxu1 %v5976_v42  ;;  %v6060_v41 = vld [vmem:[%s8671_s1 + $0x54c] ss:$16 sps:$4 sm:$0xff]   ;;  %v6055_v42 = vld [vmem:[%s8671_s1 + $0x348] ss:$16 sps:$4 sm:$0xff]  }
  0x77   : > { %1601 = vmatpush1.bf16.msra.mxu0 %v5971_v44  ;;  %v6058_v44 = vld [vmem:[%s8671_s1 + $0x548] ss:$16 sps:$4 sm:$0xff]  }
  0x78   : > { %1642 = vmatpush1.bf16.msra.mxu1 %v5974_v45  ;;  %1602 = vmatprep.subr.bf16.mxu0 %v5979_v46  ;;  %v6063_v45 = vld [vmem:[%s8671_s1 + $0x36c] ss:$16 sps:$4 sm:$0xff]  }
  0x79   : > { %1643 = vmatprep.subr.bf16.mxu1 %v5982_v48  ;;  %v6066_v46 = vld [vmem:[%s8671_s1 + $0x56c] ss:$16 sps:$4 sm:$0xff]   ;;  %v6061_v48 = vld [vmem:[%s8671_s1 + $0x368] ss:$16 sps:$4 sm:$0xff]  }
  0x7b   : > { %1603 = vmatpush1.bf16.msra.mxu0 %v5977_v51  ;;  %v6064_v51 = vld [vmem:[%s8671_s1 + $0x568] ss:$16 sps:$4 sm:$0xff]  }
  0x7c   : > { %1644 = vmatpush1.bf16.msra.mxu1 %v5980_v52  ;;  %1604 = vmatprep.subr.bf16.mxu0 %v5985_v54  ;;  %v173_v52 = vld [vmem:[%s6852_s30 + $0x10] sm:$0x77]  ;;  %v6069_v54 = vld [vmem:[%s8671_s1 + $0x38c] ss:$16 sps:$4 sm:$0xff]  }
  0x7d   : > { %1645 = vmatprep.subr.bf16.mxu1 %v5988_v55  ;;  %v6072_v55 = vld [vmem:[%s8671_s1 + $0x58c] ss:$16 sps:$4 sm:$0xff]  }
  0x7f   : > { %1605 = vmatpush1.bf16.msra.mxu0 %v5983_v56  ;;  %v4814_v56 = vcombine.low %v173_v52, %v173_v52 }
  0x80   : > { %1646 = vmatpush1.bf16.msra.mxu1 %v5986_v57  ;;  %1606 = vmatprep.subr.bf16.mxu0 %v5991_v59  ;;  %v4815_v57 = vcombine.high %v173_v52, %v173_v52  ;;  %v6067_v59 = vld [vmem:[%s8671_s1 + $0x388] ss:$16 sps:$4 sm:$0xff]  }
  0x81   : > { %1647 = vmatprep.subr.bf16.mxu1 %v5994_v60  ;;  %v6070_v60 = vld [vmem:[%s8671_s1 + $0x588] ss:$16 sps:$4 sm:$0xff]  }
  0x83   : > { %1607 = vmatpush1.bf16.msra.mxu0 %v5989_v61  ;;  %v224_v61 = vshrl.u32 %v4814_v56, 16 }
  0x84   : > { %1648 = vmatpush1.bf16.msra.mxu1 %v5992_v62  ;;  %1658 = vmatprep.subr.bf16.mxu0 %v5997_v0  ;;  %v226_v62 = vshll.u32 %v4814_v56, 16  ;;  %v6075_v0 = vld [vmem:[%s8671_s1 + $0x3ac] ss:$16 sps:$4 sm:$0xff]  }
  0x85   : > { %1699 = vmatprep.subr.bf16.mxu1 %v6000_v1  ;;  %v231_v1 = vshrl.u32 %v4815_v57, 16 }
  0x86   : > { %1609 = vmatmul.mubr.bf16.vlgmr.msra.gmra.mrb[4].mxu0 %v6956_v53 }
  0x87   : > { %1650 = vmatmul.mubr.bf16.vlgmr.msra.gmra.mrb[4].mxu1 %v6889_v13  ;;  %1659 = vmatpush1.bf16.msra.mxu0 %v5995_v2  ;;  %v6012_v13 = vld [vmem:[%s8671_s1 + $0x44c] ss:$16 sps:$4 sm:$0xff]   ;;  %v233_v2 = vshll.u32 %v4815_v57, 16 }
  0x88   : > { %1700 = vmatpush1.bf16.msra.mxu1 %v5998_v3  ;;  %1660 = vmatprep.subr.bf16.mxu0 %v6003_v4  ;;  %v6078_v3 = vld [vmem:[%s8671_s1 + $0x5ac] ss:$16 sps:$4 sm:$0xff]   ;;  %v228_v4 = vrot.slane %v226_v62, 1  ;;  %v6133_v62 = vld [vmem:[%s8671_s1 + $0x6e0] ss:$16 sps:$4 sm:$0xff]  }
  0x89   : > { %1701 = vmatprep.subr.bf16.mxu1 %v6006_v5  ;;  %1690 = vmatprep.mubr.bf16.mxu0 %v6947_v50  ;;  %v6018_v50 = vld [vmem:[%s8671_s1 + $0x46c] ss:$16 sps:$4 sm:$0xff]   ;;  %v235_v5 = vrot.slane %v233_v2, 1  ;;  %v6144_v2 = vld [vmem:[%s8671_s1 + $0x904] ss:$16 sps:$4 sm:$0xff]  }
  0x8a   : > { %1731 = vmatprep.mubr.bf16.mxu1 %v6973_v58  ;;  %v6013_v58 = vld [vmem:[%s8671_s1 + $0x268] ss:$16 sps:$4 sm:$0xff]  }
  0x8b   : > { %1661 = vmatpush1.bf16.msra.mxu0 %v6001_v6  ;;  %v6073_v6 = vld [vmem:[%s8671_s1 + $0x3a8] ss:$16 sps:$4 sm:$0xff]  }
  0x8c   : > { %1702 = vmatpush1.bf16.msra.mxu1 %v6004_v7  ;;  %1662 = vmatprep.subr.bf16.mxu0 %v6009_v8  ;;  %v229_v7 = vor.u32 %v228_v4, %v224_v61  ;;  %v6076_v8 = vld [vmem:[%s8671_s1 + $0x5a8] ss:$16 sps:$4 sm:$0xff]   ;;  %v6138_v61 = vld [vmem:[%s8671_s1 + $0x8e4] ss:$16 sps:$4 sm:$0xff]   ;;  %v6142_v4 = vld [vmem:[%s8671_s1 + $0x900] ss:$16 sps:$4 sm:$0xff]  }
  0x8d   : > { %1703 = vmatprep.subr.bf16.mxu1 %v6012_v13  ;;  %v6081_v13 = vld [vmem:[%s8671_s1 + $0x3cc] ss:$16 sps:$4 sm:$0xff]  }
  0x8f   : > { %1663 = vmatpush1.bf16.msra.mxu0 %v6007_v9  ;;  %v236_v9 = vor.u32 %v235_v5, %v231_v1  ;;  %v6141_v1 = vld [vmem:[%s8671_s1 + $0x704] ss:$16 sps:$4 sm:$0xff]  }
  0x90   : > { %1704 = vmatpush1.bf16.msra.mxu1 %v6010_v10  ;;  %1664 = vmatprep.subr.bf16.mxu0 %v6015_v11  ;;  %v6084_v10 = vld [vmem:[%s8671_s1 + $0x5cc] ss:$16 sps:$4 sm:$0xff]   ;;  %v7333_v11 = vrot.slane %v173_v52, %v6855_v49  ;;  %v6121_v52 = vld [vmem:[%s8671_s1 + $0x6a0] ss:$16 sps:$4 sm:$0xff]   ;;  %v6147_v5 = vld [vmem:[%s8671_s1 + $0x724] ss:$16 sps:$4 sm:$0xff]  }
  0x91   : > { %1705 = vmatprep.subr.bf16.mxu1 %v6018_v50  ;;  %v1745_v50 = vcombine.low %v229_v7, %v236_v9  ;;  %v6145_v7 = vld [vmem:[%s8671_s1 + $0x720] ss:$16 sps:$4 sm:$0xff]   ;;  %v6156_v9 = vld [vmem:[%s8671_s1 + $0x944] ss:$16 sps:$4 sm:$0xff]  }
  0x93   : > { %1665 = vmatpush1.bf16.msra.mxu0 %v6013_v58  ;;  %v255_v58 = vrot.slane %v4814_v56, 1  ;;  %v6132_v56 = vld [vmem:[%s8671_s1 + $0x8c4] ss:$16 sps:$4 sm:$0xff]  }
  0x94   : > { %1706 = vmatpush1.bf16.msra.mxu1 %v6016_v12  ;;  %1666 = vmatprep.subr.bf16.mxu0 %v6021_v14  ;;  %v256_v12 = vrot.slane %v4815_v57, 1  ;;  %v6079_v14 = vld [vmem:[%s8671_s1 + $0x3c8] ss:$16 sps:$4 sm:$0xff]   ;;  %v6127_v57 = vld [vmem:[%s8671_s1 + $0x6c0] ss:$16 sps:$4 sm:$0xff]  }
  0x95   : > { %1707 = vmatprep.subr.bf16.mxu1 %v6024_v15  ;;  %v6082_v15 = vld [vmem:[%s8671_s1 + $0x5c8] ss:$16 sps:$4 sm:$0xff]  }
  0x97   : > { %1667 = vmatpush1.bf16.msra.mxu0 %v6019_v16  ;;  %v6087_v16 = vld [vmem:[%s8671_s1 + $0x3ec] ss:$16 sps:$4 sm:$0xff]  }
  0x98   : > { %1708 = vmatpush1.bf16.msra.mxu1 %v6022_v17  ;;  %1668 = vmatprep.subr.bf16.mxu0 %v6027_v18  ;;  %v7345_v17 = vrot.slane %v1745_v50, %v6855_v49  ;;  %v7347_v18 = vcombine.low %v255_v58, %v256_v12  ;;  %v6154_v50 = vld [vmem:[%s8671_s1 + $0x940] ss:$16 sps:$4 sm:$0xff]   ;;  %v6159_v58 = vld [vmem:[%s8671_s1 + $0x764] ss:$16 sps:$4 sm:$0xff]  }
  0x99   : > { %1709 = vmatprep.subr.bf16.mxu1 %v6030_v19  ;;  %v6090_v19 = vld [vmem:[%s8671_s1 + $0x5ec] ss:$16 sps:$4 sm:$0xff]   ;;  %v6162_v12 = vld [vmem:[%s8671_s1 + $0x964] ss:$16 sps:$4 sm:$0xff]  }
  0x9b   : > { %1669 = vmatpush1.bf16.msra.mxu0 %v6025_v20  ;;  %v5204_v20 = vcombine.low %v6879_v63, %v7333_v11  ;;  %v6096_v63 = vld [vmem:[%s8671_s1 + $0x804] ss:$16 sps:$4 sm:$0xff]  }
  0x9c   : > { %1710 = vmatpush1.bf16.msra.mxu1 %v6028_v21  ;;  %1670 = vmatprep.subr.bf16.mxu0 %v6033_v22  ;;  %v5205_v21 = vcombine.low %v6919_v37, %v7345_v17  ;;  %v6085_v22 = vld [vmem:[%s8671_s1 + $0x3e8] ss:$16 sps:$4 sm:$0xff]  }
  0x9d   : > { %1711 = vmatprep.subr.bf16.mxu1 %v6036_v23  ;;  %v6088_v23 = vld [vmem:[%s8671_s1 + $0x5e8] ss:$16 sps:$4 sm:$0xff]   ;;  %v7369_v37 = vrot.slane %v5204_v20, %v6855_v49  ;;  %v6163_v20 = vld [vmem:[%s8671_s1 + $0x780] ss:$16 sps:$4 sm:$0xff]  }
  0x9f   : > { %1671 = vmatpush1.bf16.msra.mxu0 %v6031_v24  ;;  %v6093_v24 = vld [vmem:[%s8671_s1 + $0x604] ss:$16 sps:$4 sm:$0xff]  }
  0xa0   : > { %1712 = vmatpush1.bf16.msra.mxu1 %v6034_v25  ;;  %1672 = vmatprep.subr.bf16.mxu0 %v6039_v26  ;;  %v7372_v25 = vrot.slane %v5205_v21, %v6855_v49  ;;  %v6091_v26 = vld [vmem:[%s8671_s1 + $0x600] ss:$16 sps:$4 sm:$0xff]  }
  0xa1   : > { %1713 = vmatprep.subr.bf16.mxu1 %v6042_v27  ;;  %v6094_v27 = vld [vmem:[%s8671_s1 + $0x800] ss:$16 sps:$4 sm:$0xff]  }
  0xa2   : > { %v6166_v21 = vld [vmem:[%s8671_s1 + $0x980] ss:$16 sps:$4 sm:$0xff]  }
  0xa3   : > { %1673 = vmatpush1.bf16.msra.mxu0 %v6037_v28  ;;  %v6099_v28 = vld [vmem:[%s8671_s1 + $0x624] ss:$16 sps:$4 sm:$0xff]  }
  0xa4   : > { %1714 = vmatpush1.bf16.msra.mxu1 %v6040_v29  ;;  %1674 = vmatprep.subr.bf16.mxu0 %v6045_v30  ;;  %v6102_v29 = vld [vmem:[%s8671_s1 + $0x824] ss:$16 sps:$4 sm:$0xff]   ;;  %v7388_v30 = vcombine.high %v7369_v37, %v7369_v37 }
  0xa5   : > { %1715 = vmatprep.subr.bf16.mxu1 %v6048_v31  ;;  %v7392_v31 = vcombine.high %v7372_v25, %v7372_v25 }
  0xa7   : > { %1675 = vmatpush1.bf16.msra.mxu0 %v6043_v32  ;;  %v6097_v32 = vld [vmem:[%s8671_s1 + $0x620] ss:$16 sps:$4 sm:$0xff]  }
  0xa8   : > { %1716 = vmatpush1.bf16.msra.mxu1 %v6046_v33  ;;  %1676 = vmatprep.subr.bf16.mxu0 %v6051_v34  ;;  %v6100_v33 = vld [vmem:[%s8671_s1 + $0x820] ss:$16 sps:$4 sm:$0xff]   ;;  %v6105_v34 = vld [vmem:[%s8671_s1 + $0x644] ss:$16 sps:$4 sm:$0xff]  }
  0xa9   : > { %1717 = vmatprep.subr.bf16.mxu1 %v6054_v35  ;;  %v6106_v35 = vld [vmem:[%s8671_s1 + $0x840] ss:$16 sps:$4 sm:$0xff]  }
  0xab   : > { %1677 = vmatpush1.bf16.msra.mxu0 %v6049_v36  ;;  %v6111_v36 = vld [vmem:[%s8671_s1 + $0x664] ss:$16 sps:$4 sm:$0xff]  }
  0xac   : > { %1718 = vmatpush1.bf16.msra.mxu1 %v6052_v38  ;;  %1678 = vmatprep.subr.bf16.mxu0 %v6057_v39  ;;  %v6114_v38 = vld [vmem:[%s8671_s1 + $0x864] ss:$16 sps:$4 sm:$0xff]   ;;  %v6109_v39 = vld [vmem:[%s8671_s1 + $0x660] ss:$16 sps:$4 sm:$0xff]  }
  0xad   : > { %1719 = vmatprep.subr.bf16.mxu1 %v6060_v41  ;;  %v6112_v41 = vld [vmem:[%s8671_s1 + $0x860] ss:$16 sps:$4 sm:$0xff]  }
  0xaf   : > { %1679 = vmatpush1.bf16.msra.mxu0 %v6055_v42  ;;  %v6117_v42 = vld [vmem:[%s8671_s1 + $0x684] ss:$16 sps:$4 sm:$0xff]  }
  0xb0   : > { %1720 = vmatpush1.bf16.msra.mxu1 %v6058_v44  ;;  %1680 = vmatprep.subr.bf16.mxu0 %v6063_v45  ;;  %v6120_v44 = vld [vmem:[%s8671_s1 + $0x884] ss:$16 sps:$4 sm:$0xff]   ;;  %v6115_v45 = vld [vmem:[%s8671_s1 + $0x680] ss:$16 sps:$4 sm:$0xff]  }
  0xb1   : > { %1721 = vmatprep.subr.bf16.mxu1 %v6066_v46  ;;  %v6118_v46 = vld [vmem:[%s8671_s1 + $0x880] ss:$16 sps:$4 sm:$0xff]  }
  0xb3   : > { %1681 = vmatpush1.bf16.msra.mxu0 %v6061_v48  ;;  %v6123_v48 = vld [vmem:[%s8671_s1 + $0x6a4] ss:$16 sps:$4 sm:$0xff]  }
  0xb4   : > { %1722 = vmatpush1.bf16.msra.mxu1 %v6064_v51  ;;  %1682 = vmatprep.subr.bf16.mxu0 %v6069_v54  ;;  %v6126_v51 = vld [vmem:[%s8671_s1 + $0x8a4] ss:$16 sps:$4 sm:$0xff]   ;;  %v6124_v54 = vld [vmem:[%s8671_s1 + $0x8a0] ss:$16 sps:$4 sm:$0xff]  }
  0xb5   : > { %1723 = vmatprep.subr.bf16.mxu1 %v6072_v55  ;;  %v6129_v55 = vld [vmem:[%s8671_s1 + $0x6c4] ss:$16 sps:$4 sm:$0xff]  }
  0xb7   : > { %1683 = vmatpush1.bf16.msra.mxu0 %v6067_v59  ;;  %v6130_v59 = vld [vmem:[%s8671_s1 + $0x8c0] ss:$16 sps:$4 sm:$0xff]  }
  0xb8   : > { %1724 = vmatpush1.bf16.msra.mxu1 %v6070_v60  ;;  %1684 = vmatprep.subr.bf16.mxu0 %v6075_v0  ;;  %v6135_v60 = vld [vmem:[%s8671_s1 + $0x6e4] ss:$16 sps:$4 sm:$0xff]   ;;  %v6136_v0 = vld [vmem:[%s8671_s1 + $0x8e0] ss:$16 sps:$4 sm:$0xff]  }
  0xb9   : > { %1725 = vmatprep.subr.bf16.mxu1 %v6078_v3  ;;  %v6139_v3 = vld [vmem:[%s8671_s1 + $0x700] ss:$16 sps:$4 sm:$0xff]  }
  0xbb   : > { %1685 = vmatpush1.bf16.msra.mxu0 %v6073_v6  ;;  %v6150_v6 = vld [vmem:[%s8671_s1 + $0x924] ss:$16 sps:$4 sm:$0xff]  }
  0xbc   : > { %1726 = vmatpush1.bf16.msra.mxu1 %v6076_v8  ;;  %1686 = vmatprep.subr.bf16.mxu0 %v6081_v13  ;;  %v6148_v8 = vld [vmem:[%s8671_s1 + $0x920] ss:$16 sps:$4 sm:$0xff]   ;;  %v6153_v13 = vld [vmem:[%s8671_s1 + $0x744] ss:$16 sps:$4 sm:$0xff]  }
  0xbd   : > { %1727 = vmatprep.subr.bf16.mxu1 %v6084_v10  ;;  %v6151_v10 = vld [vmem:[%s8671_s1 + $0x740] ss:$16 sps:$4 sm:$0xff]  }
  0xbf   : > { %1687 = vmatpush1.bf16.msra.mxu0 %v6079_v14  ;;  %v6157_v14 = vld [vmem:[%s8671_s1 + $0x760] ss:$16 sps:$4 sm:$0xff]  }
  0xc0   : > { %1728 = vmatpush1.bf16.msra.mxu1 %v6082_v15  ;;  %1688 = vmatprep.subr.bf16.mxu0 %v6087_v16  ;;  %v6160_v15 = vld [vmem:[%s8671_s1 + $0x960] ss:$16 sps:$4 sm:$0xff]   ;;  %v6165_v16 = vld [vmem:[%s8671_s1 + $0x784] ss:$16 sps:$4 sm:$0xff]  }
  0xc1   : > { %1729 = vmatprep.subr.bf16.mxu1 %v6090_v19  ;;  %v6168_v19 = vld [vmem:[%s8671_s1 + $0x984] ss:$16 sps:$4 sm:$0xff]  }
  0xc3   : > { %1689 = vmatpush1.bf16.msra.mxu0 %v6085_v22  ;;  %v6171_v22 = vld [vmem:[%s8671_s1 + $0x7a4] ss:$16 sps:$4 sm:$0xff]  }
  0xc4   : > { %1730 = vmatpush1.bf16.msra.mxu1 %v6088_v23  ;;  %2955 = vmatprep.subr.bf16.mxu0 %v6093_v24  ;;  %v6174_v23 = vld [vmem:[%s8671_s1 + $0x9a4] ss:$16 sps:$4 sm:$0xff]   ;;  %v6169_v24 = vld [vmem:[%s8671_s1 + $0x7a0] ss:$16 sps:$4 sm:$0xff]  }
  0xc5   : > { %2996 = vmatprep.subr.bf16.mxu1 %v6096_v63  ;;  %v6172_v63 = vld [vmem:[%s8671_s1 + $0x9a0] ss:$16 sps:$4 sm:$0xff]  }
  0xc6   : > { %1691 = vmatmul.mubr.bf16.vlgmr.msra.gmra.mrb[8].mxu0 %v6940_v47  ;;  %v6108_v47 = vld [vmem:[%s8671_s1 + $0x844] ss:$16 sps:$4 sm:$0xff]  }
  0xc7   : > { %1732 = vmatmul.mubr.bf16.vlgmr.msra.gmra.mrb[8].mxu1 %v6956_v53  ;;  %2956 = vmatpush1.bf16.msra.mxu0 %v6091_v26  ;;  %v6103_v53 = vld [vmem:[%s8671_s1 + $0x640] ss:$16 sps:$4 sm:$0xff]   ;;  %v6177_v26 = vld [vmem:[%s8671_s1 + $0x7c4] ss:$16 sps:$4 sm:$0xff]  }
  0xc8   : > { %2997 = vmatpush1.bf16.msra.mxu1 %v6094_v27  ;;  %2957 = vmatprep.subr.bf16.mxu0 %v6099_v28  ;;  %v6180_v27 = vld [vmem:[%s8671_s1 + $0x9c4] ss:$16 sps:$4 sm:$0xff]   ;;  %v7556_v28 = vrot.slane %v7347_v18, %v6855_v49 }
  0xc9   : > { %2998 = vmatprep.subr.bf16.mxu1 %v6102_v29  ;;  %2987 = vmatprep.mubr.bf16.mxu0 %v7388_v30  ;;  %v6175_v29 = vld [vmem:[%s8671_s1 + $0x7c0] ss:$16 sps:$4 sm:$0xff]   ;;  %v6186_v18 = vld [vmem:[%s8671_s1 + $0x9e4] ss:$16 sps:$4 sm:$0xff]  }
  0xca   : > { %3028 = vmatprep.mubr.bf16.mxu1 %v7392_v31 }
  0xcb   : > { %2958 = vmatpush1.bf16.msra.mxu0 %v6097_v32  ;;  %v6178_v32 = vld [vmem:[%s8671_s1 + $0x9c0] ss:$16 sps:$4 sm:$0xff]  }
  0xcc   : > { %2999 = vmatpush1.bf16.msra.mxu1 %v6100_v33  ;;  %2959 = vmatprep.subr.bf16.mxu0 %v6105_v34  ;;  %v6183_v33 = vld [vmem:[%s8671_s1 + $0x7e4] ss:$16 sps:$4 sm:$0xff]   ;;  %v1980_v34 = vcombine.low %v6926_v40, %v7556_v28  ;;  %v6194_v40 = vld [vmem:[%s8671_s1 + $0x60c] ss:$16 sps:$4 sm:$0xff]  }
  0xcd   : > { %3000 = vmatprep.subr.bf16.mxu1 %v6108_v47  ;;  %v6181_v47 = vld [vmem:[%s8671_s1 + $0x7e0] ss:$16 sps:$4 sm:$0xff]  }
  0xcf   : > { %2960 = vmatpush1.bf16.msra.mxu0 %v6103_v53  ;;  %v6184_v53 = vld [vmem:[%s8671_s1 + $0x9e0] ss:$16 sps:$4 sm:$0xff]  }
  0xd0   : > { %3001 = vmatpush1.bf16.msra.mxu1 %v6106_v35  ;;  %2961 = vmatprep.subr.bf16.mxu0 %v6111_v36  ;;  %v6191_v35 = vld [vmem:[%s8671_s1 + $0xa04] ss:$16 sps:$4 sm:$0xff]   ;;  %v7585_v36 = vrot.slane %v1980_v34, %v6855_v49  ;;  %v6254_v34 = vld [vmem:[%s8671_s1 + $0x74c] ss:$16 sps:$4 sm:$0xff]  }
  0xd1   : > { %3002 = vmatprep.subr.bf16.mxu1 %v6114_v38  ;;  %v6189_v38 = vld [vmem:[%s8671_s1 + $0xa00] ss:$16 sps:$4 sm:$0xff]  }
  0xd3   : > { %2962 = vmatpush1.bf16.msra.mxu0 %v6109_v39  ;;  %v6192_v39 = vld [vmem:[%s8671_s1 + $0x608] ss:$16 sps:$4 sm:$0xff]  }
  0xd4   : > { %3003 = vmatpush1.bf16.msra.mxu1 %v6112_v41  ;;  %2963 = vmatprep.subr.bf16.mxu0 %v6117_v42  ;;  %v6197_v41 = vld [vmem:[%s8671_s1 + $0xa24] ss:$16 sps:$4 sm:$0xff]   ;;  %v6200_v42 = vld [vmem:[%s8671_s1 + $0x62c] ss:$16 sps:$4 sm:$0xff]  }
  0xd5   : > { %3004 = vmatprep.subr.bf16.mxu1 %v6120_v44  ;;  %v7601_v44 = vcombine.high %v7585_v36, %v7585_v36 }
  0xd7   : > { %2964 = vmatpush1.bf16.msra.mxu0 %v6115_v45  ;;  %v6195_v45 = vld [vmem:[%s8671_s1 + $0xa20] ss:$16 sps:$4 sm:$0xff]  }
  0xd8   : > { %3005 = vmatpush1.bf16.msra.mxu1 %v6118_v46  ;;  %2965 = vmatprep.subr.bf16.mxu0 %v6123_v48  ;;  %v6198_v46 = vld [vmem:[%s8671_s1 + $0x628] ss:$16 sps:$4 sm:$0xff]   ;;  %v6203_v48 = vld [vmem:[%s8671_s1 + $0xa44] ss:$16 sps:$4 sm:$0xff]  }
  0xd9   : > { %3006 = vmatprep.subr.bf16.mxu1 %v6126_v51  ;;  %v6206_v51 = vld [vmem:[%s8671_s1 + $0x64c] ss:$16 sps:$4 sm:$0xff]  }
  0xdb   : > { %2966 = vmatpush1.bf16.msra.mxu0 %v6121_v52  ;;  %v6201_v52 = vld [vmem:[%s8671_s1 + $0xa40] ss:$16 sps:$4 sm:$0xff]  }
  0xdc   : > { %3007 = vmatpush1.bf16.msra.mxu1 %v6124_v54  ;;  %2967 = vmatprep.subr.bf16.mxu0 %v6129_v55  ;;  %v6204_v54 = vld [vmem:[%s8671_s1 + $0x648] ss:$16 sps:$4 sm:$0xff]   ;;  %v6209_v55 = vld [vmem:[%s8671_s1 + $0xa64] ss:$16 sps:$4 sm:$0xff]  }
  0xdd   : > { %3008 = vmatprep.subr.bf16.mxu1 %v6132_v56  ;;  %v6207_v56 = vld [vmem:[%s8671_s1 + $0xa60] ss:$16 sps:$4 sm:$0xff]  }
  0xdf   : > { %2968 = vmatpush1.bf16.msra.mxu0 %v6127_v57  ;;  %v6210_v57 = vld [vmem:[%s8671_s1 + $0x668] ss:$16 sps:$4 sm:$0xff]  }
  0xe0   : > { %3009 = vmatpush1.bf16.msra.mxu1 %v6130_v59  ;;  %2969 = vmatprep.subr.bf16.mxu0 %v6135_v60  ;;  %v6215_v59 = vld [vmem:[%s8671_s1 + $0xa84] ss:$16 sps:$4 sm:$0xff]   ;;  %v6218_v60 = vld [vmem:[%s8671_s1 + $0x68c] ss:$16 sps:$4 sm:$0xff]  }
  0xe1   : > { %3010 = vmatprep.subr.bf16.mxu1 %v6138_v61  ;;  %v6213_v61 = vld [vmem:[%s8671_s1 + $0xa80] ss:$16 sps:$4 sm:$0xff]  }
  0xe3   : > { %2970 = vmatpush1.bf16.msra.mxu0 %v6133_v62  ;;  %v6216_v62 = vld [vmem:[%s8671_s1 + $0x688] ss:$16 sps:$4 sm:$0xff]  }
  0xe4   : > { %3011 = vmatpush1.bf16.msra.mxu1 %v6136_v0  ;;  %2971 = vmatprep.subr.bf16.mxu0 %v6141_v1  ;;  %v6221_v0 = vld [vmem:[%s8671_s1 + $0xaa4] ss:$16 sps:$4 sm:$0xff]   ;;  %v6224_v1 = vld [vmem:[%s8671_s1 + $0x6ac] ss:$16 sps:$4 sm:$0xff]  }
  0xe5   : > { %3012 = vmatprep.subr.bf16.mxu1 %v6144_v2  ;;  %v6219_v2 = vld [vmem:[%s8671_s1 + $0xaa0] ss:$16 sps:$4 sm:$0xff]  }
  0xe7   : > { %2972 = vmatpush1.bf16.msra.mxu0 %v6139_v3  ;;  %v6222_v3 = vld [vmem:[%s8671_s1 + $0x6a8] ss:$16 sps:$4 sm:$0xff]  }
  0xe8   : > { %3013 = vmatpush1.bf16.msra.mxu1 %v6142_v4  ;;  %2973 = vmatprep.subr.bf16.mxu0 %v6147_v5  ;;  %v6227_v4 = vld [vmem:[%s8671_s1 + $0xac4] ss:$16 sps:$4 sm:$0xff]   ;;  %v6230_v5 = vld [vmem:[%s8671_s1 + $0x6cc] ss:$16 sps:$4 sm:$0xff]  }
  0xe9   : > { %3014 = vmatprep.subr.bf16.mxu1 %v6150_v6 }
  0xeb   : > { %2974 = vmatpush1.bf16.msra.mxu0 %v6145_v7 }
  0xec   : > { %3015 = vmatpush1.bf16.msra.mxu1 %v6148_v8  ;;  %2975 = vmatprep.subr.bf16.mxu0 %v6153_v13  ;;  %v6225_v8 = vld [vmem:[%s8671_s1 + $0xac0] ss:$16 sps:$4 sm:$0xff]   ;;  %v6228_v13 = vld [vmem:[%s8671_s1 + $0x6c8] ss:$16 sps:$4 sm:$0xff]  }
  0xed   : > { %3016 = vmatprep.subr.bf16.mxu1 %v6156_v9 }
  0xef   : > { %2976 = vmatpush1.bf16.msra.mxu0 %v6151_v10 }
  0xf0   : > { %3017 = vmatpush1.bf16.msra.mxu1 %v6154_v50  ;;  %2977 = vmatprep.subr.bf16.mxu0 %v6159_v58 }
  0xf1   : > { %3018 = vmatprep.subr.bf16.mxu1 %v6162_v12 }
  0xf3   : > { %2978 = vmatpush1.bf16.msra.mxu0 %v6157_v14 }
  0xf4   : > { %3019 = vmatpush1.bf16.msra.mxu1 %v6160_v15  ;;  %2979 = vmatprep.subr.bf16.mxu0 %v6165_v16 }
  0xf5   : > { %3020 = vmatprep.subr.bf16.mxu1 %v6168_v19  ;;  %v6233_v19 = vld [vmem:[%s8671_s1 + $0xae4] ss:$16 sps:$4 sm:$0xff]  }
  0xf7   : > { %2980 = vmatpush1.bf16.msra.mxu0 %v6163_v20  ;;  %v6236_v20 = vld [vmem:[%s8671_s1 + $0x6ec] ss:$16 sps:$4 sm:$0xff]  }
  0xf8   : > { %3021 = vmatpush1.bf16.msra.mxu1 %v6166_v21  ;;  %2981 = vmatprep.subr.bf16.mxu0 %v6171_v22  ;;  %v6231_v21 = vld [vmem:[%s8671_s1 + $0xae0] ss:$16 sps:$4 sm:$0xff]   ;;  %v6234_v22 = vld [vmem:[%s8671_s1 + $0x6e8] ss:$16 sps:$4 sm:$0xff]  }
  0xf9   : > { %3022 = vmatprep.subr.bf16.mxu1 %v6174_v23  ;;  %v6239_v23 = vld [vmem:[%s8671_s1 + $0xb04] ss:$16 sps:$4 sm:$0xff]  }
  0xfb   : > { %2982 = vmatpush1.bf16.msra.mxu0 %v6169_v24  ;;  %v6242_v24 = vld [vmem:[%s8671_s1 + $0x70c] ss:$16 sps:$4 sm:$0xff]  }
  0xfc   : > { %3023 = vmatpush1.bf16.msra.mxu1 %v6172_v63  ;;  %2983 = vmatprep.subr.bf16.mxu0 %v6177_v26  ;;  %v6237_v63 = vld [vmem:[%s8671_s1 + $0xb00] ss:$16 sps:$4 sm:$0xff]   ;;  %v6240_v26 = vld [vmem:[%s8671_s1 + $0x708] ss:$16 sps:$4 sm:$0xff]  }
  0xfd   : > { %3024 = vmatprep.subr.bf16.mxu1 %v6180_v27  ;;  %v6245_v27 = vld [vmem:[%s8671_s1 + $0xb24] ss:$16 sps:$4 sm:$0xff]  }
  0xff   : > { %2984 = vmatpush1.bf16.msra.mxu0 %v6175_v29  ;;  %v6248_v29 = vld [vmem:[%s8671_s1 + $0x72c] ss:$16 sps:$4 sm:$0xff]  }
 0x100   : > { %3025 = vmatpush1.bf16.msra.mxu1 %v6178_v32  ;;  %2985 = vmatprep.subr.bf16.mxu0 %v6183_v33  ;;  %v6243_v32 = vld [vmem:[%s8671_s1 + $0xb20] ss:$16 sps:$4 sm:$0xff]   ;;  %v6246_v33 = vld [vmem:[%s8671_s1 + $0x728] ss:$16 sps:$4 sm:$0xff]  }
 0x101   : > { %3026 = vmatprep.subr.bf16.mxu1 %v6186_v18  ;;  %v6251_v18 = vld [vmem:[%s8671_s1 + $0xb44] ss:$16 sps:$4 sm:$0xff]  }
 0x103   : > { %2986 = vmatpush1.bf16.msra.mxu0 %v6181_v47  ;;  %v6249_v47 = vld [vmem:[%s8671_s1 + $0xb40] ss:$16 sps:$4 sm:$0xff]  }
 0x104   : > { %3027 = vmatpush1.bf16.msra.mxu1 %v6184_v53  ;;  %3037 = vmatprep.subr.bf16.mxu0 %v6191_v35  ;;  %v6252_v53 = vld [vmem:[%s8671_s1 + $0x748] ss:$16 sps:$4 sm:$0xff]   ;;  %v6257_v35 = vld [vmem:[%s8671_s1 + $0xb64] ss:$16 sps:$4 sm:$0xff]  }
 0x105   : > { %3078 = vmatprep.subr.bf16.mxu1 %v6194_v40  ;;  %v6260_v40 = vld [vmem:[%s8671_s1 + $0x76c] ss:$16 sps:$4 sm:$0xff]  }
 0x106   : > { %2988 = vmatmul.mubr.bf16.vlgmr.msra.gmra.mrb[12].mxu0 %v7369_v37 }
 0x107   : > { %3029 = vmatmul.mubr.bf16.vlgmr.msra.gmra.mrb[12].mxu1 %v7372_v25  ;;  %3038 = vmatpush1.bf16.msra.mxu0 %v6189_v38  ;;  %v6255_v38 = vld [vmem:[%s8671_s1 + $0xb60] ss:$16 sps:$4 sm:$0xff]  }
 0x108   : > { %3079 = vmatpush1.bf16.msra.mxu1 %v6192_v39  ;;  %3039 = vmatprep.subr.bf16.mxu0 %v6197_v41  ;;  %v6258_v39 = vld [vmem:[%s8671_s1 + $0x768] ss:$16 sps:$4 sm:$0xff]   ;;  %v6263_v41 = vld [vmem:[%s8671_s1 + $0xb84] ss:$16 sps:$4 sm:$0xff]  }
 0x109   : > { %3080 = vmatprep.subr.bf16.mxu1 %v6200_v42  ;;  %3069 = vmatprep.mubr.bf16.mxu0 %v7601_v44  ;;  %v6266_v42 = vld [vmem:[%s8671_s1 + $0x78c] ss:$16 sps:$4 sm:$0xff]  }
 0x10a   : > { %3110 = vmatprep.mubr.bf16.mxu1 %v7388_v30  ;;  %v6212_v30 = vld [vmem:[%s8671_s1 + $0x66c] ss:$16 sps:$4 sm:$0xff]  }
 0x10b   : > { %3040 = vmatpush1.bf16.msra.mxu0 %v6195_v45  ;;  %v6261_v45 = vld [vmem:[%s8671_s1 + $0xb80] ss:$16 sps:$4 sm:$0xff]  }
 0x10c   : > { %3081 = vmatpush1.bf16.msra.mxu1 %v6198_v46  ;;  %3041 = vmatprep.subr.bf16.mxu0 %v6203_v48  ;;  %v6264_v46 = vld [vmem:[%s8671_s1 + $0x788] ss:$16 sps:$4 sm:$0xff]   ;;  %v6269_v48 = vld [vmem:[%s8671_s1 + $0xba4] ss:$16 sps:$4 sm:$0xff]  }
 0x10d   : > { %3082 = vmatprep.subr.bf16.mxu1 %v6206_v51  ;;  %v6272_v51 = vld [vmem:[%s8671_s1 + $0x7ac] ss:$16 sps:$4 sm:$0xff]  }
 0x10f   : > { %3042 = vmatpush1.bf16.msra.mxu0 %v6201_v52  ;;  %v6267_v52 = vld [vmem:[%s8671_s1 + $0xba0] ss:$16 sps:$4 sm:$0xff]  }
 0x110   : > { %3083 = vmatpush1.bf16.msra.mxu1 %v6204_v54  ;;  %3043 = vmatprep.subr.bf16.mxu0 %v6209_v55  ;;  %v6270_v54 = vld [vmem:[%s8671_s1 + $0x7a8] ss:$16 sps:$4 sm:$0xff]   ;;  %v6275_v55 = vld [vmem:[%s8671_s1 + $0xbc4] ss:$16 sps:$4 sm:$0xff]  }
 0x111   : > { %3084 = vmatprep.subr.bf16.mxu1 %v6212_v30  ;;  %v6278_v30 = vld [vmem:[%s8671_s1 + $0x7cc] ss:$16 sps:$4 sm:$0xff]  }
 0x113   : > { %3044 = vmatpush1.bf16.msra.mxu0 %v6207_v56  ;;  %v6273_v56 = vld [vmem:[%s8671_s1 + $0xbc0] ss:$16 sps:$4 sm:$0xff]  }
 0x114   : > { %3085 = vmatpush1.bf16.msra.mxu1 %v6210_v57  ;;  %3045 = vmatprep.subr.bf16.mxu0 %v6215_v59  ;;  %v6276_v57 = vld [vmem:[%s8671_s1 + $0x7c8] ss:$16 sps:$4 sm:$0xff]   ;;  %v6281_v59 = vld [vmem:[%s8671_s1 + $0xbe4] ss:$16 sps:$4 sm:$0xff]  }
 0x115   : > { %3086 = vmatprep.subr.bf16.mxu1 %v6218_v60  ;;  %v6284_v60 = vld [vmem:[%s8671_s1 + $0x7ec] ss:$16 sps:$4 sm:$0xff]  }
 0x117   : > { %3046 = vmatpush1.bf16.msra.mxu0 %v6213_v61  ;;  %v6279_v61 = vld [vmem:[%s8671_s1 + $0xbe0] ss:$16 sps:$4 sm:$0xff]  }
 0x118   : > { %3087 = vmatpush1.bf16.msra.mxu1 %v6216_v62  ;;  %3047 = vmatprep.subr.bf16.mxu0 %v6221_v0  ;;  %v6282_v62 = vld [vmem:[%s8671_s1 + $0x7e8] ss:$16 sps:$4 sm:$0xff]   ;;  %v6287_v0 = vld [vmem:[%s8671_s1 + $0x80c] ss:$16 sps:$4 sm:$0xff]  }
 0x119   : > { %3088 = vmatprep.subr.bf16.mxu1 %v6224_v1  ;;  %v1528_v6 = vpop.f32.mrb[0].mxu0  ;;  %v6290_v1 = vld [vmem:[%s8671_s1 + $0xa0c] ss:$16 sps:$4 sm:$0xff]  }
 0x11a   : > { %v1569_v7 = vpop.f32.mrb[0].mxu1  ;;  %v1530_v10 = vpop.f32.mrb[1].mxu0 }
 0x11b   : > { %v7673_v9 = vadd.f32 %v1569_v7, %v1528_v6  ;;  %v1571_v50 = vpop.f32.mrb[1].mxu1  ;;  %v1532_v12 = vpop.f32.mrb[2].mxu0  ;;  %3048 = vmatpush1.bf16.msra.mxu0 %v6219_v2  ;;  %v6285_v2 = vld [vmem:[%s8671_s1 + $0x808] ss:$16 sps:$4 sm:$0xff]  }
 0x11c   : > { %v7675_v58 = vadd.f32 %v1571_v50, %v1530_v10  ;;  %v1573_v14 = vpop.f32.mrb[2].mxu1  ;;  %3089 = vmatpush1.bf16.msra.mxu1 %v6222_v3  ;;  %v1533_v15 = vpop.f32.mrb[3].mxu0  ;;  %3049 = vmatprep.subr.bf16.mxu0 %v6227_v4  ;;  %v6288_v3 = vld [vmem:[%s8671_s1 + $0xa08] ss:$16 sps:$4 sm:$0xff]   ;;  %v6293_v4 = vld [vmem:[%s8671_s1 + $0x82c] ss:$16 sps:$4 sm:$0xff]  }
 0x11d   : > { %v1574_v16 = vpop.f32.mrb[3].mxu1  ;;  %3090 = vmatprep.subr.bf16.mxu1 %v6230_v5  ;;  %v6296_v5 = vld [vmem:[%s8671_s1 + $0xa2c] ss:$16 sps:$4 sm:$0xff]   ;;  %v6291_v6 = vld [vmem:[%s8671_s1 + $0x828] ss:$16 sps:$4 sm:$0xff]  }
 0x11e   : > { %v6294_v7 = vld [vmem:[%s8671_s1 + $0xa28] ss:$16 sps:$4 sm:$0xff]   ;;  %v6305_v50 = vld [vmem:[%s8671_s1 + $0x86c] ss:$16 sps:$4 sm:$0xff]  }
 0x11f   : > { %3050 = vmatpush1.bf16.msra.mxu0 %v6225_v8  ;;  %v6299_v8 = vld [vmem:[%s8671_s1 + $0x84c] ss:$16 sps:$4 sm:$0xff]   ;;  %v6300_v10 = vld [vmem:[%s8671_s1 + $0xa48] ss:$16 sps:$4 sm:$0xff]  }
 0x120   : > { %3091 = vmatpush1.bf16.msra.mxu1 %v6228_v13  ;;  %3051 = vmatprep.subr.bf16.mxu0 %v6233_v19  ;;  %v6297_v13 = vld [vmem:[%s8671_s1 + $0x848] ss:$16 sps:$4 sm:$0xff]   ;;  %v6311_v14 = vld [vmem:[%s8671_s1 + $0x88c] ss:$16 sps:$4 sm:$0xff]  }
 0x121   : > { %3092 = vmatprep.subr.bf16.mxu1 %v6236_v20  ;;  %v6306_v12 = vld [vmem:[%s8671_s1 + $0xa68] ss:$16 sps:$4 sm:$0xff]   ;;  %v6314_v15 = vld [vmem:[%s8671_s1 + $0xa8c] ss:$16 sps:$4 sm:$0xff]  }
 0x122   : > { %v6309_v16 = vld [vmem:[%s8671_s1 + $0x888] ss:$16 sps:$4 sm:$0xff]   ;;  %v6317_v20 = vld [vmem:[%s8671_s1 + $0x8ac] ss:$16 sps:$4 sm:$0xff]  }
 0x123   : > { %3052 = vmatpush1.bf16.msra.mxu0 %v6231_v21  ;;  %v6312_v19 = vld [vmem:[%s8671_s1 + $0xa88] ss:$16 sps:$4 sm:$0xff]   ;;  %v6320_v21 = vld [vmem:[%s8671_s1 + $0xaac] ss:$16 sps:$4 sm:$0xff]  }
 0x124   : > { %3093 = vmatpush1.bf16.msra.mxu1 %v6234_v22  ;;  %3053 = vmatprep.subr.bf16.mxu0 %v6239_v23  ;;  %v6315_v22 = vld [vmem:[%s8671_s1 + $0x8a8] ss:$16 sps:$4 sm:$0xff]  }
 0x125   : > { %3094 = vmatprep.subr.bf16.mxu1 %v6242_v24  ;;  %v6318_v23 = vld [vmem:[%s8671_s1 + $0xaa8] ss:$16 sps:$4 sm:$0xff]   ;;  %v6323_v24 = vld [vmem:[%s8671_s1 + $0x8cc] ss:$16 sps:$4 sm:$0xff]  }
 0x127   : > { %3054 = vmatpush1.bf16.msra.mxu0 %v6237_v63  ;;  %v6326_v63 = vld [vmem:[%s8671_s1 + $0xacc] ss:$16 sps:$4 sm:$0xff]  }
 0x128   : > { %3095 = vmatpush1.bf16.msra.mxu1 %v6240_v26  ;;  %3055 = vmatprep.subr.bf16.mxu0 %v6245_v27 }
 0x129   : > { %3096 = vmatprep.subr.bf16.mxu1 %v6248_v29  ;;  %v6321_v29 = vld [vmem:[%s8671_s1 + $0x8c8] ss:$16 sps:$4 sm:$0xff]  }
 0x12b   : > { %3056 = vmatpush1.bf16.msra.mxu0 %v6243_v32  ;;  %v6324_v32 = vld [vmem:[%s8671_s1 + $0xac8] ss:$16 sps:$4 sm:$0xff]  }
 0x12c   : > { %3097 = vmatpush1.bf16.msra.mxu1 %v6246_v33  ;;  %3057 = vmatprep.subr.bf16.mxu0 %v6251_v18 }
 0x12d   : > { %3098 = vmatprep.subr.bf16.mxu1 %v6254_v34 }
 0x12f   : > { %3058 = vmatpush1.bf16.msra.mxu0 %v6249_v47 }
 0x130   : > { %3099 = vmatpush1.bf16.msra.mxu1 %v6252_v53  ;;  %3059 = vmatprep.subr.bf16.mxu0 %v6257_v35 }
 0x131   : > { %3100 = vmatprep.subr.bf16.mxu1 %v6260_v40 }
 0x133   : > { %3060 = vmatpush1.bf16.msra.mxu0 %v6255_v38 }
 0x134   : > { %3101 = vmatpush1.bf16.msra.mxu1 %v6258_v39  ;;  %3061 = vmatprep.subr.bf16.mxu0 %v6263_v41  ;;  %v6332_v39 = vld [vmem:[%s8671_s1 + $0xaec] ss:$16 sps:$4 sm:$0xff]   ;;  %v6330_v41 = vld [vmem:[%s8671_s1 + $0xae8] ss:$16 sps:$4 sm:$0xff]  }
 0x135   : > { %3102 = vmatprep.subr.bf16.mxu1 %v6266_v42  ;;  %v6335_v42 = vld [vmem:[%s8671_s1 + $0x90c] ss:$16 sps:$4 sm:$0xff]  }
 0x137   : > { %3062 = vmatpush1.bf16.msra.mxu0 %v6261_v45  ;;  %v6338_v45 = vld [vmem:[%s8671_s1 + $0xb0c] ss:$16 sps:$4 sm:$0xff]  }
 0x138   : > { %3103 = vmatpush1.bf16.msra.mxu1 %v6264_v46  ;;  %3063 = vmatprep.subr.bf16.mxu0 %v6269_v48  ;;  %v7902_v46 = vld [vmem:[%s6852_s30 + $0x18] sm:$0x77] }
 0x139   : > { %3104 = vmatprep.subr.bf16.mxu1 %v6272_v51  ;;  %v6333_v48 = vld [vmem:[%s8671_s1 + $0x908] ss:$16 sps:$4 sm:$0xff]  }
 0x13a   : > { %v6336_v51 = vld [vmem:[%s8671_s1 + $0xb08] ss:$16 sps:$4 sm:$0xff]  }
 0x13b   : > { %3064 = vmatpush1.bf16.msra.mxu0 %v6267_v52  ;;  %v6341_v52 = vld [vmem:[%s8671_s1 + $0x92c] ss:$16 sps:$4 sm:$0xff]  }
 0x13c   : > { %3105 = vmatpush1.bf16.msra.mxu1 %v6270_v54  ;;  %3065 = vmatprep.subr.bf16.mxu0 %v6275_v55  ;;  %v6344_v54 = vld [vmem:[%s8671_s1 + $0xb2c] ss:$16 sps:$4 sm:$0xff]   ;;  %v7918_v55 = vcombine.low %v7902_v46, %v7902_v46 }
 0x13d   : > { %3106 = vmatprep.subr.bf16.mxu1 %v6278_v30  ;;  %v7922_v30 = vcombine.high %v7902_v46, %v7902_v46 }
 0x13f   : > { %3066 = vmatpush1.bf16.msra.mxu0 %v6273_v56  ;;  %v6339_v56 = vld [vmem:[%s8671_s1 + $0x928] ss:$16 sps:$4 sm:$0xff]  }
 0x140   : > { %3107 = vmatpush1.bf16.msra.mxu1 %v6276_v57  ;;  %3067 = vmatprep.subr.bf16.mxu0 %v6281_v59  ;;  %v6342_v57 = vld [vmem:[%s8671_s1 + $0xb28] ss:$16 sps:$4 sm:$0xff]   ;;  %v6347_v59 = vld [vmem:[%s8671_s1 + $0x94c] ss:$16 sps:$4 sm:$0xff]  }
 0x141   : > { %3108 = vmatprep.subr.bf16.mxu1 %v6284_v60  ;;  %v6350_v60 = vld [vmem:[%s8671_s1 + $0xb4c] ss:$16 sps:$4 sm:$0xff]  }
 0x143   : > { %3068 = vmatpush1.bf16.msra.mxu0 %v6279_v61  ;;  %v240_v61 = vshll.u32 %v7918_v55, 16 }
 0x144   : > { %3109 = vmatpush1.bf16.msra.mxu1 %v6282_v62  ;;  %3119 = vmatprep.subr.bf16.mxu0 %v6287_v0  ;;  %v247_v62 = vshll.u32 %v7922_v30, 16  ;;  %v6345_v0 = vld [vmem:[%s8671_s1 + $0x948] ss:$16 sps:$4 sm:$0xff]  }
 0x145   : > { %3160 = vmatprep.subr.bf16.mxu1 %v6290_v1  ;;  %v6348_v1 = vld [vmem:[%s8671_s1 + $0xb48] ss:$16 sps:$4 sm:$0xff]  }
 0x146   : > { %3070 = vmatmul.mubr.bf16.vlgmr.msra.gmra.mrb[16].mxu0 %v7585_v36 }
 0x147   : > { %3111 = vmatmul.mubr.bf16.vlgmr.msra.gmra.mrb[16].mxu1 %v7369_v37  ;;  %3120 = vmatpush1.bf16.msra.mxu0 %v6285_v2  ;;  %v6302_v37 = vld [vmem:[%s8671_s1 + $0xa4c] ss:$16 sps:$4 sm:$0xff]  }
 0x148   : > { %3161 = vmatpush1.bf16.msra.mxu1 %v6288_v3  ;;  %3121 = vmatprep.subr.bf16.mxu0 %v6293_v4  ;;  %v6353_v2 = vld [vmem:[%s8671_s1 + $0x96c] ss:$16 sps:$4 sm:$0xff]   ;;  %v238_v4 = vshrl.u32 %v7918_v55, 16 }
 0x149   : > { %3162 = vmatprep.subr.bf16.mxu1 %v6296_v5  ;;  %3151 = vmatprep.mubr.bf16.mxu0 %v7392_v31  ;;  %v6308_v31 = vld [vmem:[%s8671_s1 + $0xa6c] ss:$16 sps:$4 sm:$0xff]   ;;  %v242_v5 = vrot.slane %v240_v61, 1  ;;  %v6407_v61 = vld [vmem:[%s8671_s1 + $0xc84] ss:$16 sps:$4 sm:$0xff]  }
 0x14a   : > { %3192 = vmatprep.mubr.bf16.mxu1 %v7601_v44  ;;  %v6303_v44 = vld [vmem:[%s8671_s1 + $0x868] ss:$16 sps:$4 sm:$0xff]   ;;  %v6356_v3 = vld [vmem:[%s8671_s1 + $0xb6c] ss:$16 sps:$4 sm:$0xff]  }
 0x14b   : > { %3122 = vmatpush1.bf16.msra.mxu0 %v6291_v6  ;;  %v245_v6 = vshrl.u32 %v7922_v30, 16 }
 0x14c   : > { %3163 = vmatpush1.bf16.msra.mxu1 %v6294_v7  ;;  %3123 = vmatprep.subr.bf16.mxu0 %v6299_v8  ;;  %v249_v7 = vrot.slane %v247_v62, 1  ;;  %v6351_v8 = vld [vmem:[%s8671_s1 + $0x968] ss:$16 sps:$4 sm:$0xff]   ;;  %v6410_v62 = vld [vmem:[%s8671_s1 + $0xe84] ss:$16 sps:$4 sm:$0xff]  }
 0x14d   : > { %3164 = vmatprep.subr.bf16.mxu1 %v6302_v37  ;;  %v6354_v37 = vld [vmem:[%s8671_s1 + $0xb68] ss:$16 sps:$4 sm:$0xff]  }
 0x14f   : > { %3124 = vmatpush1.bf16.msra.mxu0 %v6297_v13  ;;  %v6359_v13 = vld [vmem:[%s8671_s1 + $0x98c] ss:$16 sps:$4 sm:$0xff]  }
 0x150   : > { %3165 = vmatpush1.bf16.msra.mxu1 %v6300_v10  ;;  %3125 = vmatprep.subr.bf16.mxu0 %v6305_v50  ;;  %v6362_v10 = vld [vmem:[%s8671_s1 + $0xb8c] ss:$16 sps:$4 sm:$0xff]   ;;  %v243_v50 = vor.u32 %v242_v5, %v238_v4  ;;  %v6411_v4 = vld [vmem:[%s8671_s1 + $0xca0] ss:$16 sps:$4 sm:$0xff]  }
 0x151   : > { %3166 = vmatprep.subr.bf16.mxu1 %v6308_v31  ;;  %v250_v31 = vor.u32 %v249_v7, %v245_v6  ;;  %v6414_v5 = vld [vmem:[%s8671_s1 + $0xea0] ss:$16 sps:$4 sm:$0xff]   ;;  %v6419_v6 = vld [vmem:[%s8671_s1 + $0xcc4] ss:$16 sps:$4 sm:$0xff]  }
 0x152   : > { %v6422_v7 = vld [vmem:[%s8671_s1 + $0xec4] ss:$16 sps:$4 sm:$0xff]  }
 0x153   : > { %3126 = vmatpush1.bf16.msra.mxu0 %v6303_v44  ;;  %v6357_v44 = vld [vmem:[%s8671_s1 + $0x988] ss:$16 sps:$4 sm:$0xff]  }
 0x154   : > { %3167 = vmatpush1.bf16.msra.mxu1 %v6306_v12  ;;  %3127 = vmatprep.subr.bf16.mxu0 %v6311_v14  ;;  %v6360_v12 = vld [vmem:[%s8671_s1 + $0xb88] ss:$16 sps:$4 sm:$0xff]   ;;  %v6365_v14 = vld [vmem:[%s8671_s1 + $0x9ac] ss:$16 sps:$4 sm:$0xff]  }
 0x155   : > { %3168 = vmatprep.subr.bf16.mxu1 %v6314_v15  ;;  %v6368_v15 = vld [vmem:[%s8671_s1 + $0xbac] ss:$16 sps:$4 sm:$0xff]  }
 0x157   : > { %3128 = vmatpush1.bf16.msra.mxu0 %v6309_v16  ;;  %v3214_v16 = vcombine.low %v243_v50, %v250_v31 }
 0x158   : > { %3169 = vmatpush1.bf16.msra.mxu1 %v6312_v19  ;;  %3129 = vmatprep.subr.bf16.mxu0 %v6317_v20  ;;  %v6363_v19 = vld [vmem:[%s8671_s1 + $0x9a8] ss:$16 sps:$4 sm:$0xff]  }
 0x159   : > { %3170 = vmatprep.subr.bf16.mxu1 %v6320_v21  ;;  %v1610_v26 = vpop.f32.mrb[4].mxu0  ;;  %v6366_v20 = vld [vmem:[%s8671_s1 + $0xba8] ss:$16 sps:$4 sm:$0xff]   ;;  %v6371_v21 = vld [vmem:[%s8671_s1 + $0x9cc] ss:$16 sps:$4 sm:$0xff]  }
 0x15a   : > { %v7867_v27 = vpop.f32.mrb[4].mxu1  ;;  %v7876_v33 = vadd.f32 %v1610_v26, %v7673_v9  ;;  %v1612_v18 = vpop.f32.mrb[5].mxu0  ;;  %v6329_v9 = vld [vmem:[%s8671_s1 + $0x8ec] ss:$16 sps:$4 sm:$0xff]   ;;  %v6372_v26 = vld [vmem:[%s8671_s1 + $0xbc8] ss:$16 sps:$4 sm:$0xff]  }
 0x15b   : > { %v7878_v34 = vpop.f32.mrb[5].mxu1  ;;  %v7881_v47 = vadd.f32 %v1612_v18, %v7675_v58  ;;  %v1614_v53 = vpop.f32.mrb[6].mxu0  ;;  %3130 = vmatpush1.bf16.msra.mxu0 %v6315_v22  ;;  %v6327_v58 = vld [vmem:[%s8671_s1 + $0x8e8] ss:$16 sps:$4 sm:$0xff]   ;;  %v6374_v22 = vld [vmem:[%s8671_s1 + $0xbcc] ss:$16 sps:$4 sm:$0xff]  }
 0x15c   : > { %v1655_v35 = vpop.f32.mrb[6].mxu1  ;;  %3171 = vmatpush1.bf16.msra.mxu1 %v6318_v23  ;;  %v1615_v40 = vpop.f32.mrb[7].mxu0  ;;  %3131 = vmatprep.subr.bf16.mxu0 %v6323_v24  ;;  %v3221_v23 = vrot.slane %v7902_v46, %v6855_v49  ;;  %v3228_v24 = vrot.slane %v3214_v16, %v6855_v49 }
 0x15d   : > { %v1656_v38 = vpop.f32.mrb[7].mxu1  ;;  %3172 = vmatprep.subr.bf16.mxu1 %v6326_v63  ;;  %v6369_v63 = vld [vmem:[%s8671_s1 + $0x9c8] ss:$16 sps:$4 sm:$0xff]  }
 0x15e   : > { %v5590_v18 = vcombine.low %v7333_v11, %v3221_v23  ;;  %v5591_v53 = vcombine.low %v7345_v17, %v3228_v24  ;;  %v6375_v35 = vld [vmem:[%s8671_s1 + $0x9e8] ss:$16 sps:$4 sm:$0xff]   ;;  %v6383_v38 = vld [vmem:[%s8671_s1 + $0xc04] ss:$16 sps:$4 sm:$0xff]   ;;  %v6426_v23 = vld [vmem:[%s8671_s1 + $0xee0] ss:$16 sps:$4 sm:$0xff]  }
 0x15f   : > { %3132 = vmatpush1.bf16.msra.mxu0 %v6321_v29  ;;  %v6377_v29 = vld [vmem:[%s8671_s1 + $0x9ec] ss:$16 sps:$4 sm:$0xff]   ;;  %v6378_v40 = vld [vmem:[%s8671_s1 + $0xbe8] ss:$16 sps:$4 sm:$0xff]   ;;  %v6386_v11 = vld [vmem:[%s8671_s1 + $0xe04] ss:$16 sps:$4 sm:$0xff]  }
 0x160   : > { %3173 = vmatpush1.bf16.msra.mxu1 %v6324_v32  ;;  %3133 = vmatprep.subr.bf16.mxu0 %v6329_v9  ;;  %v6380_v32 = vld [vmem:[%s8671_s1 + $0xbec] ss:$16 sps:$4 sm:$0xff]   ;;  %v8018_v17 = vrot.slane %v5590_v18, %v6855_v49  ;;  %v8021_v9 = vrot.slane %v5591_v53, %v6855_v49  ;;  %v6431_v24 = vld [vmem:[%s8671_s1 + $0xd04] ss:$16 sps:$4 sm:$0xff]   ;;  %v6435_v53 = vld [vmem:[%s8671_s1 + $0xd20] ss:$16 sps:$4 sm:$0xff]  }
 0x161   : > { %3174 = vmatprep.subr.bf16.mxu1 %v6332_v39  ;;  %v6381_v39 = vld [vmem:[%s8671_s1 + $0xc00] ss:$16 sps:$4 sm:$0xff]   ;;  %v6440_v18 = vld [vmem:[%s8671_s1 + $0xf24] ss:$16 sps:$4 sm:$0xff]  }
 0x162   : > { %v8041_v46 = vcombine.high %v8021_v9, %v8021_v9 }
 0x163   : > { %3134 = vmatpush1.bf16.msra.mxu0 %v6327_v58  ;;  %v6384_v58 = vld [vmem:[%s8671_s1 + $0xe00] ss:$16 sps:$4 sm:$0xff]  }
 0x164   : > { %3175 = vmatpush1.bf16.msra.mxu1 %v6330_v41  ;;  %3135 = vmatprep.subr.bf16.mxu0 %v6335_v42  ;;  %v6389_v41 = vld [vmem:[%s8671_s1 + $0xc24] ss:$16 sps:$4 sm:$0xff]  }
 0x165   : > { %3176 = vmatprep.subr.bf16.mxu1 %v6338_v45  ;;  %v6392_v42 = vld [vmem:[%s8671_s1 + $0xe24] ss:$16 sps:$4 sm:$0xff]   ;;  %v8037_v45 = vcombine.high %v8018_v17, %v8018_v17 }
 0x167   : > { %3136 = vmatpush1.bf16.msra.mxu0 %v6333_v48  ;;  %v6387_v48 = vld [vmem:[%s8671_s1 + $0xc20] ss:$16 sps:$4 sm:$0xff]  }
 0x168   : > { %3177 = vmatpush1.bf16.msra.mxu1 %v6336_v51  ;;  %3137 = vmatprep.subr.bf16.mxu0 %v6341_v52  ;;  %v6390_v51 = vld [vmem:[%s8671_s1 + $0xe20] ss:$16 sps:$4 sm:$0xff]   ;;  %v6395_v52 = vld [vmem:[%s8671_s1 + $0xc44] ss:$16 sps:$4 sm:$0xff]  }
 0x169   : > { %3178 = vmatprep.subr.bf16.mxu1 %v6344_v54  ;;  %v6396_v54 = vld [vmem:[%s8671_s1 + $0xe40] ss:$16 sps:$4 sm:$0xff]  }
 0x16b   : > { %3138 = vmatpush1.bf16.msra.mxu0 %v6339_v56  ;;  %v6401_v56 = vld [vmem:[%s8671_s1 + $0xc64] ss:$16 sps:$4 sm:$0xff]  }
 0x16c   : > { %3179 = vmatpush1.bf16.msra.mxu1 %v6342_v57  ;;  %3139 = vmatprep.subr.bf16.mxu0 %v6347_v59  ;;  %v6404_v57 = vld [vmem:[%s8671_s1 + $0xe64] ss:$16 sps:$4 sm:$0xff]   ;;  %v6399_v59 = vld [vmem:[%s8671_s1 + $0xc60] ss:$16 sps:$4 sm:$0xff]  }
 0x16d   : > { %3180 = vmatprep.subr.bf16.mxu1 %v6350_v60  ;;  %v6402_v60 = vld [vmem:[%s8671_s1 + $0xe60] ss:$16 sps:$4 sm:$0xff]  }
 0x16f   : > { %3140 = vmatpush1.bf16.msra.mxu0 %v6345_v0  ;;  %v6405_v0 = vld [vmem:[%s8671_s1 + $0xc80] ss:$16 sps:$4 sm:$0xff]  }
 0x170   : > { %3181 = vmatpush1.bf16.msra.mxu1 %v6348_v1  ;;  %3141 = vmatprep.subr.bf16.mxu0 %v6353_v2  ;;  %v6408_v1 = vld [vmem:[%s8671_s1 + $0xe80] ss:$16 sps:$4 sm:$0xff]   ;;  %v6413_v2 = vld [vmem:[%s8671_s1 + $0xca4] ss:$16 sps:$4 sm:$0xff]  }
 0x171   : > { %3182 = vmatprep.subr.bf16.mxu1 %v6356_v3  ;;  %v6416_v3 = vld [vmem:[%s8671_s1 + $0xea4] ss:$16 sps:$4 sm:$0xff]  }
 0x173   : > { %3142 = vmatpush1.bf16.msra.mxu0 %v6351_v8 }
 0x174   : > { %3183 = vmatpush1.bf16.msra.mxu1 %v6354_v37  ;;  %3143 = vmatprep.subr.bf16.mxu0 %v6359_v13 }
 0x175   : > { %3184 = vmatprep.subr.bf16.mxu1 %v6362_v10 }
 0x177   : > { %3144 = vmatpush1.bf16.msra.mxu0 %v6357_v44 }
 0x178   : > { %3185 = vmatpush1.bf16.msra.mxu1 %v6360_v12  ;;  %3145 = vmatprep.subr.bf16.mxu0 %v6365_v14  ;;  %v6417_v14 = vld [vmem:[%s8671_s1 + $0xcc0] ss:$16 sps:$4 sm:$0xff]  }
 0x179   : > { %3186 = vmatprep.subr.bf16.mxu1 %v6368_v15  ;;  %v6420_v15 = vld [vmem:[%s8671_s1 + $0xec0] ss:$16 sps:$4 sm:$0xff]  }
 0x17b   : > { %3146 = vmatpush1.bf16.msra.mxu0 %v6363_v19 }
 0x17c   : > { %3187 = vmatpush1.bf16.msra.mxu1 %v6366_v20  ;;  %3147 = vmatprep.subr.bf16.mxu0 %v6371_v21  ;;  %v6428_v20 = vld [vmem:[%s8671_s1 + $0xee4] ss:$16 sps:$4 sm:$0xff]  }
 0x17d   : > { %3188 = vmatprep.subr.bf16.mxu1 %v6374_v22  ;;  %v6423_v22 = vld [vmem:[%s8671_s1 + $0xce0] ss:$16 sps:$4 sm:$0xff]  }
 0x17f   : > { %3148 = vmatpush1.bf16.msra.mxu0 %v6369_v63  ;;  %v6434_v63 = vld [vmem:[%s8671_s1 + $0xf04] ss:$16 sps:$4 sm:$0xff]  }
 0x180   : > { %3189 = vmatpush1.bf16.msra.mxu1 %v6372_v26  ;;  %3149 = vmatprep.subr.bf16.mxu0 %v6377_v29  ;;  %v6429_v26 = vld [vmem:[%s8671_s1 + $0xd00] ss:$16 sps:$4 sm:$0xff]  }
 0x181   : > { %3190 = vmatprep.subr.bf16.mxu1 %v6380_v32  ;;  %v6432_v29 = vld [vmem:[%s8671_s1 + $0xf00] ss:$16 sps:$4 sm:$0xff]   ;;  %v6437_v32 = vld [vmem:[%s8671_s1 + $0xd24] ss:$16 sps:$4 sm:$0xff]  }
 0x183   : > { %3150 = vmatpush1.bf16.msra.mxu0 %v6375_v35  ;;  %v6438_v35 = vld [vmem:[%s8671_s1 + $0xf20] ss:$16 sps:$4 sm:$0xff]  }
 0x184   : > { %3191 = vmatpush1.bf16.msra.mxu1 %v6378_v40  ;;  %4424 = vmatprep.subr.bf16.mxu0 %v6383_v38  ;;  %v6443_v40 = vld [vmem:[%s8671_s1 + $0xd44] ss:$16 sps:$4 sm:$0xff]  }
 0x185   : > { %4465 = vmatprep.subr.bf16.mxu1 %v6386_v11  ;;  %v6446_v38 = vld [vmem:[%s8671_s1 + $0xf44] ss:$16 sps:$4 sm:$0xff]   ;;  %v6441_v11 = vld [vmem:[%s8671_s1 + $0xd40] ss:$16 sps:$4 sm:$0xff]  }
 0x186   : > { %3152 = vmatmul.mubr.bf16.vlgmr.msra.gmra.mrb[20].mxu0 %v7372_v25  ;;  %v6398_v25 = vld [vmem:[%s8671_s1 + $0xe44] ss:$16 sps:$4 sm:$0xff]  }
 0x187   : > { %3193 = vmatmul.mubr.bf16.vlgmr.msra.gmra.mrb[20].mxu1 %v7585_v36  ;;  %4425 = vmatpush1.bf16.msra.mxu0 %v6381_v39  ;;  %v6393_v36 = vld [vmem:[%s8671_s1 + $0xc40] ss:$16 sps:$4 sm:$0xff]  }
 0x188   : > { %4466 = vmatpush1.bf16.msra.mxu1 %v6384_v58  ;;  %4426 = vmatprep.subr.bf16.mxu0 %v6389_v41  ;;  %v6444_v39 = vld [vmem:[%s8671_s1 + $0xf40] ss:$16 sps:$4 sm:$0xff]   ;;  %v6449_v58 = vld [vmem:[%s8671_s1 + $0xd64] ss:$16 sps:$4 sm:$0xff]  }
 0x189   : > { %4467 = vmatprep.subr.bf16.mxu1 %v6392_v42  ;;  %4456 = vmatprep.mubr.bf16.mxu0 %v8037_v45  ;;  %v6452_v41 = vld [vmem:[%s8671_s1 + $0xf64] ss:$16 sps:$4 sm:$0xff]   ;;  %v6447_v42 = vld [vmem:[%s8671_s1 + $0xd60] ss:$16 sps:$4 sm:$0xff]  }
 0x18a   : > { %4497 = vmatprep.mubr.bf16.mxu1 %v8041_v46 }
 0x18b   : > { %4427 = vmatpush1.bf16.msra.mxu0 %v6387_v48  ;;  %v6450_v48 = vld [vmem:[%s8671_s1 + $0xf60] ss:$16 sps:$4 sm:$0xff]  }
 0x18c   : > { %4468 = vmatpush1.bf16.msra.mxu1 %v6390_v51  ;;  %4428 = vmatprep.subr.bf16.mxu0 %v6395_v52  ;;  %v6455_v51 = vld [vmem:[%s8671_s1 + $0xd84] ss:$16 sps:$4 sm:$0xff]  }
 0x18d   : > { %4469 = vmatprep.subr.bf16.mxu1 %v6398_v25  ;;  %v6458_v52 = vld [vmem:[%s8671_s1 + $0xf84] ss:$16 sps:$4 sm:$0xff]   ;;  %v257_v25 = vrot.slane %v7918_v55, 1 }
 0x18e   : > { %v6464_v55 = vld [vmem:[%s8671_s1 + $0xfa4] ss:$16 sps:$4 sm:$0xff]  }
 0x18f   : > { %4429 = vmatpush1.bf16.msra.mxu0 %v6393_v36  ;;  %v258_v36 = vrot.slane %v7922_v30, 1 }
 0x190   : > { %4470 = vmatpush1.bf16.msra.mxu1 %v6396_v54  ;;  %4430 = vmatprep.subr.bf16.mxu0 %v6401_v56  ;;  %v6453_v54 = vld [vmem:[%s8671_s1 + $0xd80] ss:$16 sps:$4 sm:$0xff]  }
 0x191   : > { %4471 = vmatprep.subr.bf16.mxu1 %v6404_v57  ;;  %v6456_v56 = vld [vmem:[%s8671_s1 + $0xf80] ss:$16 sps:$4 sm:$0xff]   ;;  %v6461_v57 = vld [vmem:[%s8671_s1 + $0xda4] ss:$16 sps:$4 sm:$0xff]   ;;  %v3230_v30 = vcombine.low %v257_v25, %v258_v36  ;;  %v6518_v36 = vld [vmem:[%s8671_s1 + $0xcc8] ss:$16 sps:$4 sm:$0xff]  }
 0x192   : > { %v6515_v25 = vld [vmem:[%s8671_s1 + $0x10c0] ss:$16 sps:$4 sm:$0xff]  }
 0x193   : > { %4431 = vmatpush1.bf16.msra.mxu0 %v6399_v59  ;;  %v6459_v59 = vld [vmem:[%s8671_s1 + $0xda0] ss:$16 sps:$4 sm:$0xff]  }
 0x194   : > { %4472 = vmatpush1.bf16.msra.mxu1 %v6402_v60  ;;  %4432 = vmatprep.subr.bf16.mxu0 %v6407_v61  ;;  %v6462_v60 = vld [vmem:[%s8671_s1 + $0xfa0] ss:$16 sps:$4 sm:$0xff]   ;;  %v6467_v61 = vld [vmem:[%s8671_s1 + $0xdc4] ss:$16 sps:$4 sm:$0xff]  }
 0x195   : > { %4473 = vmatprep.subr.bf16.mxu1 %v6410_v62  ;;  %v6470_v62 = vld [vmem:[%s8671_s1 + $0xfc4] ss:$16 sps:$4 sm:$0xff]  }
 0x197   : > { %4433 = vmatpush1.bf16.msra.mxu0 %v6405_v0  ;;  %v3237_v0 = vrot.slane %v3230_v30, %v6855_v49  ;;  %v6521_v30 = vld [vmem:[%s8671_s1 + $0x10e0] ss:$16 sps:$4 sm:$0xff]  }
 0x198   : > { %4474 = vmatpush1.bf16.msra.mxu1 %v6408_v1  ;;  %4434 = vmatprep.subr.bf16.mxu0 %v6413_v2  ;;  %v6465_v1 = vld [vmem:[%s8671_s1 + $0xdc0] ss:$16 sps:$4 sm:$0xff]  }
 0x199   : > { %4475 = vmatprep.subr.bf16.mxu1 %v6416_v3  ;;  %v1692_v8 = vpop.f32.mrb[8].mxu0  ;;  %v6468_v2 = vld [vmem:[%s8671_s1 + $0xfc0] ss:$16 sps:$4 sm:$0xff]   ;;  %v6473_v3 = vld [vmem:[%s8671_s1 + $0xde4] ss:$16 sps:$4 sm:$0xff]  }
 0x19a   : > { %v1733_v37 = vpop.f32.mrb[8].mxu1  ;;  %v1693_v13 = vadd.f32 %v1692_v8, %v7867_v27  ;;  %v1694_v10 = vpop.f32.mrb[9].mxu0  ;;  %v6481_v8 = vld [vmem:[%s8671_s1 + $0x1004] ss:$16 sps:$4 sm:$0xff]  }
 0x19b   : > { %v1735_v50 = vpop.f32.mrb[9].mxu1  ;;  %v1695_v31 = vadd.f32 %v1694_v10, %v7878_v34  ;;  %v1696_v44 = vpop.f32.mrb[10].mxu0  ;;  %4435 = vmatpush1.bf16.msra.mxu0 %v6411_v4  ;;  %v6425_v34 = vld [vmem:[%s8671_s1 + $0xce4] ss:$16 sps:$4 sm:$0xff]   ;;  %v6482_v10 = vld [vmem:[%s8671_s1 + $0xc08] ss:$16 sps:$4 sm:$0xff]  }
 0x19c   : > { %v1737_v12 = vpop.f32.mrb[10].mxu1  ;;  %4476 = vmatpush1.bf16.msra.mxu1 %v6414_v5  ;;  %v8115_v16 = vadd.f32 %v1733_v37, %v1693_v13  ;;  %v1697_v19 = vpop.f32.mrb[11].mxu0  ;;  %4436 = vmatprep.subr.bf16.mxu0 %v6419_v6  ;;  %v6476_v4 = vld [vmem:[%s8671_s1 + $0xfe4] ss:$16 sps:$4 sm:$0xff]   ;;  %v3449_v5 = vcombine.low %v7556_v28, %v3237_v0  ;;  %v6471_v6 = vld [vmem:[%s8671_s1 + $0xde0] ss:$16 sps:$4 sm:$0xff]  }
 0x19d   : > { %v1738_v27 = vpop.f32.mrb[11].mxu1  ;;  %4477 = vmatprep.subr.bf16.mxu1 %v6422_v7  ;;  %v8123_v21 = vadd.f32 %v1735_v50, %v1695_v31  ;;  %v6474_v7 = vld [vmem:[%s8671_s1 + $0xfe0] ss:$16 sps:$4 sm:$0xff]   ;;  %v6484_v28 = vld [vmem:[%s8671_s1 + $0xc0c] ss:$16 sps:$4 sm:$0xff]  }
 0x19e   : > { %v8238_v37 = vrot.slane %v3449_v5, %v6855_v49  ;;  %v6479_v13 = vld [vmem:[%s8671_s1 + $0x1000] ss:$16 sps:$4 sm:$0xff]   ;;  %v6487_v50 = vld [vmem:[%s8671_s1 + $0x1024] ss:$16 sps:$4 sm:$0xff]   ;;  %v6490_v31 = vld [vmem:[%s8671_s1 + $0xc2c] ss:$16 sps:$4 sm:$0xff]  }
 0x19f   : > { %4437 = vmatpush1.bf16.msra.mxu0 %v6417_v14  ;;  %v6485_v12 = vld [vmem:[%s8671_s1 + $0x1020] ss:$16 sps:$4 sm:$0xff]   ;;  %v6488_v14 = vld [vmem:[%s8671_s1 + $0xc28] ss:$16 sps:$4 sm:$0xff]   ;;  %v6496_v19 = vld [vmem:[%s8671_s1 + $0xc4c] ss:$16 sps:$4 sm:$0xff]  }
 0x1a0   : > { %4478 = vmatpush1.bf16.msra.mxu1 %v6420_v15  ;;  %4438 = vmatprep.subr.bf16.mxu0 %v6425_v34  ;;  %v8254_v44 = vcombine.high %v8238_v37, %v8238_v37  ;;  %v6493_v15 = vld [vmem:[%s8671_s1 + $0x1044] ss:$16 sps:$4 sm:$0xff]   ;;  %v6491_v27 = vld [vmem:[%s8671_s1 + $0x1040] ss:$16 sps:$4 sm:$0xff]   ;;  %v6494_v34 = vld [vmem:[%s8671_s1 + $0xc48] ss:$16 sps:$4 sm:$0xff]  }
 0x1a1   : > { %4479 = vmatprep.subr.bf16.mxu1 %v6428_v20  ;;  %v6499_v20 = vld [vmem:[%s8671_s1 + $0x1064] ss:$16 sps:$4 sm:$0xff]   ;;  %v6530_v0 = vld [vmem:[%s8671_s1 + $0xd08] ss:$16 sps:$4 sm:$0xff]  }
 0x1a2   : > { %v6541_v5 = vld [vmem:[%s8671_s1 + $0x1144] ss:$16 sps:$4 sm:$0xff]  }
 0x1a3   : > { %4439 = vmatpush1.bf16.msra.mxu0 %v6423_v22  ;;  %v6497_v22 = vld [vmem:[%s8671_s1 + $0x1060] ss:$16 sps:$4 sm:$0xff]  }
 0x1a4   : > { %4480 = vmatpush1.bf16.msra.mxu1 %v6426_v23  ;;  %4440 = vmatprep.subr.bf16.mxu0 %v6431_v24  ;;  %v6500_v23 = vld [vmem:[%s8671_s1 + $0xc68] ss:$16 sps:$4 sm:$0xff]   ;;  %v6505_v24 = vld [vmem:[%s8671_s1 + $0x1084] ss:$16 sps:$4 sm:$0xff]  }
 0x1a5   : > { %4481 = vmatprep.subr.bf16.mxu1 %v6434_v63  ;;  %v6508_v63 = vld [vmem:[%s8671_s1 + $0xc8c] ss:$16 sps:$4 sm:$0xff]  }
 0x1a7   : > { %4441 = vmatpush1.bf16.msra.mxu0 %v6429_v26  ;;  %v6503_v26 = vld [vmem:[%s8671_s1 + $0x1080] ss:$16 sps:$4 sm:$0xff]  }
 0x1a8   : > { %4482 = vmatpush1.bf16.msra.mxu1 %v6432_v29  ;;  %4442 = vmatprep.subr.bf16.mxu0 %v6437_v32  ;;  %v6506_v29 = vld [vmem:[%s8671_s1 + $0xc88] ss:$16 sps:$4 sm:$0xff]   ;;  %v6511_v32 = vld [vmem:[%s8671_s1 + $0x10a4] ss:$16 sps:$4 sm:$0xff]  }
 0x1a9   : > { %4483 = vmatprep.subr.bf16.mxu1 %v6440_v18  ;;  %v6514_v18 = vld [vmem:[%s8671_s1 + $0xcac] ss:$16 sps:$4 sm:$0xff]  }
 0x1ab   : > { %4443 = vmatpush1.bf16.msra.mxu0 %v6435_v53  ;;  %v6509_v53 = vld [vmem:[%s8671_s1 + $0x10a0] ss:$16 sps:$4 sm:$0xff]  }
 0x1ac   : > { %4484 = vmatpush1.bf16.msra.mxu1 %v6438_v35  ;;  %4444 = vmatprep.subr.bf16.mxu0 %v6443_v40  ;;  %v6512_v35 = vld [vmem:[%s8671_s1 + $0xca8] ss:$16 sps:$4 sm:$0xff]   ;;  %v6517_v40 = vld [vmem:[%s8671_s1 + $0x10c4] ss:$16 sps:$4 sm:$0xff]  }
 0x1ad   : > { %4485 = vmatprep.subr.bf16.mxu1 %v6446_v38  ;;  %v6520_v38 = vld [vmem:[%s8671_s1 + $0xccc] ss:$16 sps:$4 sm:$0xff]  }
 0x1af   : > { %4445 = vmatpush1.bf16.msra.mxu0 %v6441_v11 }
 0x1b0   : > { %4486 = vmatpush1.bf16.msra.mxu1 %v6444_v39  ;;  %4446 = vmatprep.subr.bf16.mxu0 %v6449_v58 }
 0x1b1   : > { %4487 = vmatprep.subr.bf16.mxu1 %v6452_v41 }
 0x1b3   : > { %4447 = vmatpush1.bf16.msra.mxu0 %v6447_v42 }
 0x1b4   : > { %4488 = vmatpush1.bf16.msra.mxu1 %v6450_v48  ;;  %4448 = vmatprep.subr.bf16.mxu0 %v6455_v51 }
 0x1b5   : > { %4489 = vmatprep.subr.bf16.mxu1 %v6458_v52 }
 0x1b7   : > { %4449 = vmatpush1.bf16.msra.mxu0 %v6453_v54 }
 0x1b8   : > { %4490 = vmatpush1.bf16.msra.mxu1 %v6456_v56  ;;  %4450 = vmatprep.subr.bf16.mxu0 %v6461_v57  ;;  %v6523_v57 = vld [vmem:[%s8671_s1 + $0x10e4] ss:$16 sps:$4 sm:$0xff]  }
 0x1b9   : > { %4491 = vmatprep.subr.bf16.mxu1 %v6464_v55  ;;  %v6526_v55 = vld [vmem:[%s8671_s1 + $0xcec] ss:$16 sps:$4 sm:$0xff]  }
 0x1bb   : > { %4451 = vmatpush1.bf16.msra.mxu0 %v6459_v59  ;;  %v6524_v59 = vld [vmem:[%s8671_s1 + $0xce8] ss:$16 sps:$4 sm:$0xff]  }
 0x1bc   : > { %4492 = vmatpush1.bf16.msra.mxu1 %v6462_v60  ;;  %4452 = vmatprep.subr.bf16.mxu0 %v6467_v61  ;;  %v6529_v60 = vld [vmem:[%s8671_s1 + $0x1104] ss:$16 sps:$4 sm:$0xff]   ;;  %v6532_v61 = vld [vmem:[%s8671_s1 + $0xd0c] ss:$16 sps:$4 sm:$0xff]  }
 0x1bd   : > { %4493 = vmatprep.subr.bf16.mxu1 %v6470_v62  ;;  %v6527_v62 = vld [vmem:[%s8671_s1 + $0x1100] ss:$16 sps:$4 sm:$0xff]  }
 0x1bf   : > { %4453 = vmatpush1.bf16.msra.mxu0 %v6465_v1  ;;  %v6535_v1 = vld [vmem:[%s8671_s1 + $0x1124] ss:$16 sps:$4 sm:$0xff]  }
 0x1c0   : > { %4494 = vmatpush1.bf16.msra.mxu1 %v6468_v2  ;;  %4454 = vmatprep.subr.bf16.mxu0 %v6473_v3  ;;  %v6538_v2 = vld [vmem:[%s8671_s1 + $0xd2c] ss:$16 sps:$4 sm:$0xff]   ;;  %v6533_v3 = vld [vmem:[%s8671_s1 + $0x1120] ss:$16 sps:$4 sm:$0xff]  }
 0x1c1   : > { %4495 = vmatprep.subr.bf16.mxu1 %v6476_v4  ;;  %v6536_v4 = vld [vmem:[%s8671_s1 + $0xd28] ss:$16 sps:$4 sm:$0xff]  }
 0x1c3   : > { %4455 = vmatpush1.bf16.msra.mxu0 %v6471_v6  ;;  %v6544_v6 = vld [vmem:[%s8671_s1 + $0xd4c] ss:$16 sps:$4 sm:$0xff]  }
 0x1c4   : > { %4496 = vmatpush1.bf16.msra.mxu1 %v6474_v7  ;;  %4506 = vmatprep.subr.bf16.mxu0 %v6481_v8  ;;  %v6539_v7 = vld [vmem:[%s8671_s1 + $0x1140] ss:$16 sps:$4 sm:$0xff]   ;;  %v6542_v8 = vld [vmem:[%s8671_s1 + $0xd48] ss:$16 sps:$4 sm:$0xff]  }
 0x1c5   : > { %4547 = vmatprep.subr.bf16.mxu1 %v6484_v28  ;;  %v6547_v28 = vld [vmem:[%s8671_s1 + $0x1164] ss:$16 sps:$4 sm:$0xff]  }
 0x1c6   : > { %4457 = vmatmul.mubr.bf16.vlgmr.msra.gmra.mrb[24].mxu0 %v8018_v17 }
 0x1c7   : > { %4498 = vmatmul.mubr.bf16.vlgmr.msra.gmra.mrb[24].mxu1 %v8021_v9  ;;  %4507 = vmatpush1.bf16.msra.mxu0 %v6479_v13  ;;  %v6550_v13 = vld [vmem:[%s8671_s1 + $0xd6c] ss:$16 sps:$4 sm:$0xff]  }
 0x1c8   : > { %4548 = vmatpush1.bf16.msra.mxu1 %v6482_v10  ;;  %4508 = vmatprep.subr.bf16.mxu0 %v6487_v50  ;;  %v6545_v10 = vld [vmem:[%s8671_s1 + $0x1160] ss:$16 sps:$4 sm:$0xff]   ;;  %v6548_v50 = vld [vmem:[%s8671_s1 + $0xd68] ss:$16 sps:$4 sm:$0xff]  }
 0x1c9   : > { %4549 = vmatprep.subr.bf16.mxu1 %v6490_v31  ;;  %4538 = vmatprep.mubr.bf16.mxu0 %v8254_v44  ;;  %v6553_v31 = vld [vmem:[%s8671_s1 + $0x1184] ss:$16 sps:$4 sm:$0xff]  }
 0x1ca   : > { %4579 = vmatprep.mubr.bf16.mxu1 %v8037_v45  ;;  %v6502_v45 = vld [vmem:[%s8671_s1 + $0xc6c] ss:$16 sps:$4 sm:$0xff]  }
 0x1cb   : > { %4509 = vmatpush1.bf16.msra.mxu0 %v6485_v12  ;;  %v6556_v12 = vld [vmem:[%s8671_s1 + $0xd8c] ss:$16 sps:$4 sm:$0xff]  }
 0x1cc   : > { %4550 = vmatpush1.bf16.msra.mxu1 %v6488_v14  ;;  %4510 = vmatprep.subr.bf16.mxu0 %v6493_v15  ;;  %v6551_v14 = vld [vmem:[%s8671_s1 + $0x1180] ss:$16 sps:$4 sm:$0xff]   ;;  %v6554_v15 = vld [vmem:[%s8671_s1 + $0xd88] ss:$16 sps:$4 sm:$0xff]  }
 0x1cd   : > { %4551 = vmatprep.subr.bf16.mxu1 %v6496_v19  ;;  %v6559_v19 = vld [vmem:[%s8671_s1 + $0x11a4] ss:$16 sps:$4 sm:$0xff]  }
 0x1cf   : > { %4511 = vmatpush1.bf16.msra.mxu0 %v6491_v27  ;;  %v6562_v27 = vld [vmem:[%s8671_s1 + $0xdac] ss:$16 sps:$4 sm:$0xff]  }
 0x1d0   : > { %4552 = vmatpush1.bf16.msra.mxu1 %v6494_v34  ;;  %4512 = vmatprep.subr.bf16.mxu0 %v6499_v20  ;;  %v6557_v34 = vld [vmem:[%s8671_s1 + $0x11a0] ss:$16 sps:$4 sm:$0xff]   ;;  %v6560_v20 = vld [vmem:[%s8671_s1 + $0xda8] ss:$16 sps:$4 sm:$0xff]  }
 0x1d1   : > { %4553 = vmatprep.subr.bf16.mxu1 %v6502_v45  ;;  %v6565_v45 = vld [vmem:[%s8671_s1 + $0x11c4] ss:$16 sps:$4 sm:$0xff]  }
 0x1d3   : > { %4513 = vmatpush1.bf16.msra.mxu0 %v6497_v22  ;;  %v6568_v22 = vld [vmem:[%s8671_s1 + $0xdcc] ss:$16 sps:$4 sm:$0xff]  }
 0x1d4   : > { %4554 = vmatpush1.bf16.msra.mxu1 %v6500_v23  ;;  %4514 = vmatprep.subr.bf16.mxu0 %v6505_v24  ;;  %v6563_v23 = vld [vmem:[%s8671_s1 + $0x11c0] ss:$16 sps:$4 sm:$0xff]   ;;  %v6566_v24 = vld [vmem:[%s8671_s1 + $0xdc8] ss:$16 sps:$4 sm:$0xff]  }
 0x1d5   : > { %4555 = vmatprep.subr.bf16.mxu1 %v6508_v63  ;;  %v6571_v63 = vld [vmem:[%s8671_s1 + $0x11e4] ss:$16 sps:$4 sm:$0xff]  }
 0x1d7   : > { %4515 = vmatpush1.bf16.msra.mxu0 %v6503_v26  ;;  %v6574_v26 = vld [vmem:[%s8671_s1 + $0xdec] ss:$16 sps:$4 sm:$0xff]  }
 0x1d8   : > { %4556 = vmatpush1.bf16.msra.mxu1 %v6506_v29  ;;  %4516 = vmatprep.subr.bf16.mxu0 %v6511_v32  ;;  %v6569_v29 = vld [vmem:[%s8671_s1 + $0x11e0] ss:$16 sps:$4 sm:$0xff]   ;;  %v6572_v32 = vld [vmem:[%s8671_s1 + $0xde8] ss:$16 sps:$4 sm:$0xff]  }
 0x1d9   : > { %4557 = vmatprep.subr.bf16.mxu1 %v6514_v18  ;;  %v2989_v11 = vpop.f32.mrb[12].mxu0  ;;  %v6577_v18 = vld [vmem:[%s8671_s1 + $0xe0c] ss:$16 sps:$4 sm:$0xff]  }
 0x1da   : > { %v3030_v39 = vpop.f32.mrb[12].mxu1  ;;  %v2991_v41 = vpop.f32.mrb[13].mxu0 }
 0x1db   : > { %v8320_v58 = vadd.f32 %v3030_v39, %v2989_v11  ;;  %v3032_v42 = vpop.f32.mrb[13].mxu1  ;;  %v2993_v51 = vpop.f32.mrb[14].mxu0  ;;  %4517 = vmatpush1.bf16.msra.mxu0 %v6509_v53  ;;  %v6580_v53 = vld [vmem:[%s8671_s1 + $0x100c] ss:$16 sps:$4 sm:$0xff]   ;;  %v6581_v39 = vld [vmem:[%s8671_s1 + $0xe28] ss:$16 sps:$4 sm:$0xff]  }
 0x1dc   : > { %v8322_v48 = vadd.f32 %v3032_v42, %v2991_v41  ;;  %v3034_v52 = vpop.f32.mrb[14].mxu1  ;;  %4558 = vmatpush1.bf16.msra.mxu1 %v6512_v35  ;;  %v2994_v54 = vpop.f32.mrb[15].mxu0  ;;  %4518 = vmatprep.subr.bf16.mxu0 %v6517_v40  ;;  %v6575_v35 = vld [vmem:[%s8671_s1 + $0xe08] ss:$16 sps:$4 sm:$0xff]   ;;  %v6586_v11 = vld [vmem:[%s8671_s1 + $0x102c] ss:$16 sps:$4 sm:$0xff]  }
 0x1dd   : > { %v3035_v56 = vpop.f32.mrb[15].mxu1  ;;  %4559 = vmatprep.subr.bf16.mxu1 %v6520_v38  ;;  %v6578_v40 = vld [vmem:[%s8671_s1 + $0x1008] ss:$16 sps:$4 sm:$0xff]   ;;  %v6583_v38 = vld [vmem:[%s8671_s1 + $0xe2c] ss:$16 sps:$4 sm:$0xff]  }
 0x1de   : > { %v6584_v41 = vld [vmem:[%s8671_s1 + $0x1028] ss:$16 sps:$4 sm:$0xff]   ;;  %v6589_v42 = vld [vmem:[%s8671_s1 + $0xe4c] ss:$16 sps:$4 sm:$0xff]  }
 0x1df   : > { %4519 = vmatpush1.bf16.msra.mxu0 %v6515_v25  ;;  %v6587_v51 = vld [vmem:[%s8671_s1 + $0xe48] ss:$16 sps:$4 sm:$0xff]   ;;  %v6595_v25 = vld [vmem:[%s8671_s1 + $0xe6c] ss:$16 sps:$4 sm:$0xff]  }
 0x1e0   : > { %4560 = vmatpush1.bf16.msra.mxu1 %v6518_v36  ;;  %4520 = vmatprep.subr.bf16.mxu0 %v6523_v57  ;;  %v6590_v52 = vld [vmem:[%s8671_s1 + $0x1048] ss:$16 sps:$4 sm:$0xff]   ;;  %v6601_v54 = vld [vmem:[%s8671_s1 + $0xe8c] ss:$16 sps:$4 sm:$0xff]  }
 0x1e1   : > { %4561 = vmatprep.subr.bf16.mxu1 %v6526_v55  ;;  %v6596_v36 = vld [vmem:[%s8671_s1 + $0x1068] ss:$16 sps:$4 sm:$0xff]   ;;  %v6604_v56 = vld [vmem:[%s8671_s1 + $0x108c] ss:$16 sps:$4 sm:$0xff]  }
 0x1e2   : > { %v6599_v57 = vld [vmem:[%s8671_s1 + $0xe88] ss:$16 sps:$4 sm:$0xff]  }
 0x1e3   : > { %4521 = vmatpush1.bf16.msra.mxu0 %v6521_v30  ;;  %v6602_v55 = vld [vmem:[%s8671_s1 + $0x1088] ss:$16 sps:$4 sm:$0xff]   ;;  %v6607_v30 = vld [vmem:[%s8671_s1 + $0xeac] ss:$16 sps:$4 sm:$0xff]  }
 0x1e4   : > { %4562 = vmatpush1.bf16.msra.mxu1 %v6524_v59  ;;  %4522 = vmatprep.subr.bf16.mxu0 %v6529_v60  ;;  %v6610_v59 = vld [vmem:[%s8671_s1 + $0x10ac] ss:$16 sps:$4 sm:$0xff]   ;;  %v6605_v60 = vld [vmem:[%s8671_s1 + $0xea8] ss:$16 sps:$4 sm:$0xff]  }
 0x1e5   : > { %4563 = vmatprep.subr.bf16.mxu1 %v6532_v61  ;;  %v6608_v61 = vld [vmem:[%s8671_s1 + $0x10a8] ss:$16 sps:$4 sm:$0xff]  }
 0x1e7   : > { %4523 = vmatpush1.bf16.msra.mxu0 %v6527_v62  ;;  %v6613_v62 = vld [vmem:[%s8671_s1 + $0xecc] ss:$16 sps:$4 sm:$0xff]  }
 0x1e8   : > { %4564 = vmatpush1.bf16.msra.mxu1 %v6530_v0  ;;  %4524 = vmatprep.subr.bf16.mxu0 %v6535_v1  ;;  %v6616_v0 = vld [vmem:[%s8671_s1 + $0x10cc] ss:$16 sps:$4 sm:$0xff]  }
 0x1e9   : > { %4565 = vmatprep.subr.bf16.mxu1 %v6538_v2 }
 0x1eb   : > { %4525 = vmatpush1.bf16.msra.mxu0 %v6533_v3 }
 0x1ec   : > { %4566 = vmatpush1.bf16.msra.mxu1 %v6536_v4  ;;  %4526 = vmatprep.subr.bf16.mxu0 %v6541_v5 }
 0x1ed   : > { %4567 = vmatprep.subr.bf16.mxu1 %v6544_v6 }
 0x1ef   : > { %4527 = vmatpush1.bf16.msra.mxu0 %v6539_v7 }
 0x1f0   : > { %4568 = vmatpush1.bf16.msra.mxu1 %v6542_v8  ;;  %4528 = vmatprep.subr.bf16.mxu0 %v6547_v28  ;;  %v6611_v28 = vld [vmem:[%s8671_s1 + $0xec8] ss:$16 sps:$4 sm:$0xff]  }
 0x1f1   : > { %4569 = vmatprep.subr.bf16.mxu1 %v6550_v13  ;;  %v6614_v13 = vld [vmem:[%s8671_s1 + $0x10c8] ss:$16 sps:$4 sm:$0xff]  }
 0x1f3   : > { %4529 = vmatpush1.bf16.msra.mxu0 %v6545_v10 }
 0x1f4   : > { %4570 = vmatpush1.bf16.msra.mxu1 %v6548_v50  ;;  %4530 = vmatprep.subr.bf16.mxu0 %v6553_v31  ;;  %v6622_v31 = vld [vmem:[%s8671_s1 + $0x10ec] ss:$16 sps:$4 sm:$0xff]  }
 0x1f5   : > { %4571 = vmatprep.subr.bf16.mxu1 %v6556_v12 }
 0x1f7   : > { %4531 = vmatpush1.bf16.msra.mxu0 %v6551_v14  ;;  %v6620_v14 = vld [vmem:[%s8671_s1 + $0x10e8] ss:$16 sps:$4 sm:$0xff]  }
 0x1f8   : > { %4572 = vmatpush1.bf16.msra.mxu1 %v6554_v15  ;;  %4532 = vmatprep.subr.bf16.mxu0 %v6559_v19  ;;  %v6625_v15 = vld [vmem:[%s8671_s1 + $0xf0c] ss:$16 sps:$4 sm:$0xff]   ;;  %v6623_v19 = vld [vmem:[%s8671_s1 + $0xf08] ss:$16 sps:$4 sm:$0xff]  }
 0x1f9   : > { %4573 = vmatprep.subr.bf16.mxu1 %v6562_v27  ;;  %v6626_v27 = vld [vmem:[%s8671_s1 + $0x1108] ss:$16 sps:$4 sm:$0xff]  }
 0x1fb   : > { %4533 = vmatpush1.bf16.msra.mxu0 %v6557_v34  ;;  %v6631_v34 = vld [vmem:[%s8671_s1 + $0xf2c] ss:$16 sps:$4 sm:$0xff]  }
 0x1fc   : > { %4574 = vmatpush1.bf16.msra.mxu1 %v6560_v20  ;;  %4534 = vmatprep.subr.bf16.mxu0 %v6565_v45  ;;  %v6634_v20 = vld [vmem:[%s8671_s1 + $0x112c] ss:$16 sps:$4 sm:$0xff]   ;;  %v6629_v45 = vld [vmem:[%s8671_s1 + $0xf28] ss:$16 sps:$4 sm:$0xff]  }
 0x1fd   : > { %4575 = vmatprep.subr.bf16.mxu1 %v6568_v22  ;;  %v6632_v22 = vld [vmem:[%s8671_s1 + $0x1128] ss:$16 sps:$4 sm:$0xff]  }
 0x1ff   : > { %4535 = vmatpush1.bf16.msra.mxu0 %v6563_v23  ;;  %v6637_v23 = vld [vmem:[%s8671_s1 + $0xf4c] ss:$16 sps:$4 sm:$0xff]  }
 0x200   : > { %4576 = vmatpush1.bf16.msra.mxu1 %v6566_v24  ;;  %4536 = vmatprep.subr.bf16.mxu0 %v6571_v63  ;;  %v6640_v24 = vld [vmem:[%s8671_s1 + $0x114c] ss:$16 sps:$4 sm:$0xff]   ;;  %v6635_v63 = vld [vmem:[%s8671_s1 + $0xf48] ss:$16 sps:$4 sm:$0xff]  }
 0x201   : > { %4577 = vmatprep.subr.bf16.mxu1 %v6574_v26  ;;  %v6638_v26 = vld [vmem:[%s8671_s1 + $0x1148] ss:$16 sps:$4 sm:$0xff]  }
 0x203   : > { %4537 = vmatpush1.bf16.msra.mxu0 %v6569_v29  ;;  %v6643_v29 = vld [vmem:[%s8671_s1 + $0xf6c] ss:$16 sps:$4 sm:$0xff]  }
 0x204   : > { %4578 = vmatpush1.bf16.msra.mxu1 %v6572_v32  ;;  %4588 = vmatprep.subr.bf16.mxu0 %v6577_v18  ;;  %v6646_v32 = vld [vmem:[%s8671_s1 + $0x116c] ss:$16 sps:$4 sm:$0xff]   ;;  %v6641_v18 = vld [vmem:[%s8671_s1 + $0xf68] ss:$16 sps:$4 sm:$0xff]  }
 0x205   : > { %4629 = vmatprep.subr.bf16.mxu1 %v6580_v53  ;;  %v6644_v53 = vld [vmem:[%s8671_s1 + $0x1168] ss:$16 sps:$4 sm:$0xff]  }
 0x206   : > { %4539 = vmatmul.mubr.bf16.vlgmr.msra.gmra.mrb[28].mxu0 %v8238_v37 }
 0x207   : > { %4580 = vmatmul.mubr.bf16.vlgmr.msra.gmra.mrb[28].mxu1 %v8018_v17  ;;  %4589 = vmatpush1.bf16.msra.mxu0 %v6575_v35  ;;  %v6592_v17 = vld [vmem:[%s8671_s1 + $0x104c] ss:$16 sps:$4 sm:$0xff]  }
 0x208   : > { %4630 = vmatpush1.bf16.msra.mxu1 %v6578_v40  ;;  %4590 = vmatprep.subr.bf16.mxu0 %v6583_v38  ;;  %v6649_v35 = vld [vmem:[%s8671_s1 + $0xf8c] ss:$16 sps:$4 sm:$0xff]   ;;  %v6647_v38 = vld [vmem:[%s8671_s1 + $0xf88] ss:$16 sps:$4 sm:$0xff]  }
 0x209   : > { %4631 = vmatprep.subr.bf16.mxu1 %v6586_v11  ;;  %4620 = vmatprep.mubr.bf16.mxu0 %v8041_v46  ;;  %v6598_v46 = vld [vmem:[%s8671_s1 + $0x106c] ss:$16 sps:$4 sm:$0xff]   ;;  %v6650_v11 = vld [vmem:[%s8671_s1 + $0x1188] ss:$16 sps:$4 sm:$0xff]  }
 0x20a   : > { %4661 = vmatprep.mubr.bf16.mxu1 %v8254_v44  ;;  %v6593_v44 = vld [vmem:[%s8671_s1 + $0xe68] ss:$16 sps:$4 sm:$0xff]   ;;  %v6652_v40 = vld [vmem:[%s8671_s1 + $0x118c] ss:$16 sps:$4 sm:$0xff]  }
 0x20b   : > { %4591 = vmatpush1.bf16.msra.mxu0 %v6581_v39  ;;  %v6655_v39 = vld [vmem:[%s8671_s1 + $0xfac] ss:$16 sps:$4 sm:$0xff]  }
 0x20c   : > { %4632 = vmatpush1.bf16.msra.mxu1 %v6584_v41  ;;  %4592 = vmatprep.subr.bf16.mxu0 %v6589_v42  ;;  %v6658_v41 = vld [vmem:[%s8671_s1 + $0x11ac] ss:$16 sps:$4 sm:$0xff]   ;;  %v6653_v42 = vld [vmem:[%s8671_s1 + $0xfa8] ss:$16 sps:$4 sm:$0xff]  }
 0x20d   : > { %4633 = vmatprep.subr.bf16.mxu1 %v6592_v17  ;;  %v6656_v17 = vld [vmem:[%s8671_s1 + $0x11a8] ss:$16 sps:$4 sm:$0xff]  }
 0x20f   : > { %4593 = vmatpush1.bf16.msra.mxu0 %v6587_v51  ;;  %v6661_v51 = vld [vmem:[%s8671_s1 + $0xfcc] ss:$16 sps:$4 sm:$0xff]  }
 0x210   : > { %4634 = vmatpush1.bf16.msra.mxu1 %v6590_v52  ;;  %4594 = vmatprep.subr.bf16.mxu0 %v6595_v25  ;;  %v6664_v52 = vld [vmem:[%s8671_s1 + $0x11cc] ss:$16 sps:$4 sm:$0xff]   ;;  %v6659_v25 = vld [vmem:[%s8671_s1 + $0xfc8] ss:$16 sps:$4 sm:$0xff]  }
 0x211   : > { %4635 = vmatprep.subr.bf16.mxu1 %v6598_v46  ;;  %v6662_v46 = vld [vmem:[%s8671_s1 + $0x11c8] ss:$16 sps:$4 sm:$0xff]  }
 0x213   : > { %4595 = vmatpush1.bf16.msra.mxu0 %v6593_v44  ;;  %v6667_v44 = vld [vmem:[%s8671_s1 + $0xfec] ss:$16 sps:$4 sm:$0xff]  }
 0x214   : > { %4636 = vmatpush1.bf16.msra.mxu1 %v6596_v36  ;;  %4596 = vmatprep.subr.bf16.mxu0 %v6601_v54  ;;  %v6670_v36 = vld [vmem:[%s8671_s1 + $0x11ec] ss:$16 sps:$4 sm:$0xff]   ;;  %v6665_v54 = vld [vmem:[%s8671_s1 + $0xfe8] ss:$16 sps:$4 sm:$0xff]  }
 0x215   : > { %4637 = vmatprep.subr.bf16.mxu1 %v6604_v56  ;;  %v6668_v56 = vld [vmem:[%s8671_s1 + $0x11e8] ss:$16 sps:$4 sm:$0xff]  }
 0x217   : > { %4597 = vmatpush1.bf16.msra.mxu0 %v6599_v57 }
 0x218   : > { %4638 = vmatpush1.bf16.msra.mxu1 %v6602_v55  ;;  %4598 = vmatprep.subr.bf16.mxu0 %v6607_v30 }
 0x219   : > { %4639 = vmatprep.subr.bf16.mxu1 %v6610_v59  ;;  %v3071_v1 = vpop.f32.mrb[16].mxu0 }
 0x21a   : > { %v8520_v2 = vpop.f32.mrb[16].mxu1  ;;  %v3072_v3 = vadd.f32 %v3071_v1, %v8320_v58  ;;  %v3073_v4 = vpop.f32.mrb[17].mxu0 }
 0x21b   : > { %v8523_v5 = vpop.f32.mrb[17].mxu1  ;;  %v3074_v6 = vadd.f32 %v3073_v4, %v8322_v48  ;;  %v3075_v7 = vpop.f32.mrb[18].mxu0  ;;  %4599 = vmatpush1.bf16.msra.mxu0 %v6605_v60  ;;  %v6619_v48 = vld [vmem:[%s8671_s1 + $0xeec] ss:$16 sps:$4 sm:$0xff]  }
 0x21c   : > { %v3116_v8 = vpop.f32.mrb[18].mxu1  ;;  %4640 = vmatpush1.bf16.msra.mxu1 %v6608_v61  ;;  %v8533_v10 = vadd.f32 %v3072_v3, %v7876_v33  ;;  %v3076_v58 = vpop.f32.mrb[19].mxu0  ;;  %4600 = vmatprep.subr.bf16.mxu0 %v6613_v62  ;;  %v6617_v33 = vld [vmem:[%s8671_s1 + $0xee8] ss:$16 sps:$4 sm:$0xff]  }
 0x21d   : > { %v3117_v50 = vpop.f32.mrb[19].mxu1  ;;  %4641 = vmatprep.subr.bf16.mxu1 %v6616_v0  ;;  %v8542_v12 = vadd.f32 %v3074_v6, %v7881_v47  ;;  %v6628_v47 = vld [vmem:[%s8671_s1 + $0x110c] ss:$16 sps:$4 sm:$0xff]  }
 0x21f   : > { %4601 = vmatpush1.bf16.msra.mxu0 %v6611_v28 }
 0x220   : > { %4642 = vmatpush1.bf16.msra.mxu1 %v6614_v13  ;;  %4602 = vmatprep.subr.bf16.mxu0 %v6619_v48 }
 0x221   : > { %4643 = vmatprep.subr.bf16.mxu1 %v6622_v31 }
 0x223   : > { %4603 = vmatpush1.bf16.msra.mxu0 %v6617_v33  ;;  %v4690_v33 = vsub.s32 0, %v6831_v43 }
 0x224   : > { %4644 = vmatpush1.bf16.msra.mxu1 %v6620_v14  ;;  %4604 = vmatprep.subr.bf16.mxu0 %v6625_v15  ;;  %v4686_v14 = vld [vmem:[%s8672_s2] sm:$0xf] }
 0x225   : > { %4645 = vmatprep.subr.bf16.mxu1 %v6628_v47 }
 0x227   : > { %4605 = vmatpush1.bf16.msra.mxu0 %v6623_v19  ;;  %v4691_v19 = vrot.slane %v4686_v14, %v4690_v33 }
 0x228   : > { %4646 = vmatpush1.bf16.msra.mxu1 %v6626_v27  ;;  %4606 = vmatprep.subr.bf16.mxu0 %v6631_v34 }
 0x229   : > { %4647 = vmatprep.subr.bf16.mxu1 %v6634_v20 }
 0x22b   : > { %4607 = vmatpush1.bf16.msra.mxu0 %v6629_v45 }
 0x22c   : > { %4648 = vmatpush1.bf16.msra.mxu1 %v6632_v22  ;;  %4608 = vmatprep.subr.bf16.mxu0 %v6637_v23 }
 0x22d   : > { %4649 = vmatprep.subr.bf16.mxu1 %v6640_v24 }
 0x22f   : > { %4609 = vmatpush1.bf16.msra.mxu0 %v6635_v63 }
 0x230   : > { %4650 = vmatpush1.bf16.msra.mxu1 %v6638_v26  ;;  %4610 = vmatprep.subr.bf16.mxu0 %v6643_v29 }
 0x231   : > { %4651 = vmatprep.subr.bf16.mxu1 %v6646_v32 }
 0x233   : > { %4611 = vmatpush1.bf16.msra.mxu0 %v6641_v18 }
 0x234   : > { %4652 = vmatpush1.bf16.msra.mxu1 %v6644_v53  ;;  %4612 = vmatprep.subr.bf16.mxu0 %v6649_v35 }
 0x235   : > { %4653 = vmatprep.subr.bf16.mxu1 %v6652_v40 }
 0x237   : > { %4613 = vmatpush1.bf16.msra.mxu0 %v6647_v38  ;;  %v4698_v38 = vsub.s32 2, %v6831_v43 }
 0x238   : > { %4654 = vmatpush1.bf16.msra.mxu1 %v6650_v11  ;;  %4614 = vmatprep.subr.bf16.mxu0 %v6655_v39 }
 0x239   : > { %4655 = vmatprep.subr.bf16.mxu1 %v6658_v41  ;;  %v4702_v41 = vsub.s32 3, %v6831_v43 }
 0x23b   : > { %4615 = vmatpush1.bf16.msra.mxu0 %v6653_v42 }
 0x23c   : > { %4656 = vmatpush1.bf16.msra.mxu1 %v6656_v17  ;;  %4616 = vmatprep.subr.bf16.mxu0 %v6661_v51 }
 0x23d   : > { %4657 = vmatprep.subr.bf16.mxu1 %v6664_v52 }
 0x23f   : > { %4617 = vmatpush1.bf16.msra.mxu0 %v6659_v25 }
 0x240   : > { %4658 = vmatpush1.bf16.msra.mxu1 %v6662_v46  ;;  %4618 = vmatprep.subr.bf16.mxu0 %v6667_v44 }
 0x241   : > { %4659 = vmatprep.subr.bf16.mxu1 %v6670_v36 }
 0x243   : > { %4619 = vmatpush1.bf16.msra.mxu0 %v6665_v54 }
 0x244   : > { %4660 = vmatpush1.bf16.msra.mxu1 %v6668_v56  ;;  %v4703_v56 = vrot.slane %v4686_v14, %v4702_v41 }
 0x246   : > { %4621 = vmatmul.mubr.bf16.vlgmr.msra.gmra.mrb[32].mxu0 %v8021_v9 }
 0x247   : > { %4662 = vmatmul.mubr.bf16.vlgmr.msra.gmra.mrb[32].mxu1 %v8238_v37 }
 0x259   : > { %v3153_v57 = vpop.f32.mrb[20].mxu0 }
 0x25a   : > { %v3194_v55 = vpop.f32.mrb[20].mxu1  ;;  %v3154_v30 = vadd.f32 %v3153_v57, %v8520_v2  ;;  %v3155_v59 = vpop.f32.mrb[21].mxu0 }
 0x25b   : > { %v3196_v60 = vpop.f32.mrb[21].mxu1  ;;  %v3156_v61 = vadd.f32 %v3155_v59, %v8523_v5  ;;  %v3157_v62 = vpop.f32.mrb[22].mxu0 }
 0x25c   : > { %v3198_v0 = vpop.f32.mrb[22].mxu1  ;;  %v3195_v1 = vadd.f32 %v3194_v55, %v3154_v30  ;;  %v3158_v3 = vpop.f32.mrb[23].mxu0 }
 0x25d   : > { %v3199_v4 = vpop.f32.mrb[23].mxu1  ;;  %v3197_v6 = vadd.f32 %v3196_v60, %v3156_v61 }
 0x25e   : > { %v3207_v7 = vadd.f32 %v3195_v1, %v8115_v16  ;;  %v4694_v16 = vsub.s32 1, %v6831_v43 }
 0x25f   : > { %v3208_v9 = vadd.f32 %v3197_v6, %v8123_v21 }
 0x260   : > { %v4695_v45 = vrot.slane %v4686_v14, %v4694_v16 }
 0x299   : > { %v4458_v8 = vpop.f32.mrb[24].mxu0 }
 0x29a   : > { %v4499_v37 = vpop.f32.mrb[24].mxu1  ;;  %v4460_v13 = vpop.f32.mrb[25].mxu0 }
 0x29b   : > { %v4500_v28 = vadd.f32 %v4499_v37, %v4458_v8  ;;  %v4501_v58 = vpop.f32.mrb[25].mxu1  ;;  %v4462_v50 = vpop.f32.mrb[26].mxu0 }
 0x29c   : > { %v4502_v2 = vadd.f32 %v4501_v58, %v4460_v13  ;;  %v4503_v48 = vpop.f32.mrb[26].mxu1  ;;  %v4463_v31 = vpop.f32.mrb[27].mxu0 }
 0x29d   : > { %v4504_v5 = vpop.f32.mrb[27].mxu1 }
 0x2d9   : > { %v4540_v15 = vpop.f32.mrb[28].mxu0 }
 0x2da   : > { %v4581_v21 = vpop.f32.mrb[28].mxu1  ;;  %v4541_v47 = vadd.f32 %v4540_v15, %v4500_v28  ;;  %v4542_v27 = vpop.f32.mrb[29].mxu0 }
 0x2db   : > { %v4583_v34 = vpop.f32.mrb[29].mxu1  ;;  %v4543_v20 = vadd.f32 %v4542_v27, %v4502_v2  ;;  %v4544_v22 = vpop.f32.mrb[30].mxu0 }
 0x2dc   : > { %v4585_v23 = vpop.f32.mrb[30].mxu1  ;;  %v4674_v24 = vadd.f32 %v4541_v47, %v8533_v10  ;;  %v4545_v63 = vpop.f32.mrb[31].mxu0 }
 0x2dd   : > { %v4586_v26 = vpop.f32.mrb[31].mxu1  ;;  %v4675_v29 = vadd.f32 %v4543_v20, %v8542_v12  ;;  %v4699_v12 = vrot.slane %v4686_v14, %v4698_v38 }
 0x2de   : > { %v4708_v32 = vadd.f32 %v4691_v19, %v4674_v24 }
 0x2df   : > { %v4709_v18 = vadd.f32 %v4695_v45, %v4675_v29 }
 0x2e0   : > { %v4712_v53 = vmax.f32 %v4708_v32, 0.0 }
 0x2e1   : > { %v4713_v35 = vmax.f32 %v4709_v18, 0.0 }
 0x2e3   : > { %v5784_v40 = vpack.c.bf16 %v4713_v35, %v4712_v53 }
 0x2e5   : > { %v4732_v62 = vrot.slane %v5784_v40, %v6855_v49 }
 0x319   : > { %v4622_v11 = vpop.f32.mrb[32].mxu0 }
 0x31a   : > { %v4663_v39 = vpop.f32.mrb[32].mxu1  ;;  %v4623_v42 = vadd.f32 %v4622_v11, %v4581_v21  ;;  %v4624_v17 = vpop.f32.mrb[33].mxu0 }
 0x31b   : > { %v4665_v51 = vpop.f32.mrb[33].mxu1  ;;  %v4625_v10 = vadd.f32 %v4624_v17, %v4583_v34  ;;  %v4626_v52 = vpop.f32.mrb[34].mxu0 }
 0x31c   : > { %v4667_v25 = vpop.f32.mrb[34].mxu1  ;;  %v4664_v46 = vadd.f32 %v4663_v39, %v4623_v42  ;;  %v4627_v44 = vpop.f32.mrb[35].mxu0 }
 0x31d   : > { %v4668_v36 = vpop.f32.mrb[35].mxu1  ;;  %v4666_v54 = vadd.f32 %v4665_v51, %v4625_v10 }
 0x31e   : > { %v4676_v57 = vadd.f32 %v4664_v46, %v3207_v7 }
 0x31f   : > { %v4677_v55 = vadd.f32 %v4666_v54, %v3208_v9 }
 0x320   : > { %v4710_v30 = vadd.f32 %v4699_v12, %v4676_v57 }
 0x321   : > { %v4711_v59 = vadd.f32 %v4703_v56, %v4677_v55 }
 0x322   : > { %v4714_v60 = vmax.f32 %v4710_v30, 0.0 }
 0x323   : > { %v4715_v61 = vmax.f32 %v4711_v59, 0.0 }
 0x325   : > { %v5785_v43 = vpack.c.bf16 %v4715_v61, %v4714_v60 }
 0x327   : > { %v4739_v0 = vrot.slane %v5785_v43, %v6855_v49 }
 0x329   : > { %v4740_v1 = vcombine.low %v4732_v62, %v4739_v0  ;;  %v4741_v3 = vcombine.high %v4732_v62, %v4739_v0 }
 0x32b   : > { %4744 = vst [vmem:[%s170_s25] sm:$0xff] %v4740_v1  ;;  %4745 = vst [vmem:[%s170_s25 + $0x8] sm:$0xff] %v4741_v3 }
 0x32c PF: > { %s13_s12 = sadd.s32 1, %s6677_s12  }
 0x32d   : > { %p10_p4 = scmp.ge.s32.totalorder %s13_s12, 4  }
 0x32f   :  { %12 = sbr.rel (!%p10_p4) target bundleno = 1 (0x1), region = 64 }

// kernel: lcnet_forward.11
= control target key start
LH: loop header
LB: loop body
LE: loop exit
PB: predicated region body
PF: predicated region fallthrough
CT: control target
= control target key end

     0   :  { %s5756_s12 = smov 0   ;;  %s7401_s0 = inlined_call_operand.vmem [shape: bf16[2,2,4,512], index: 0, kind: input, shape index: {}]   ;;  %s7402_s1 = inlined_call_operand.vmem [shape: bf16[2,1024,512], index: 1, kind: input, shape index: {}]   ;;  %s7403_s2 = inlined_call_operand.vmem [shape: f32[1,512], index: 2, kind: input, shape index: {}]   ;;  %s7404_s3 = inlined_call_operand.vmem [shape: f32[2,1,3,512], index: 3, kind: output, shape index: {}]  }
   0x1 LB: > { %s4119_s13 = sadd.s32 4294967295, %s5733_s12   ;;  %p4123_p0 = scmp.ge.s32.totalorder %s5733_s12, 1  ;;  %s5733_s12 = sphi %s5756_s12, %s13_s12  }
   0x2   : > { %p137_p1 = scmp.lt.s32.totalorder %s5733_s12, 3 }
   0x4   : > { %p138_p2 = pnand %p4123_p0, %p137_p1 }
   0x5   : > { %v4957_v0 = vld [vmem:[%s7402_s1 + $0x4] ss:$16 sps:$4 sm:$0xff] (!%p138_p2)   ;;  %v4959_v1 = vld [vmem:[%s7402_s1 + $0xc] ss:$16 sps:$4 sm:$0xff] (!%p138_p2)   ;;  %v4961_v2 = vld [vmem:[%s7402_s1] ss:$16 sps:$4 sm:$0xff] (!%p138_p2)   ;;  %v179_v38 = vlaneseq (!%p138_p2) }
   0x6   : > { %141 = sbr.rel (%p138_p2) target bundleno = 748 (0x2ec), region = 32  ;;  %1817 = vmatprep.subr.bf16.mxu0 (!%p138_p2), %v4957_v0  ;;  %v4962_v3 = vld [vmem:[%s7402_s1 + $0x8] ss:$16 sps:$4 sm:$0xff] (!%p138_p2)   ;;  %1981 = vmatprep.subr.bf16.mxu1 (!%p138_p2), %v4959_v1  ;;  %v4963_v4 = vld [vmem:[%s7402_s1 + $0x24] ss:$16 sps:$4 sm:$0xff] (!%p138_p2)   ;;  %p161_p3 = scmp.lt.s32.totalorder (!%p138_p2), %s4119_s13, 1 }
   0x7   : > { %1818 = vmatpush1.bf16.msra.mxu0 (!%p138_p2), %v4961_v2  ;;  %1982 = vmatpush1.bf16.msra.mxu1 (!%p138_p2), %v4962_v3  ;;  %v4965_v5 = vld [vmem:[%s7402_s1 + $0x2c] ss:$16 sps:$4 sm:$0xff] (!%p138_p2)   ;;  %v4967_v6 = vld [vmem:[%s7402_s1 + $0x20] ss:$16 sps:$4 sm:$0xff] (!%p138_p2)   ;;  %v4968_v7 = vld [vmem:[%s7402_s1 + $0x28] ss:$16 sps:$4 sm:$0xff] (!%p138_p2)  }
   0x8   : > { %1819 = vmatprep.subr.bf16.mxu0 (!%p138_p2), %v4963_v4  ;;  %1983 = vmatprep.subr.bf16.mxu1 (!%p138_p2), %v4965_v5  ;;  %v4969_v8 = vld [vmem:[%s7402_s1 + $0x44] ss:$16 sps:$4 sm:$0xff] (!%p138_p2)   ;;  %v4971_v9 = vld [vmem:[%s7402_s1 + $0x4c] ss:$16 sps:$4 sm:$0xff] (!%p138_p2)   ;;  %v4973_v10 = vld [vmem:[%s7402_s1 + $0x40] ss:$16 sps:$4 sm:$0xff] (!%p138_p2)  }
   0x9   : > { %v4974_v11 = vld [vmem:[%s7402_s1 + $0x48] ss:$16 sps:$4 sm:$0xff] (!%p138_p2)   ;;  %v4975_v12 = vld [vmem:[%s7402_s1 + $0x64] ss:$16 sps:$4 sm:$0xff] (!%p138_p2)   ;;  %v4977_v13 = vld [vmem:[%s7402_s1 + $0x6c] ss:$16 sps:$4 sm:$0xff] (!%p138_p2)  }
   0xa   : > { %v4979_v14 = vld [vmem:[%s7402_s1 + $0x60] ss:$16 sps:$4 sm:$0xff] (!%p138_p2)   ;;  %v4980_v15 = vld [vmem:[%s7402_s1 + $0x68] ss:$16 sps:$4 sm:$0xff] (!%p138_p2)   ;;  %v4981_v16 = vld [vmem:[%s7402_s1 + $0x84] ss:$16 sps:$4 sm:$0xff] (!%p138_p2)  }
   0xb   : > { %1820 = vmatpush1.bf16.msra.mxu0 (!%p138_p2), %v4967_v6  ;;  %1984 = vmatpush1.bf16.msra.mxu1 (!%p138_p2), %v4968_v7  ;;  %v4983_v17 = vld [vmem:[%s7402_s1 + $0x8c] ss:$16 sps:$4 sm:$0xff] (!%p138_p2)   ;;  %v4985_v18 = vld [vmem:[%s7402_s1 + $0x80] ss:$16 sps:$4 sm:$0xff] (!%p138_p2)   ;;  %v4986_v19 = vld [vmem:[%s7402_s1 + $0x88] ss:$16 sps:$4 sm:$0xff] (!%p138_p2)  }
   0xc   : > { %1821 = vmatprep.subr.bf16.mxu0 (!%p138_p2), %v4969_v8  ;;  %1985 = vmatprep.subr.bf16.mxu1 (!%p138_p2), %v4971_v9  ;;  %v4987_v20 = vld [vmem:[%s7402_s1 + $0xa4] ss:$16 sps:$4 sm:$0xff] (!%p138_p2)   ;;  %v4989_v21 = vld [vmem:[%s7402_s1 + $0xac] ss:$16 sps:$4 sm:$0xff] (!%p138_p2)   ;;  %v4991_v22 = vld [vmem:[%s7402_s1 + $0xa0] ss:$16 sps:$4 sm:$0xff] (!%p138_p2)  }
   0xd   : > { %v4992_v23 = vld [vmem:[%s7402_s1 + $0xa8] ss:$16 sps:$4 sm:$0xff]   ;;  %v4993_v24 = vld [vmem:[%s7402_s1 + $0xc4] ss:$16 sps:$4 sm:$0xff]   ;;  %v4995_v25 = vld [vmem:[%s7402_s1 + $0xcc] ss:$16 sps:$4 sm:$0xff]  }
   0xe   : > { %v4997_v26 = vld [vmem:[%s7402_s1 + $0xc0] ss:$16 sps:$4 sm:$0xff]   ;;  %v4998_v27 = vld [vmem:[%s7402_s1 + $0xc8] ss:$16 sps:$4 sm:$0xff]   ;;  %v4999_v28 = vld [vmem:[%s7402_s1 + $0xe4] ss:$16 sps:$4 sm:$0xff]  }
   0xf   : > { %1822 = vmatpush1.bf16.msra.mxu0 %v4973_v10  ;;  %1986 = vmatpush1.bf16.msra.mxu1 %v4974_v11  ;;  %v5001_v29 = vld [vmem:[%s7402_s1 + $0xec] ss:$16 sps:$4 sm:$0xff]   ;;  %v5003_v30 = vld [vmem:[%s7402_s1 + $0xe0] ss:$16 sps:$4 sm:$0xff]   ;;  %v5004_v31 = vld [vmem:[%s7402_s1 + $0xe8] ss:$16 sps:$4 sm:$0xff]  }
  0x10   : > { %1823 = vmatprep.subr.bf16.mxu0 %v4975_v12  ;;  %1987 = vmatprep.subr.bf16.mxu1 %v4977_v13  ;;  %v5005_v32 = vld [vmem:[%s7402_s1 + $0x104] ss:$16 sps:$4 sm:$0xff]   ;;  %v5007_v33 = vld [vmem:[%s7402_s1 + $0x10c] ss:$16 sps:$4 sm:$0xff]   ;;  %v5009_v34 = vld [vmem:[%s7402_s1 + $0x100] ss:$16 sps:$4 sm:$0xff]  }
  0x11   : > { %v5010_v35 = vld [vmem:[%s7402_s1 + $0x108] ss:$16 sps:$4 sm:$0xff]   ;;  %v5735_v36 = vmov 1983009808   ;;  %v5011_v39 = vld [vmem:[%s7402_s1 + $0x124] ss:$16 sps:$4 sm:$0xff]  }
  0x12   : > { %v177_v37 = vunpack.c.l.s4 %v5735_v36  ;;  %s7406_s13 = smov (!%p161_p3, %s4119_s13), 1  ;;  %v5013_v40 = vld [vmem:[%s7402_s1 + $0x12c] ss:$16 sps:$4 sm:$0xff]   ;;  %v5015_v41 = vld [vmem:[%s7402_s1 + $0x120] ss:$16 sps:$4 sm:$0xff]   ;;  %v5887_v43 = vshrl.u32 %v179_v38, 7 }
  0x13   : > { %1824 = vmatpush1.bf16.msra.mxu0 %v4979_v14  ;;  %1988 = vmatpush1.bf16.msra.mxu1 %v4980_v15  ;;  %v5016_v44 = vld [vmem:[%s7402_s1 + $0x128] ss:$16 sps:$4 sm:$0xff]   ;;  %v5017_v45 = vld [vmem:[%s7402_s1 + $0x144] ss:$16 sps:$4 sm:$0xff]   ;;  %s4898_s21 = sshll.u32 %s7406_s13, 4 }
  0x14   : > { %1825 = vmatprep.subr.bf16.mxu0 %v4981_v16  ;;  %1989 = vmatprep.subr.bf16.mxu1 %v4983_v17  ;;  %v178_v42 = vunpack.c.0.s8 %v177_v37  ;;  %v5019_v46 = vld [vmem:[%s7402_s1 + $0x14c] ss:$16 sps:$4 sm:$0xff]   ;;  %v5021_v47 = vld [vmem:[%s7402_s1 + $0x140] ss:$16 sps:$4 sm:$0xff]   ;;  %v5022_v48 = vld [vmem:[%s7402_s1 + $0x148] ss:$16 sps:$4 sm:$0xff]   ;;  %s5910_s30 = scalar_lea.vmem %s7401_s0, %s4898_s21  ;;  %s170_s28 = scalar_lea.vmem %s7404_s3, %s4898_s21 }
  0x15   : > { %v5023_v50 = vld [vmem:[%s7402_s1 + $0x164] ss:$16 sps:$4 sm:$0xff]   ;;  %v5025_v51 = vld [vmem:[%s7402_s1 + $0x16c] ss:$16 sps:$4 sm:$0xff]   ;;  %v5027_v53 = vld [vmem:[%s7402_s1 + $0x160] ss:$16 sps:$4 sm:$0xff]  }
  0x16   : > { %v5913_v49 = vsub.s32 %v178_v42, %v5887_v43  ;;  %v171_v52 = vld [vmem:[%s5910_s30] sm:$0xff]  ;;  %v5028_v55 = vld [vmem:[%s7402_s1 + $0x168] ss:$16 sps:$4 sm:$0xff]   ;;  %v5031_v57 = vld [vmem:[%s7402_s1 + $0x18c] ss:$16 sps:$4 sm:$0xff]  }
  0x17   : > { %1826 = vmatpush1.bf16.msra.mxu0 %v4985_v18  ;;  %1990 = vmatpush1.bf16.msra.mxu1 %v4986_v19  ;;  %v5029_v56 = vld [vmem:[%s7402_s1 + $0x184] ss:$16 sps:$4 sm:$0xff]   ;;  %v5033_v59 = vld [vmem:[%s7402_s1 + $0x180] ss:$16 sps:$4 sm:$0xff]   ;;  %v5034_v60 = vld [vmem:[%s7402_s1 + $0x188] ss:$16 sps:$4 sm:$0xff]   ;;  %v175_v7 = vcombine.high %v171_v52, %v171_v52 }
  0x18   : > { %1827 = vmatprep.subr.bf16.mxu0 %v4987_v20  ;;  %1991 = vmatprep.subr.bf16.mxu1 %v4989_v21  ;;  %v5926_v54 = vrot.slane %v171_v52, %v5913_v49  ;;  %v5035_v61 = vld [vmem:[%s7402_s1 + $0x1a4] ss:$16 sps:$4 sm:$0xff]   ;;  %v5037_v62 = vld [vmem:[%s7402_s1 + $0x1ac] ss:$16 sps:$4 sm:$0xff]   ;;  %v5039_v63 = vld [vmem:[%s7402_s1 + $0x1a0] ss:$16 sps:$4 sm:$0xff]  }
  0x19   : > { %v5040_v0 = vld [vmem:[%s7402_s1 + $0x1a8] ss:$16 sps:$4 sm:$0xff]   ;;  %v5041_v1 = vld [vmem:[%s7402_s1 + $0x1c4] ss:$16 sps:$4 sm:$0xff]   ;;  %v5043_v2 = vld [vmem:[%s7402_s1 + $0x1cc] ss:$16 sps:$4 sm:$0xff]   ;;  %v5992_v12 = vrot.slane %v175_v7, %v5913_v49 }
  0x1a   : > { %v5939_v58 = vcombine.high %v5926_v54, %v5926_v54  ;;  %v5045_v3 = vld [vmem:[%s7402_s1 + $0x1c0] ss:$16 sps:$4 sm:$0xff]   ;;  %v5046_v4 = vld [vmem:[%s7402_s1 + $0x1c8] ss:$16 sps:$4 sm:$0xff]   ;;  %v5047_v5 = vld [vmem:[%s7402_s1 + $0x1e4] ss:$16 sps:$4 sm:$0xff]  }
  0x1b   : > { %1828 = vmatpush1.bf16.msra.mxu0 %v4991_v22  ;;  %1992 = vmatpush1.bf16.msra.mxu1 %v4992_v23  ;;  %v5049_v6 = vld [vmem:[%s7402_s1 + $0x1ec] ss:$16 sps:$4 sm:$0xff]   ;;  %v5051_v8 = vld [vmem:[%s7402_s1 + $0x1e0] ss:$16 sps:$4 sm:$0xff]   ;;  %v5052_v9 = vld [vmem:[%s7402_s1 + $0x1e8] ss:$16 sps:$4 sm:$0xff]   ;;  %v6008_v17 = vcombine.high %v5992_v12, %v5992_v12 }
  0x1c   : > { %1829 = vmatprep.subr.bf16.mxu0 %v4993_v24  ;;  %1993 = vmatprep.subr.bf16.mxu1 %v4995_v25  ;;  %v5055_v10 = vld [vmem:[%s7402_s1 + $0x204] ss:$16 sps:$4 sm:$0xff]   ;;  %v5058_v11 = vld [vmem:[%s7402_s1 + $0x20c] ss:$16 sps:$4 sm:$0xff]   ;;  %v5053_v13 = vld [vmem:[%s7402_s1 + $0x200] ss:$16 sps:$4 sm:$0xff]  }
  0x1d   : > { %1849 = vmatprep.mubr.bf16.mxu0 %v5939_v58  ;;  %2013 = vmatprep.mubr.bf16.mxu1 %v5939_v58  ;;  %v5056_v14 = vld [vmem:[%s7402_s1 + $0x208] ss:$16 sps:$4 sm:$0xff]   ;;  %v5061_v15 = vld [vmem:[%s7402_s1 + $0x224] ss:$16 sps:$4 sm:$0xff]   ;;  %v5064_v16 = vld [vmem:[%s7402_s1 + $0x22c] ss:$16 sps:$4 sm:$0xff]  }
  0x1e   : > { %v5059_v18 = vld [vmem:[%s7402_s1 + $0x220] ss:$16 sps:$4 sm:$0xff]   ;;  %v5062_v19 = vld [vmem:[%s7402_s1 + $0x228] ss:$16 sps:$4 sm:$0xff]   ;;  %v5067_v20 = vld [vmem:[%s7402_s1 + $0x244] ss:$16 sps:$4 sm:$0xff]  }
  0x1f   : > { %1830 = vmatpush1.bf16.msra.mxu0 %v4997_v26  ;;  %1994 = vmatpush1.bf16.msra.mxu1 %v4998_v27  ;;  %v5070_v21 = vld [vmem:[%s7402_s1 + $0x24c] ss:$16 sps:$4 sm:$0xff]   ;;  %v5065_v22 = vld [vmem:[%s7402_s1 + $0x240] ss:$16 sps:$4 sm:$0xff]   ;;  %v5068_v23 = vld [vmem:[%s7402_s1 + $0x248] ss:$16 sps:$4 sm:$0xff]  }
  0x20   : > { %1831 = vmatprep.subr.bf16.mxu0 %v4999_v28  ;;  %1995 = vmatprep.subr.bf16.mxu1 %v5001_v29  ;;  %v5073_v24 = vld [vmem:[%s7402_s1 + $0x264] ss:$16 sps:$4 sm:$0xff]   ;;  %v5076_v25 = vld [vmem:[%s7402_s1 + $0x26c] ss:$16 sps:$4 sm:$0xff]   ;;  %v5071_v26 = vld [vmem:[%s7402_s1 + $0x260] ss:$16 sps:$4 sm:$0xff]  }
  0x21   : > { %v5074_v27 = vld [vmem:[%s7402_s1 + $0x268] ss:$16 sps:$4 sm:$0xff]   ;;  %v5079_v28 = vld [vmem:[%s7402_s1 + $0x284] ss:$16 sps:$4 sm:$0xff]   ;;  %v5082_v29 = vld [vmem:[%s7402_s1 + $0x28c] ss:$16 sps:$4 sm:$0xff]  }
  0x22   : > { %v5091_v36 = vld [vmem:[%s7402_s1 + $0x2c4] ss:$16 sps:$4 sm:$0xff]   ;;  %v5094_v37 = vld [vmem:[%s7402_s1 + $0x2cc] ss:$16 sps:$4 sm:$0xff]   ;;  %v5089_v38 = vld [vmem:[%s7402_s1 + $0x2c0] ss:$16 sps:$4 sm:$0xff]  }
  0x23   : > { %1832 = vmatpush1.bf16.msra.mxu0 %v5003_v30  ;;  %1996 = vmatpush1.bf16.msra.mxu1 %v5004_v31  ;;  %v5077_v30 = vld [vmem:[%s7402_s1 + $0x280] ss:$16 sps:$4 sm:$0xff]   ;;  %v5080_v31 = vld [vmem:[%s7402_s1 + $0x288] ss:$16 sps:$4 sm:$0xff]  }
  0x24   : > { %1833 = vmatprep.subr.bf16.mxu0 %v5005_v32  ;;  %1997 = vmatprep.subr.bf16.mxu1 %v5007_v33  ;;  %v5085_v32 = vld [vmem:[%s7402_s1 + $0x2a4] ss:$16 sps:$4 sm:$0xff]   ;;  %v5088_v33 = vld [vmem:[%s7402_s1 + $0x2ac] ss:$16 sps:$4 sm:$0xff]   ;;  %v5095_v42 = vld [vmem:[%s7402_s1 + $0x2e0] ss:$16 sps:$4 sm:$0xff]  }
  0x25   : > { %v5107_v52 = vld [vmem:[%s7402_s1 + $0x320] ss:$16 sps:$4 sm:$0xff]   ;;  %v5134_v7 = vld [vmem:[%s7402_s1 + $0x3a8] ss:$16 sps:$4 sm:$0xff]  }
  0x27   : > { %1834 = vmatpush1.bf16.msra.mxu0 %v5009_v34  ;;  %1998 = vmatpush1.bf16.msra.mxu1 %v5010_v35  ;;  %v5083_v34 = vld [vmem:[%s7402_s1 + $0x2a0] ss:$16 sps:$4 sm:$0xff]   ;;  %v5086_v35 = vld [vmem:[%s7402_s1 + $0x2a8] ss:$16 sps:$4 sm:$0xff]  }
  0x28   : > { %1835 = vmatprep.subr.bf16.mxu0 %v5011_v39  ;;  %1999 = vmatprep.subr.bf16.mxu1 %v5013_v40  ;;  %v5092_v39 = vld [vmem:[%s7402_s1 + $0x2c8] ss:$16 sps:$4 sm:$0xff]   ;;  %v5097_v40 = vld [vmem:[%s7402_s1 + $0x2e4] ss:$16 sps:$4 sm:$0xff]  }
  0x2b   : > { %1836 = vmatpush1.bf16.msra.mxu0 %v5015_v41  ;;  %2000 = vmatpush1.bf16.msra.mxu1 %v5016_v44  ;;  %v5100_v41 = vld [vmem:[%s7402_s1 + $0x2ec] ss:$16 sps:$4 sm:$0xff]   ;;  %v5098_v44 = vld [vmem:[%s7402_s1 + $0x2e8] ss:$16 sps:$4 sm:$0xff]  }
  0x2c   : > { %1837 = vmatprep.subr.bf16.mxu0 %v5017_v45  ;;  %2001 = vmatprep.subr.bf16.mxu1 %v5019_v46  ;;  %v5103_v45 = vld [vmem:[%s7402_s1 + $0x304] ss:$16 sps:$4 sm:$0xff]   ;;  %v5106_v46 = vld [vmem:[%s7402_s1 + $0x30c] ss:$16 sps:$4 sm:$0xff]  }
  0x2f   : > { %1838 = vmatpush1.bf16.msra.mxu0 %v5021_v47  ;;  %2002 = vmatpush1.bf16.msra.mxu1 %v5022_v48  ;;  %v5101_v47 = vld [vmem:[%s7402_s1 + $0x300] ss:$16 sps:$4 sm:$0xff]   ;;  %v5104_v48 = vld [vmem:[%s7402_s1 + $0x308] ss:$16 sps:$4 sm:$0xff]  }
  0x30   : > { %1839 = vmatprep.subr.bf16.mxu0 %v5023_v50  ;;  %2003 = vmatprep.subr.bf16.mxu1 %v5025_v51  ;;  %v5109_v50 = vld [vmem:[%s7402_s1 + $0x324] ss:$16 sps:$4 sm:$0xff]   ;;  %v5112_v51 = vld [vmem:[%s7402_s1 + $0x32c] ss:$16 sps:$4 sm:$0xff]  }
  0x33   : > { %1840 = vmatpush1.bf16.msra.mxu0 %v5027_v53  ;;  %2004 = vmatpush1.bf16.msra.mxu1 %v5028_v55  ;;  %v5110_v53 = vld [vmem:[%s7402_s1 + $0x328] ss:$16 sps:$4 sm:$0xff]   ;;  %v5115_v55 = vld [vmem:[%s7402_s1 + $0x344] ss:$16 sps:$4 sm:$0xff]  }
  0x34   : > { %1841 = vmatprep.subr.bf16.mxu0 %v5029_v56  ;;  %2005 = vmatprep.subr.bf16.mxu1 %v5031_v57  ;;  %v5118_v56 = vld [vmem:[%s7402_s1 + $0x34c] ss:$16 sps:$4 sm:$0xff]   ;;  %v5113_v57 = vld [vmem:[%s7402_s1 + $0x340] ss:$16 sps:$4 sm:$0xff]  }
  0x37   : > { %1842 = vmatpush1.bf16.msra.mxu0 %v5033_v59  ;;  %2006 = vmatpush1.bf16.msra.mxu1 %v5034_v60  ;;  %v5116_v59 = vld [vmem:[%s7402_s1 + $0x348] ss:$16 sps:$4 sm:$0xff]   ;;  %v5121_v60 = vld [vmem:[%s7402_s1 + $0x364] ss:$16 sps:$4 sm:$0xff]  }
  0x38   : > { %1843 = vmatprep.subr.bf16.mxu0 %v5035_v61  ;;  %2007 = vmatprep.subr.bf16.mxu1 %v5037_v62  ;;  %v5124_v61 = vld [vmem:[%s7402_s1 + $0x36c] ss:$16 sps:$4 sm:$0xff]   ;;  %v5119_v62 = vld [vmem:[%s7402_s1 + $0x360] ss:$16 sps:$4 sm:$0xff]  }
  0x3b   : > { %1844 = vmatpush1.bf16.msra.mxu0 %v5039_v63  ;;  %2008 = vmatpush1.bf16.msra.mxu1 %v5040_v0  ;;  %v5122_v63 = vld [vmem:[%s7402_s1 + $0x368] ss:$16 sps:$4 sm:$0xff]   ;;  %v5127_v0 = vld [vmem:[%s7402_s1 + $0x384] ss:$16 sps:$4 sm:$0xff]  }
  0x3c   : > { %1845 = vmatprep.subr.bf16.mxu0 %v5041_v1  ;;  %2009 = vmatprep.subr.bf16.mxu1 %v5043_v2  ;;  %v5130_v1 = vld [vmem:[%s7402_s1 + $0x38c] ss:$16 sps:$4 sm:$0xff]   ;;  %v5125_v2 = vld [vmem:[%s7402_s1 + $0x380] ss:$16 sps:$4 sm:$0xff]  }
  0x3f   : > { %1846 = vmatpush1.bf16.msra.mxu0 %v5045_v3  ;;  %2010 = vmatpush1.bf16.msra.mxu1 %v5046_v4  ;;  %v5128_v3 = vld [vmem:[%s7402_s1 + $0x388] ss:$16 sps:$4 sm:$0xff]   ;;  %v5133_v4 = vld [vmem:[%s7402_s1 + $0x3a4] ss:$16 sps:$4 sm:$0xff]  }
  0x40   : > { %1847 = vmatprep.subr.bf16.mxu0 %v5047_v5  ;;  %2011 = vmatprep.subr.bf16.mxu1 %v5049_v6  ;;  %v5136_v5 = vld [vmem:[%s7402_s1 + $0x3ac] ss:$16 sps:$4 sm:$0xff]   ;;  %v5131_v6 = vld [vmem:[%s7402_s1 + $0x3a0] ss:$16 sps:$4 sm:$0xff]  }
  0x43   : > { %1848 = vmatpush1.bf16.msra.mxu0 %v5051_v8  ;;  %2012 = vmatpush1.bf16.msra.mxu1 %v5052_v9  ;;  %v5139_v8 = vld [vmem:[%s7402_s1 + $0x3c4] ss:$16 sps:$4 sm:$0xff]   ;;  %v5142_v9 = vld [vmem:[%s7402_s1 + $0x3cc] ss:$16 sps:$4 sm:$0xff]  }
  0x44   : > { %1858 = vmatprep.subr.bf16.mxu0 %v5055_v10  ;;  %2022 = vmatprep.subr.bf16.mxu1 %v5058_v11  ;;  %v5137_v10 = vld [vmem:[%s7402_s1 + $0x3c0] ss:$16 sps:$4 sm:$0xff]   ;;  %v5140_v11 = vld [vmem:[%s7402_s1 + $0x3c8] ss:$16 sps:$4 sm:$0xff]  }
  0x46   : > { %1850 = vmatmul.mubr.bf16.vlgmr.msra.gmra.mrb[0].mxu0 %v5926_v54  ;;  %2014 = vmatmul.mubr.bf16.vlgmr.msra.gmra.mrb[0].mxu1 %v5926_v54 }
  0x47   : > { %1859 = vmatpush1.bf16.msra.mxu0 %v5053_v13  ;;  %2023 = vmatpush1.bf16.msra.mxu1 %v5056_v14  ;;  %v5145_v13 = vld [vmem:[%s7402_s1 + $0x3e4] ss:$16 sps:$4 sm:$0xff]   ;;  %v5148_v14 = vld [vmem:[%s7402_s1 + $0x3ec] ss:$16 sps:$4 sm:$0xff]  }
  0x48   : > { %1860 = vmatprep.subr.bf16.mxu0 %v5061_v15  ;;  %2024 = vmatprep.subr.bf16.mxu1 %v5064_v16  ;;  %v227_v15 = vshll.u32 %v5939_v58, 16  ;;  %v5143_v16 = vld [vmem:[%s7402_s1 + $0x3e0] ss:$16 sps:$4 sm:$0xff]  }
  0x49   : > { %1890 = vmatprep.mubr.bf16.mxu0 %v6008_v17  ;;  %2054 = vmatprep.mubr.bf16.mxu1 %v6008_v17 }
  0x4b   : > { %1861 = vmatpush1.bf16.msra.mxu0 %v5059_v18  ;;  %2025 = vmatpush1.bf16.msra.mxu1 %v5062_v19  ;;  %v5146_v18 = vld [vmem:[%s7402_s1 + $0x3e8] ss:$16 sps:$4 sm:$0xff]   ;;  %v5152_v19 = vld [vmem:[%s7402_s1 + $0x404] ss:$16 sps:$4 sm:$0xff]  }
  0x4c   : > { %1862 = vmatprep.subr.bf16.mxu0 %v5067_v20  ;;  %2026 = vmatprep.subr.bf16.mxu1 %v5070_v21  ;;  %v5155_v20 = vld [vmem:[%s7402_s1 + $0x40c] ss:$16 sps:$4 sm:$0xff]   ;;  %v225_v21 = vshrl.u32 %v5939_v58, 16 }
  0x4d   : > { %v5161_v58 = vld [vmem:[%s7402_s1 + $0x42c] ss:$16 sps:$4 sm:$0xff]  }
  0x4f   : > { %1863 = vmatpush1.bf16.msra.mxu0 %v5065_v22  ;;  %2027 = vmatpush1.bf16.msra.mxu1 %v5068_v23  ;;  %v229_v22 = vrot.slane %v227_v15, 1  ;;  %v5150_v23 = vld [vmem:[%s7402_s1 + $0x400] ss:$16 sps:$4 sm:$0xff]   ;;  %v5233_v15 = vld [vmem:[%s7402_s1 + $0x5ac] ss:$16 sps:$4 sm:$0xff]  }
  0x50   : > { %1864 = vmatprep.subr.bf16.mxu0 %v5073_v24  ;;  %2028 = vmatprep.subr.bf16.mxu1 %v5076_v25  ;;  %v5153_v24 = vld [vmem:[%s7402_s1 + $0x408] ss:$16 sps:$4 sm:$0xff]   ;;  %v5158_v25 = vld [vmem:[%s7402_s1 + $0x424] ss:$16 sps:$4 sm:$0xff]  }
  0x53   : > { %1865 = vmatpush1.bf16.msra.mxu0 %v5071_v26  ;;  %2029 = vmatpush1.bf16.msra.mxu1 %v5074_v27  ;;  %v230_v26 = vor.u32 %v229_v22, %v225_v21  ;;  %v5156_v27 = vld [vmem:[%s7402_s1 + $0x420] ss:$16 sps:$4 sm:$0xff]   ;;  %v220_v22 = vshll.u32 %v5926_v54, 16 }
  0x54   : > { %1866 = vmatprep.subr.bf16.mxu0 %v5079_v28  ;;  %2030 = vmatprep.subr.bf16.mxu1 %v5082_v29  ;;  %v5159_v28 = vld [vmem:[%s7402_s1 + $0x428] ss:$16 sps:$4 sm:$0xff]   ;;  %v5164_v29 = vld [vmem:[%s7402_s1 + $0x444] ss:$16 sps:$4 sm:$0xff]   ;;  %v5234_v21 = vld [vmem:[%s7402_s1 + $0x5c0] ss:$16 sps:$4 sm:$0xff]  }
  0x57   : > { %1867 = vmatpush1.bf16.msra.mxu0 %v5077_v30  ;;  %2031 = vmatpush1.bf16.msra.mxu1 %v5080_v31  ;;  %v5167_v30 = vld [vmem:[%s7402_s1 + $0x44c] ss:$16 sps:$4 sm:$0xff]   ;;  %v5162_v31 = vld [vmem:[%s7402_s1 + $0x440] ss:$16 sps:$4 sm:$0xff]  }
  0x58   : > { %1868 = vmatprep.subr.bf16.mxu0 %v5085_v32  ;;  %2032 = vmatprep.subr.bf16.mxu1 %v5088_v33  ;;  %v5165_v32 = vld [vmem:[%s7402_s1 + $0x448] ss:$16 sps:$4 sm:$0xff]   ;;  %v5170_v33 = vld [vmem:[%s7402_s1 + $0x464] ss:$16 sps:$4 sm:$0xff]  }
  0x5b   : > { %1869 = vmatpush1.bf16.msra.mxu0 %v5083_v34  ;;  %2033 = vmatpush1.bf16.msra.mxu1 %v5086_v35  ;;  %v5173_v34 = vld [vmem:[%s7402_s1 + $0x46c] ss:$16 sps:$4 sm:$0xff]   ;;  %v5168_v35 = vld [vmem:[%s7402_s1 + $0x460] ss:$16 sps:$4 sm:$0xff]  }
  0x5c   : > { %1870 = vmatprep.subr.bf16.mxu0 %v5091_v36  ;;  %2034 = vmatprep.subr.bf16.mxu1 %v5094_v37  ;;  %v5171_v36 = vld [vmem:[%s7402_s1 + $0x468] ss:$16 sps:$4 sm:$0xff]   ;;  %v5176_v37 = vld [vmem:[%s7402_s1 + $0x484] ss:$16 sps:$4 sm:$0xff]  }
  0x5f   : > { %1871 = vmatpush1.bf16.msra.mxu0 %v5089_v38  ;;  %2035 = vmatpush1.bf16.msra.mxu1 %v5092_v39  ;;  %v5179_v38 = vld [vmem:[%s7402_s1 + $0x48c] ss:$16 sps:$4 sm:$0xff]   ;;  %v5174_v39 = vld [vmem:[%s7402_s1 + $0x480] ss:$16 sps:$4 sm:$0xff]  }
  0x60   : > { %1872 = vmatprep.subr.bf16.mxu0 %v5097_v40  ;;  %2036 = vmatprep.subr.bf16.mxu1 %v5100_v41  ;;  %v5177_v40 = vld [vmem:[%s7402_s1 + $0x488] ss:$16 sps:$4 sm:$0xff]   ;;  %v5182_v41 = vld [vmem:[%s7402_s1 + $0x4a4] ss:$16 sps:$4 sm:$0xff]  }
  0x63   : > { %1873 = vmatpush1.bf16.msra.mxu0 %v5095_v42  ;;  %2037 = vmatpush1.bf16.msra.mxu1 %v5098_v44  ;;  %v5185_v42 = vld [vmem:[%s7402_s1 + $0x4ac] ss:$16 sps:$4 sm:$0xff]   ;;  %v5180_v44 = vld [vmem:[%s7402_s1 + $0x4a0] ss:$16 sps:$4 sm:$0xff]  }
  0x64   : > { %1874 = vmatprep.subr.bf16.mxu0 %v5103_v45  ;;  %2038 = vmatprep.subr.bf16.mxu1 %v5106_v46  ;;  %v5183_v45 = vld [vmem:[%s7402_s1 + $0x4a8] ss:$16 sps:$4 sm:$0xff]   ;;  %v5188_v46 = vld [vmem:[%s7402_s1 + $0x4c4] ss:$16 sps:$4 sm:$0xff]  }
  0x67   : > { %1875 = vmatpush1.bf16.msra.mxu0 %v5101_v47  ;;  %2039 = vmatpush1.bf16.msra.mxu1 %v5104_v48  ;;  %v5191_v47 = vld [vmem:[%s7402_s1 + $0x4cc] ss:$16 sps:$4 sm:$0xff]   ;;  %v5186_v48 = vld [vmem:[%s7402_s1 + $0x4c0] ss:$16 sps:$4 sm:$0xff]  }
  0x68   : > { %1876 = vmatprep.subr.bf16.mxu0 %v5109_v50  ;;  %2040 = vmatprep.subr.bf16.mxu1 %v5112_v51  ;;  %v5189_v50 = vld [vmem:[%s7402_s1 + $0x4c8] ss:$16 sps:$4 sm:$0xff]   ;;  %v5194_v51 = vld [vmem:[%s7402_s1 + $0x4e4] ss:$16 sps:$4 sm:$0xff]  }
  0x6b   : > { %1877 = vmatpush1.bf16.msra.mxu0 %v5107_v52  ;;  %2041 = vmatpush1.bf16.msra.mxu1 %v5110_v53  ;;  %v5197_v52 = vld [vmem:[%s7402_s1 + $0x4ec] ss:$16 sps:$4 sm:$0xff]   ;;  %v5192_v53 = vld [vmem:[%s7402_s1 + $0x4e0] ss:$16 sps:$4 sm:$0xff]  }
  0x6c   : > { %1878 = vmatprep.subr.bf16.mxu0 %v5115_v55  ;;  %2042 = vmatprep.subr.bf16.mxu1 %v5118_v56  ;;  %v5195_v55 = vld [vmem:[%s7402_s1 + $0x4e8] ss:$16 sps:$4 sm:$0xff]   ;;  %v5200_v56 = vld [vmem:[%s7402_s1 + $0x504] ss:$16 sps:$4 sm:$0xff]  }
  0x6f   : > { %1879 = vmatpush1.bf16.msra.mxu0 %v5113_v57  ;;  %2043 = vmatpush1.bf16.msra.mxu1 %v5116_v59  ;;  %v5203_v57 = vld [vmem:[%s7402_s1 + $0x50c] ss:$16 sps:$4 sm:$0xff]   ;;  %v5198_v59 = vld [vmem:[%s7402_s1 + $0x500] ss:$16 sps:$4 sm:$0xff]  }
  0x70   : > { %1880 = vmatprep.subr.bf16.mxu0 %v5121_v60  ;;  %2044 = vmatprep.subr.bf16.mxu1 %v5124_v61  ;;  %v5201_v60 = vld [vmem:[%s7402_s1 + $0x508] ss:$16 sps:$4 sm:$0xff]   ;;  %v5206_v61 = vld [vmem:[%s7402_s1 + $0x524] ss:$16 sps:$4 sm:$0xff]  }
  0x73   : > { %1881 = vmatpush1.bf16.msra.mxu0 %v5119_v62  ;;  %2045 = vmatpush1.bf16.msra.mxu1 %v5122_v63  ;;  %v5209_v62 = vld [vmem:[%s7402_s1 + $0x52c] ss:$16 sps:$4 sm:$0xff]   ;;  %v5204_v63 = vld [vmem:[%s7402_s1 + $0x520] ss:$16 sps:$4 sm:$0xff]  }
  0x74   : > { %1882 = vmatprep.subr.bf16.mxu0 %v5127_v0  ;;  %2046 = vmatprep.subr.bf16.mxu1 %v5130_v1  ;;  %v5207_v0 = vld [vmem:[%s7402_s1 + $0x528] ss:$16 sps:$4 sm:$0xff]   ;;  %v5212_v1 = vld [vmem:[%s7402_s1 + $0x544] ss:$16 sps:$4 sm:$0xff]  }
  0x77   : > { %1883 = vmatpush1.bf16.msra.mxu0 %v5125_v2  ;;  %2047 = vmatpush1.bf16.msra.mxu1 %v5128_v3  ;;  %v5215_v2 = vld [vmem:[%s7402_s1 + $0x54c] ss:$16 sps:$4 sm:$0xff]   ;;  %v5210_v3 = vld [vmem:[%s7402_s1 + $0x540] ss:$16 sps:$4 sm:$0xff]  }
  0x78   : > { %1884 = vmatprep.subr.bf16.mxu0 %v5133_v4  ;;  %2048 = vmatprep.subr.bf16.mxu1 %v5136_v5  ;;  %v5213_v4 = vld [vmem:[%s7402_s1 + $0x548] ss:$16 sps:$4 sm:$0xff]   ;;  %v5218_v5 = vld [vmem:[%s7402_s1 + $0x564] ss:$16 sps:$4 sm:$0xff]  }
  0x7b   : > { %1885 = vmatpush1.bf16.msra.mxu0 %v5131_v6  ;;  %2049 = vmatpush1.bf16.msra.mxu1 %v5134_v7  ;;  %v5221_v6 = vld [vmem:[%s7402_s1 + $0x56c] ss:$16 sps:$4 sm:$0xff]   ;;  %v5216_v7 = vld [vmem:[%s7402_s1 + $0x560] ss:$16 sps:$4 sm:$0xff]  }
  0x7c   : > { %1886 = vmatprep.subr.bf16.mxu0 %v5139_v8  ;;  %2050 = vmatprep.subr.bf16.mxu1 %v5142_v9  ;;  %v5219_v8 = vld [vmem:[%s7402_s1 + $0x568] ss:$16 sps:$4 sm:$0xff]   ;;  %v5224_v9 = vld [vmem:[%s7402_s1 + $0x584] ss:$16 sps:$4 sm:$0xff]  }
  0x7f   : > { %1887 = vmatpush1.bf16.msra.mxu0 %v5137_v10  ;;  %2051 = vmatpush1.bf16.msra.mxu1 %v5140_v11  ;;  %v5227_v10 = vld [vmem:[%s7402_s1 + $0x58c] ss:$16 sps:$4 sm:$0xff]   ;;  %v5222_v11 = vld [vmem:[%s7402_s1 + $0x580] ss:$16 sps:$4 sm:$0xff]  }
  0x80   : > { %1888 = vmatprep.subr.bf16.mxu0 %v5145_v13  ;;  %2052 = vmatprep.subr.bf16.mxu1 %v5148_v14  ;;  %v5225_v13 = vld [vmem:[%s7402_s1 + $0x588] ss:$16 sps:$4 sm:$0xff]   ;;  %v5230_v14 = vld [vmem:[%s7402_s1 + $0x5a4] ss:$16 sps:$4 sm:$0xff]  }
  0x83   : > { %1889 = vmatpush1.bf16.msra.mxu0 %v5143_v16  ;;  %2053 = vmatpush1.bf16.msra.mxu1 %v5146_v18  ;;  %v5228_v16 = vld [vmem:[%s7402_s1 + $0x5a0] ss:$16 sps:$4 sm:$0xff]   ;;  %v5231_v18 = vld [vmem:[%s7402_s1 + $0x5a8] ss:$16 sps:$4 sm:$0xff]  }
  0x84   : > { %1899 = vmatprep.subr.bf16.mxu0 %v5152_v19  ;;  %2063 = vmatprep.subr.bf16.mxu1 %v5155_v20  ;;  %v5236_v19 = vld [vmem:[%s7402_s1 + $0x5c4] ss:$16 sps:$4 sm:$0xff]   ;;  %v5239_v20 = vld [vmem:[%s7402_s1 + $0x5cc] ss:$16 sps:$4 sm:$0xff]  }
  0x86   : > { %1891 = vmatmul.mubr.bf16.vlgmr.msra.gmra.mrb[0].mxu0 %v5992_v12  ;;  %2055 = vmatmul.mubr.bf16.vlgmr.msra.gmra.mrb[0].mxu1 %v5992_v12 }
  0x87   : > { %1900 = vmatpush1.bf16.msra.mxu0 %v5150_v23  ;;  %2064 = vmatpush1.bf16.msra.mxu1 %v5153_v24  ;;  %v5237_v23 = vld [vmem:[%s7402_s1 + $0x5c8] ss:$16 sps:$4 sm:$0xff]   ;;  %v5242_v24 = vld [vmem:[%s7402_s1 + $0x5e4] ss:$16 sps:$4 sm:$0xff]  }
  0x88   : > { %1901 = vmatprep.subr.bf16.mxu0 %v5158_v25  ;;  %2065 = vmatprep.subr.bf16.mxu1 %v5161_v58  ;;  %v5245_v25 = vld [vmem:[%s7402_s1 + $0x5ec] ss:$16 sps:$4 sm:$0xff]   ;;  %v241_v58 = vshll.u32 %v6008_v17, 16 }
  0x89   : > { %1931 = vmatprep.mubr.bf16.mxu0 %v230_v26  ;;  %2095 = vmatprep.mubr.bf16.mxu1 %v230_v26  ;;  %v5240_v26 = vld [vmem:[%s7402_s1 + $0x5e0] ss:$16 sps:$4 sm:$0xff]  }
  0x8b   : > { %1902 = vmatpush1.bf16.msra.mxu0 %v5156_v27  ;;  %2066 = vmatpush1.bf16.msra.mxu1 %v5159_v28  ;;  %v218_v27 = vshrl.u32 %v5926_v54, 16  ;;  %v222_v28 = vrot.slane %v220_v22, 1  ;;  %v243_v54 = vrot.slane %v241_v58, 1  ;;  %v5320_v22 = vld [vmem:[%s7402_s1 + $0x784] ss:$16 sps:$4 sm:$0xff]  }
  0x8c   : > { %1903 = vmatprep.subr.bf16.mxu0 %v5164_v29  ;;  %2067 = vmatprep.subr.bf16.mxu1 %v5167_v30  ;;  %v5243_v29 = vld [vmem:[%s7402_s1 + $0x5e8] ss:$16 sps:$4 sm:$0xff]   ;;  %v5248_v30 = vld [vmem:[%s7402_s1 + $0x604] ss:$16 sps:$4 sm:$0xff]  }
  0x8d   : > { %v5326_v58 = vld [vmem:[%s7402_s1 + $0x7a4] ss:$16 sps:$4 sm:$0xff]  }
  0x8f   : > { %1904 = vmatpush1.bf16.msra.mxu0 %v5162_v31  ;;  %2068 = vmatpush1.bf16.msra.mxu1 %v5165_v32  ;;  %v5251_v31 = vld [vmem:[%s7402_s1 + $0x60c] ss:$16 sps:$4 sm:$0xff]   ;;  %v239_v32 = vshrl.u32 %v6008_v17, 16 }
  0x90   : > { %1905 = vmatprep.subr.bf16.mxu0 %v5170_v33  ;;  %2069 = vmatprep.subr.bf16.mxu1 %v5173_v34  ;;  %v5246_v33 = vld [vmem:[%s7402_s1 + $0x600] ss:$16 sps:$4 sm:$0xff]   ;;  %v223_v34 = vor.u32 %v222_v28, %v218_v27  ;;  %v5257_v17 = vld [vmem:[%s7402_s1 + $0x62c] ss:$16 sps:$4 sm:$0xff]   ;;  %v5327_v28 = vld [vmem:[%s7402_s1 + $0x7a8] ss:$16 sps:$4 sm:$0xff]  }
  0x91   : > { %v5324_v27 = vld [vmem:[%s7402_s1 + $0x7a0] ss:$16 sps:$4 sm:$0xff]  }
  0x93   : > { %1906 = vmatpush1.bf16.msra.mxu0 %v5168_v35  ;;  %2070 = vmatpush1.bf16.msra.mxu1 %v5171_v36  ;;  %v5249_v35 = vld [vmem:[%s7402_s1 + $0x608] ss:$16 sps:$4 sm:$0xff]   ;;  %v5254_v36 = vld [vmem:[%s7402_s1 + $0x624] ss:$16 sps:$4 sm:$0xff]  }
  0x94   : > { %1907 = vmatprep.subr.bf16.mxu0 %v5176_v37  ;;  %2071 = vmatprep.subr.bf16.mxu1 %v5179_v38  ;;  %v244_v37 = vor.u32 %v243_v54, %v239_v32  ;;  %v5252_v38 = vld [vmem:[%s7402_s1 + $0x620] ss:$16 sps:$4 sm:$0xff]   ;;  %v5333_v54 = vld [vmem:[%s7402_s1 + $0x7c8] ss:$16 sps:$4 sm:$0xff]  }
  0x95   : > { %v5330_v32 = vld [vmem:[%s7402_s1 + $0x7c0] ss:$16 sps:$4 sm:$0xff]  }
  0x97   : > { %1908 = vmatpush1.bf16.msra.mxu0 %v5174_v39  ;;  %2072 = vmatpush1.bf16.msra.mxu1 %v5177_v40  ;;  %v5255_v39 = vld [vmem:[%s7402_s1 + $0x628] ss:$16 sps:$4 sm:$0xff]   ;;  %v5260_v40 = vld [vmem:[%s7402_s1 + $0x644] ss:$16 sps:$4 sm:$0xff]  }
  0x98   : > { %1909 = vmatprep.subr.bf16.mxu0 %v5182_v41  ;;  %2073 = vmatprep.subr.bf16.mxu1 %v5185_v42  ;;  %v5263_v41 = vld [vmem:[%s7402_s1 + $0x64c] ss:$16 sps:$4 sm:$0xff]   ;;  %v5258_v42 = vld [vmem:[%s7402_s1 + $0x640] ss:$16 sps:$4 sm:$0xff]  }
  0x9b   : > { %1910 = vmatpush1.bf16.msra.mxu0 %v5180_v44  ;;  %2074 = vmatpush1.bf16.msra.mxu1 %v5183_v45  ;;  %v5261_v44 = vld [vmem:[%s7402_s1 + $0x648] ss:$16 sps:$4 sm:$0xff]   ;;  %v5266_v45 = vld [vmem:[%s7402_s1 + $0x664] ss:$16 sps:$4 sm:$0xff]  }
  0x9c   : > { %1911 = vmatprep.subr.bf16.mxu0 %v5188_v46  ;;  %2075 = vmatprep.subr.bf16.mxu1 %v5191_v47  ;;  %v5269_v46 = vld [vmem:[%s7402_s1 + $0x66c] ss:$16 sps:$4 sm:$0xff]   ;;  %v5264_v47 = vld [vmem:[%s7402_s1 + $0x660] ss:$16 sps:$4 sm:$0xff]  }
  0x9f   : > { %1912 = vmatpush1.bf16.msra.mxu0 %v5186_v48  ;;  %2076 = vmatpush1.bf16.msra.mxu1 %v5189_v50  ;;  %v5267_v48 = vld [vmem:[%s7402_s1 + $0x668] ss:$16 sps:$4 sm:$0xff]   ;;  %v5272_v50 = vld [vmem:[%s7402_s1 + $0x684] ss:$16 sps:$4 sm:$0xff]  }
  0xa0   : > { %1913 = vmatprep.subr.bf16.mxu0 %v5194_v51  ;;  %2077 = vmatprep.subr.bf16.mxu1 %v5197_v52  ;;  %v5275_v51 = vld [vmem:[%s7402_s1 + $0x68c] ss:$16 sps:$4 sm:$0xff]   ;;  %v5270_v52 = vld [vmem:[%s7402_s1 + $0x680] ss:$16 sps:$4 sm:$0xff]  }
  0xa3   : > { %1914 = vmatpush1.bf16.msra.mxu0 %v5192_v53  ;;  %2078 = vmatpush1.bf16.msra.mxu1 %v5195_v55  ;;  %v5273_v53 = vld [vmem:[%s7402_s1 + $0x688] ss:$16 sps:$4 sm:$0xff]   ;;  %v5278_v55 = vld [vmem:[%s7402_s1 + $0x6a4] ss:$16 sps:$4 sm:$0xff]  }
  0xa4   : > { %1915 = vmatprep.subr.bf16.mxu0 %v5200_v56  ;;  %2079 = vmatprep.subr.bf16.mxu1 %v5203_v57  ;;  %v5281_v56 = vld [vmem:[%s7402_s1 + $0x6ac] ss:$16 sps:$4 sm:$0xff]   ;;  %v5276_v57 = vld [vmem:[%s7402_s1 + $0x6a0] ss:$16 sps:$4 sm:$0xff]  }
  0xa7   : > { %1916 = vmatpush1.bf16.msra.mxu0 %v5198_v59  ;;  %2080 = vmatpush1.bf16.msra.mxu1 %v5201_v60  ;;  %v5279_v59 = vld [vmem:[%s7402_s1 + $0x6a8] ss:$16 sps:$4 sm:$0xff]   ;;  %v5284_v60 = vld [vmem:[%s7402_s1 + $0x6c4] ss:$16 sps:$4 sm:$0xff]  }
  0xa8   : > { %1917 = vmatprep.subr.bf16.mxu0 %v5206_v61  ;;  %2081 = vmatprep.subr.bf16.mxu1 %v5209_v62  ;;  %v5287_v61 = vld [vmem:[%s7402_s1 + $0x6cc] ss:$16 sps:$4 sm:$0xff]   ;;  %v5282_v62 = vld [vmem:[%s7402_s1 + $0x6c0] ss:$16 sps:$4 sm:$0xff]  }
  0xab   : > { %1918 = vmatpush1.bf16.msra.mxu0 %v5204_v63  ;;  %2082 = vmatpush1.bf16.msra.mxu1 %v5207_v0  ;;  %v5285_v63 = vld [vmem:[%s7402_s1 + $0x6c8] ss:$16 sps:$4 sm:$0xff]   ;;  %v5290_v0 = vld [vmem:[%s7402_s1 + $0x6e4] ss:$16 sps:$4 sm:$0xff]  }
  0xac   : > { %1919 = vmatprep.subr.bf16.mxu0 %v5212_v1  ;;  %2083 = vmatprep.subr.bf16.mxu1 %v5215_v2  ;;  %v5293_v1 = vld [vmem:[%s7402_s1 + $0x6ec] ss:$16 sps:$4 sm:$0xff]   ;;  %v5288_v2 = vld [vmem:[%s7402_s1 + $0x6e0] ss:$16 sps:$4 sm:$0xff]  }
  0xaf   : > { %1920 = vmatpush1.bf16.msra.mxu0 %v5210_v3  ;;  %2084 = vmatpush1.bf16.msra.mxu1 %v5213_v4  ;;  %v5291_v3 = vld [vmem:[%s7402_s1 + $0x6e8] ss:$16 sps:$4 sm:$0xff]   ;;  %v5296_v4 = vld [vmem:[%s7402_s1 + $0x704] ss:$16 sps:$4 sm:$0xff]  }
  0xb0   : > { %1921 = vmatprep.subr.bf16.mxu0 %v5218_v5  ;;  %2085 = vmatprep.subr.bf16.mxu1 %v5221_v6  ;;  %v5299_v5 = vld [vmem:[%s7402_s1 + $0x70c] ss:$16 sps:$4 sm:$0xff]   ;;  %v5294_v6 = vld [vmem:[%s7402_s1 + $0x700] ss:$16 sps:$4 sm:$0xff]  }
  0xb3   : > { %1922 = vmatpush1.bf16.msra.mxu0 %v5216_v7  ;;  %2086 = vmatpush1.bf16.msra.mxu1 %v5219_v8  ;;  %v5297_v7 = vld [vmem:[%s7402_s1 + $0x708] ss:$16 sps:$4 sm:$0xff]   ;;  %v5302_v8 = vld [vmem:[%s7402_s1 + $0x724] ss:$16 sps:$4 sm:$0xff]  }
  0xb4   : > { %1923 = vmatprep.subr.bf16.mxu0 %v5224_v9  ;;  %2087 = vmatprep.subr.bf16.mxu1 %v5227_v10  ;;  %v5305_v9 = vld [vmem:[%s7402_s1 + $0x72c] ss:$16 sps:$4 sm:$0xff]   ;;  %v5300_v10 = vld [vmem:[%s7402_s1 + $0x720] ss:$16 sps:$4 sm:$0xff]  }
  0xb7   : > { %1924 = vmatpush1.bf16.msra.mxu0 %v5222_v11  ;;  %2088 = vmatpush1.bf16.msra.mxu1 %v5225_v13  ;;  %v5303_v11 = vld [vmem:[%s7402_s1 + $0x728] ss:$16 sps:$4 sm:$0xff]   ;;  %v5308_v13 = vld [vmem:[%s7402_s1 + $0x744] ss:$16 sps:$4 sm:$0xff]  }
  0xb8   : > { %1925 = vmatprep.subr.bf16.mxu0 %v5230_v14  ;;  %2089 = vmatprep.subr.bf16.mxu1 %v5233_v15  ;;  %v5311_v14 = vld [vmem:[%s7402_s1 + $0x74c] ss:$16 sps:$4 sm:$0xff]   ;;  %v5306_v15 = vld [vmem:[%s7402_s1 + $0x740] ss:$16 sps:$4 sm:$0xff]  }
  0xbb   : > { %1926 = vmatpush1.bf16.msra.mxu0 %v5228_v16  ;;  %2090 = vmatpush1.bf16.msra.mxu1 %v5231_v18  ;;  %v5309_v16 = vld [vmem:[%s7402_s1 + $0x748] ss:$16 sps:$4 sm:$0xff]   ;;  %v5314_v18 = vld [vmem:[%s7402_s1 + $0x764] ss:$16 sps:$4 sm:$0xff]  }
  0xbc   : > { %1927 = vmatprep.subr.bf16.mxu0 %v5236_v19  ;;  %2091 = vmatprep.subr.bf16.mxu1 %v5239_v20  ;;  %v5317_v19 = vld [vmem:[%s7402_s1 + $0x76c] ss:$16 sps:$4 sm:$0xff]   ;;  %v5312_v20 = vld [vmem:[%s7402_s1 + $0x760] ss:$16 sps:$4 sm:$0xff]  }
  0xbf   : > { %1928 = vmatpush1.bf16.msra.mxu0 %v5234_v21  ;;  %2092 = vmatpush1.bf16.msra.mxu1 %v5237_v23  ;;  %v5315_v21 = vld [vmem:[%s7402_s1 + $0x768] ss:$16 sps:$4 sm:$0xff]   ;;  %v5323_v23 = vld [vmem:[%s7402_s1 + $0x78c] ss:$16 sps:$4 sm:$0xff]  }
  0xc0   : > { %1929 = vmatprep.subr.bf16.mxu0 %v5242_v24  ;;  %2093 = vmatprep.subr.bf16.mxu1 %v5245_v25  ;;  %v5318_v24 = vld [vmem:[%s7402_s1 + $0x780] ss:$16 sps:$4 sm:$0xff]   ;;  %v5321_v25 = vld [vmem:[%s7402_s1 + $0x788] ss:$16 sps:$4 sm:$0xff]  }
  0xc3   : > { %1930 = vmatpush1.bf16.msra.mxu0 %v5240_v26  ;;  %2094 = vmatpush1.bf16.msra.mxu1 %v5243_v29  ;;  %v5329_v26 = vld [vmem:[%s7402_s1 + $0x7ac] ss:$16 sps:$4 sm:$0xff]   ;;  %v5332_v29 = vld [vmem:[%s7402_s1 + $0x7c4] ss:$16 sps:$4 sm:$0xff]  }
  0xc4   : > { %1940 = vmatprep.subr.bf16.mxu0 %v5248_v30  ;;  %2104 = vmatprep.subr.bf16.mxu1 %v5251_v31  ;;  %v5335_v30 = vld [vmem:[%s7402_s1 + $0x7cc] ss:$16 sps:$4 sm:$0xff]   ;;  %v234_v31 = vshll.u32 %v5992_v12, 16 }
  0xc6   : > { %1932 = vmatmul.mubr.bf16.vlgmr.msra.gmra.mrb[0].mxu0 %v223_v34  ;;  %2096 = vmatmul.mubr.bf16.vlgmr.msra.gmra.mrb[0].mxu1 %v223_v34  ;;  %v5341_v34 = vld [vmem:[%s7402_s1 + $0x7ec] ss:$16 sps:$4 sm:$0xff]  }
  0xc7   : > { %1941 = vmatpush1.bf16.msra.mxu0 %v5246_v33  ;;  %2105 = vmatpush1.bf16.msra.mxu1 %v5249_v35  ;;  %v5338_v33 = vld [vmem:[%s7402_s1 + $0x7e4] ss:$16 sps:$4 sm:$0xff]   ;;  %v232_v35 = vshrl.u32 %v5992_v12, 16  ;;  %v5347_v12 = vld [vmem:[%s7402_s1 + $0x80c] ss:$16 sps:$4 sm:$0xff]  }
  0xc8   : > { %1942 = vmatprep.subr.bf16.mxu0 %v5254_v36  ;;  %2106 = vmatprep.subr.bf16.mxu1 %v5257_v17  ;;  %v236_v36 = vrot.slane %v234_v31, 1  ;;  %v6577_v17 = vld [vmem:[%s5910_s30 + $0x8] sm:$0xff] }
  0xc9   : > { %1972 = vmatprep.mubr.bf16.mxu0 %v244_v37  ;;  %2136 = vmatprep.mubr.bf16.mxu1 %v244_v37  ;;  %v5336_v37 = vld [vmem:[%s7402_s1 + $0x7e0] ss:$16 sps:$4 sm:$0xff]   ;;  %v5419_v31 = vld [vmem:[%s7402_s1 + $0x98c] ss:$16 sps:$4 sm:$0xff]  }
  0xcb   : > { %1943 = vmatpush1.bf16.msra.mxu0 %v5252_v38  ;;  %2107 = vmatpush1.bf16.msra.mxu1 %v5255_v39  ;;  %v5339_v38 = vld [vmem:[%s7402_s1 + $0x7e8] ss:$16 sps:$4 sm:$0xff]   ;;  %v5344_v39 = vld [vmem:[%s7402_s1 + $0x804] ss:$16 sps:$4 sm:$0xff]  }
  0xcc   : > { %1944 = vmatprep.subr.bf16.mxu0 %v5260_v40  ;;  %2108 = vmatprep.subr.bf16.mxu1 %v5263_v41  ;;  %v6593_v40 = vrot.slane %v6577_v17, %v5913_v49  ;;  %v237_v41 = vor.u32 %v236_v36, %v232_v35  ;;  %v5420_v35 = vld [vmem:[%s7402_s1 + $0x9a0] ss:$16 sps:$4 sm:$0xff]   ;;  %v5423_v36 = vld [vmem:[%s7402_s1 + $0x9a8] ss:$16 sps:$4 sm:$0xff]  }
  0xcf   : > { %1945 = vmatpush1.bf16.msra.mxu0 %v5258_v42  ;;  %2109 = vmatpush1.bf16.msra.mxu1 %v5261_v44  ;;  %v5342_v42 = vld [vmem:[%s7402_s1 + $0x800] ss:$16 sps:$4 sm:$0xff]   ;;  %v5345_v44 = vld [vmem:[%s7402_s1 + $0x808] ss:$16 sps:$4 sm:$0xff]  }
  0xd0   : > { %1946 = vmatprep.subr.bf16.mxu0 %v5266_v45  ;;  %2110 = vmatprep.subr.bf16.mxu1 %v5269_v46  ;;  %v5350_v45 = vld [vmem:[%s7402_s1 + $0x824] ss:$16 sps:$4 sm:$0xff]   ;;  %v5353_v46 = vld [vmem:[%s7402_s1 + $0x82c] ss:$16 sps:$4 sm:$0xff]  }
  0xd3   : > { %1947 = vmatpush1.bf16.msra.mxu0 %v5264_v47  ;;  %2111 = vmatpush1.bf16.msra.mxu1 %v5267_v48  ;;  %v6609_v47 = vcombine.high %v6593_v40, %v6593_v40  ;;  %v5348_v48 = vld [vmem:[%s7402_s1 + $0x820] ss:$16 sps:$4 sm:$0xff]  }
  0xd4   : > { %1948 = vmatprep.subr.bf16.mxu0 %v5272_v50  ;;  %2112 = vmatprep.subr.bf16.mxu1 %v5275_v51  ;;  %v5351_v50 = vld [vmem:[%s7402_s1 + $0x828] ss:$16 sps:$4 sm:$0xff]   ;;  %v5356_v51 = vld [vmem:[%s7402_s1 + $0x844] ss:$16 sps:$4 sm:$0xff]  }
  0xd7   : > { %1949 = vmatpush1.bf16.msra.mxu0 %v5270_v52  ;;  %2113 = vmatpush1.bf16.msra.mxu1 %v5273_v53  ;;  %v5359_v52 = vld [vmem:[%s7402_s1 + $0x84c] ss:$16 sps:$4 sm:$0xff]   ;;  %v5354_v53 = vld [vmem:[%s7402_s1 + $0x840] ss:$16 sps:$4 sm:$0xff]  }
  0xd8   : > { %1950 = vmatprep.subr.bf16.mxu0 %v5278_v55  ;;  %2114 = vmatprep.subr.bf16.mxu1 %v5281_v56  ;;  %v5357_v55 = vld [vmem:[%s7402_s1 + $0x848] ss:$16 sps:$4 sm:$0xff]   ;;  %v5362_v56 = vld [vmem:[%s7402_s1 + $0x864] ss:$16 sps:$4 sm:$0xff]  }
  0xdb   : > { %1951 = vmatpush1.bf16.msra.mxu0 %v5276_v57  ;;  %2115 = vmatpush1.bf16.msra.mxu1 %v5279_v59  ;;  %v5365_v57 = vld [vmem:[%s7402_s1 + $0x86c] ss:$16 sps:$4 sm:$0xff]   ;;  %v5360_v59 = vld [vmem:[%s7402_s1 + $0x860] ss:$16 sps:$4 sm:$0xff]  }
  0xdc   : > { %1952 = vmatprep.subr.bf16.mxu0 %v5284_v60  ;;  %2116 = vmatprep.subr.bf16.mxu1 %v5287_v61  ;;  %v5363_v60 = vld [vmem:[%s7402_s1 + $0x868] ss:$16 sps:$4 sm:$0xff]   ;;  %v5368_v61 = vld [vmem:[%s7402_s1 + $0x884] ss:$16 sps:$4 sm:$0xff]  }
  0xdf   : > { %1953 = vmatpush1.bf16.msra.mxu0 %v5282_v62  ;;  %2117 = vmatpush1.bf16.msra.mxu1 %v5285_v63  ;;  %v5371_v62 = vld [vmem:[%s7402_s1 + $0x88c] ss:$16 sps:$4 sm:$0xff]   ;;  %v5366_v63 = vld [vmem:[%s7402_s1 + $0x880] ss:$16 sps:$4 sm:$0xff]  }
  0xe0   : > { %1954 = vmatprep.subr.bf16.mxu0 %v5290_v0  ;;  %2118 = vmatprep.subr.bf16.mxu1 %v5293_v1  ;;  %v5369_v0 = vld [vmem:[%s7402_s1 + $0x888] ss:$16 sps:$4 sm:$0xff]   ;;  %v5374_v1 = vld [vmem:[%s7402_s1 + $0x8a4] ss:$16 sps:$4 sm:$0xff]  }
  0xe3   : > { %1955 = vmatpush1.bf16.msra.mxu0 %v5288_v2  ;;  %2119 = vmatpush1.bf16.msra.mxu1 %v5291_v3  ;;  %v5377_v2 = vld [vmem:[%s7402_s1 + $0x8ac] ss:$16 sps:$4 sm:$0xff]   ;;  %v5372_v3 = vld [vmem:[%s7402_s1 + $0x8a0] ss:$16 sps:$4 sm:$0xff]  }
  0xe4   : > { %1956 = vmatprep.subr.bf16.mxu0 %v5296_v4  ;;  %2120 = vmatprep.subr.bf16.mxu1 %v5299_v5  ;;  %v5375_v4 = vld [vmem:[%s7402_s1 + $0x8a8] ss:$16 sps:$4 sm:$0xff]   ;;  %v5380_v5 = vld [vmem:[%s7402_s1 + $0x8c4] ss:$16 sps:$4 sm:$0xff]  }
  0xe7   : > { %1957 = vmatpush1.bf16.msra.mxu0 %v5294_v6  ;;  %2121 = vmatpush1.bf16.msra.mxu1 %v5297_v7  ;;  %v5383_v6 = vld [vmem:[%s7402_s1 + $0x8cc] ss:$16 sps:$4 sm:$0xff]   ;;  %v5378_v7 = vld [vmem:[%s7402_s1 + $0x8c0] ss:$16 sps:$4 sm:$0xff]  }
  0xe8   : > { %1958 = vmatprep.subr.bf16.mxu0 %v5302_v8  ;;  %2122 = vmatprep.subr.bf16.mxu1 %v5305_v9  ;;  %v5381_v8 = vld [vmem:[%s7402_s1 + $0x8c8] ss:$16 sps:$4 sm:$0xff]   ;;  %v5386_v9 = vld [vmem:[%s7402_s1 + $0x8e4] ss:$16 sps:$4 sm:$0xff]  }
  0xeb   : > { %1959 = vmatpush1.bf16.msra.mxu0 %v5300_v10  ;;  %2123 = vmatpush1.bf16.msra.mxu1 %v5303_v11  ;;  %v5389_v10 = vld [vmem:[%s7402_s1 + $0x8ec] ss:$16 sps:$4 sm:$0xff]   ;;  %v5384_v11 = vld [vmem:[%s7402_s1 + $0x8e0] ss:$16 sps:$4 sm:$0xff]  }
  0xec   : > { %1960 = vmatprep.subr.bf16.mxu0 %v5308_v13  ;;  %2124 = vmatprep.subr.bf16.mxu1 %v5311_v14  ;;  %v5387_v13 = vld [vmem:[%s7402_s1 + $0x8e8] ss:$16 sps:$4 sm:$0xff]   ;;  %v5392_v14 = vld [vmem:[%s7402_s1 + $0x904] ss:$16 sps:$4 sm:$0xff]  }
  0xef   : > { %1961 = vmatpush1.bf16.msra.mxu0 %v5306_v15  ;;  %2125 = vmatpush1.bf16.msra.mxu1 %v5309_v16  ;;  %v5395_v15 = vld [vmem:[%s7402_s1 + $0x90c] ss:$16 sps:$4 sm:$0xff]   ;;  %v5390_v16 = vld [vmem:[%s7402_s1 + $0x900] ss:$16 sps:$4 sm:$0xff]  }
  0xf0   : > { %1962 = vmatprep.subr.bf16.mxu0 %v5314_v18  ;;  %2126 = vmatprep.subr.bf16.mxu1 %v5317_v19  ;;  %v5393_v18 = vld [vmem:[%s7402_s1 + $0x908] ss:$16 sps:$4 sm:$0xff]   ;;  %v5398_v19 = vld [vmem:[%s7402_s1 + $0x924] ss:$16 sps:$4 sm:$0xff]  }
  0xf3   : > { %1963 = vmatpush1.bf16.msra.mxu0 %v5312_v20  ;;  %2127 = vmatpush1.bf16.msra.mxu1 %v5315_v21  ;;  %v5401_v20 = vld [vmem:[%s7402_s1 + $0x92c] ss:$16 sps:$4 sm:$0xff]   ;;  %v5396_v21 = vld [vmem:[%s7402_s1 + $0x920] ss:$16 sps:$4 sm:$0xff]  }
  0xf4   : > { %1964 = vmatprep.subr.bf16.mxu0 %v5320_v22  ;;  %2128 = vmatprep.subr.bf16.mxu1 %v5323_v23  ;;  %v5399_v22 = vld [vmem:[%s7402_s1 + $0x928] ss:$16 sps:$4 sm:$0xff]   ;;  %v5404_v23 = vld [vmem:[%s7402_s1 + $0x944] ss:$16 sps:$4 sm:$0xff]  }
  0xf7   : > { %1965 = vmatpush1.bf16.msra.mxu0 %v5318_v24  ;;  %2129 = vmatpush1.bf16.msra.mxu1 %v5321_v25  ;;  %v5407_v24 = vld [vmem:[%s7402_s1 + $0x94c] ss:$16 sps:$4 sm:$0xff]   ;;  %v5402_v25 = vld [vmem:[%s7402_s1 + $0x940] ss:$16 sps:$4 sm:$0xff]  }
  0xf8   : > { %1966 = vmatprep.subr.bf16.mxu0 %v5326_v58  ;;  %2130 = vmatprep.subr.bf16.mxu1 %v5329_v26  ;;  %v5405_v58 = vld [vmem:[%s7402_s1 + $0x948] ss:$16 sps:$4 sm:$0xff]   ;;  %v5410_v26 = vld [vmem:[%s7402_s1 + $0x964] ss:$16 sps:$4 sm:$0xff]  }
  0xfb   : > { %1967 = vmatpush1.bf16.msra.mxu0 %v5324_v27  ;;  %2131 = vmatpush1.bf16.msra.mxu1 %v5327_v28  ;;  %v5413_v27 = vld [vmem:[%s7402_s1 + $0x96c] ss:$16 sps:$4 sm:$0xff]   ;;  %v5408_v28 = vld [vmem:[%s7402_s1 + $0x960] ss:$16 sps:$4 sm:$0xff]  }
  0xfc   : > { %1968 = vmatprep.subr.bf16.mxu0 %v5332_v29  ;;  %2132 = vmatprep.subr.bf16.mxu1 %v5335_v30  ;;  %v5411_v29 = vld [vmem:[%s7402_s1 + $0x968] ss:$16 sps:$4 sm:$0xff]   ;;  %v5416_v30 = vld [vmem:[%s7402_s1 + $0x984] ss:$16 sps:$4 sm:$0xff]  }
  0xff   : > { %1969 = vmatpush1.bf16.msra.mxu0 %v5330_v32  ;;  %2133 = vmatpush1.bf16.msra.mxu1 %v5333_v54  ;;  %v5414_v32 = vld [vmem:[%s7402_s1 + $0x980] ss:$16 sps:$4 sm:$0xff]   ;;  %v5417_v54 = vld [vmem:[%s7402_s1 + $0x988] ss:$16 sps:$4 sm:$0xff]  }
 0x100   : > { %1970 = vmatprep.subr.bf16.mxu0 %v5338_v33  ;;  %2134 = vmatprep.subr.bf16.mxu1 %v5341_v34  ;;  %v5422_v33 = vld [vmem:[%s7402_s1 + $0x9a4] ss:$16 sps:$4 sm:$0xff]   ;;  %v5425_v34 = vld [vmem:[%s7402_s1 + $0x9ac] ss:$16 sps:$4 sm:$0xff]  }
 0x103   : > { %1971 = vmatpush1.bf16.msra.mxu0 %v5336_v37  ;;  %2135 = vmatpush1.bf16.msra.mxu1 %v5339_v38  ;;  %v5428_v37 = vld [vmem:[%s7402_s1 + $0x9c4] ss:$16 sps:$4 sm:$0xff]   ;;  %v5431_v38 = vld [vmem:[%s7402_s1 + $0x9cc] ss:$16 sps:$4 sm:$0xff]  }
 0x104   : > { %3692 = vmatprep.subr.bf16.mxu0 %v5344_v39  ;;  %3856 = vmatprep.subr.bf16.mxu1 %v5347_v12  ;;  %v5426_v39 = vld [vmem:[%s7402_s1 + $0x9c0] ss:$16 sps:$4 sm:$0xff]   ;;  %v5429_v12 = vld [vmem:[%s7402_s1 + $0x9c8] ss:$16 sps:$4 sm:$0xff]  }
 0x106   : > { %1973 = vmatmul.mubr.bf16.vlgmr.msra.gmra.mrb[0].mxu0 %v237_v41  ;;  %2137 = vmatmul.mubr.bf16.vlgmr.msra.gmra.mrb[0].mxu1 %v237_v41  ;;  %v5434_v41 = vld [vmem:[%s7402_s1 + $0x9e4] ss:$16 sps:$4 sm:$0xff]  }
 0x107   : > { %3693 = vmatpush1.bf16.msra.mxu0 %v5342_v42  ;;  %3857 = vmatpush1.bf16.msra.mxu1 %v5345_v44  ;;  %v5437_v42 = vld [vmem:[%s7402_s1 + $0x9ec] ss:$16 sps:$4 sm:$0xff]   ;;  %v192_v44 = vcombine.high %v6577_v17, %v6577_v17 }
 0x108   : > { %3694 = vmatprep.subr.bf16.mxu0 %v5350_v45  ;;  %3858 = vmatprep.subr.bf16.mxu1 %v5353_v46  ;;  %v5432_v45 = vld [vmem:[%s7402_s1 + $0x9e0] ss:$16 sps:$4 sm:$0xff]   ;;  %v5435_v46 = vld [vmem:[%s7402_s1 + $0x9e8] ss:$16 sps:$4 sm:$0xff]   ;;  %v5443_v17 = vld [vmem:[%s7402_s1 + $0xa0c] ss:$16 sps:$4 sm:$0xff]  }
 0x109   : > { %3724 = vmatprep.mubr.bf16.mxu0 %v6609_v47  ;;  %3888 = vmatprep.mubr.bf16.mxu1 %v6609_v47 }
 0x10b   : > { %3695 = vmatpush1.bf16.msra.mxu0 %v5348_v48  ;;  %3859 = vmatpush1.bf16.msra.mxu1 %v5351_v50  ;;  %v5440_v48 = vld [vmem:[%s7402_s1 + $0xa04] ss:$16 sps:$4 sm:$0xff]   ;;  %v6796_v50 = vrot.slane %v192_v44, %v5913_v49  ;;  %v5449_v49 = vld [vmem:[%s7402_s1 + $0xa2c] ss:$16 sps:$4 sm:$0xff]  }
 0x10c   : > { %3696 = vmatprep.subr.bf16.mxu0 %v5356_v51  ;;  %3860 = vmatprep.subr.bf16.mxu1 %v5359_v52  ;;  %v5438_v51 = vld [vmem:[%s7402_s1 + $0xa00] ss:$16 sps:$4 sm:$0xff]   ;;  %v5441_v52 = vld [vmem:[%s7402_s1 + $0xa08] ss:$16 sps:$4 sm:$0xff]   ;;  %v5524_v44 = vld [vmem:[%s7402_s1 + $0xbc4] ss:$16 sps:$4 sm:$0xff]  }
 0x10f   : > { %3697 = vmatpush1.bf16.msra.mxu0 %v5354_v53  ;;  %3861 = vmatpush1.bf16.msra.mxu1 %v5357_v55  ;;  %v5446_v53 = vld [vmem:[%s7402_s1 + $0xa24] ss:$16 sps:$4 sm:$0xff]   ;;  %v6812_v55 = vcombine.high %v6796_v50, %v6796_v50 }
 0x110   : > { %3698 = vmatprep.subr.bf16.mxu0 %v5362_v56  ;;  %3862 = vmatprep.subr.bf16.mxu1 %v5365_v57  ;;  %v5444_v56 = vld [vmem:[%s7402_s1 + $0xa20] ss:$16 sps:$4 sm:$0xff]   ;;  %v5447_v57 = vld [vmem:[%s7402_s1 + $0xa28] ss:$16 sps:$4 sm:$0xff]  }
 0x113   : > { %3699 = vmatpush1.bf16.msra.mxu0 %v5360_v59  ;;  %3863 = vmatpush1.bf16.msra.mxu1 %v5363_v60  ;;  %v5452_v59 = vld [vmem:[%s7402_s1 + $0xa44] ss:$16 sps:$4 sm:$0xff]   ;;  %v5455_v60 = vld [vmem:[%s7402_s1 + $0xa4c] ss:$16 sps:$4 sm:$0xff]  }
 0x114   : > { %3700 = vmatprep.subr.bf16.mxu0 %v5368_v61  ;;  %3864 = vmatprep.subr.bf16.mxu1 %v5371_v62  ;;  %v5450_v61 = vld [vmem:[%s7402_s1 + $0xa40] ss:$16 sps:$4 sm:$0xff]   ;;  %v5453_v62 = vld [vmem:[%s7402_s1 + $0xa48] ss:$16 sps:$4 sm:$0xff]  }
 0x117   : > { %3701 = vmatpush1.bf16.msra.mxu0 %v5366_v63  ;;  %3865 = vmatpush1.bf16.msra.mxu1 %v5369_v0  ;;  %v5458_v63 = vld [vmem:[%s7402_s1 + $0xa64] ss:$16 sps:$4 sm:$0xff]   ;;  %v5461_v0 = vld [vmem:[%s7402_s1 + $0xa6c] ss:$16 sps:$4 sm:$0xff]  }
 0x118   : > { %3702 = vmatprep.subr.bf16.mxu0 %v5374_v1  ;;  %3866 = vmatprep.subr.bf16.mxu1 %v5377_v2  ;;  %v5456_v1 = vld [vmem:[%s7402_s1 + $0xa60] ss:$16 sps:$4 sm:$0xff]   ;;  %v5459_v2 = vld [vmem:[%s7402_s1 + $0xa68] ss:$16 sps:$4 sm:$0xff]  }
 0x11b   : > { %3703 = vmatpush1.bf16.msra.mxu0 %v5372_v3  ;;  %3867 = vmatpush1.bf16.msra.mxu1 %v5375_v4  ;;  %v5464_v3 = vld [vmem:[%s7402_s1 + $0xa84] ss:$16 sps:$4 sm:$0xff]   ;;  %v5467_v4 = vld [vmem:[%s7402_s1 + $0xa8c] ss:$16 sps:$4 sm:$0xff]  }
 0x11c   : > { %3704 = vmatprep.subr.bf16.mxu0 %v5380_v5  ;;  %3868 = vmatprep.subr.bf16.mxu1 %v5383_v6  ;;  %v5462_v5 = vld [vmem:[%s7402_s1 + $0xa80] ss:$16 sps:$4 sm:$0xff]   ;;  %v5465_v6 = vld [vmem:[%s7402_s1 + $0xa88] ss:$16 sps:$4 sm:$0xff]  }
 0x11f   : > { %3705 = vmatpush1.bf16.msra.mxu0 %v5378_v7  ;;  %3869 = vmatpush1.bf16.msra.mxu1 %v5381_v8  ;;  %v5470_v7 = vld [vmem:[%s7402_s1 + $0xaa4] ss:$16 sps:$4 sm:$0xff]   ;;  %v5473_v8 = vld [vmem:[%s7402_s1 + $0xaac] ss:$16 sps:$4 sm:$0xff]  }
 0x120   : > { %3706 = vmatprep.subr.bf16.mxu0 %v5386_v9  ;;  %3870 = vmatprep.subr.bf16.mxu1 %v5389_v10  ;;  %v5468_v9 = vld [vmem:[%s7402_s1 + $0xaa0] ss:$16 sps:$4 sm:$0xff]   ;;  %v5471_v10 = vld [vmem:[%s7402_s1 + $0xaa8] ss:$16 sps:$4 sm:$0xff]  }
 0x123   : > { %3707 = vmatpush1.bf16.msra.mxu0 %v5384_v11  ;;  %3871 = vmatpush1.bf16.msra.mxu1 %v5387_v13  ;;  %v5476_v11 = vld [vmem:[%s7402_s1 + $0xac4] ss:$16 sps:$4 sm:$0xff]   ;;  %v5479_v13 = vld [vmem:[%s7402_s1 + $0xacc] ss:$16 sps:$4 sm:$0xff]  }
 0x124   : > { %3708 = vmatprep.subr.bf16.mxu0 %v5392_v14  ;;  %3872 = vmatprep.subr.bf16.mxu1 %v5395_v15  ;;  %v5474_v14 = vld [vmem:[%s7402_s1 + $0xac0] ss:$16 sps:$4 sm:$0xff]   ;;  %v5477_v15 = vld [vmem:[%s7402_s1 + $0xac8] ss:$16 sps:$4 sm:$0xff]  }
 0x127   : > { %3709 = vmatpush1.bf16.msra.mxu0 %v5390_v16  ;;  %3873 = vmatpush1.bf16.msra.mxu1 %v5393_v18  ;;  %v5482_v16 = vld [vmem:[%s7402_s1 + $0xae4] ss:$16 sps:$4 sm:$0xff]   ;;  %v5485_v18 = vld [vmem:[%s7402_s1 + $0xaec] ss:$16 sps:$4 sm:$0xff]  }
 0x128   : > { %3710 = vmatprep.subr.bf16.mxu0 %v5398_v19  ;;  %3874 = vmatprep.subr.bf16.mxu1 %v5401_v20  ;;  %v5480_v19 = vld [vmem:[%s7402_s1 + $0xae0] ss:$16 sps:$4 sm:$0xff]   ;;  %v5483_v20 = vld [vmem:[%s7402_s1 + $0xae8] ss:$16 sps:$4 sm:$0xff]  }
 0x12b   : > { %3711 = vmatpush1.bf16.msra.mxu0 %v5396_v21  ;;  %3875 = vmatpush1.bf16.msra.mxu1 %v5399_v22  ;;  %v5488_v21 = vld [vmem:[%s7402_s1 + $0xb04] ss:$16 sps:$4 sm:$0xff]   ;;  %v5491_v22 = vld [vmem:[%s7402_s1 + $0xb0c] ss:$16 sps:$4 sm:$0xff]  }
 0x12c   : > { %3712 = vmatprep.subr.bf16.mxu0 %v5404_v23  ;;  %3876 = vmatprep.subr.bf16.mxu1 %v5407_v24  ;;  %v5486_v23 = vld [vmem:[%s7402_s1 + $0xb00] ss:$16 sps:$4 sm:$0xff]   ;;  %v5489_v24 = vld [vmem:[%s7402_s1 + $0xb08] ss:$16 sps:$4 sm:$0xff]  }
 0x12f   : > { %3713 = vmatpush1.bf16.msra.mxu0 %v5402_v25  ;;  %3877 = vmatpush1.bf16.msra.mxu1 %v5405_v58  ;;  %v5494_v25 = vld [vmem:[%s7402_s1 + $0xb24] ss:$16 sps:$4 sm:$0xff]   ;;  %v5497_v58 = vld [vmem:[%s7402_s1 + $0xb2c] ss:$16 sps:$4 sm:$0xff]  }
 0x130   : > { %3714 = vmatprep.subr.bf16.mxu0 %v5410_v26  ;;  %3878 = vmatprep.subr.bf16.mxu1 %v5413_v27  ;;  %v5492_v26 = vld [vmem:[%s7402_s1 + $0xb20] ss:$16 sps:$4 sm:$0xff]   ;;  %v5495_v27 = vld [vmem:[%s7402_s1 + $0xb28] ss:$16 sps:$4 sm:$0xff]  }
 0x133   : > { %3715 = vmatpush1.bf16.msra.mxu0 %v5408_v28  ;;  %3879 = vmatpush1.bf16.msra.mxu1 %v5411_v29  ;;  %v5500_v28 = vld [vmem:[%s7402_s1 + $0xb44] ss:$16 sps:$4 sm:$0xff]   ;;  %v5503_v29 = vld [vmem:[%s7402_s1 + $0xb4c] ss:$16 sps:$4 sm:$0xff]  }
 0x134   : > { %3716 = vmatprep.subr.bf16.mxu0 %v5416_v30  ;;  %3880 = vmatprep.subr.bf16.mxu1 %v5419_v31  ;;  %v5498_v30 = vld [vmem:[%s7402_s1 + $0xb40] ss:$16 sps:$4 sm:$0xff]   ;;  %v5501_v31 = vld [vmem:[%s7402_s1 + $0xb48] ss:$16 sps:$4 sm:$0xff]  }
 0x137   : > { %3717 = vmatpush1.bf16.msra.mxu0 %v5414_v32  ;;  %3881 = vmatpush1.bf16.msra.mxu1 %v5417_v54  ;;  %v5506_v32 = vld [vmem:[%s7402_s1 + $0xb64] ss:$16 sps:$4 sm:$0xff]   ;;  %v5509_v54 = vld [vmem:[%s7402_s1 + $0xb6c] ss:$16 sps:$4 sm:$0xff]  }
 0x138   : > { %3718 = vmatprep.subr.bf16.mxu0 %v5422_v33  ;;  %3882 = vmatprep.subr.bf16.mxu1 %v5425_v34  ;;  %v5504_v33 = vld [vmem:[%s7402_s1 + $0xb60] ss:$16 sps:$4 sm:$0xff]   ;;  %v5507_v34 = vld [vmem:[%s7402_s1 + $0xb68] ss:$16 sps:$4 sm:$0xff]  }
 0x13b   : > { %3719 = vmatpush1.bf16.msra.mxu0 %v5420_v35  ;;  %3883 = vmatpush1.bf16.msra.mxu1 %v5423_v36  ;;  %v5512_v35 = vld [vmem:[%s7402_s1 + $0xb84] ss:$16 sps:$4 sm:$0xff]   ;;  %v5515_v36 = vld [vmem:[%s7402_s1 + $0xb8c] ss:$16 sps:$4 sm:$0xff]  }
 0x13c   : > { %3720 = vmatprep.subr.bf16.mxu0 %v5428_v37  ;;  %3884 = vmatprep.subr.bf16.mxu1 %v5431_v38  ;;  %v5510_v37 = vld [vmem:[%s7402_s1 + $0xb80] ss:$16 sps:$4 sm:$0xff]   ;;  %v5513_v38 = vld [vmem:[%s7402_s1 + $0xb88] ss:$16 sps:$4 sm:$0xff]  }
 0x13f   : > { %3721 = vmatpush1.bf16.msra.mxu0 %v5426_v39  ;;  %3885 = vmatpush1.bf16.msra.mxu1 %v5429_v12  ;;  %v5518_v39 = vld [vmem:[%s7402_s1 + $0xba4] ss:$16 sps:$4 sm:$0xff]   ;;  %v5521_v12 = vld [vmem:[%s7402_s1 + $0xbac] ss:$16 sps:$4 sm:$0xff]  }
 0x140   : > { %3722 = vmatprep.subr.bf16.mxu0 %v5434_v41  ;;  %3886 = vmatprep.subr.bf16.mxu1 %v5437_v42  ;;  %v5516_v41 = vld [vmem:[%s7402_s1 + $0xba0] ss:$16 sps:$4 sm:$0xff]   ;;  %v5519_v42 = vld [vmem:[%s7402_s1 + $0xba8] ss:$16 sps:$4 sm:$0xff]  }
 0x143   : > { %3723 = vmatpush1.bf16.msra.mxu0 %v5432_v45  ;;  %3887 = vmatpush1.bf16.msra.mxu1 %v5435_v46  ;;  %v5527_v45 = vld [vmem:[%s7402_s1 + $0xbcc] ss:$16 sps:$4 sm:$0xff]   ;;  %v5522_v46 = vld [vmem:[%s7402_s1 + $0xbc0] ss:$16 sps:$4 sm:$0xff]  }
 0x144   : > { %3733 = vmatprep.subr.bf16.mxu0 %v5440_v48  ;;  %3897 = vmatprep.subr.bf16.mxu1 %v5443_v17  ;;  %v5525_v48 = vld [vmem:[%s7402_s1 + $0xbc8] ss:$16 sps:$4 sm:$0xff]   ;;  %v5530_v17 = vld [vmem:[%s7402_s1 + $0xbe4] ss:$16 sps:$4 sm:$0xff]  }
 0x146   : > { %3725 = vmatmul.mubr.bf16.vlgmr.msra.gmra.mrb[4].mxu0 %v6593_v40  ;;  %3889 = vmatmul.mubr.bf16.vlgmr.msra.gmra.mrb[4].mxu1 %v6593_v40 }
 0x147   : > { %3734 = vmatpush1.bf16.msra.mxu0 %v5438_v51  ;;  %3898 = vmatpush1.bf16.msra.mxu1 %v5441_v52  ;;  %v5533_v51 = vld [vmem:[%s7402_s1 + $0xbec] ss:$16 sps:$4 sm:$0xff]   ;;  %v255_v52 = vshll.u32 %v6609_v47, 16 }
 0x148   : > { %3735 = vmatprep.subr.bf16.mxu0 %v5446_v53  ;;  %3899 = vmatprep.subr.bf16.mxu1 %v5449_v49  ;;  %v5528_v53 = vld [vmem:[%s7402_s1 + $0xbe0] ss:$16 sps:$4 sm:$0xff]   ;;  %v5531_v49 = vld [vmem:[%s7402_s1 + $0xbe8] ss:$16 sps:$4 sm:$0xff]  }
 0x149   : > { %3765 = vmatprep.mubr.bf16.mxu0 %v6812_v55  ;;  %3929 = vmatprep.mubr.bf16.mxu1 %v6812_v55 }
 0x14b   : > { %3736 = vmatpush1.bf16.msra.mxu0 %v5444_v56  ;;  %3900 = vmatpush1.bf16.msra.mxu1 %v5447_v57  ;;  %v5537_v56 = vld [vmem:[%s7402_s1 + $0xc04] ss:$16 sps:$4 sm:$0xff]   ;;  %v5540_v57 = vld [vmem:[%s7402_s1 + $0xc0c] ss:$16 sps:$4 sm:$0xff]  }
 0x14c   : > { %3737 = vmatprep.subr.bf16.mxu0 %v5452_v59  ;;  %3901 = vmatprep.subr.bf16.mxu1 %v5455_v60  ;;  %v253_v59 = vshrl.u32 %v6609_v47, 16  ;;  %v257_v60 = vrot.slane %v255_v52, 1  ;;  %v5546_v47 = vld [vmem:[%s7402_s1 + $0xc2c] ss:$16 sps:$4 sm:$0xff]   ;;  %v5613_v52 = vld [vmem:[%s7402_s1 + $0xda0] ss:$16 sps:$4 sm:$0xff]  }
 0x14f   : > { %3738 = vmatpush1.bf16.msra.mxu0 %v5450_v61  ;;  %3902 = vmatpush1.bf16.msra.mxu1 %v5453_v62  ;;  %v5535_v61 = vld [vmem:[%s7402_s1 + $0xc00] ss:$16 sps:$4 sm:$0xff]   ;;  %v5538_v62 = vld [vmem:[%s7402_s1 + $0xc08] ss:$16 sps:$4 sm:$0xff]  }
 0x150   : > { %3739 = vmatprep.subr.bf16.mxu0 %v5458_v63  ;;  %3903 = vmatprep.subr.bf16.mxu1 %v5461_v0  ;;  %v5543_v63 = vld [vmem:[%s7402_s1 + $0xc24] ss:$16 sps:$4 sm:$0xff]   ;;  %v258_v0 = vor.u32 %v257_v60, %v253_v59  ;;  %v5619_v59 = vld [vmem:[%s7402_s1 + $0xdc0] ss:$16 sps:$4 sm:$0xff]   ;;  %v5622_v60 = vld [vmem:[%s7402_s1 + $0xdc8] ss:$16 sps:$4 sm:$0xff]  }
 0x153   : > { %3740 = vmatpush1.bf16.msra.mxu0 %v5456_v1  ;;  %3904 = vmatpush1.bf16.msra.mxu1 %v5459_v2  ;;  %v5541_v1 = vld [vmem:[%s7402_s1 + $0xc20] ss:$16 sps:$4 sm:$0xff]   ;;  %v5544_v2 = vld [vmem:[%s7402_s1 + $0xc28] ss:$16 sps:$4 sm:$0xff]  }
 0x154   : > { %3741 = vmatprep.subr.bf16.mxu0 %v5464_v3  ;;  %3905 = vmatprep.subr.bf16.mxu1 %v5467_v4  ;;  %v5549_v3 = vld [vmem:[%s7402_s1 + $0xc44] ss:$16 sps:$4 sm:$0xff]   ;;  %v5552_v4 = vld [vmem:[%s7402_s1 + $0xc4c] ss:$16 sps:$4 sm:$0xff]  }
 0x157   : > { %3742 = vmatpush1.bf16.msra.mxu0 %v5462_v5  ;;  %3906 = vmatpush1.bf16.msra.mxu1 %v5465_v6  ;;  %v5547_v5 = vld [vmem:[%s7402_s1 + $0xc40] ss:$16 sps:$4 sm:$0xff]   ;;  %v5550_v6 = vld [vmem:[%s7402_s1 + $0xc48] ss:$16 sps:$4 sm:$0xff]  }
 0x158   : > { %3743 = vmatprep.subr.bf16.mxu0 %v5470_v7  ;;  %3907 = vmatprep.subr.bf16.mxu1 %v5473_v8  ;;  %v5555_v7 = vld [vmem:[%s7402_s1 + $0xc64] ss:$16 sps:$4 sm:$0xff]   ;;  %v5558_v8 = vld [vmem:[%s7402_s1 + $0xc6c] ss:$16 sps:$4 sm:$0xff]  }
 0x15b   : > { %3744 = vmatpush1.bf16.msra.mxu0 %v5468_v9  ;;  %3908 = vmatpush1.bf16.msra.mxu1 %v5471_v10  ;;  %v5553_v9 = vld [vmem:[%s7402_s1 + $0xc60] ss:$16 sps:$4 sm:$0xff]   ;;  %v5556_v10 = vld [vmem:[%s7402_s1 + $0xc68] ss:$16 sps:$4 sm:$0xff]  }
 0x15c   : > { %3745 = vmatprep.subr.bf16.mxu0 %v5476_v11  ;;  %3909 = vmatprep.subr.bf16.mxu1 %v5479_v13  ;;  %v5561_v11 = vld [vmem:[%s7402_s1 + $0xc84] ss:$16 sps:$4 sm:$0xff]   ;;  %v5564_v13 = vld [vmem:[%s7402_s1 + $0xc8c] ss:$16 sps:$4 sm:$0xff]  }
 0x15f   : > { %3746 = vmatpush1.bf16.msra.mxu0 %v5474_v14  ;;  %3910 = vmatpush1.bf16.msra.mxu1 %v5477_v15  ;;  %v5559_v14 = vld [vmem:[%s7402_s1 + $0xc80] ss:$16 sps:$4 sm:$0xff]   ;;  %v5562_v15 = vld [vmem:[%s7402_s1 + $0xc88] ss:$16 sps:$4 sm:$0xff]  }
 0x160   : > { %3747 = vmatprep.subr.bf16.mxu0 %v5482_v16  ;;  %3911 = vmatprep.subr.bf16.mxu1 %v5485_v18  ;;  %v5567_v16 = vld [vmem:[%s7402_s1 + $0xca4] ss:$16 sps:$4 sm:$0xff]   ;;  %v5570_v18 = vld [vmem:[%s7402_s1 + $0xcac] ss:$16 sps:$4 sm:$0xff]  }
 0x163   : > { %3748 = vmatpush1.bf16.msra.mxu0 %v5480_v19  ;;  %3912 = vmatpush1.bf16.msra.mxu1 %v5483_v20  ;;  %v5565_v19 = vld [vmem:[%s7402_s1 + $0xca0] ss:$16 sps:$4 sm:$0xff]   ;;  %v5568_v20 = vld [vmem:[%s7402_s1 + $0xca8] ss:$16 sps:$4 sm:$0xff]  }
 0x164   : > { %3749 = vmatprep.subr.bf16.mxu0 %v5488_v21  ;;  %3913 = vmatprep.subr.bf16.mxu1 %v5491_v22  ;;  %v5573_v21 = vld [vmem:[%s7402_s1 + $0xcc4] ss:$16 sps:$4 sm:$0xff]   ;;  %v5576_v22 = vld [vmem:[%s7402_s1 + $0xccc] ss:$16 sps:$4 sm:$0xff]  }
 0x167   : > { %3750 = vmatpush1.bf16.msra.mxu0 %v5486_v23  ;;  %3914 = vmatpush1.bf16.msra.mxu1 %v5489_v24  ;;  %v5571_v23 = vld [vmem:[%s7402_s1 + $0xcc0] ss:$16 sps:$4 sm:$0xff]   ;;  %v5574_v24 = vld [vmem:[%s7402_s1 + $0xcc8] ss:$16 sps:$4 sm:$0xff]  }
 0x168   : > { %3751 = vmatprep.subr.bf16.mxu0 %v5494_v25  ;;  %3915 = vmatprep.subr.bf16.mxu1 %v5497_v58  ;;  %v5579_v25 = vld [vmem:[%s7402_s1 + $0xce4] ss:$16 sps:$4 sm:$0xff]   ;;  %v5582_v58 = vld [vmem:[%s7402_s1 + $0xcec] ss:$16 sps:$4 sm:$0xff]  }
 0x16b   : > { %3752 = vmatpush1.bf16.msra.mxu0 %v5492_v26  ;;  %3916 = vmatpush1.bf16.msra.mxu1 %v5495_v27  ;;  %v5577_v26 = vld [vmem:[%s7402_s1 + $0xce0] ss:$16 sps:$4 sm:$0xff]   ;;  %v5580_v27 = vld [vmem:[%s7402_s1 + $0xce8] ss:$16 sps:$4 sm:$0xff]  }
 0x16c   : > { %3753 = vmatprep.subr.bf16.mxu0 %v5500_v28  ;;  %3917 = vmatprep.subr.bf16.mxu1 %v5503_v29  ;;  %v5585_v28 = vld [vmem:[%s7402_s1 + $0xd04] ss:$16 sps:$4 sm:$0xff]   ;;  %v5588_v29 = vld [vmem:[%s7402_s1 + $0xd0c] ss:$16 sps:$4 sm:$0xff]  }
 0x16f   : > { %3754 = vmatpush1.bf16.msra.mxu0 %v5498_v30  ;;  %3918 = vmatpush1.bf16.msra.mxu1 %v5501_v31  ;;  %v5583_v30 = vld [vmem:[%s7402_s1 + $0xd00] ss:$16 sps:$4 sm:$0xff]   ;;  %v5586_v31 = vld [vmem:[%s7402_s1 + $0xd08] ss:$16 sps:$4 sm:$0xff]  }
 0x170   : > { %3755 = vmatprep.subr.bf16.mxu0 %v5506_v32  ;;  %3919 = vmatprep.subr.bf16.mxu1 %v5509_v54  ;;  %v5591_v32 = vld [vmem:[%s7402_s1 + $0xd24] ss:$16 sps:$4 sm:$0xff]   ;;  %v5594_v54 = vld [vmem:[%s7402_s1 + $0xd2c] ss:$16 sps:$4 sm:$0xff]  }
 0x173   : > { %3756 = vmatpush1.bf16.msra.mxu0 %v5504_v33  ;;  %3920 = vmatpush1.bf16.msra.mxu1 %v5507_v34  ;;  %v5589_v33 = vld [vmem:[%s7402_s1 + $0xd20] ss:$16 sps:$4 sm:$0xff]   ;;  %v5592_v34 = vld [vmem:[%s7402_s1 + $0xd28] ss:$16 sps:$4 sm:$0xff]  }
 0x174   : > { %3757 = vmatprep.subr.bf16.mxu0 %v5512_v35  ;;  %3921 = vmatprep.subr.bf16.mxu1 %v5515_v36  ;;  %v5597_v35 = vld [vmem:[%s7402_s1 + $0xd44] ss:$16 sps:$4 sm:$0xff]   ;;  %v5600_v36 = vld [vmem:[%s7402_s1 + $0xd4c] ss:$16 sps:$4 sm:$0xff]  }
 0x177   : > { %3758 = vmatpush1.bf16.msra.mxu0 %v5510_v37  ;;  %3922 = vmatpush1.bf16.msra.mxu1 %v5513_v38  ;;  %v5595_v37 = vld [vmem:[%s7402_s1 + $0xd40] ss:$16 sps:$4 sm:$0xff]   ;;  %v5598_v38 = vld [vmem:[%s7402_s1 + $0xd48] ss:$16 sps:$4 sm:$0xff]  }
 0x178   : > { %3759 = vmatprep.subr.bf16.mxu0 %v5518_v39  ;;  %3923 = vmatprep.subr.bf16.mxu1 %v5521_v12  ;;  %v5603_v39 = vld [vmem:[%s7402_s1 + $0xd64] ss:$16 sps:$4 sm:$0xff]   ;;  %v5606_v12 = vld [vmem:[%s7402_s1 + $0xd6c] ss:$16 sps:$4 sm:$0xff]  }
 0x17b   : > { %3760 = vmatpush1.bf16.msra.mxu0 %v5516_v41  ;;  %3924 = vmatpush1.bf16.msra.mxu1 %v5519_v42  ;;  %v5601_v41 = vld [vmem:[%s7402_s1 + $0xd60] ss:$16 sps:$4 sm:$0xff]   ;;  %v5604_v42 = vld [vmem:[%s7402_s1 + $0xd68] ss:$16 sps:$4 sm:$0xff]  }
 0x17c   : > { %3761 = vmatprep.subr.bf16.mxu0 %v5524_v44  ;;  %3925 = vmatprep.subr.bf16.mxu1 %v5527_v45  ;;  %v5609_v44 = vld [vmem:[%s7402_s1 + $0xd84] ss:$16 sps:$4 sm:$0xff]   ;;  %v5612_v45 = vld [vmem:[%s7402_s1 + $0xd8c] ss:$16 sps:$4 sm:$0xff]  }
 0x17f   : > { %3762 = vmatpush1.bf16.msra.mxu0 %v5522_v46  ;;  %3926 = vmatpush1.bf16.msra.mxu1 %v5525_v48  ;;  %v5607_v46 = vld [vmem:[%s7402_s1 + $0xd80] ss:$16 sps:$4 sm:$0xff]   ;;  %v5610_v48 = vld [vmem:[%s7402_s1 + $0xd88] ss:$16 sps:$4 sm:$0xff]  }
 0x180   : > { %3763 = vmatprep.subr.bf16.mxu0 %v5530_v17  ;;  %3927 = vmatprep.subr.bf16.mxu1 %v5533_v51  ;;  %v5615_v17 = vld [vmem:[%s7402_s1 + $0xda4] ss:$16 sps:$4 sm:$0xff]   ;;  %v5618_v51 = vld [vmem:[%s7402_s1 + $0xdac] ss:$16 sps:$4 sm:$0xff]  }
 0x183   : > { %3764 = vmatpush1.bf16.msra.mxu0 %v5528_v53  ;;  %3928 = vmatpush1.bf16.msra.mxu1 %v5531_v49  ;;  %v5616_v53 = vld [vmem:[%s7402_s1 + $0xda8] ss:$16 sps:$4 sm:$0xff]   ;;  %v5621_v49 = vld [vmem:[%s7402_s1 + $0xdc4] ss:$16 sps:$4 sm:$0xff]  }
 0x184   : > { %3774 = vmatprep.subr.bf16.mxu0 %v5537_v56  ;;  %3938 = vmatprep.subr.bf16.mxu1 %v5540_v57  ;;  %v5624_v56 = vld [vmem:[%s7402_s1 + $0xdcc] ss:$16 sps:$4 sm:$0xff]   ;;  %v248_v57 = vshll.u32 %v6593_v40, 16 }
 0x186   : > { %3766 = vmatmul.mubr.bf16.vlgmr.msra.gmra.mrb[4].mxu0 %v6796_v50  ;;  %3930 = vmatmul.mubr.bf16.vlgmr.msra.gmra.mrb[4].mxu1 %v6796_v50 }
 0x187   : > { %3775 = vmatpush1.bf16.msra.mxu0 %v5535_v61  ;;  %3939 = vmatpush1.bf16.msra.mxu1 %v5538_v62  ;;  %v5627_v61 = vld [vmem:[%s7402_s1 + $0xde4] ss:$16 sps:$4 sm:$0xff]   ;;  %v5630_v62 = vld [vmem:[%s7402_s1 + $0xdec] ss:$16 sps:$4 sm:$0xff]  }
 0x188   : > { %3776 = vmatprep.subr.bf16.mxu0 %v5543_v63  ;;  %3940 = vmatprep.subr.bf16.mxu1 %v5546_v47  ;;  %v269_v63 = vshll.u32 %v6812_v55, 16  ;;  %v246_v47 = vshrl.u32 %v6593_v40, 16  ;;  %v5636_v40 = vld [vmem:[%s7402_s1 + $0xe0c] ss:$16 sps:$4 sm:$0xff]  }
 0x189   : > { %3806 = vmatprep.mubr.bf16.mxu0 %v258_v0  ;;  %3970 = vmatprep.mubr.bf16.mxu1 %v258_v0  ;;  %v250_v0 = vrot.slane %v248_v57, 1  ;;  %v5685_v57 = vld [vmem:[%s7402_s1 + $0xf20] ss:$16 sps:$4 sm:$0xff]  }
 0x18b   : > { %3777 = vmatpush1.bf16.msra.mxu0 %v5541_v1  ;;  %3941 = vmatpush1.bf16.msra.mxu1 %v5544_v2  ;;  %v5625_v1 = vld [vmem:[%s7402_s1 + $0xde0] ss:$16 sps:$4 sm:$0xff]   ;;  %v5628_v2 = vld [vmem:[%s7402_s1 + $0xde8] ss:$16 sps:$4 sm:$0xff]  }
 0x18c   : > { %3778 = vmatprep.subr.bf16.mxu0 %v5549_v3  ;;  %3942 = vmatprep.subr.bf16.mxu1 %v5552_v4  ;;  %v5633_v3 = vld [vmem:[%s7402_s1 + $0xe04] ss:$16 sps:$4 sm:$0xff]   ;;  %v267_v4 = vshrl.u32 %v6812_v55, 16  ;;  %v5642_v55 = vld [vmem:[%s7402_s1 + $0xe2c] ss:$16 sps:$4 sm:$0xff]  }
 0x18f   : > { %3779 = vmatpush1.bf16.msra.mxu0 %v5547_v5  ;;  %3943 = vmatpush1.bf16.msra.mxu1 %v5550_v6  ;;  %v271_v5 = vrot.slane %v269_v63, 1  ;;  %v251_v6 = vor.u32 %v250_v0, %v246_v47  ;;  %v5694_v63 = vld [vmem:[%s7402_s1 + $0xf48] ss:$16 sps:$4 sm:$0xff]   ;;  %v5699_v47 = vld [vmem:[%s7402_s1 + $0xf64] ss:$16 sps:$4 sm:$0xff]  }
 0x190   : > { %3780 = vmatprep.subr.bf16.mxu0 %v5555_v7  ;;  %3944 = vmatprep.subr.bf16.mxu1 %v5558_v8  ;;  %v5631_v7 = vld [vmem:[%s7402_s1 + $0xe00] ss:$16 sps:$4 sm:$0xff]   ;;  %v5634_v8 = vld [vmem:[%s7402_s1 + $0xe08] ss:$16 sps:$4 sm:$0xff]   ;;  %v5702_v0 = vld [vmem:[%s7402_s1 + $0xf6c] ss:$16 sps:$4 sm:$0xff]  }
 0x193   : > { %3781 = vmatpush1.bf16.msra.mxu0 %v5553_v9  ;;  %3945 = vmatpush1.bf16.msra.mxu1 %v5556_v10  ;;  %v5639_v9 = vld [vmem:[%s7402_s1 + $0xe24] ss:$16 sps:$4 sm:$0xff]   ;;  %v272_v10 = vor.u32 %v271_v5, %v267_v4  ;;  %v5703_v4 = vld [vmem:[%s7402_s1 + $0xf80] ss:$16 sps:$4 sm:$0xff]   ;;  %v5706_v5 = vld [vmem:[%s7402_s1 + $0xf88] ss:$16 sps:$4 sm:$0xff]  }
 0x194   : > { %3782 = vmatprep.subr.bf16.mxu0 %v5561_v11  ;;  %3946 = vmatprep.subr.bf16.mxu1 %v5564_v13  ;;  %v5637_v11 = vld [vmem:[%s7402_s1 + $0xe20] ss:$16 sps:$4 sm:$0xff]   ;;  %v5640_v13 = vld [vmem:[%s7402_s1 + $0xe28] ss:$16 sps:$4 sm:$0xff]  }
 0x197   : > { %3783 = vmatpush1.bf16.msra.mxu0 %v5559_v14  ;;  %3947 = vmatpush1.bf16.msra.mxu1 %v5562_v15  ;;  %v5645_v14 = vld [vmem:[%s7402_s1 + $0xe44] ss:$16 sps:$4 sm:$0xff]   ;;  %v5648_v15 = vld [vmem:[%s7402_s1 + $0xe4c] ss:$16 sps:$4 sm:$0xff]  }
 0x198   : > { %3784 = vmatprep.subr.bf16.mxu0 %v5567_v16  ;;  %3948 = vmatprep.subr.bf16.mxu1 %v5570_v18  ;;  %v5643_v16 = vld [vmem:[%s7402_s1 + $0xe40] ss:$16 sps:$4 sm:$0xff]   ;;  %v5646_v18 = vld [vmem:[%s7402_s1 + $0xe48] ss:$16 sps:$4 sm:$0xff]  }
 0x19b   : > { %3785 = vmatpush1.bf16.msra.mxu0 %v5565_v19  ;;  %3949 = vmatpush1.bf16.msra.mxu1 %v5568_v20  ;;  %v5651_v19 = vld [vmem:[%s7402_s1 + $0xe64] ss:$16 sps:$4 sm:$0xff]   ;;  %v5654_v20 = vld [vmem:[%s7402_s1 + $0xe6c] ss:$16 sps:$4 sm:$0xff]  }
 0x19c   : > { %3786 = vmatprep.subr.bf16.mxu0 %v5573_v21  ;;  %3950 = vmatprep.subr.bf16.mxu1 %v5576_v22  ;;  %v5649_v21 = vld [vmem:[%s7402_s1 + $0xe60] ss:$16 sps:$4 sm:$0xff]   ;;  %v5652_v22 = vld [vmem:[%s7402_s1 + $0xe68] ss:$16 sps:$4 sm:$0xff]  }
 0x19f   : > { %3787 = vmatpush1.bf16.msra.mxu0 %v5571_v23  ;;  %3951 = vmatpush1.bf16.msra.mxu1 %v5574_v24  ;;  %v5657_v23 = vld [vmem:[%s7402_s1 + $0xe84] ss:$16 sps:$4 sm:$0xff]   ;;  %v5660_v24 = vld [vmem:[%s7402_s1 + $0xe8c] ss:$16 sps:$4 sm:$0xff]  }
 0x1a0   : > { %3788 = vmatprep.subr.bf16.mxu0 %v5579_v25  ;;  %3952 = vmatprep.subr.bf16.mxu1 %v5582_v58  ;;  %v5655_v25 = vld [vmem:[%s7402_s1 + $0xe80] ss:$16 sps:$4 sm:$0xff]   ;;  %v5658_v58 = vld [vmem:[%s7402_s1 + $0xe88] ss:$16 sps:$4 sm:$0xff]  }
 0x1a3   : > { %3789 = vmatpush1.bf16.msra.mxu0 %v5577_v26  ;;  %3953 = vmatpush1.bf16.msra.mxu1 %v5580_v27  ;;  %v5663_v26 = vld [vmem:[%s7402_s1 + $0xea4] ss:$16 sps:$4 sm:$0xff]   ;;  %v5666_v27 = vld [vmem:[%s7402_s1 + $0xeac] ss:$16 sps:$4 sm:$0xff]  }
 0x1a4   : > { %3790 = vmatprep.subr.bf16.mxu0 %v5585_v28  ;;  %3954 = vmatprep.subr.bf16.mxu1 %v5588_v29  ;;  %v5661_v28 = vld [vmem:[%s7402_s1 + $0xea0] ss:$16 sps:$4 sm:$0xff]   ;;  %v5664_v29 = vld [vmem:[%s7402_s1 + $0xea8] ss:$16 sps:$4 sm:$0xff]  }
 0x1a7   : > { %3791 = vmatpush1.bf16.msra.mxu0 %v5583_v30  ;;  %3955 = vmatpush1.bf16.msra.mxu1 %v5586_v31  ;;  %v5669_v30 = vld [vmem:[%s7402_s1 + $0xec4] ss:$16 sps:$4 sm:$0xff]   ;;  %v5672_v31 = vld [vmem:[%s7402_s1 + $0xecc] ss:$16 sps:$4 sm:$0xff]  }
 0x1a8   : > { %3792 = vmatprep.subr.bf16.mxu0 %v5591_v32  ;;  %3956 = vmatprep.subr.bf16.mxu1 %v5594_v54 }
 0x1ab   : > { %3793 = vmatpush1.bf16.msra.mxu0 %v5589_v33  ;;  %3957 = vmatpush1.bf16.msra.mxu1 %v5592_v34 }
 0x1ac   : > { %3794 = vmatprep.subr.bf16.mxu0 %v5597_v35  ;;  %3958 = vmatprep.subr.bf16.mxu1 %v5600_v36 }
 0x1af   : > { %3795 = vmatpush1.bf16.msra.mxu0 %v5595_v37  ;;  %3959 = vmatpush1.bf16.msra.mxu1 %v5598_v38 }
 0x1b0   : > { %3796 = vmatprep.subr.bf16.mxu0 %v5603_v39  ;;  %3960 = vmatprep.subr.bf16.mxu1 %v5606_v12  ;;  %v5667_v39 = vld [vmem:[%s7402_s1 + $0xec0] ss:$16 sps:$4 sm:$0xff]   ;;  %v5670_v12 = vld [vmem:[%s7402_s1 + $0xec8] ss:$16 sps:$4 sm:$0xff]  }
 0x1b3   : > { %3797 = vmatpush1.bf16.msra.mxu0 %v5601_v41  ;;  %3961 = vmatpush1.bf16.msra.mxu1 %v5604_v42 }
 0x1b4   : > { %3798 = vmatprep.subr.bf16.mxu0 %v5609_v44  ;;  %3962 = vmatprep.subr.bf16.mxu1 %v5612_v45  ;;  %v5675_v44 = vld [vmem:[%s7402_s1 + $0xee4] ss:$16 sps:$4 sm:$0xff]   ;;  %v5678_v45 = vld [vmem:[%s7402_s1 + $0xeec] ss:$16 sps:$4 sm:$0xff]  }
 0x1b7   : > { %3799 = vmatpush1.bf16.msra.mxu0 %v5607_v46  ;;  %3963 = vmatpush1.bf16.msra.mxu1 %v5610_v48  ;;  %v5673_v46 = vld [vmem:[%s7402_s1 + $0xee0] ss:$16 sps:$4 sm:$0xff]   ;;  %v5676_v48 = vld [vmem:[%s7402_s1 + $0xee8] ss:$16 sps:$4 sm:$0xff]  }
 0x1b8   : > { %3800 = vmatprep.subr.bf16.mxu0 %v5615_v17  ;;  %3964 = vmatprep.subr.bf16.mxu1 %v5618_v51  ;;  %v5681_v17 = vld [vmem:[%s7402_s1 + $0xf04] ss:$16 sps:$4 sm:$0xff]   ;;  %v5684_v51 = vld [vmem:[%s7402_s1 + $0xf0c] ss:$16 sps:$4 sm:$0xff]  }
 0x1bb   : > { %3801 = vmatpush1.bf16.msra.mxu0 %v5613_v52  ;;  %3965 = vmatpush1.bf16.msra.mxu1 %v5616_v53  ;;  %v5679_v52 = vld [vmem:[%s7402_s1 + $0xf00] ss:$16 sps:$4 sm:$0xff]   ;;  %v5682_v53 = vld [vmem:[%s7402_s1 + $0xf08] ss:$16 sps:$4 sm:$0xff]  }
 0x1bc   : > { %3802 = vmatprep.subr.bf16.mxu0 %v5621_v49  ;;  %3966 = vmatprep.subr.bf16.mxu1 %v5624_v56  ;;  %v5687_v49 = vld [vmem:[%s7402_s1 + $0xf24] ss:$16 sps:$4 sm:$0xff]   ;;  %v5690_v56 = vld [vmem:[%s7402_s1 + $0xf2c] ss:$16 sps:$4 sm:$0xff]  }
 0x1bf   : > { %3803 = vmatpush1.bf16.msra.mxu0 %v5619_v59  ;;  %3967 = vmatpush1.bf16.msra.mxu1 %v5622_v60  ;;  %v5688_v59 = vld [vmem:[%s7402_s1 + $0xf28] ss:$16 sps:$4 sm:$0xff]   ;;  %v5693_v60 = vld [vmem:[%s7402_s1 + $0xf44] ss:$16 sps:$4 sm:$0xff]  }
 0x1c0   : > { %3804 = vmatprep.subr.bf16.mxu0 %v5627_v61  ;;  %3968 = vmatprep.subr.bf16.mxu1 %v5630_v62  ;;  %v5696_v61 = vld [vmem:[%s7402_s1 + $0xf4c] ss:$16 sps:$4 sm:$0xff]   ;;  %v5691_v62 = vld [vmem:[%s7402_s1 + $0xf40] ss:$16 sps:$4 sm:$0xff]  }
 0x1c3   : > { %3805 = vmatpush1.bf16.msra.mxu0 %v5625_v1  ;;  %3969 = vmatpush1.bf16.msra.mxu1 %v5628_v2  ;;  %v5697_v1 = vld [vmem:[%s7402_s1 + $0xf60] ss:$16 sps:$4 sm:$0xff]   ;;  %v5700_v2 = vld [vmem:[%s7402_s1 + $0xf68] ss:$16 sps:$4 sm:$0xff]  }
 0x1c4   : > { %3815 = vmatprep.subr.bf16.mxu0 %v5633_v3  ;;  %3979 = vmatprep.subr.bf16.mxu1 %v5636_v40  ;;  %v5705_v3 = vld [vmem:[%s7402_s1 + $0xf84] ss:$16 sps:$4 sm:$0xff]   ;;  %v5708_v40 = vld [vmem:[%s7402_s1 + $0xf8c] ss:$16 sps:$4 sm:$0xff]  }
 0x1c6   : > { %3807 = vmatmul.mubr.bf16.vlgmr.msra.gmra.mrb[4].mxu0 %v251_v6  ;;  %3971 = vmatmul.mubr.bf16.vlgmr.msra.gmra.mrb[4].mxu1 %v251_v6  ;;  %v5711_v6 = vld [vmem:[%s7402_s1 + $0xfa4] ss:$16 sps:$4 sm:$0xff]  }
 0x1c7   : > { %3816 = vmatpush1.bf16.msra.mxu0 %v5631_v7  ;;  %3980 = vmatpush1.bf16.msra.mxu1 %v5634_v8  ;;  %v5714_v7 = vld [vmem:[%s7402_s1 + $0xfac] ss:$16 sps:$4 sm:$0xff]   ;;  %v5709_v8 = vld [vmem:[%s7402_s1 + $0xfa0] ss:$16 sps:$4 sm:$0xff]  }
 0x1c8   : > { %3817 = vmatprep.subr.bf16.mxu0 %v5639_v9  ;;  %3981 = vmatprep.subr.bf16.mxu1 %v5642_v55  ;;  %v5712_v9 = vld [vmem:[%s7402_s1 + $0xfa8] ss:$16 sps:$4 sm:$0xff]   ;;  %v5717_v55 = vld [vmem:[%s7402_s1 + $0xfc4] ss:$16 sps:$4 sm:$0xff]  }
 0x1c9   : > { %3847 = vmatprep.mubr.bf16.mxu0 %v272_v10  ;;  %4011 = vmatprep.mubr.bf16.mxu1 %v272_v10  ;;  %v5720_v10 = vld [vmem:[%s7402_s1 + $0xfcc] ss:$16 sps:$4 sm:$0xff]  }
 0x1cb   : > { %3818 = vmatpush1.bf16.msra.mxu0 %v5637_v11  ;;  %3982 = vmatpush1.bf16.msra.mxu1 %v5640_v13  ;;  %v262_v11 = vshll.u32 %v6796_v50, 16  ;;  %v5715_v13 = vld [vmem:[%s7402_s1 + $0xfc0] ss:$16 sps:$4 sm:$0xff]  }
 0x1cc   : > { %3819 = vmatprep.subr.bf16.mxu0 %v5645_v14  ;;  %3983 = vmatprep.subr.bf16.mxu1 %v5648_v15  ;;  %v5718_v14 = vld [vmem:[%s7402_s1 + $0xfc8] ss:$16 sps:$4 sm:$0xff]   ;;  %v5723_v15 = vld [vmem:[%s7402_s1 + $0xfe4] ss:$16 sps:$4 sm:$0xff]  }
 0x1cf   : > { %3820 = vmatpush1.bf16.msra.mxu0 %v5643_v16  ;;  %3984 = vmatpush1.bf16.msra.mxu1 %v5646_v18  ;;  %v5726_v16 = vld [vmem:[%s7402_s1 + $0xfec] ss:$16 sps:$4 sm:$0xff]   ;;  %v260_v18 = vshrl.u32 %v6796_v50, 16 }
 0x1d0   : > { %3821 = vmatprep.subr.bf16.mxu0 %v5651_v19  ;;  %3985 = vmatprep.subr.bf16.mxu1 %v5654_v20  ;;  %v264_v19 = vrot.slane %v262_v11, 1  ;;  %v5721_v20 = vld [vmem:[%s7402_s1 + $0xfe0] ss:$16 sps:$4 sm:$0xff]  }
 0x1d3   : > { %3822 = vmatpush1.bf16.msra.mxu0 %v5649_v21  ;;  %3986 = vmatpush1.bf16.msra.mxu1 %v5652_v22  ;;  %v5724_v21 = vld [vmem:[%s7402_s1 + $0xfe8] ss:$16 sps:$4 sm:$0xff]   ;;  %v265_v22 = vor.u32 %v264_v19, %v260_v18 }
 0x1d4   : > { %3823 = vmatprep.subr.bf16.mxu0 %v5657_v23  ;;  %3987 = vmatprep.subr.bf16.mxu1 %v5660_v24 }
 0x1d7   : > { %3824 = vmatpush1.bf16.msra.mxu0 %v5655_v25  ;;  %3988 = vmatpush1.bf16.msra.mxu1 %v5658_v58  ;;  %v4040_v25 = vsub.s32 0, %v5887_v43  ;;  %v4044_v58 = vsub.s32 1, %v5887_v43 }
 0x1d8   : > { %3825 = vmatprep.subr.bf16.mxu0 %v5663_v26  ;;  %3989 = vmatprep.subr.bf16.mxu1 %v5666_v27 }
 0x1d9   : > { %v1974_v32 = vpop.f32.mrb[0].mxu0  ;;  %v2138_v54 = vpop.f32.mrb[0].mxu1 }
 0x1da   : > { %v1976_v33 = vpop.f32.mrb[1].mxu0  ;;  %v2140_v34 = vpop.f32.mrb[1].mxu1 }
 0x1db   : > { %v2149_v35 = vcombine.low %v1974_v32, %v1976_v33  ;;  %v2150_v36 = vcombine.low %v2138_v54, %v2140_v34  ;;  %v1978_v37 = vpop.f32.mrb[2].mxu0  ;;  %v2142_v38 = vpop.f32.mrb[2].mxu1  ;;  %3826 = vmatpush1.bf16.msra.mxu0 %v5661_v28  ;;  %3990 = vmatpush1.bf16.msra.mxu1 %v5664_v29  ;;  %v4036_v33 = vld [vmem:[%s7403_s2] sm:$0xf] }
 0x1dc   : > { %v1979_v41 = vpop.f32.mrb[3].mxu0  ;;  %v2143_v42 = vpop.f32.mrb[3].mxu1  ;;  %3827 = vmatprep.subr.bf16.mxu0 %v5669_v30  ;;  %3991 = vmatprep.subr.bf16.mxu1 %v5672_v31  ;;  %v4048_v30 = vsub.s32 2, %v5887_v43  ;;  %v4052_v31 = vsub.s32 3, %v5887_v43 }
 0x1dd   : > { %2153 = vst [vmem:[#allocation2] sm:$0x77] %v2149_v35  ;;  %2154 = vst [vmem:[#allocation2 + $0x8] sm:$0x77] %v2150_v36 }
 0x1de   : > { %v4049_v41 = vrot.slane %v4036_v33, %v4048_v30  ;;  %v4053_v42 = vrot.slane %v4036_v33, %v4052_v31 }
 0x1df   : > { %3828 = vmatpush1.bf16.msra.mxu0 %v5667_v39  ;;  %3992 = vmatpush1.bf16.msra.mxu1 %v5670_v12  ;;  %v4041_v39 = vrot.slane %v4036_v33, %v4040_v25  ;;  %v4045_v12 = vrot.slane %v4036_v33, %v4044_v58 }
 0x1e0   : > { %3829 = vmatprep.subr.bf16.mxu0 %v5675_v44  ;;  %3993 = vmatprep.subr.bf16.mxu1 %v5678_v45  ;;  %v4055_v43 = vcombine.low %v4049_v41, %v4053_v42 }
 0x1e1   : > { %v4054_v44 = vcombine.low %v4041_v39, %v4045_v12 }
 0x1e3   : > { %3830 = vmatpush1.bf16.msra.mxu0 %v5673_v46  ;;  %3994 = vmatpush1.bf16.msra.mxu1 %v5676_v48 }
 0x1e4   : > { %3831 = vmatprep.subr.bf16.mxu0 %v5681_v17  ;;  %3995 = vmatprep.subr.bf16.mxu1 %v5684_v51  ;;  %v4020_v27 = vld [vmem:[#allocation2] sm:$0x77]  ;;  %v4021_v34 = vld [vmem:[#allocation2 + $0x8] sm:$0x77] }
 0x1e7   : > { %3832 = vmatpush1.bf16.msra.mxu0 %v5679_v52  ;;  %3996 = vmatpush1.bf16.msra.mxu1 %v5682_v53 }
 0x1e8   : > { %3833 = vmatprep.subr.bf16.mxu0 %v5687_v49  ;;  %3997 = vmatprep.subr.bf16.mxu1 %v5690_v56 }
 0x1eb   : > { %3834 = vmatpush1.bf16.msra.mxu0 %v5685_v57  ;;  %3998 = vmatpush1.bf16.msra.mxu1 %v5688_v59 }
 0x1ec   : > { %3835 = vmatprep.subr.bf16.mxu0 %v5693_v60  ;;  %3999 = vmatprep.subr.bf16.mxu1 %v5696_v61 }
 0x1ef   : > { %3836 = vmatpush1.bf16.msra.mxu0 %v5691_v62  ;;  %4000 = vmatpush1.bf16.msra.mxu1 %v5694_v63 }
 0x1f0   : > { %3837 = vmatprep.subr.bf16.mxu0 %v5699_v47  ;;  %4001 = vmatprep.subr.bf16.mxu1 %v5702_v0 }
 0x1f3   : > { %3838 = vmatpush1.bf16.msra.mxu0 %v5697_v1  ;;  %4002 = vmatpush1.bf16.msra.mxu1 %v5700_v2 }
 0x1f4   : > { %3839 = vmatprep.subr.bf16.mxu0 %v5705_v3  ;;  %4003 = vmatprep.subr.bf16.mxu1 %v5708_v40 }
 0x1f7   : > { %3840 = vmatpush1.bf16.msra.mxu0 %v5703_v4  ;;  %4004 = vmatpush1.bf16.msra.mxu1 %v5706_v5 }
 0x1f8   : > { %3841 = vmatprep.subr.bf16.mxu0 %v5711_v6  ;;  %4005 = vmatprep.subr.bf16.mxu1 %v5714_v7 }
 0x1fb   : > { %3842 = vmatpush1.bf16.msra.mxu0 %v5709_v8  ;;  %4006 = vmatpush1.bf16.msra.mxu1 %v5712_v9 }
 0x1fc   : > { %3843 = vmatprep.subr.bf16.mxu0 %v5717_v55  ;;  %4007 = vmatprep.subr.bf16.mxu1 %v5720_v10 }
 0x1ff   : > { %3844 = vmatpush1.bf16.msra.mxu0 %v5715_v13  ;;  %4008 = vmatpush1.bf16.msra.mxu1 %v5718_v14 }
 0x200   : > { %3845 = vmatprep.subr.bf16.mxu0 %v5723_v15  ;;  %4009 = vmatprep.subr.bf16.mxu1 %v5726_v16 }
 0x203   : > { %3846 = vmatpush1.bf16.msra.mxu0 %v5721_v20  ;;  %4010 = vmatpush1.bf16.msra.mxu1 %v5724_v21 }
 0x206   : > { %3848 = vmatmul.mubr.bf16.vlgmr.msra.gmra.mrb[4].mxu0 %v265_v22  ;;  %4012 = vmatmul.mubr.bf16.vlgmr.msra.gmra.mrb[4].mxu1 %v265_v22 }
 0x2d9   : > { %v3849_v23 = vpop.f32.mrb[4].mxu0  ;;  %v4013_v50 = vpop.f32.mrb[4].mxu1 }
 0x2da   : > { %v3851_v24 = vpop.f32.mrb[5].mxu0  ;;  %v4015_v26 = vpop.f32.mrb[5].mxu1 }
 0x2db   : > { %v4026_v28 = vcombine.low %v3849_v23, %v3851_v24  ;;  %v4027_v29 = vcombine.low %v4013_v50, %v4015_v26  ;;  %v3853_v32 = vpop.f32.mrb[6].mxu0  ;;  %v4017_v54 = vpop.f32.mrb[6].mxu1 }
 0x2dc   : > { %v3854_v35 = vpop.f32.mrb[7].mxu0  ;;  %v4018_v36 = vpop.f32.mrb[7].mxu1 }
 0x2dd   : > { %v4030_v37 = vadd.f32 %v4026_v28, %v4020_v27  ;;  %v4031_v38 = vadd.f32 %v4027_v29, %v4021_v34 }
 0x2df   : > { %4032 = vst [vmem:[#allocation2] sm:$0x77] %v4030_v37  ;;  %4033 = vst [vmem:[#allocation2 + $0x8] sm:$0x77] %v4031_v38 }
 0x2e6   : > { %v4034_v45 = vld [vmem:[#allocation2] sm:$0x77]  ;;  %v4035_v46 = vld [vmem:[#allocation2 + $0x8] sm:$0x77] }
 0x2e7   : > { %v4058_v48 = vadd.f32 %v4054_v44, %v4034_v45  ;;  %v4059_v17 = vadd.f32 %v4055_v43, %v4035_v46 }
 0x2e9   : > { %v4060_v51 = vmax.f32 %v4058_v48, 0.0  ;;  %v4061_v52 = vmax.f32 %v4059_v17, 0.0 }
 0x2eb   : > { %4062 = vst [vmem:[%s170_s28] sm:$0x77] %v4060_v51  ;;  %4063 = vst [vmem:[%s170_s28 + $0x8] sm:$0x77] %v4061_v52 }
 0x2ec PF: > { %s13_s12 = sadd.s32 1, %s5733_s12  }
 0x2ed   : > { %p10_p4 = scmp.ge.s32.totalorder %s13_s12, 4  }
 0x2ef   :  { %12 = sbr.rel (!%p10_p4) target bundleno = 1 (0x1), region = 63 }

</bundles_post_ra>
